<compile_context>
chip_gen: v5e
topology: v5e:2x2
jax: 0.10.0
libtpu: 0.0.40
codegen_flags: <defaults>
</compile_context>

<pallas_src>
import jax
import jax.numpy as jnp
from jax.experimental import pallas as pl
from jax.experimental.pallas import tpu as pltpu

# ---------------------------------------------------------------------------
# Model hyper-parameters (small, consistent with the module's __init__).
# ---------------------------------------------------------------------------
NUM_AAS = 20                      # len(AAs)
SEQ_LEN = 8                       # sequence_length
LATENT = 32                       # latent_dim
INPUT_DIM = SEQ_LEN * NUM_AAS     # 160
BN_EPS = 1e-5

BATCH = 2                         # per-group batch (= one module forward)
GROUPS = 256                      # independent forwards fused into one call
GROUPS_PER_BLOCK = 128            # groups per grid step -> 256 rows per matmul


def _pad128(n: int) -> int:
    return ((n + 127) // 128) * 128


# Unpadded / lane-padded layer widths.
H1, H2, H3 = INPUT_DIM * 2, LATENT * 4, LATENT * 2        # 320, 128, 64
D_IN_P = _pad128(INPUT_DIM)                               # 256
H1_P = _pad128(H1)                                        # 384
H2_P = _pad128(H2)                                        # 128
H3_P = _pad128(H3)                                        # 128
LAT_P = _pad128(LATENT)                                   # 128


# ---------------------------------------------------------------------------
# Pallas kernel: full autoencoder forward on one block of complete groups.
# Rows in the block are BATCH-MAJOR: rows [k*R/B, (k+1)*R/B) hold batch element k
# of every group in the block, so per-group BN pairs row r with row r + R/B.
# ---------------------------------------------------------------------------
def _make_ae_kernel(batch: int):
    def ae_kernel(x_ref,
                  we1_ref, we2_ref, we3_ref, we4_ref, be4_ref,
                  wd1_ref, wd2_ref, wd3_ref, wd4_ref, bd4_ref,
                  o_ref):
        def lin(h, w_ref):
            # bf16 MXU matmul with f32 accumulation (weights stored bf16).
            hb = h if h.dtype == jnp.bfloat16 else h.astype(jnp.bfloat16)
            return jnp.dot(hb, w_ref[...], preferred_element_type=jnp.float32)

        def bn(h):
            # BatchNorm1d, training mode, gamma=1 / beta=0, statistics PER GROUP.
            # Batch-major row layout => the (R,D)->(B,R/B,D) reshape only splits the
            # majormost (non-tiled) dim: layout-preserving, no data movement.  The
            # reduction over the leading batch axis is a couple of VPU adds; rsqrt
            # goes to the EUP.  All math stays f32 (v5e-safe).
            r, d = h.shape
            h3 = h.reshape(batch, r // batch, d)
            mu = jnp.mean(h3, axis=0, keepdims=True)
            c = h3 - mu
            var = jnp.mean(c * c, axis=0, keepdims=True)
            return (c * jax.lax.rsqrt(var + BN_EPS)).reshape(r, d)

        x = x_ref[...]                                    # (R, 256) bf16, zero-padded lanes

        # ----- encoder: (Linear -> ReLU -> BN) x3, then Linear+bias -----
        h = bn(jnp.maximum(lin(x, we1_ref), 0.0))
        h = bn(jnp.maximum(lin(h, we2_ref), 0.0))
        h = bn(jnp.maximum(lin(h, we3_ref), 0.0))
        z = lin(h, we4_ref) + be4_ref[...]

        # ----- decoder: (Linear -> ReLU -> BN) x3, then Linear+bias -> Sigmoid -----
        h = bn(jnp.maximum(lin(z, wd1_ref), 0.0))
        h = bn(jnp.maximum(lin(h, wd2_ref), 0.0))
        h = bn(jnp.maximum(lin(h, wd3_ref), 0.0))
        y = lin(h, wd4_ref) + bd4_ref[...]

        # Padded lanes (cols 160..255) hold sigmoid(0)=0.5; sliced off in the wrapper.
        o_ref[...] = jax.nn.sigmoid(y)                    # lane-dense (R, 256) store

    return ae_kernel


# ---------------------------------------------------------------------------
# Wrapper: flatten / pad / batch-major block layout / grid setup / unpad+unflatten.
# ---------------------------------------------------------------------------
@jax.jit
def amino_acid_ae_forward(x, params):
    """x: (G, B, SEQ_LEN, NUM_AAS) -- G independent batches of B one-hot sequences."""
    g, b = x.shape[0], x.shape[1]
    g_blk = min(g, GROUPS_PER_BLOCK)
    assert g % g_blk == 0, "number of groups must be a multiple of groups-per-block"
    r_blk = g_blk * b
    rows = g * b
    n_blocks = g // g_blk

    # nn.Flatten, then arrange rows BATCH-MAJOR within each grid block so that
    # per-group BN stats are a leading-dim reduction inside the kernel.
    x2d = x.reshape(n_blocks, g_blk, b, INPUT_DIM)
    x2d = x2d.transpose(0, 2, 1, 3).reshape(rows, INPUT_DIM)
    # Zero-pad features to a lane-dense width (160 -> 256); one-hot is exact in bf16.
    x2d = jnp.pad(x2d, ((0, 0), (0, D_IN_P - INPUT_DIM))).astype(jnp.bfloat16)

    args = (x2d,
            params["we1"], params["we2"], params["we3"], params["we4"], params["be4"],
            params["wd1"], params["wd2"], params["wd3"], params["wd4"], params["bd4"])

    def const_spec(shape):
        return pl.BlockSpec(shape, lambda i: (0, 0))      # same block every grid step

    in_specs = ([pl.BlockSpec((r_blk, D_IN_P), lambda i: (i, 0))]   # x: tiled over groups
                + [const_spec(a.shape) for a in args[1:]])          # weights / biases
    out_spec = pl.BlockSpec((r_blk, D_IN_P), lambda i: (i, 0))

    # Advisory cost estimate so XLA schedules surrounding ops around this small call.
    layer_dims = [(D_IN_P, H1_P), (H1_P, H2_P), (H2_P, H3_P), (H3_P, LAT_P),
                  (LAT_P, H3_P), (H3_P, H2_P), (H2_P, H1_P), (H1_P, D_IN_P)]
    bn_widths = [H1_P, H2_P, H3_P, H3_P, H2_P, H1_P]
    flops = 2 * rows * sum(i * o for i, o in layer_dims)
    transcendentals = (rows // b) * sum(bn_widths) + rows * D_IN_P   # rsqrt + sigmoid
    weight_bytes = sum(int(a.size) * a.dtype.itemsize for a in args[1:])
    bytes_accessed = (rows * D_IN_P * (2 + 4)                        # bf16 in, f32 out
                      + weight_bytes * min(n_blocks, 2))             # once per core (v7x)

    out2d = pl.pallas_call(
        _make_ae_kernel(b),
        out_shape=jax.ShapeDtypeStruct((rows, D_IN_P), jnp.float32),
        grid=(n_blocks,),
        in_specs=in_specs,
        out_specs=out_spec,
        compiler_params=pltpu.CompilerParams(
            dimension_semantics=("parallel",)),
        cost_estimate=pl.CostEstimate(flops=flops,
                                      transcendentals=transcendentals,
                                      bytes_accessed=bytes_accessed),
    )(*args)

    # Drop lane padding, undo the batch-major layout, nn.Unflatten back to
    # (G, B, SEQ_LEN, NUM_AAS).
    out = out2d[:, :INPUT_DIM].reshape(n_blocks, b, g_blk, INPUT_DIM)
    out = out.transpose(0, 2, 1, 3).reshape(g, b, SEQ_LEN, NUM_AAS)
    return out


# ---------------------------------------------------------------------------
# Parameter init (kaiming_normal_ fan_out, a=0.0003; bias ~ N(0,1)).
# Weights stored transposed, i.e. shape (in, out), so the kernel computes h @ W
# (identical to PyTorch's h @ W.T with W of shape (out, in)).
# ---------------------------------------------------------------------------
def init_params(key):
    a = 0.0003
    gain = (2.0 / (1.0 + a * a)) ** 0.5

    def kaiming(k, fan_in, fan_out):
        std = gain / (fan_out ** 0.5)                     # mode='fan_out'
        return std * jax.random.normal(k, (fan_in, fan_out), jnp.float32)

    ks = jax.random.split(key, 10)
    return {
        # encoder
        "we1": kaiming(ks[0], INPUT_DIM, H1),
        "we2": kaiming(ks[1], H1, H2),
        "we3": kaiming(ks[2], H2, H3),
        "we4": kaiming(ks[3], H3, LATENT),
        "be4": jax.random.normal(ks[4], (1, LATENT), jnp.float32),
        # decoder
        "wd1": kaiming(ks[5], LATENT, H3),
        "wd2": kaiming(ks[6], H3, H2),
        "wd3": kaiming(ks[7], H2, H1),
        "wd4": kaiming(ks[8], H1, INPUT_DIM),
        "bd4": jax.random.normal(ks[9], (1, INPUT_DIM), jnp.float32),
    }


def pack_params(p):
    """Zero-pad every feature dim to a multiple of 128; weights -> bf16, biases f32."""
    def padw(w):
        wp = jnp.zeros((_pad128(w.shape[0]), _pad128(w.shape[1])), jnp.float32)
        wp = wp.at[: w.shape[0], : w.shape[1]].set(w)
        return wp.astype(jnp.bfloat16)

    def padb(bias):
        bp = jnp.zeros((1, _pad128(bias.shape[1])), jnp.float32)
        return bp.at[:, : bias.shape[1]].set(bias)

    return {k: (padb(v) if k.startswith("b") else padw(v)) for k, v in p.items()}


# ---------------------------------------------------------------------------
# Pure-JAX reference (same math: bf16 weights, per-group training-mode BN).
# ---------------------------------------------------------------------------
def reference_forward(x, p):
    g, b = x.shape[0], x.shape[1]

    def bn(h):
        mu = jnp.mean(h, axis=1, keepdims=True)
        c = h - mu
        var = jnp.mean(c * c, axis=1, keepdims=True)
        return c * jax.lax.rsqrt(var + BN_EPS)

    def lin(h, w):
        return jnp.dot(h.astype(jnp.bfloat16), w.astype(jnp.bfloat16),
                       preferred_element_type=jnp.float32)

    h = x.reshape(g, b, INPUT_DIM)
    h = bn(jnp.maximum(lin(h, p["we1"]), 0.0))
    h = bn(jnp.maximum(lin(h, p["we2"]), 0.0))
    h = bn(jnp.maximum(lin(h, p["we3"]), 0.0))
    z = lin(h, p["we4"]) + p["be4"]
    h = bn(jnp.maximum(lin(z, p["wd1"]), 0.0))
    h = bn(jnp.maximum(lin(h, p["wd2"]), 0.0))
    h = bn(jnp.maximum(lin(h, p["wd3"]), 0.0))
    y = lin(h, p["wd4"]) + p["bd4"]
    return jax.nn.sigmoid(y).reshape(g, b, SEQ_LEN, NUM_AAS)


if __name__ == "__main__":
    key = jax.random.PRNGKey(0)
    k_param, k_data = jax.random.split(key)

    params_f32 = init_params(k_param)
    kernel_params = pack_params(params_f32)

    # Deterministic one-hot amino-acid inputs: GROUPS independent batches of BATCH.
    aa_ids = jax.random.randint(k_data, (GROUPS, BATCH, SEQ_LEN), 0, NUM_AAS)
    x = jax.nn.one_hot(aa_ids, NUM_AAS, dtype=jnp.float32)

    out = amino_acid_ae_forward(x, kernel_params)
    out = jax.block_until_ready(out)

    ref = reference_forward(x, params_f32)
    assert out.shape == (GROUPS, BATCH, SEQ_LEN, NUM_AAS)
    max_err = float(jnp.max(jnp.abs(out - ref)))
    mean_err = float(jnp.mean(jnp.abs(out - ref)))
    # Training-mode BN with B=2 divides by sqrt(var+eps); tiny eps-floored features
    # amplify ulp-level differences, so track mean and max error separately.
    assert mean_err < 1e-3 and max_err < 3e-2, f"mismatch: mean={mean_err} max={max_err}"

    print("KERNEL_OK")
</pallas_src>

<mosaic_0001>
module attributes {stable_mosaic.version = 11 : i64} {
  func.func @ae_kernel(%arg0: i32, %arg1: memref<256x256xbf16, #tpu.memory_space<vmem>>, %arg2: memref<256x384xbf16, #tpu.memory_space<vmem>>, %arg3: memref<384x128xbf16, #tpu.memory_space<vmem>>, %arg4: memref<128x128xbf16, #tpu.memory_space<vmem>>, %arg5: memref<128x128xbf16, #tpu.memory_space<vmem>>, %arg6: memref<1x128xf32, #tpu.memory_space<vmem>>, %arg7: memref<128x128xbf16, #tpu.memory_space<vmem>>, %arg8: memref<128x128xbf16, #tpu.memory_space<vmem>>, %arg9: memref<128x384xbf16, #tpu.memory_space<vmem>>, %arg10: memref<384x256xbf16, #tpu.memory_space<vmem>>, %arg11: memref<1x256xf32, #tpu.memory_space<vmem>>, %arg12: memref<256x256xf32, #tpu.memory_space<vmem>>) attributes {dimension_semantics = [#tpu.dimension_semantics<parallel>], iteration_bounds = array<i64: 2>, scalar_prefetch = 0 : i64, scratch_operands = 0 : i64, tpu.core_type = #tpu.core_type<tc>, window_params = [{transform_indices = @transform_0, window_bounds = array<i64: 256, 256>}, {pipeline_mode = #tpu.pipeline_mode<synchronous>, transform_indices = @transform_1, window_bounds = array<i64: 256, 384>}, {pipeline_mode = #tpu.pipeline_mode<synchronous>, transform_indices = @transform_2, window_bounds = array<i64: 384, 128>}, {pipeline_mode = #tpu.pipeline_mode<synchronous>, transform_indices = @transform_3, window_bounds = array<i64: 128, 128>}, {pipeline_mode = #tpu.pipeline_mode<synchronous>, transform_indices = @transform_4, window_bounds = array<i64: 128, 128>}, {pipeline_mode = #tpu.pipeline_mode<synchronous>, transform_indices = @transform_5, window_bounds = array<i64: 1, 128>}, {pipeline_mode = #tpu.pipeline_mode<synchronous>, transform_indices = @transform_6, window_bounds = array<i64: 128, 128>}, {pipeline_mode = #tpu.pipeline_mode<synchronous>, transform_indices = @transform_7, window_bounds = array<i64: 128, 128>}, {pipeline_mode = #tpu.pipeline_mode<synchronous>, transform_indices = @transform_8, window_bounds = array<i64: 128, 384>}, {pipeline_mode = #tpu.pipeline_mode<synchronous>, transform_indices = @transform_9, window_bounds = array<i64: 384, 256>}, {pipeline_mode = #tpu.pipeline_mode<synchronous>, transform_indices = @transform_10, window_bounds = array<i64: 1, 256>}, {transform_indices = @transform_11, window_bounds = array<i64: 256, 256>}]} {
    %c0 = arith.constant 0 : index
    %c0_0 = arith.constant 0 : index
    %0 = vector.load %arg1[%c0, %c0_0] : memref<256x256xbf16, #tpu.memory_space<vmem>>, vector<256x256xbf16>
    %c0_1 = arith.constant 0 : index
    %c0_2 = arith.constant 0 : index
    %1 = vector.load %arg2[%c0_1, %c0_2] : memref<256x384xbf16, #tpu.memory_space<vmem>>, vector<256x384xbf16>
    %cst = arith.constant dense<0.000000e+00> : vector<256x384xf32>
    %2 = tpu.matmul %0, %1, %cst {dimension_numbers = #tpu.dot_dimension_numbers<[1], [0], [0], [1], [0, 0, 1, 1], [], []>} : vector<256x256xbf16>, vector<256x384xbf16>, vector<256x384xf32> -> vector<256x384xf32>
    %cst_3 = arith.constant 0.000000e+00 : f32
    %3 = vector.broadcast %cst_3 : f32 to vector<256x384xf32>
    %4 = arith.maximumf %2, %3 : vector<256x384xf32>
    %5 = vector.shape_cast %4 : vector<256x384xf32> to vector<2x128x384xf32>
    %cst_4 = arith.constant dense<0.000000e+00> : vector<128x384xf32>
    %6 = vector.multi_reduction <add>, %5, %cst_4 [0] : vector<2x128x384xf32> to vector<128x384xf32>
    %7 = vector.shape_cast %6 : vector<128x384xf32> to vector<1x128x384xf32>
    %cst_5 = arith.constant 2.000000e+00 : f32
    %8 = vector.broadcast %cst_5 : f32 to vector<1x128x384xf32>
    %9 = arith.divf %7, %8 : vector<1x128x384xf32>
    %10 = vector.broadcast %9 : vector<1x128x384xf32> to vector<2x128x384xf32>
    %11 = arith.subf %5, %10 : vector<2x128x384xf32>
    %12 = arith.mulf %11, %11 : vector<2x128x384xf32>
    %cst_6 = arith.constant dense<0.000000e+00> : vector<128x384xf32>
    %13 = vector.multi_reduction <add>, %12, %cst_6 [0] : vector<2x128x384xf32> to vector<128x384xf32>
    %14 = vector.shape_cast %13 : vector<128x384xf32> to vector<1x128x384xf32>
    %cst_7 = arith.constant 2.000000e+00 : f32
    %15 = vector.broadcast %cst_7 : f32 to vector<1x128x384xf32>
    %16 = arith.divf %14, %15 : vector<1x128x384xf32>
    %cst_8 = arith.constant 9.99999974E-6 : f32
    %17 = vector.broadcast %cst_8 : f32 to vector<1x128x384xf32>
    %18 = arith.addf %16, %17 : vector<1x128x384xf32>
    %19 = math.rsqrt %18 : vector<1x128x384xf32>
    %20 = vector.broadcast %19 : vector<1x128x384xf32> to vector<2x128x384xf32>
    %21 = arith.mulf %11, %20 : vector<2x128x384xf32>
    %22 = vector.shape_cast %21 : vector<2x128x384xf32> to vector<256x384xf32>
    %23 = arith.truncf %22 : vector<256x384xf32> to vector<256x384xbf16>
    %c0_9 = arith.constant 0 : index
    %c0_10 = arith.constant 0 : index
    %24 = vector.load %arg3[%c0_9, %c0_10] : memref<384x128xbf16, #tpu.memory_space<vmem>>, vector<384x128xbf16>
    %cst_11 = arith.constant dense<0.000000e+00> : vector<256x128xf32>
    %25 = tpu.matmul %23, %24, %cst_11 {dimension_numbers = #tpu.dot_dimension_numbers<[1], [0], [0], [1], [0, 0, 1, 1], [], []>} : vector<256x384xbf16>, vector<384x128xbf16>, vector<256x128xf32> -> vector<256x128xf32>
    %cst_12 = arith.constant 0.000000e+00 : f32
    %26 = vector.broadcast %cst_12 : f32 to vector<256x128xf32>
    %27 = arith.maximumf %25, %26 : vector<256x128xf32>
    %28 = vector.shape_cast %27 : vector<256x128xf32> to vector<2x128x128xf32>
    %cst_13 = arith.constant dense<0.000000e+00> : vector<128x128xf32>
    %29 = vector.multi_reduction <add>, %28, %cst_13 [0] : vector<2x128x128xf32> to vector<128x128xf32>
    %30 = vector.shape_cast %29 : vector<128x128xf32> to vector<1x128x128xf32>
    %cst_14 = arith.constant 2.000000e+00 : f32
    %31 = vector.broadcast %cst_14 : f32 to vector<1x128x128xf32>
    %32 = arith.divf %30, %31 : vector<1x128x128xf32>
    %33 = vector.broadcast %32 : vector<1x128x128xf32> to vector<2x128x128xf32>
    %34 = arith.subf %28, %33 : vector<2x128x128xf32>
    %35 = arith.mulf %34, %34 : vector<2x128x128xf32>
    %cst_15 = arith.constant dense<0.000000e+00> : vector<128x128xf32>
    %36 = vector.multi_reduction <add>, %35, %cst_15 [0] : vector<2x128x128xf32> to vector<128x128xf32>
    %37 = vector.shape_cast %36 : vector<128x128xf32> to vector<1x128x128xf32>
    %cst_16 = arith.constant 2.000000e+00 : f32
    %38 = vector.broadcast %cst_16 : f32 to vector<1x128x128xf32>
    %39 = arith.divf %37, %38 : vector<1x128x128xf32>
    %cst_17 = arith.constant 9.99999974E-6 : f32
    %40 = vector.broadcast %cst_17 : f32 to vector<1x128x128xf32>
    %41 = arith.addf %39, %40 : vector<1x128x128xf32>
    %42 = math.rsqrt %41 : vector<1x128x128xf32>
    %43 = vector.broadcast %42 : vector<1x128x128xf32> to vector<2x128x128xf32>
    %44 = arith.mulf %34, %43 : vector<2x128x128xf32>
    %45 = vector.shape_cast %44 : vector<2x128x128xf32> to vector<256x128xf32>
    %46 = arith.truncf %45 : vector<256x128xf32> to vector<256x128xbf16>
    %c0_18 = arith.constant 0 : index
    %c0_19 = arith.constant 0 : index
    %47 = vector.load %arg4[%c0_18, %c0_19] : memref<128x128xbf16, #tpu.memory_space<vmem>>, vector<128x128xbf16>
    %cst_20 = arith.constant dense<0.000000e+00> : vector<256x128xf32>
    %48 = tpu.matmul %46, %47, %cst_20 {dimension_numbers = #tpu.dot_dimension_numbers<[1], [0], [0], [1], [0, 0, 1, 1], [], []>} : vector<256x128xbf16>, vector<128x128xbf16>, vector<256x128xf32> -> vector<256x128xf32>
    %cst_21 = arith.constant 0.000000e+00 : f32
    %49 = vector.broadcast %cst_21 : f32 to vector<256x128xf32>
    %50 = arith.maximumf %48, %49 : vector<256x128xf32>
    %51 = vector.shape_cast %50 : vector<256x128xf32> to vector<2x128x128xf32>
    %cst_22 = arith.constant dense<0.000000e+00> : vector<128x128xf32>
    %52 = vector.multi_reduction <add>, %51, %cst_22 [0] : vector<2x128x128xf32> to vector<128x128xf32>
    %53 = vector.shape_cast %52 : vector<128x128xf32> to vector<1x128x128xf32>
    %cst_23 = arith.constant 2.000000e+00 : f32
    %54 = vector.broadcast %cst_23 : f32 to vector<1x128x128xf32>
    %55 = arith.divf %53, %54 : vector<1x128x128xf32>
    %56 = vector.broadcast %55 : vector<1x128x128xf32> to vector<2x128x128xf32>
    %57 = arith.subf %51, %56 : vector<2x128x128xf32>
    %58 = arith.mulf %57, %57 : vector<2x128x128xf32>
    %cst_24 = arith.constant dense<0.000000e+00> : vector<128x128xf32>
    %59 = vector.multi_reduction <add>, %58, %cst_24 [0] : vector<2x128x128xf32> to vector<128x128xf32>
    %60 = vector.shape_cast %59 : vector<128x128xf32> to vector<1x128x128xf32>
    %cst_25 = arith.constant 2.000000e+00 : f32
    %61 = vector.broadcast %cst_25 : f32 to vector<1x128x128xf32>
    %62 = arith.divf %60, %61 : vector<1x128x128xf32>
    %cst_26 = arith.constant 9.99999974E-6 : f32
    %63 = vector.broadcast %cst_26 : f32 to vector<1x128x128xf32>
    %64 = arith.addf %62, %63 : vector<1x128x128xf32>
    %65 = math.rsqrt %64 : vector<1x128x128xf32>
    %66 = vector.broadcast %65 : vector<1x128x128xf32> to vector<2x128x128xf32>
    %67 = arith.mulf %57, %66 : vector<2x128x128xf32>
    %68 = vector.shape_cast %67 : vector<2x128x128xf32> to vector<256x128xf32>
    %69 = arith.truncf %68 : vector<256x128xf32> to vector<256x128xbf16>
    %c0_27 = arith.constant 0 : index
    %c0_28 = arith.constant 0 : index
    %70 = vector.load %arg5[%c0_27, %c0_28] : memref<128x128xbf16, #tpu.memory_space<vmem>>, vector<128x128xbf16>
    %cst_29 = arith.constant dense<0.000000e+00> : vector<256x128xf32>
    %71 = tpu.matmul %69, %70, %cst_29 {dimension_numbers = #tpu.dot_dimension_numbers<[1], [0], [0], [1], [0, 0, 1, 1], [], []>} : vector<256x128xbf16>, vector<128x128xbf16>, vector<256x128xf32> -> vector<256x128xf32>
    %c0_30 = arith.constant 0 : index
    %c0_31 = arith.constant 0 : index
    %72 = vector.load %arg6[%c0_30, %c0_31] : memref<1x128xf32, #tpu.memory_space<vmem>>, vector<1x128xf32>
    %73 = vector.broadcast %72 : vector<1x128xf32> to vector<256x128xf32>
    %74 = arith.addf %71, %73 : vector<256x128xf32>
    %75 = arith.truncf %74 : vector<256x128xf32> to vector<256x128xbf16>
    %c0_32 = arith.constant 0 : index
    %c0_33 = arith.constant 0 : index
    %76 = vector.load %arg7[%c0_32, %c0_33] : memref<128x128xbf16, #tpu.memory_space<vmem>>, vector<128x128xbf16>
    %cst_34 = arith.constant dense<0.000000e+00> : vector<256x128xf32>
    %77 = tpu.matmul %75, %76, %cst_34 {dimension_numbers = #tpu.dot_dimension_numbers<[1], [0], [0], [1], [0, 0, 1, 1], [], []>} : vector<256x128xbf16>, vector<128x128xbf16>, vector<256x128xf32> -> vector<256x128xf32>
    %cst_35 = arith.constant 0.000000e+00 : f32
    %78 = vector.broadcast %cst_35 : f32 to vector<256x128xf32>
    %79 = arith.maximumf %77, %78 : vector<256x128xf32>
    %80 = vector.shape_cast %79 : vector<256x128xf32> to vector<2x128x128xf32>
    %cst_36 = arith.constant dense<0.000000e+00> : vector<128x128xf32>
    %81 = vector.multi_reduction <add>, %80, %cst_36 [0] : vector<2x128x128xf32> to vector<128x128xf32>
    %82 = vector.shape_cast %81 : vector<128x128xf32> to vector<1x128x128xf32>
    %cst_37 = arith.constant 2.000000e+00 : f32
    %83 = vector.broadcast %cst_37 : f32 to vector<1x128x128xf32>
    %84 = arith.divf %82, %83 : vector<1x128x128xf32>
    %85 = vector.broadcast %84 : vector<1x128x128xf32> to vector<2x128x128xf32>
    %86 = arith.subf %80, %85 : vector<2x128x128xf32>
    %87 = arith.mulf %86, %86 : vector<2x128x128xf32>
    %cst_38 = arith.constant dense<0.000000e+00> : vector<128x128xf32>
    %88 = vector.multi_reduction <add>, %87, %cst_38 [0] : vector<2x128x128xf32> to vector<128x128xf32>
    %89 = vector.shape_cast %88 : vector<128x128xf32> to vector<1x128x128xf32>
    %cst_39 = arith.constant 2.000000e+00 : f32
    %90 = vector.broadcast %cst_39 : f32 to vector<1x128x128xf32>
    %91 = arith.divf %89, %90 : vector<1x128x128xf32>
    %cst_40 = arith.constant 9.99999974E-6 : f32
    %92 = vector.broadcast %cst_40 : f32 to vector<1x128x128xf32>
    %93 = arith.addf %91, %92 : vector<1x128x128xf32>
    %94 = math.rsqrt %93 : vector<1x128x128xf32>
    %95 = vector.broadcast %94 : vector<1x128x128xf32> to vector<2x128x128xf32>
    %96 = arith.mulf %86, %95 : vector<2x128x128xf32>
    %97 = vector.shape_cast %96 : vector<2x128x128xf32> to vector<256x128xf32>
    %98 = arith.truncf %97 : vector<256x128xf32> to vector<256x128xbf16>
    %c0_41 = arith.constant 0 : index
    %c0_42 = arith.constant 0 : index
    %99 = vector.load %arg8[%c0_41, %c0_42] : memref<128x128xbf16, #tpu.memory_space<vmem>>, vector<128x128xbf16>
    %cst_43 = arith.constant dense<0.000000e+00> : vector<256x128xf32>
    %100 = tpu.matmul %98, %99, %cst_43 {dimension_numbers = #tpu.dot_dimension_numbers<[1], [0], [0], [1], [0, 0, 1, 1], [], []>} : vector<256x128xbf16>, vector<128x128xbf16>, vector<256x128xf32> -> vector<256x128xf32>
    %cst_44 = arith.constant 0.000000e+00 : f32
    %101 = vector.broadcast %cst_44 : f32 to vector<256x128xf32>
    %102 = arith.maximumf %100, %101 : vector<256x128xf32>
    %103 = vector.shape_cast %102 : vector<256x128xf32> to vector<2x128x128xf32>
    %cst_45 = arith.constant dense<0.000000e+00> : vector<128x128xf32>
    %104 = vector.multi_reduction <add>, %103, %cst_45 [0] : vector<2x128x128xf32> to vector<128x128xf32>
    %105 = vector.shape_cast %104 : vector<128x128xf32> to vector<1x128x128xf32>
    %cst_46 = arith.constant 2.000000e+00 : f32
    %106 = vector.broadcast %cst_46 : f32 to vector<1x128x128xf32>
    %107 = arith.divf %105, %106 : vector<1x128x128xf32>
    %108 = vector.broadcast %107 : vector<1x128x128xf32> to vector<2x128x128xf32>
    %109 = arith.subf %103, %108 : vector<2x128x128xf32>
    %110 = arith.mulf %109, %109 : vector<2x128x128xf32>
    %cst_47 = arith.constant dense<0.000000e+00> : vector<128x128xf32>
    %111 = vector.multi_reduction <add>, %110, %cst_47 [0] : vector<2x128x128xf32> to vector<128x128xf32>
    %112 = vector.shape_cast %111 : vector<128x128xf32> to vector<1x128x128xf32>
    %cst_48 = arith.constant 2.000000e+00 : f32
    %113 = vector.broadcast %cst_48 : f32 to vector<1x128x128xf32>
    %114 = arith.divf %112, %113 : vector<1x128x128xf32>
    %cst_49 = arith.constant 9.99999974E-6 : f32
    %115 = vector.broadcast %cst_49 : f32 to vector<1x128x128xf32>
    %116 = arith.addf %114, %115 : vector<1x128x128xf32>
    %117 = math.rsqrt %116 : vector<1x128x128xf32>
    %118 = vector.broadcast %117 : vector<1x128x128xf32> to vector<2x128x128xf32>
    %119 = arith.mulf %109, %118 : vector<2x128x128xf32>
    %120 = vector.shape_cast %119 : vector<2x128x128xf32> to vector<256x128xf32>
    %121 = arith.truncf %120 : vector<256x128xf32> to vector<256x128xbf16>
    %c0_50 = arith.constant 0 : index
    %c0_51 = arith.constant 0 : index
    %122 = vector.load %arg9[%c0_50, %c0_51] : memref<128x384xbf16, #tpu.memory_space<vmem>>, vector<128x384xbf16>
    %cst_52 = arith.constant dense<0.000000e+00> : vector<256x384xf32>
    %123 = tpu.matmul %121, %122, %cst_52 {dimension_numbers = #tpu.dot_dimension_numbers<[1], [0], [0], [1], [0, 0, 1, 1], [], []>} : vector<256x128xbf16>, vector<128x384xbf16>, vector<256x384xf32> -> vector<256x384xf32>
    %cst_53 = arith.constant 0.000000e+00 : f32
    %124 = vector.broadcast %cst_53 : f32 to vector<256x384xf32>
    %125 = arith.maximumf %123, %124 : vector<256x384xf32>
    %126 = vector.shape_cast %125 : vector<256x384xf32> to vector<2x128x384xf32>
    %cst_54 = arith.constant dense<0.000000e+00> : vector<128x384xf32>
    %127 = vector.multi_reduction <add>, %126, %cst_54 [0] : vector<2x128x384xf32> to vector<128x384xf32>
    %128 = vector.shape_cast %127 : vector<128x384xf32> to vector<1x128x384xf32>
    %cst_55 = arith.constant 2.000000e+00 : f32
    %129 = vector.broadcast %cst_55 : f32 to vector<1x128x384xf32>
    %130 = arith.divf %128, %129 : vector<1x128x384xf32>
    %131 = vector.broadcast %130 : vector<1x128x384xf32> to vector<2x128x384xf32>
    %132 = arith.subf %126, %131 : vector<2x128x384xf32>
    %133 = arith.mulf %132, %132 : vector<2x128x384xf32>
    %cst_56 = arith.constant dense<0.000000e+00> : vector<128x384xf32>
    %134 = vector.multi_reduction <add>, %133, %cst_56 [0] : vector<2x128x384xf32> to vector<128x384xf32>
    %135 = vector.shape_cast %134 : vector<128x384xf32> to vector<1x128x384xf32>
    %cst_57 = arith.constant 2.000000e+00 : f32
    %136 = vector.broadcast %cst_57 : f32 to vector<1x128x384xf32>
    %137 = arith.divf %135, %136 : vector<1x128x384xf32>
    %cst_58 = arith.constant 9.99999974E-6 : f32
    %138 = vector.broadcast %cst_58 : f32 to vector<1x128x384xf32>
    %139 = arith.addf %137, %138 : vector<1x128x384xf32>
    %140 = math.rsqrt %139 : vector<1x128x384xf32>
    %141 = vector.broadcast %140 : vector<1x128x384xf32> to vector<2x128x384xf32>
    %142 = arith.mulf %132, %141 : vector<2x128x384xf32>
    %143 = vector.shape_cast %142 : vector<2x128x384xf32> to vector<256x384xf32>
    %144 = arith.truncf %143 : vector<256x384xf32> to vector<256x384xbf16>
    %c0_59 = arith.constant 0 : index
    %c0_60 = arith.constant 0 : index
    %145 = vector.load %arg10[%c0_59, %c0_60] : memref<384x256xbf16, #tpu.memory_space<vmem>>, vector<384x256xbf16>
    %cst_61 = arith.constant dense<0.000000e+00> : vector<256x256xf32>
    %146 = tpu.matmul %144, %145, %cst_61 {dimension_numbers = #tpu.dot_dimension_numbers<[1], [0], [0], [1], [0, 0, 1, 1], [], []>} : vector<256x384xbf16>, vector<384x256xbf16>, vector<256x256xf32> -> vector<256x256xf32>
    %c0_62 = arith.constant 0 : index
    %c0_63 = arith.constant 0 : index
    %147 = vector.load %arg11[%c0_62, %c0_63] : memref<1x256xf32, #tpu.memory_space<vmem>>, vector<1x256xf32>
    %148 = vector.broadcast %147 : vector<1x256xf32> to vector<256x256xf32>
    %149 = arith.addf %146, %148 : vector<256x256xf32>
    %150 = arith.negf %149 : vector<256x256xf32>
    %151 = math.exp %150 : vector<256x256xf32>
    %cst_64 = arith.constant 1.000000e+00 : f32
    %152 = vector.broadcast %cst_64 : f32 to vector<256x256xf32>
    %153 = arith.addf %152, %151 : vector<256x256xf32>
    %154 = arith.divf %152, %153 : vector<256x256xf32>
    %c0_65 = arith.constant 0 : index
    %c0_66 = arith.constant 0 : index
    %155 = vector.load %arg12[%c0_65, %c0_66] : memref<256x256xf32, #tpu.memory_space<vmem>>, vector<256x256xf32>
    tpu.vector_store %arg12[%c0_65, %c0_66], %154 {strides = array<i32>} : memref<256x256xf32, #tpu.memory_space<vmem>>, vector<256x256xf32>,
    return
  }
  func.func @transform_0(%arg0: i32) -> (i32, i32) {
    %c0_i32 = arith.constant 0 : i32
    %c0_i32_0 = arith.constant 0 : i32
    return %arg0, %c0_i32 : i32, i32
  }
  func.func @transform_1(%arg0: i32) -> (i32, i32) {
    %c0_i32 = arith.constant 0 : i32
    %c0_i32_0 = arith.constant 0 : i32
    %c0_i32_1 = arith.constant 0 : i32
    return %c0_i32, %c0_i32_0 : i32, i32
  }
  func.func @transform_2(%arg0: i32) -> (i32, i32) {
    %c0_i32 = arith.constant 0 : i32
    %c0_i32_0 = arith.constant 0 : i32
    %c0_i32_1 = arith.constant 0 : i32
    return %c0_i32, %c0_i32_0 : i32, i32
  }
  func.func @transform_3(%arg0: i32) -> (i32, i32) {
    %c0_i32 = arith.constant 0 : i32
    %c0_i32_0 = arith.constant 0 : i32
    %c0_i32_1 = arith.constant 0 : i32
    return %c0_i32, %c0_i32_0 : i32, i32
  }
  func.func @transform_4(%arg0: i32) -> (i32, i32) {
    %c0_i32 = arith.constant 0 : i32
    %c0_i32_0 = arith.constant 0 : i32
    %c0_i32_1 = arith.constant 0 : i32
    return %c0_i32, %c0_i32_0 : i32, i32
  }
  func.func @transform_5(%arg0: i32) -> (i32, i32) {
    %c0_i32 = arith.constant 0 : i32
    %c0_i32_0 = arith.constant 0 : i32
    %c0_i32_1 = arith.constant 0 : i32
    return %c0_i32, %c0_i32_0 : i32, i32
  }
  func.func @transform_6(%arg0: i32) -> (i32, i32) {
    %c0_i32 = arith.constant 0 : i32
    %c0_i32_0 = arith.constant 0 : i32
    %c0_i32_1 = arith.constant 0 : i32
    return %c0_i32, %c0_i32_0 : i32, i32
  }
  func.func @transform_7(%arg0: i32) -> (i32, i32) {
    %c0_i32 = arith.constant 0 : i32
    %c0_i32_0 = arith.constant 0 : i32
    %c0_i32_1 = arith.constant 0 : i32
    return %c0_i32, %c0_i32_0 : i32, i32
  }
  func.func @transform_8(%arg0: i32) -> (i32, i32) {
    %c0_i32 = arith.constant 0 : i32
    %c0_i32_0 = arith.constant 0 : i32
    %c0_i32_1 = arith.constant 0 : i32
    return %c0_i32, %c0_i32_0 : i32, i32
  }
  func.func @transform_9(%arg0: i32) -> (i32, i32) {
    %c0_i32 = arith.constant 0 : i32
    %c0_i32_0 = arith.constant 0 : i32
    %c0_i32_1 = arith.constant 0 : i32
    return %c0_i32, %c0_i32_0 : i32, i32
  }
  func.func @transform_10(%arg0: i32) -> (i32, i32) {
    %c0_i32 = arith.constant 0 : i32
    %c0_i32_0 = arith.constant 0 : i32
    %c0_i32_1 = arith.constant 0 : i32
    return %c0_i32, %c0_i32_0 : i32, i32
  }
  func.func @transform_11(%arg0: i32) -> (i32, i32) {
    %c0_i32 = arith.constant 0 : i32
    %c0_i32_0 = arith.constant 0 : i32
    return %arg0, %c0_i32 : i32, i32
  }
}

</mosaic_0001>

<bundles_post_ra>
// kernel: amino_acid_ae_forward.1
= control target key start
LH: loop header
LB: loop body
LE: loop exit
PB: predicated region body
PF: predicated region fallthrough
CT: control target
= control target key end

     0   :  { %s10765_s17 = smov 0   ;;  %s17169_s0 = inlined_call_operand.vmem [shape: bf16[512,256], index: 0, kind: input, shape index: {}]   ;;  %s17170_s1 = inlined_call_operand.vmem [shape: bf16[256,384], index: 1, kind: input, shape index: {}]   ;;  %s17171_s2 = inlined_call_operand.vmem [shape: bf16[384,128], index: 2, kind: input, shape index: {}]   ;;  %s17172_s3 = inlined_call_operand.vmem [shape: bf16[128,128], index: 3, kind: input, shape index: {}]   ;;  %s17173_s4 = inlined_call_operand.vmem [shape: bf16[128,128], index: 4, kind: input, shape index: {}]   ;;  %s17174_s5 = inlined_call_operand.vmem [shape: f32[1,128], index: 5, kind: input, shape index: {}]   ;;  %s17175_s6 = inlined_call_operand.vmem [shape: bf16[128,128], index: 6, kind: input, shape index: {}]   ;;  %s17176_s7 = inlined_call_operand.vmem [shape: bf16[128,128], index: 7, kind: input, shape index: {}]   ;;  %s17177_s8 = inlined_call_operand.vmem [shape: bf16[128,384], index: 8, kind: input, shape index: {}]   ;;  %s17178_s9 = inlined_call_operand.vmem [shape: bf16[384,256], index: 9, kind: input, shape index: {}]   ;;  %s17179_s10 = inlined_call_operand.vmem [shape: f32[1,256], index: 10, kind: input, shape index: {}]   ;;  %s17180_s11 = inlined_call_operand.vmem [shape: f32[512,256], index: 11, kind: output, shape index: {}]  }
   0x1 LB: > { %s8972_s18 = sadd.s32 4294967295, %s10702_s17   ;;  %p8976_p0 = scmp.ge.s32.totalorder %s10702_s17, 1  ;;  %s10702_s17 = sphi %s10765_s17, %s21_s17  }
   0x2   : > { %p339_p1 = scmp.lt.s32.totalorder %s10702_s17, 3 }
   0x4   : > { %p340_p2 = pnand %p8976_p0, %p339_p1 }
   0x6   : > { %343 = sbr.rel (%p340_p2) target bundleno = 3042 (0xbe2), region = 64 }
   0xb   : > { %v9197_v0 = vld [vmem:[%s17170_s1 + $0xa8] sm:$0xf]  ;;  %v9937_v1 = vld [vmem:[%s17170_s1 + $0xb0] sm:$0xf0]  ;;  %v9185_v5 = vld [vmem:[%s17170_s1 + $0x90] sm:$0xf] }
   0xc   : > { %v9293_v2 = vld [vmem:[%s17170_s1 + $0x168] sm:$0xf]  ;;  %v9198_v3 = vor.u32 %v9937_v1, %v9197_v0  ;;  %v9961_v4 = vld [vmem:[%s17170_s1 + $0x170] sm:$0xf0]  ;;  %v9934_v6 = vld [vmem:[%s17170_s1 + $0x98] sm:$0xf0] }
   0xd   : > { %v9294_v7 = vor.u32 %v9961_v4, %v9293_v2  ;;  %v9281_v8 = vld [vmem:[%s17170_s1 + $0x150] sm:$0xf]  ;;  %v9958_v9 = vld [vmem:[%s17170_s1 + $0x158] sm:$0xf0]  ;;  %v9186_v10 = vor.u32 %v9934_v6, %v9185_v5  ;;  %v9173_v12 = vld [vmem:[%s17170_s1 + $0x78] sm:$0xf] }
   0xe   : > { %907 = vmatpush.bf16.msra.mxu0 %v9198_v3  ;;  %10091 = vmatpush.bf16.msra.mxu2 %v9198_v3  ;;  %v9282_v11 = vor.u32 %v9958_v9, %v9281_v8  ;;  %v9931_v13 = vld [vmem:[%s17170_s1 + $0x80] sm:$0xf0]  ;;  %v9269_v14 = vld [vmem:[%s17170_s1 + $0x138] sm:$0xf]  ;;  %v9161_v18 = vld [vmem:[%s17170_s1 + $0x60] sm:$0xf] }
   0xf   : > { %996 = vmatpush.bf16.msra.mxu1 %v9294_v7  ;;  %10099 = vmatpush.bf16.msra.mxu3 %v9294_v7  ;;  %v9955_v15 = vld [vmem:[%s17170_s1 + $0x140] sm:$0xf0]  ;;  %v9174_v16 = vor.u32 %v9931_v13, %v9173_v12  ;;  %v9928_v19 = vld [vmem:[%s17170_s1 + $0x68] sm:$0xf0]  ;;  %v9257_v20 = vld [vmem:[%s17170_s1 + $0x120] sm:$0xf] }
  0x10   : > { %v9270_v17 = vor.u32 %v9955_v15, %v9269_v14  ;;  %v9952_v21 = vld [vmem:[%s17170_s1 + $0x128] sm:$0xf0]  ;;  %s8977_s15 = sshll.u32 %s8972_s18, 5  ;;  %v9162_v22 = vor.u32 %v9928_v19, %v9161_v18  ;;  %v9149_v24 = vld [vmem:[%s17170_s1 + $0x48] sm:$0xf] }
  0x11   : > { %v9258_v23 = vor.u32 %v9952_v21, %v9257_v20  ;;  %v9925_v25 = vld [vmem:[%s17170_s1 + $0x50] sm:$0xf0]  ;;  %p382_p3 = scmp.lt.s32.totalorder %s8977_s15, 63  ;;  %v9245_v26 = vld [vmem:[%s17170_s1 + $0x108] sm:$0xf] }
  0x12   : > { %908 = vmatpush.bf16.msra.mxu0 %v9186_v10  ;;  %10092 = vmatpush.bf16.msra.mxu2 %v9186_v10  ;;  %v9949_v27 = vld [vmem:[%s17170_s1 + $0x110] sm:$0xf0]  ;;  %v9150_v28 = vor.u32 %v9925_v25, %v9149_v24  ;;  %v9137_v30 = vld [vmem:[%s17170_s1 + $0x30] sm:$0xf]  ;;  %v9922_v31 = vld [vmem:[%s17170_s1 + $0x38] sm:$0xf0] }
  0x13   : > { %997 = vmatpush.bf16.msra.mxu1 %v9282_v11  ;;  %10100 = vmatpush.bf16.msra.mxu3 %v9282_v11  ;;  %v9246_v29 = vor.u32 %v9949_v27, %v9245_v26  ;;  %s17713_s15 = smov (!%p382_p3, %s8977_s15), 63  ;;  %v9233_v32 = vld [vmem:[%s17170_s1 + $0xf0] sm:$0xf]  ;;  %v9946_v33 = vld [vmem:[%s17170_s1 + $0xf8] sm:$0xf0]  ;;  %v9138_v34 = vor.u32 %v9922_v31, %v9137_v30 }
  0x14   : > { %v9234_v35 = vor.u32 %v9946_v33, %v9233_v32  ;;  %v9125_v36 = vld [vmem:[%s17170_s1 + $0x18] sm:$0xf]  ;;  %v9919_v37 = vld [vmem:[%s17170_s1 + $0x20] sm:$0xf0]  ;;  %s9881_s21 = sshll.u32 %s17713_s15, 3  ;;  %s9882_s24 = sshll.u32 %s17713_s15, 4 }
  0x15   : > { %v9221_v38 = vld [vmem:[%s17170_s1 + $0xd8] sm:$0xf]  ;;  %v9943_v39 = vld [vmem:[%s17170_s1 + $0xe0] sm:$0xf0]  ;;  %v9126_v40 = vor.u32 %v9919_v37, %v9125_v36  ;;  %v9113_v41 = vld [vmem:[%s17170_s1] sm:$0xf]  ;;  %s10868_s29 = scalar_lea.vmem %s17169_s0, %s9881_s21  ;;  %s16784_s12 = scalar_lea.vmem %s17180_s11, %s9882_s24 }
  0x16   : > { %909 = vmatpush.bf16.msra.mxu0 %v9174_v16  ;;  %10093 = vmatpush.bf16.msra.mxu2 %v9174_v16  ;;  %v9222_v42 = vor.u32 %v9943_v39, %v9221_v38  ;;  %v9916_v43 = vld [vmem:[%s17170_s1 + $0x8] sm:$0xf0]  ;;  %v9209_v44 = vld [vmem:[%s17170_s1 + $0xc0] sm:$0xf]  ;;  %v9199_v47 = vld [vmem:[%s17170_s1 + $0xb4] sm:$0xf0] }
  0x17   : > { %998 = vmatpush.bf16.msra.mxu1 %v9270_v17  ;;  %10101 = vmatpush.bf16.msra.mxu3 %v9270_v17  ;;  %v9940_v45 = vld [vmem:[%s17170_s1 + $0xc8] sm:$0xf0]  ;;  %v8985_v49 = vld [vmem:[%s10868_s29] sm:$0xf]  ;;  %v9884_v50 = vld [vmem:[%s10868_s29 + $0x4] sm:$0xf0]  ;;  %v9114_v52 = vor.u32 %v9916_v43, %v9113_v41 }
  0x18   : > { %v9936_v46 = vld [vmem:[%s17170_s1 + $0xac] sm:$0xf]  ;;  %v9295_v51 = vld [vmem:[%s17170_s1 + $0x174] sm:$0xf0]  ;;  %v9049_v53 = vld [vmem:[%s10868_s29 + $0x80] sm:$0xf]  ;;  %v9210_v58 = vor.u32 %v9940_v45, %v9209_v44  ;;  %v10914_v3 = vor.u32 %v9884_v50, %v8985_v49 }
  0x19   : > { %v9960_v48 = vld [vmem:[%s17170_s1 + $0x16c] sm:$0xf]  ;;  %v9900_v54 = vld [vmem:[%s10868_s29 + $0x84] sm:$0xf0]  ;;  %v9883_v55 = vld [vmem:[%s10868_s29 + $0x4] sm:$0xf]  ;;  %v9202_v62 = vor.u32 %v9936_v46, %v9199_v47 }
  0x1a   : > { %910 = vmatpush.bf16.msra.mxu0 %v9162_v22  ;;  %10094 = vmatpush.bf16.msra.mxu2 %v9162_v22  ;;  %v9205_v56 = vld [vmem:[%s17170_s1 + $0xb0] sm:$0xf]  ;;  %v9938_v57 = vld [vmem:[%s17170_s1 + $0xb8] sm:$0xf0]  ;;  %v8987_v59 = vld [vmem:[%s10868_s29 + $0x8] sm:$0xf0]  ;;  %v9298_v63 = vor.u32 %v9960_v48, %v9295_v51  ;;  %v10916_v4 = vor.u32 %v9900_v54, %v9049_v53 }
  0x1b   : > { %999 = vmatpush.bf16.msra.mxu1 %v9258_v23  ;;  %10102 = vmatpush.bf16.msra.mxu3 %v9258_v23  ;;  %v9899_v60 = vld [vmem:[%s10868_s29 + $0x84] sm:$0xf]  ;;  %v9051_v61 = vld [vmem:[%s10868_s29 + $0x88] sm:$0xf0]  ;;  %v9301_v0 = vld [vmem:[%s17170_s1 + $0x170] sm:$0xf]  ;;  %v10927_v8 = vor.u32 %v9883_v55, %v8987_v59  ;;  %v9206_v10 = vor.u32 %v9938_v57, %v9205_v56 }
  0x1c   : > { %v9962_v1 = vld [vmem:[%s17170_s1 + $0x178] sm:$0xf0]  ;;  %v9933_v2 = vld [vmem:[%s17170_s1 + $0x94] sm:$0xf]  ;;  %v9187_v5 = vld [vmem:[%s17170_s1 + $0x9c] sm:$0xf0]  ;;  %v10929_v9 = vor.u32 %v9899_v60, %v9051_v61 }
  0x1d   : > { %v9957_v6 = vld [vmem:[%s17170_s1 + $0x154] sm:$0xf]  ;;  %v9283_v7 = vld [vmem:[%s17170_s1 + $0x15c] sm:$0xf0]  ;;  %v9302_v11 = vor.u32 %v9962_v1, %v9301_v0  ;;  %v9193_v12 = vld [vmem:[%s17170_s1 + $0x98] sm:$0xf]  ;;  %v9190_v13 = vor.u32 %v9933_v2, %v9187_v5 }
  0x1e   : > { %911 = vmatpush.bf16.msra.mxu0 %v9150_v28  ;;  %10095 = vmatpush.bf16.msra.mxu2 %v9150_v28  ;;  %v9286_v14 = vor.u32 %v9957_v6, %v9283_v7  ;;  %v9935_v15 = vld [vmem:[%s17170_s1 + $0xa0] sm:$0xf0]  ;;  %v9289_v16 = vld [vmem:[%s17170_s1 + $0x158] sm:$0xf]  ;;  %v9930_v18 = vld [vmem:[%s17170_s1 + $0x7c] sm:$0xf] }
  0x1f   : > { %1000 = vmatpush.bf16.msra.mxu1 %v9246_v29  ;;  %10103 = vmatpush.bf16.msra.mxu3 %v9246_v29  ;;  %v9959_v17 = vld [vmem:[%s17170_s1 + $0x160] sm:$0xf0]  ;;  %v9175_v19 = vld [vmem:[%s17170_s1 + $0x84] sm:$0xf0]  ;;  %v9954_v20 = vld [vmem:[%s17170_s1 + $0x13c] sm:$0xf]  ;;  %v9194_v21 = vor.u32 %v9935_v15, %v9193_v12 }
  0x20   : > { %v9290_v22 = vor.u32 %v9959_v17, %v9289_v16  ;;  %v9271_v23 = vld [vmem:[%s17170_s1 + $0x144] sm:$0xf0]  ;;  %v9181_v24 = vld [vmem:[%s17170_s1 + $0x80] sm:$0xf]  ;;  %v9178_v25 = vor.u32 %v9930_v18, %v9175_v19  ;;  %v9932_v27 = vld [vmem:[%s17170_s1 + $0x88] sm:$0xf0] }
  0x21   : > { %v9274_v26 = vor.u32 %v9954_v20, %v9271_v23  ;;  %v9277_v28 = vld [vmem:[%s17170_s1 + $0x140] sm:$0xf]  ;;  %v9956_v29 = vld [vmem:[%s17170_s1 + $0x148] sm:$0xf0]  ;;  %v9182_v30 = vor.u32 %v9932_v27, %v9181_v24  ;;  %v8993_v32 = vld [vmem:[%s10868_s29 + $0x10] sm:$0xf] }
  0x22   : > { %912 = vmatpush.bf16.msra.mxu0 %v9138_v34  ;;  %10096 = vmatpush.bf16.msra.mxu2 %v9138_v34  ;;  %v9278_v31 = vor.u32 %v9956_v29, %v9277_v28  ;;  %v9886_v33 = vld [vmem:[%s10868_s29 + $0x14] sm:$0xf0]  ;;  %v9057_v34 = vld [vmem:[%s10868_s29 + $0x90] sm:$0xf]  ;;  %v9885_v36 = vld [vmem:[%s10868_s29 + $0x14] sm:$0xf] }
  0x23   : > { %1001 = vmatpush.bf16.msra.mxu1 %v9234_v35  ;;  %10104 = vmatpush.bf16.msra.mxu3 %v9234_v35  ;;  %v9902_v35 = vld [vmem:[%s10868_s29 + $0x94] sm:$0xf0]  ;;  %v8995_v37 = vld [vmem:[%s10868_s29 + $0x18] sm:$0xf0]  ;;  %v9901_v38 = vld [vmem:[%s10868_s29 + $0x94] sm:$0xf] }
  0x24   : > { %v9059_v39 = vld [vmem:[%s10868_s29 + $0x98] sm:$0xf0]  ;;  %v10981_v41 = vor.u32 %v9902_v35, %v9057_v34  ;;  %v9927_v44 = vld [vmem:[%s17170_s1 + $0x64] sm:$0xf]  ;;  %v9163_v45 = vld [vmem:[%s17170_s1 + $0x6c] sm:$0xf0] }
  0x25   : > { %v10985_v43 = vor.u32 %v9901_v38, %v9059_v39  ;;  %v9951_v46 = vld [vmem:[%s17170_s1 + $0x124] sm:$0xf]  ;;  %v9166_v47 = vor.u32 %v9927_v44, %v9163_v45  ;;  %v9259_v48 = vld [vmem:[%s17170_s1 + $0x12c] sm:$0xf0]  ;;  %v9169_v49 = vld [vmem:[%s17170_s1 + $0x68] sm:$0xf] }
  0x26   : > { %913 = vmatpush.bf16.msra.mxu0 %v9126_v40  ;;  %10097 = vmatpush.bf16.msra.mxu2 %v9126_v40  ;;  %v10979_v40 = vor.u32 %v9886_v33, %v8993_v32  ;;  %v9929_v50 = vld [vmem:[%s17170_s1 + $0x70] sm:$0xf0]  ;;  %v9262_v51 = vor.u32 %v9951_v46, %v9259_v48  ;;  %v9265_v53 = vld [vmem:[%s17170_s1 + $0x128] sm:$0xf]  ;;  %v9001_v56 = vld [vmem:[%s10868_s29 + $0x20] sm:$0xf] }
  0x27   : > { %1002 = vmatpush.bf16.msra.mxu1 %v9222_v42  ;;  %10105 = vmatpush.bf16.msra.mxu3 %v9222_v42  ;;  %v10983_v42 = vor.u32 %v9885_v36, %v8995_v37  ;;  %v9953_v54 = vld [vmem:[%s17170_s1 + $0x130] sm:$0xf0]  ;;  %v9888_v57 = vld [vmem:[%s10868_s29 + $0x24] sm:$0xf0]  ;;  %v9887_v60 = vld [vmem:[%s10868_s29 + $0x24] sm:$0xf] }
  0x28   : > { %v9266_v55 = vor.u32 %v9953_v54, %v9265_v53  ;;  %v9904_v59 = vld [vmem:[%s10868_s29 + $0xa4] sm:$0xf0]  ;;  %v9003_v61 = vld [vmem:[%s10868_s29 + $0x28] sm:$0xf0]  ;;  %v11023_v0 = vor.u32 %v9888_v57, %v9001_v56  ;;  %v9151_v7 = vld [vmem:[%s17170_s1 + $0x54] sm:$0xf0] }
  0x29   : > { %v11027_v2 = vor.u32 %v9887_v60, %v9003_v61  ;;  %v9924_v6 = vld [vmem:[%s17170_s1 + $0x4c] sm:$0xf]  ;;  %v9247_v12 = vld [vmem:[%s17170_s1 + $0x114] sm:$0xf0]  ;;  %v9253_v17 = vld [vmem:[%s17170_s1 + $0x110] sm:$0xf] }
  0x2a   : > { %914 = vmatpush.bf16.msra.mxu0 %v9114_v52  ;;  %10098 = vmatpush.bf16.msra.mxu2 %v9114_v52  ;;  %v9170_v52 = vor.u32 %v9929_v50, %v9169_v49  ;;  %v9950_v18 = vld [vmem:[%s17170_s1 + $0x118] sm:$0xf0]  ;;  %v9009_v20 = vld [vmem:[%s10868_s29 + $0x30] sm:$0xf]  ;;  %v9906_v23 = vld [vmem:[%s10868_s29 + $0xb4] sm:$0xf0] }
  0x2b   : > { %1003 = vmatpush.bf16.msra.mxu1 %v9210_v58  ;;  %10106 = vmatpush.bf16.msra.mxu3 %v9210_v58  ;;  %v9065_v58 = vld [vmem:[%s10868_s29 + $0xa0] sm:$0xf]  ;;  %v9254_v19 = vor.u32 %v9950_v18, %v9253_v17  ;;  %v9889_v24 = vld [vmem:[%s10868_s29 + $0x34] sm:$0xf]  ;;  %v9075_v27 = vld [vmem:[%s10868_s29 + $0xb8] sm:$0xf0] }
  0x2c   : > { %v11025_v1 = vor.u32 %v9904_v59, %v9065_v58  ;;  %v9921_v32 = vld [vmem:[%s17170_s1 + $0x34] sm:$0xf]  ;;  %v9139_v33 = vld [vmem:[%s17170_s1 + $0x3c] sm:$0xf0]  ;;  %v9145_v37 = vld [vmem:[%s17170_s1 + $0x38] sm:$0xf] }
  0x2d   : > { %915 = vmatmul.bf16.vlgmr.msra.gmra.mxu0 %v10914_v3  ;;  %955 = vmatmul.bf16.vlgmr.msra.gmra.mxu2 %v10916_v4  ;;  %v9945_v34 = vld [vmem:[%s17170_s1 + $0xf4] sm:$0xf]  ;;  %v9142_v35 = vor.u32 %v9921_v32, %v9139_v33  ;;  %v9235_v36 = vld [vmem:[%s17170_s1 + $0xfc] sm:$0xf0]  ;;  %v9923_v38 = vld [vmem:[%s17170_s1 + $0x40] sm:$0xf0] }
  0x2e   : > { %1085 = vmatpush.bf16.msrb.mxu2 %v9202_v62  ;;  %1004 = vmatmul.bf16.vlgmr.msra.gmra.mxu1 %v10927_v8  ;;  %v9903_v62 = vld [vmem:[%s10868_s29 + $0xa4] sm:$0xf]  ;;  %v9238_v39 = vor.u32 %v9945_v34, %v9235_v36  ;;  %v9146_v44 = vor.u32 %v9923_v38, %v9145_v37  ;;  %v9241_v45 = vld [vmem:[%s17170_s1 + $0xf8] sm:$0xf]  ;;  %v9017_v48 = vld [vmem:[%s10868_s29 + $0x40] sm:$0xf] }
  0x2f   : > { %1174 = vmatpush.bf16.msrb.mxu3 %v9298_v63  ;;  %1263 = vmatpush.bf16.msrb.mxu0 %v9206_v10  ;;  %v9067_v63 = vld [vmem:[%s10868_s29 + $0xa8] sm:$0xf0]  ;;  %v9947_v46 = vld [vmem:[%s17170_s1 + $0x100] sm:$0xf0]  ;;  %v9892_v49 = vld [vmem:[%s10868_s29 + $0x44] sm:$0xf0] }
  0x30   : > { %1044 = vmatmul.bf16.vlgmr.msra.gmra.mxu3 %v10929_v9  ;;  %1352 = vmatpush.bf16.msrb.mxu1 %v9302_v11  ;;  %v11029_v5 = vor.u32 %v9903_v62, %v9067_v63  ;;  %v9948_v10 = vld [vmem:[%s17170_s1 + $0x10c] sm:$0xf]  ;;  %v9154_v11 = vor.u32 %v9924_v6, %v9151_v7  ;;  %v9081_v50 = vld [vmem:[%s10868_s29 + $0xc0] sm:$0xf]  ;;  %v9907_v54 = vld [vmem:[%s10868_s29 + $0xc4] sm:$0xf]  ;;  %v11111_v56 = vor.u32 %v9892_v49, %v9017_v48 }
  0x31   : > { %v9250_v15 = vor.u32 %v9948_v10, %v9247_v12  ;;  %v9019_v53 = vld [vmem:[%s10868_s29 + $0x48] sm:$0xf0]  ;;  %v9918_v60 = vld [vmem:[%s17170_s1 + $0x1c] sm:$0xf]  ;;  %v9127_v61 = vld [vmem:[%s17170_s1 + $0x24] sm:$0xf0] }
  0x32   : > { %1086 = vmatpush.bf16.msrb.mxu2 %v9190_v13  ;;  %v9157_v13 = vld [vmem:[%s17170_s1 + $0x50] sm:$0xf]  ;;  %v9942_v62 = vld [vmem:[%s17170_s1 + $0xdc] sm:$0xf]  ;;  %v9130_v63 = vor.u32 %v9918_v60, %v9127_v61  ;;  %v9223_v6 = vld [vmem:[%s17170_s1 + $0xe4] sm:$0xf0] }
  0x33   : > { %1175 = vmatpush.bf16.msrb.mxu3 %v9286_v14  ;;  %1264 = vmatpush.bf16.msrb.mxu0 %v9194_v21  ;;  %v9926_v14 = vld [vmem:[%s17170_s1 + $0x58] sm:$0xf0]  ;;  %v9890_v21 = vld [vmem:[%s10868_s29 + $0x34] sm:$0xf0]  ;;  %v9133_v7 = vld [vmem:[%s17170_s1 + $0x20] sm:$0xf] }
  0x34   : > { %1353 = vmatpush.bf16.msrb.mxu1 %v9290_v22  ;;  %v9158_v16 = vor.u32 %v9926_v14, %v9157_v13  ;;  %v9073_v22 = vld [vmem:[%s10868_s29 + $0xb0] sm:$0xf]  ;;  %v11067_v28 = vor.u32 %v9890_v21, %v9009_v20  ;;  %v9920_v10 = vld [vmem:[%s17170_s1 + $0x28] sm:$0xf0]  ;;  %v9229_v13 = vld [vmem:[%s17170_s1 + $0xe0] sm:$0xf] }
  0x35   : > { %v11069_v29 = vor.u32 %v9906_v23, %v9073_v22  ;;  %v9134_v12 = vor.u32 %v9920_v10, %v9133_v7  ;;  %v9944_v14 = vld [vmem:[%s17170_s1 + $0xe8] sm:$0xf0]  ;;  %v9894_v17 = vld [vmem:[%s10868_s29 + $0x54] sm:$0xf0]  ;;  %v9089_v18 = vld [vmem:[%s10868_s29 + $0xd0] sm:$0xf] }
  0x36   : > { %1087 = vmatpush.bf16.msrb.mxu2 %v9178_v25  ;;  %v9011_v25 = vld [vmem:[%s10868_s29 + $0x38] sm:$0xf0]  ;;  %v9893_v20 = vld [vmem:[%s10868_s29 + $0x54] sm:$0xf]  ;;  %v9915_v32 = vld [vmem:[%s17170_s1 + $0x4] sm:$0xf] }
  0x37   : > { %1176 = vmatpush.bf16.msrb.mxu3 %v9274_v26  ;;  %1265 = vmatpush.bf16.msrb.mxu0 %v9182_v30  ;;  %v9905_v26 = vld [vmem:[%s10868_s29 + $0xb4] sm:$0xf]  ;;  %v11071_v30 = vor.u32 %v9889_v24, %v9011_v25  ;;  %v9027_v21 = vld [vmem:[%s10868_s29 + $0x58] sm:$0xf0]  ;;  %v9115_v33 = vld [vmem:[%s17170_s1 + $0xc] sm:$0xf0] }
  0x38   : > { %1354 = vmatpush.bf16.msrb.mxu1 %v9278_v31  ;;  %v11073_v31 = vor.u32 %v9905_v26, %v9075_v27  ;;  %v9909_v22 = vld [vmem:[%s10868_s29 + $0xd4] sm:$0xf]  ;;  %v9091_v23 = vld [vmem:[%s10868_s29 + $0xd8] sm:$0xf0]  ;;  %v11159_v26 = vor.u32 %v9893_v20, %v9027_v21  ;;  %v9939_v34 = vld [vmem:[%s17170_s1 + $0xc4] sm:$0xf] }
  0x39   : > { %v11161_v27 = vor.u32 %v9909_v22, %v9091_v23  ;;  %v9211_v36 = vld [vmem:[%s17170_s1 + $0xcc] sm:$0xf0]  ;;  %v9033_v38 = vld [vmem:[%s10868_s29 + $0x60] sm:$0xf]  ;;  %v9911_v48 = vld [vmem:[%s10868_s29 + $0xe4] sm:$0xf] }
  0x3a   : > { %1088 = vmatpush.bf16.msrb.mxu2 %v9166_v47  ;;  %v9242_v47 = vor.u32 %v9947_v46, %v9241_v45  ;;  %v9214_v37 = vor.u32 %v9939_v34, %v9211_v36  ;;  %v9912_v45 = vld [vmem:[%s10868_s29 + $0xe4] sm:$0xf0]  ;;  %v9895_v46 = vld [vmem:[%s10868_s29 + $0x64] sm:$0xf]  ;;  %v9099_v49 = vld [vmem:[%s10868_s29 + $0xe8] sm:$0xf0] }
  0x3b   : > { %1177 = vmatpush.bf16.msrb.mxu3 %v9262_v51  ;;  %1266 = vmatpush.bf16.msrb.mxu0 %v9170_v52  ;;  %v9908_v51 = vld [vmem:[%s10868_s29 + $0xc4] sm:$0xf0]  ;;  %v9891_v52 = vld [vmem:[%s10868_s29 + $0x44] sm:$0xf]  ;;  %v9941_v60 = vld [vmem:[%s17170_s1 + $0xd0] sm:$0xf0] }
  0x3c   : > { %1355 = vmatpush.bf16.msrb.mxu1 %v9266_v55  ;;  %v9083_v55 = vld [vmem:[%s10868_s29 + $0xc8] sm:$0xf0]  ;;  %v11113_v57 = vor.u32 %v9908_v51, %v9081_v50  ;;  %v11115_v58 = vor.u32 %v9891_v52, %v9019_v53  ;;  %v9121_v50 = vld [vmem:[%s17170_s1 + $0x8] sm:$0xf]  ;;  %v9917_v51 = vld [vmem:[%s17170_s1 + $0x10] sm:$0xf0] }
  0x3d   : > { %920 = vmatmul.bf16.gmra.mxu0 %v10979_v40  ;;  %960 = vmatmul.bf16.gmra.mxu2 %v10981_v41  ;;  %v11117_v59 = vor.u32 %v9907_v54, %v9083_v55  ;;  %v9217_v52 = vld [vmem:[%s17170_s1 + $0xc8] sm:$0xf]  ;;  %v9122_v55 = vor.u32 %v9917_v51, %v9121_v50  ;;  %v9898_v7 = vld [vmem:[%s10868_s29 + $0x74] sm:$0xf0]  ;;  %v9105_v10 = vld [vmem:[%s10868_s29 + $0xf0] sm:$0xf] }
  0x3e   : > { %1009 = vmatmul.bf16.gmra.mxu1 %v10983_v42  ;;  %1089 = vmatpush.bf16.msrb.mxu2 %v9154_v11  ;;  %v9226_v11 = vor.u32 %v9942_v62, %v9223_v6  ;;  %v11205_v62 = vor.u32 %v9911_v48, %v9099_v49  ;;  %v9041_v6 = vld [vmem:[%s10868_s29 + $0x70] sm:$0xf]  ;;  %v10704_v20 = vmov 2.0  }
  0x3f   : > { %1178 = vmatpush.bf16.msrb.mxu3 %v9250_v15  ;;  %1267 = vmatpush.bf16.msrb.mxu0 %v9158_v16  ;;  %v9230_v15 = vor.u32 %v9944_v14, %v9229_v13  ;;  %v9025_v16 = vld [vmem:[%s10868_s29 + $0x50] sm:$0xf]  ;;  %v9043_v13 = vld [vmem:[%s10868_s29 + $0x78] sm:$0xf0]  ;;  %v9913_v14 = vld [vmem:[%s10868_s29 + $0xf4] sm:$0xf]  ;;  %10117 = vrcp.f32 %v10704_v20 }
  0x40   : > { %1049 = vmatmul.bf16.gmra.mxu3 %v10985_v43  ;;  %1356 = vmatpush.bf16.msrb.mxu1 %v9254_v19  ;;  %v9910_v19 = vld [vmem:[%s10868_s29 + $0xd4] sm:$0xf0]  ;;  %v11155_v24 = vor.u32 %v9894_v17, %v9025_v16  ;;  %v11219_v16 = vor.u32 %v9898_v7, %v9041_v6 }
  0x41   : > { %v11157_v25 = vor.u32 %v9910_v19, %v9089_v18 }
  0x42   : > { %1090 = vmatpush.bf16.msrb.mxu2 %v9142_v35  ;;  %v9118_v35 = vor.u32 %v9915_v32, %v9115_v33 }
  0x43   : > { %1179 = vmatpush.bf16.msrb.mxu3 %v9238_v39  ;;  %1268 = vmatpush.bf16.msrb.mxu0 %v9146_v44  ;;  %v9896_v39 = vld [vmem:[%s10868_s29 + $0x64] sm:$0xf0]  ;;  %v9097_v44 = vld [vmem:[%s10868_s29 + $0xe0] sm:$0xf] }
  0x44   : > { %1357 = vmatpush.bf16.msrb.mxu1 %v9242_v47  ;;  %v9035_v47 = vld [vmem:[%s10868_s29 + $0x68] sm:$0xf0]  ;;  %v11196_v53 = vor.u32 %v9896_v39, %v9033_v38  ;;  %v11198_v54 = vor.u32 %v9912_v45, %v9097_v44 }
  0x45   : > { %v11203_v61 = vor.u32 %v9895_v46, %v9035_v47  ;;  %v10118_v21 = vpop.eup %10117 }
  0x46   : > { %1091 = vmatpush.bf16.msrb.mxu2 %v9130_v63  ;;  %v9218_v63 = vor.u32 %v9941_v60, %v9217_v52  ;;  %v1586_v22 = vmul.f32 2.0, %v10118_v21  ;;  %vm1590_vm0 = vweird.f32 %v10118_v21 }
  0x47   : > { %1180 = vmatpush.bf16.msrb.mxu3 %v9226_v11  ;;  %1269 = vmatpush.bf16.msrb.mxu0 %v9134_v12  ;;  %v9914_v11 = vld [vmem:[%s10868_s29 + $0xf4] sm:$0xf0]  ;;  %v9897_v12 = vld [vmem:[%s10868_s29 + $0x74] sm:$0xf] }
  0x48   : > { %1358 = vmatpush.bf16.msrb.mxu1 %v9230_v15  ;;  %v9107_v15 = vld [vmem:[%s10868_s29 + $0xf8] sm:$0xf0]  ;;  %v11221_v17 = vor.u32 %v9914_v11, %v9105_v10  ;;  %v11223_v18 = vor.u32 %v9897_v12, %v9043_v13  ;;  %v1587_v23 = vsub.f32 1.0, %v1586_v22 }
  0x49   : > { %v11225_v19 = vor.u32 %v9913_v14, %v9107_v15 }
  0x4a   : > { %1092 = vmatpush.bf16.msrb.mxu2 %v9118_v35  ;;  %v1588_v35 = vmul.f32 %v10118_v21, %v1587_v23 }
  0x4b   : > { %1181 = vmatpush.bf16.msrb.mxu3 %v9214_v37  ;;  %1270 = vmatpush.bf16.msrb.mxu0 %v9122_v55 }
  0x4c   : > { %1359 = vmatpush.bf16.msrb.mxu1 %v9218_v63  ;;  %v1589_v38 = vadd.f32 %v10118_v21, %v1588_v35 }
  0x4d   : > { %925 = vmatmul.bf16.gmra.mxu0 %v11023_v0  ;;  %965 = vmatmul.bf16.gmra.mxu2 %v11025_v1 }
  0x4e   : > { %1014 = vmatmul.bf16.gmra.mxu1 %v11027_v2  ;;  %v11235_v49 = vsel %vm1590_vm0, %v10118_v21, %v1589_v38 }
  0x50   : > { %1054 = vmatmul.bf16.gmra.mxu3 %v11029_v5 }
  0x5d   : > { %930 = vmatmul.bf16.gmra.mxu0 %v11067_v28  ;;  %970 = vmatmul.bf16.gmra.mxu2 %v11069_v29 }
  0x5e   : > { %1019 = vmatmul.bf16.gmra.mxu1 %v11071_v30 }
  0x60   : > { %1059 = vmatmul.bf16.gmra.mxu3 %v11073_v31 }
  0x6d   : > { %935 = vmatmul.bf16.gmra.mxu0 %v11111_v56  ;;  %975 = vmatmul.bf16.gmra.mxu2 %v11113_v57 }
  0x6e   : > { %1024 = vmatmul.bf16.gmra.mxu1 %v11115_v58 }
  0x70   : > { %1064 = vmatmul.bf16.gmra.mxu3 %v11117_v59 }
  0x7d   : > { %940 = vmatmul.bf16.gmra.mxu0 %v11155_v24  ;;  %980 = vmatmul.bf16.gmra.mxu2 %v11157_v25 }
  0x7e   : > { %1029 = vmatmul.bf16.gmra.mxu1 %v11159_v26 }
  0x80   : > { %1069 = vmatmul.bf16.gmra.mxu3 %v11161_v27 }
  0x8d   : > { %945 = vmatmul.bf16.gmra.mxu0 %v11196_v53  ;;  %985 = vmatmul.bf16.gmra.mxu2 %v11198_v54 }
  0x8e   : > { %1034 = vmatmul.bf16.gmra.mxu1 %v11203_v61 }
  0x90   : > { %1074 = vmatmul.bf16.gmra.mxu3 %v11205_v62 }
  0x9d   : > { %950 = vmatmul.bf16.gmra.mxu0 %v11219_v16  ;;  %990 = vmatmul.bf16.gmra.mxu2 %v11221_v17 }
  0x9e   : > { %1039 = vmatmul.bf16.gmra.mxu1 %v11223_v18 }
  0xa0   : > { %1079 = vmatmul.bf16.gmra.mxu3 %v11225_v19 }
  0xaa   : > { %v916_v32 = vpop.f32.mrf.mxu0 }
  0xab   : > { %v1005_v33 = vpop.f32.mrf.mxu1 }
  0xac   : > { %v1006_v34 = vadd.f32 %v1005_v33, %v916_v32 }
  0xad   : > { %1093 = vmatmul.bf16.vlgmr.msrb.gmra.mxu2 %v10914_v3  ;;  %1271 = vmatmul.bf16.vlgmr.msrb.gmra.mxu0 %v10914_v3 }
  0xae   : > { %1360 = vmatmul.bf16.vlgmr.msrb.gmra.mxu1 %v10927_v8  ;;  %v1441_v39 = vmax.f32 %v1006_v34, 0.0 }
  0xb0   : > { %1182 = vmatmul.bf16.vlgmr.msrb.gmra.mxu3 %v10927_v8  ;;  %v956_v36 = vpop.f32.mrf.mxu2 }
  0xb2   : > { %v918_v45 = vpop.f32.mrf.mxu0 }
  0xb3   : > { %v1045_v37 = vpop.f32.mrf.mxu3  ;;  %v1007_v46 = vpop.f32.mrf.mxu1 }
  0xb4   : > { %v1046_v44 = vadd.f32 %v1045_v37, %v956_v36  ;;  %v1008_v48 = vadd.f32 %v1007_v46, %v918_v45 }
  0xb6   : > { %v1489_v47 = vmax.f32 %v1046_v44, 0.0  ;;  %v1444_v60 = vmax.f32 %v1008_v48, 0.0 }
  0xb8   : > { %v1537_v50 = vadd.f32 %v1489_v47, %v1441_v39  ;;  %v958_v51 = vpop.f32.mrf.mxu2 }
  0xba   : > { %v1592_v3 = vmul.f32 %v11235_v49, %v1537_v50  ;;  %v921_v6 = vpop.f32.mrf.mxu0 }
  0xbb   : > { %v1047_v52 = vpop.f32.mrf.mxu3  ;;  %v1010_v7 = vpop.f32.mrf.mxu1 }
  0xbc   : > { %v11238_v55 = vsub.f32 %v1441_v39, %v1592_v3  ;;  %v11240_v8 = vsub.f32 %v1489_v47, %v1592_v3  ;;  %v1048_v63 = vadd.f32 %v1047_v52, %v958_v51  ;;  %v1011_v13 = vadd.f32 %v1010_v7, %v921_v6 }
  0xbd   : > { %1098 = vmatmul.bf16.gmra.mxu2 %v10979_v40  ;;  %1276 = vmatmul.bf16.gmra.mxu0 %v10979_v40 }
  0xbe   : > { %v1736_v10 = vmul.f32 %v11238_v55, %v11238_v55  ;;  %v1784_v11 = vmul.f32 %v11240_v8, %v11240_v8  ;;  %v1492_v12 = vmax.f32 %v1048_v63, 0.0  ;;  %1365 = vmatmul.bf16.gmra.mxu1 %v10983_v42  ;;  %v1447_v40 = vmax.f32 %v1011_v13, 0.0 }
  0xc0   : > { %v1832_v14 = vadd.f32 %v1784_v11, %v1736_v10  ;;  %v1540_v15 = vadd.f32 %v1492_v12, %v1444_v60  ;;  %1187 = vmatmul.bf16.gmra.mxu3 %v10983_v42  ;;  %v961_v22 = vpop.f32.mrf.mxu2 }
  0xc2   : > { %v1880_v20 = vmul.f32 %v1832_v14, %v11235_v49  ;;  %v1595_v21 = vmul.f32 %v11235_v49, %v1540_v15  ;;  %v923_v36 = vpop.f32.mrf.mxu0 }
  0xc3   : > { %v1050_v23 = vpop.f32.mrf.mxu3  ;;  %v1012_v37 = vpop.f32.mrf.mxu1 }
  0xc4   : > { %v1928_v32 = vadd.f32 1e-05, %v1880_v20  ;;  %v11252_v33 = vsub.f32 %v1444_v60, %v1595_v21  ;;  %v11254_v34 = vsub.f32 %v1492_v12, %v1595_v21  ;;  %v1051_v35 = vadd.f32 %v1050_v23, %v961_v22 }
  0xc5   : > { %v1013_v44 = vadd.f32 %v1012_v37, %v923_v36 }
  0xc6   : > { %10119 = vrsqrt.f32 %v1928_v32  ;;  %v1739_v38 = vmul.f32 %v11252_v33, %v11252_v33  ;;  %v1787_v42 = vmul.f32 %v11254_v34, %v11254_v34  ;;  %v1495_v39 = vmax.f32 %v1051_v35, 0.0 }
  0xc7   : > { %v1450_v60 = vmax.f32 %v1013_v44, 0.0  ;;  %vm1982_vm2 = vweird.f32 %v1928_v32 }
  0xc8   : > { %v1835_v45 = vadd.f32 %v1787_v42, %v1739_v38  ;;  %v1543_v46 = vadd.f32 %v1495_v39, %v1447_v40  ;;  %v963_v48 = vpop.f32.mrf.mxu2 }
  0xca   : > { %v1883_v47 = vmul.f32 %v1835_v45, %v11235_v49  ;;  %v1598_v50 = vmul.f32 %v11235_v49, %v1543_v46  ;;  %v926_v6 = vpop.f32.mrf.mxu0 }
  0xcb   : > { %v1052_v3 = vpop.f32.mrf.mxu3  ;;  %v1015_v12 = vpop.f32.mrf.mxu1 }
  0xcc   : > { %v10120_v51 = vpop.eup %10119  ;;  %v11262_v52 = vadd.f32 1e-05, %v1883_v47  ;;  %v1053_v63 = vadd.f32 %v1052_v3, %v963_v48  ;;  %v11264_v10 = vsub.f32 %v1447_v40, %v1598_v50  ;;  %v11266_v11 = vsub.f32 %v1495_v39, %v1598_v50 }
  0xcd   : > { %v1977_v7 = vmul.f32 %v10120_v51, %v1928_v32  ;;  %v1016_v14 = vadd.f32 %v1015_v12, %v926_v6  ;;  %1103 = vmatmul.bf16.gmra.mxu2 %v11023_v0  ;;  %1281 = vmatmul.bf16.gmra.mxu0 %v11023_v0  ;;  %vm1983_vm1 = vweird.f32 %v10120_v51 }
  0xce   : > { %10121 = vrsqrt.f32 %v11262_v52  ;;  %v1498_v13 = vmax.f32 %v1053_v63, 0.0  ;;  %v1742_v20 = vmul.f32 %v11264_v10, %v11264_v10  ;;  %v1790_v21 = vmul.f32 %v11266_v11, %v11266_v11  ;;  %1370 = vmatmul.bf16.gmra.mxu1 %v11027_v2  ;;  %vm1984_vm3 = vmor %vm1982_vm2, %vm1983_vm1 }
  0xcf   : > { %v1978_v15 = vmul.f32 %v10120_v51, %v1977_v7  ;;  %v1453_v45 = vmax.f32 %v1016_v14, 0.0  ;;  %vm2012_vm5 = vweird.f32 %v11262_v52 }
  0xd0   : > { %v1546_v22 = vadd.f32 %v1498_v13, %v1450_v60  ;;  %1192 = vmatmul.bf16.gmra.mxu3 %v11027_v2  ;;  %v1838_v35 = vadd.f32 %v1790_v21, %v1742_v20  ;;  %v966_v40 = vpop.f32.mrf.mxu2 }
  0xd1   : > { %v1979_v23 = vmul.f32 0.5, %v1978_v15 }
  0xd2   : > { %v1601_v36 = vmul.f32 %v11235_v49, %v1546_v22  ;;  %v1886_v38 = vmul.f32 %v1838_v35, %v11235_v49  ;;  %v928_v46 = vpop.f32.mrf.mxu0 }
  0xd3   : > { %v1980_v37 = vsub.f32 1.5, %v1979_v23  ;;  %v1055_v42 = vpop.f32.mrf.mxu3  ;;  %v1017_v3 = vpop.f32.mrf.mxu1 }
  0xd4   : > { %v10122_v39 = vpop.eup %10121  ;;  %v11279_v44 = vsub.f32 %v1498_v13, %v1601_v36  ;;  %v1056_v0 = vadd.f32 %v1055_v42, %v966_v40  ;;  %v11281_v47 = vsub.f32 %v1450_v60, %v1601_v36  ;;  %v11284_v50 = vadd.f32 1e-05, %v1886_v38 }
  0xd5   : > { %v1981_v48 = vmul.f32 %v10120_v51, %v1980_v37  ;;  %v2007_v2 = vmul.f32 %v10122_v39, %v11262_v52  ;;  %v1018_v7 = vadd.f32 %v1017_v3, %v928_v46  ;;  %vm2013_vm4 = vweird.f32 %v10122_v39 }
  0xd6   : > { %v1793_v63 = vmul.f32 %v11279_v44, %v11279_v44  ;;  %v1501_v6 = vmax.f32 %v1056_v0, 0.0  ;;  %v1745_v12 = vmul.f32 %v11281_v47, %v11281_v47  ;;  %10123 = vrsqrt.f32 %v11284_v50  ;;  %vm2014_vm6 = vmor %vm2012_vm5, %vm2013_vm4 }
  0xd7   : > { %v1985_v13 = vsel %vm1984_vm3, %v10120_v51, %v1981_v48  ;;  %v2008_v14 = vmul.f32 %v10122_v39, %v2007_v2  ;;  %v1456_v0 = vmax.f32 %v1018_v7, 0.0  ;;  %vm2042_vm8 = vweird.f32 %v11284_v50 }
  0xd8   : > { %v11292_v32 = vmul.f32 %v1985_v13, %v11238_v55  ;;  %v11295_v60 = vmul.f32 %v1985_v13, %v11240_v8  ;;  %v1549_v15 = vadd.f32 %v1501_v6, %v1453_v45  ;;  %v1841_v21 = vadd.f32 %v1793_v63, %v1745_v12  ;;  %v968_v23 = vpop.f32.mrf.mxu2 }
  0xd9   : > { %v2009_v20 = vmul.f32 0.5, %v2008_v14 }
  0xda   : > { %17286 = vst [vmem:[#allocation2_spill] sm:$0xff] %v11295_v60  ;;  %v1604_v22 = vmul.f32 %v11235_v49, %v1549_v15  ;;  %v1889_v51 = vmul.f32 %v1841_v21, %v11235_v49  ;;  %v931_v38 = vpop.f32.mrf.mxu0 }
  0xdb   : > { %v2010_v35 = vsub.f32 1.5, %v2009_v20  ;;  %v1057_v36 = vpop.f32.mrf.mxu3  ;;  %v1020_v46 = vpop.f32.mrf.mxu1 }
  0xdc   : > { %v11299_v40 = vsub.f32 %v1453_v45, %v1604_v22  ;;  %v11301_v37 = vsub.f32 %v1501_v6, %v1604_v22  ;;  %v1058_v55 = vadd.f32 %v1057_v36, %v968_v23  ;;  %v10124_v42 = vpop.eup %10123  ;;  %v11304_v48 = vadd.f32 1e-05, %v1889_v51 }
  0xdd   : > { %v2011_v8 = vmul.f32 %v10122_v39, %v2010_v35  ;;  %v2037_v2 = vmul.f32 %v10124_v42, %v11284_v50  ;;  %v1021_v12 = vadd.f32 %v1020_v46, %v931_v38  ;;  %1108 = vmatmul.bf16.gmra.mxu2 %v11067_v28  ;;  %1286 = vmatmul.bf16.gmra.mxu0 %v11067_v28  ;;  %vm2043_vm7 = vweird.f32 %v10124_v42  ;;  %v9978_v50 = vld [vmem:[%s17171_s2 + $0x78] sm:$0xff] }
  0xde   : > { %v1748_v3 = vmul.f32 %v11299_v40, %v11299_v40  ;;  %v1796_v45 = vmul.f32 %v11301_v37, %v11301_v37  ;;  %v1504_v6 = vmax.f32 %v1058_v55, 0.0  ;;  %10125 = vrsqrt.f32 %v11304_v48  ;;  %1375 = vmatmul.bf16.gmra.mxu1 %v11071_v30  ;;  %vm2044_vm9 = vmor %vm2042_vm8, %vm2043_vm7  ;;  %2881 = vmatpush.bf16.msra.mxu3 %v9978_v50 }
  0xdf   : > { %v11311_v63 = vsel %vm2014_vm6, %v10122_v39, %v2011_v8  ;;  %v2038_v7 = vmul.f32 %v10124_v42, %v2037_v2  ;;  %v1459_v35 = vmax.f32 %v1021_v12, 0.0  ;;  %vm2072_vm11 = vweird.f32 %v11304_v48 }
  0xe0   : > { %v11318_v52 = vmul.f32 %v11311_v63, %v11252_v33  ;;  %v1844_v13 = vadd.f32 %v1796_v45, %v1748_v3  ;;  %1197 = vmatmul.bf16.gmra.mxu3 %v11071_v30  ;;  %v1552_v39 = vadd.f32 %v1504_v6, %v1456_v0  ;;  %v971_v20 = vpop.f32.mrf.mxu2 }
  0xe1   : > { %v2039_v14 = vmul.f32 0.5, %v2038_v7 }
  0xe2   : > { %v1892_v15 = vmul.f32 %v1844_v13, %v11235_v49  ;;  %v1607_v21 = vmul.f32 %v11235_v49, %v1552_v39  ;;  %v933_v51 = vpop.f32.mrf.mxu0  ;;  %v9986_v13 = vld [vmem:[%s17171_s2 + $0xb8] sm:$0xff] }
  0xe3   : > { %v1060_v22 = vpop.f32.mrf.mxu3  ;;  %v2040_v33 = vsub.f32 1.5, %v2039_v14  ;;  %v1022_v38 = vpop.f32.mrf.mxu1  ;;  %2970 = vmatpush.bf16.msra.mxu0 %v9986_v13 }
  0xe4   : > { %v11326_v23 = vadd.f32 1e-05, %v1892_v15  ;;  %v1061_v36 = vadd.f32 %v1060_v22, %v971_v20  ;;  %v10126_v55 = vpop.eup %10125  ;;  %v11328_v30 = vsub.f32 %v1504_v6, %v1607_v21  ;;  %v11330_v8 = vsub.f32 %v1456_v0, %v1607_v21  ;;  %v9970_v0 = vld [vmem:[%s17171_s2 + $0x38] sm:$0xff] }
  0xe5   : > { %v2041_v46 = vmul.f32 %v10124_v42, %v2040_v33  ;;  %v11337_v45 = vadd.f32 %v1022_v38, %v933_v51  ;;  %v2067_v12 = vmul.f32 %v10126_v55, %v11304_v48  ;;  %2792 = vmatpush.bf16.msra.mxu2 %v9970_v0  ;;  %vm2073_vm10 = vweird.f32 %v10126_v55 }
  0xe6   : > { %10127 = vrsqrt.f32 %v11326_v23  ;;  %v1507_v2 = vmax.f32 %v1061_v36, 0.0  ;;  %v1799_v3 = vmul.f32 %v11328_v30, %v11328_v30  ;;  %v1751_v39 = vmul.f32 %v11330_v8, %v11330_v8  ;;  %vm2074_vm12 = vmor %vm2072_vm11, %vm2073_vm10 }
  0xe7   : > { %v2045_v6 = vsel %vm2044_vm9, %v10124_v42, %v2041_v46  ;;  %v2068_v42 = vmul.f32 %v10126_v55, %v2067_v12  ;;  %v1462_v33 = vmax.f32 %v11337_v45, 0.0  ;;  %vm2102_vm14 = vweird.f32 %v11326_v23 }
  0xe8   : > { %v1555_v7 = vadd.f32 %v1507_v2, %v1459_v35  ;;  %v11352_v14 = vmul.f32 %v2045_v6, %v11266_v11  ;;  %v11355_v15 = vmul.f32 %v2045_v6, %v11264_v10  ;;  %v973_v21 = vpop.f32.mrf.mxu2  ;;  %v1847_v22 = vadd.f32 %v1799_v3, %v1751_v39 }
  0xe9   : > { %v2069_v51 = vmul.f32 0.5, %v2068_v42 }
  0xea   : > { %17287 = vst [vmem:[#allocation3_spill] sm:$0xff] %v11352_v14  ;;  %v1610_v20 = vmul.f32 %v11235_v49, %v1555_v7  ;;  %v936_v28 = vpop.f32.mrf.mxu0  ;;  %v1895_v10 = vmul.f32 %v1847_v22, %v11235_v49 }
  0xeb   : > { %v1062_v36 = vpop.f32.mrf.mxu3  ;;  %v1025_v7 = vpop.f32.mrf.mxu1  ;;  %v2070_v0 = vsub.f32 1.5, %v2069_v51 }
  0xec   : > { %v10128_v38 = vpop.eup %10127  ;;  %v11359_v46 = vsub.f32 %v1459_v35, %v1610_v20  ;;  %v11361_v11 = vsub.f32 %v1507_v2, %v1610_v20  ;;  %v1063_v12 = vadd.f32 %v1062_v36, %v973_v21  ;;  %v1026_v35 = vadd.f32 %v1025_v7, %v936_v28 }
  0xed   : > { %v2097_v6 = vmul.f32 %v10128_v38, %v11326_v23  ;;  %1113 = vmatmul.bf16.gmra.mxu2 %v11111_v56  ;;  %1291 = vmatmul.bf16.gmra.mxu0 %v11111_v56  ;;  %v2071_v2 = vmul.f32 %v10126_v55, %v2070_v0  ;;  %v11372_v39 = vadd.f32 1e-05, %v1895_v10  ;;  %vm2103_vm13 = vweird.f32 %v10128_v38 }
  0xee   : > { %v1754_v3 = vmul.f32 %v11359_v46, %v11359_v46  ;;  %v1802_v45 = vmul.f32 %v11361_v11, %v11361_v11  ;;  %v1510_v50 = vmax.f32 %v1063_v12, 0.0  ;;  %1380 = vmatmul.bf16.gmra.mxu1 %v11115_v58  ;;  %v1465_v12 = vmax.f32 %v1026_v35, 0.0  ;;  %vm2104_vm15 = vmor %vm2102_vm14, %vm2103_vm13 }
  0xef   : > { %v2098_v13 = vmul.f32 %v10128_v38, %v2097_v6  ;;  %v11377_v28 = vsel %vm2074_vm12, %v10126_v55, %v2071_v2  ;;  %10129 = vrsqrt.f32 %v11372_v39  ;;  %vm2132_vm1 = vweird.f32 %v11372_v39 }
  0xf0   : > { %v1850_v42 = vadd.f32 %v1802_v45, %v1754_v3  ;;  %v1558_v20 = vadd.f32 %v1510_v50, %v1462_v33  ;;  %1202 = vmatmul.bf16.gmra.mxu3 %v11115_v58  ;;  %v976_v48 = vpop.f32.mrf.mxu2  ;;  %v11384_v36 = vmul.f32 %v11377_v28, %v11281_v47 }
  0xf1   : > { %v2099_v21 = vmul.f32 0.5, %v2098_v13 }
  0xf2   : > { %v1898_v56 = vmul.f32 %v1850_v42, %v11235_v49  ;;  %v1613_v22 = vmul.f32 %v11235_v49, %v1558_v20  ;;  %v938_v7 = vpop.f32.mrf.mxu0 }
  0xf3   : > { %v2100_v51 = vsub.f32 1.5, %v2099_v21  ;;  %v1065_v58 = vpop.f32.mrf.mxu3  ;;  %v1027_v45 = vpop.f32.mrf.mxu1 }
  0xf4   : > { %v11386_v10 = vadd.f32 1e-05, %v1898_v56  ;;  %v11388_v6 = vsub.f32 %v1510_v50, %v1613_v22  ;;  %v1066_v55 = vadd.f32 %v1065_v58, %v976_v48  ;;  %v11393_v13 = vsub.f32 %v1462_v33, %v1613_v22 }
  0xf5   : > { %v2101_v3 = vmul.f32 %v10128_v38, %v2100_v51  ;;  %v10130_v50 = vpop.eup %10129  ;;  %v1028_v42 = vadd.f32 %v1027_v45, %v938_v7  ;;  %v11409_v48 = vmul.f32 %v11311_v63, %v11254_v34 }
  0xf6   : > { %10131 = vrsqrt.f32 %v11386_v10  ;;  %v1805_v47 = vmul.f32 %v11388_v6, %v11388_v6  ;;  %v1513_v35 = vmax.f32 %v1066_v55, 0.0  ;;  %v1757_v20 = vmul.f32 %v11393_v13, %v11393_v13 }
  0xf7   : > { %v2105_v2 = vsel %vm2104_vm15, %v10128_v38, %v2101_v3  ;;  %v2127_v33 = vmul.f32 %v10130_v50, %v11372_v39  ;;  %17289 = vst [vmem:[#allocation5_spill] sm:$0xff] %v11409_v48  ;;  %v1468_v55 = vmax.f32 %v1028_v42, 0.0  ;;  %vm2133_vm0 = vweird.f32 %v10130_v50 }
  0xf8   : > { %v11401_v21 = vmul.f32 %v2105_v2, %v11301_v37  ;;  %v1561_v23 = vadd.f32 %v1513_v35, %v1465_v12  ;;  %v11405_v56 = vmul.f32 %v2105_v2, %v11299_v40  ;;  %v1853_v22 = vadd.f32 %v1805_v47, %v1757_v20  ;;  %v978_v51 = vpop.f32.mrf.mxu2  ;;  %vm2134_vm2 = vmor %vm2132_vm1, %vm2133_vm0 }
  0xf9   : > { %v2128_v58 = vmul.f32 %v10130_v50, %v2127_v33  ;;  %vm2162_vm4 = vweird.f32 %v11386_v10 }
  0xfa   : > { %17288 = vst [vmem:[#allocation4_spill] sm:$0xff] %v11401_v21  ;;  %v1616_v38 = vmul.f32 %v11235_v49, %v1561_v23  ;;  %v1901_v37 = vmul.f32 %v1853_v22, %v11235_v49  ;;  %v941_v2 = vpop.f32.mrf.mxu0 }
  0xfb   : > { %v1067_v7 = vpop.f32.mrf.mxu3  ;;  %v2129_v34 = vmul.f32 0.5, %v2128_v58  ;;  %v1030_v20 = vpop.f32.mrf.mxu1 }
  0xfc   : > { %v10132_v45 = vpop.eup %10131  ;;  %v11415_v0 = vsub.f32 %v1465_v12, %v1616_v38  ;;  %v11417_v40 = vsub.f32 %v1513_v35, %v1616_v38  ;;  %v1068_v47 = vadd.f32 %v1067_v7, %v978_v51  ;;  %v11420_v23 = vadd.f32 1e-05, %v1901_v37 }
  0xfd   : > { %v2157_v63 = vmul.f32 %v10132_v45, %v11386_v10  ;;  %v1031_v3 = vadd.f32 %v1030_v20, %v941_v2  ;;  %1118 = vmatmul.bf16.gmra.mxu2 %v11155_v24  ;;  %1296 = vmatmul.bf16.gmra.mxu0 %v11155_v24  ;;  %v2130_v35 = vsub.f32 1.5, %v2129_v34  ;;  %vm2163_vm3 = vweird.f32 %v10132_v45 }
  0xfe   : > { %v1760_v42 = vmul.f32 %v11415_v0, %v11415_v0  ;;  %v1808_v33 = vmul.f32 %v11417_v40, %v11417_v40  ;;  %v1516_v22 = vmax.f32 %v1068_v47, 0.0  ;;  %10133 = vrsqrt.f32 %v11420_v23  ;;  %1385 = vmatmul.bf16.gmra.mxu1 %v11159_v26  ;;  %vm2164_vm5 = vmor %vm2162_vm4, %vm2163_vm3 }
  0xff   : > { %v2158_v12 = vmul.f32 %v10132_v45, %v2157_v63  ;;  %v2131_v7 = vmul.f32 %v10130_v50, %v2130_v35  ;;  %v1471_v34 = vmax.f32 %v1031_v3, 0.0  ;;  %vm2192_vm7 = vweird.f32 %v11420_v23 }
 0x100   : > { %v1856_v38 = vadd.f32 %v1808_v33, %v1760_v42  ;;  %v1564_v51 = vadd.f32 %v1516_v22, %v1468_v55  ;;  %1207 = vmatmul.bf16.gmra.mxu3 %v11159_v26  ;;  %v981_v2 = vpop.f32.mrf.mxu2 }
 0x101   : > { %v2159_v58 = vmul.f32 0.5, %v2158_v12  ;;  %v11434_v20 = vsel %vm2134_vm2, %v10130_v50, %v2131_v7 }
 0x102   : > { %v1904_v37 = vmul.f32 %v1856_v38, %v11235_v49  ;;  %v1619_v47 = vmul.f32 %v11235_v49, %v1564_v51  ;;  %v943_v12 = vpop.f32.mrf.mxu0  ;;  %v11442_v39 = vmul.f32 %v11434_v20, %v11330_v8 }
 0x103   : > { %v2160_v24 = vsub.f32 1.5, %v2159_v58  ;;  %v1070_v63 = vpop.f32.mrf.mxu3  ;;  %v1032_v51 = vpop.f32.mrf.mxu1 }
 0x104   : > { %v11436_v42 = vadd.f32 1e-05, %v1904_v37  ;;  %v11438_v33 = vsub.f32 %v1516_v22, %v1619_v47  ;;  %v1071_v26 = vadd.f32 %v1070_v63, %v981_v2  ;;  %v10134_v35 = vpop.eup %10133  ;;  %v11445_v58 = vsub.f32 %v1468_v55, %v1619_v47  ;;  %v9969_v47 = vld [vmem:[%s17171_s2 + $0x30] sm:$0xff] }
 0x105   : > { %v2161_v38 = vmul.f32 %v10132_v45, %v2160_v24  ;;  %v11450_v7 = vadd.f32 %v1032_v51, %v943_v12  ;;  %v2187_v37 = vmul.f32 %v10134_v35, %v11420_v23  ;;  %v9977_v2 = vld [vmem:[%s17171_s2 + $0x70] sm:$0xff]  ;;  %2793 = vmatpush.bf16.msra.mxu2 %v9969_v47  ;;  %vm2193_vm6 = vweird.f32 %v10134_v35 }
 0x106   : > { %17290 = vst [vmem:[#allocation6_spill] sm:$0xff] %v11438_v33  ;;  %10135 = vrsqrt.f32 %v11436_v42  ;;  %v1811_v50 = vmul.f32 %v11438_v33, %v11438_v33  ;;  %v1519_v3 = vmax.f32 %v1071_v26, 0.0  ;;  %v11474_v26 = vmul.f32 %v11377_v28, %v11279_v44  ;;  %2882 = vmatpush.bf16.msra.mxu3 %v9977_v2  ;;  %vm2194_vm8 = vmor %vm2192_vm7, %vm2193_vm6 }
 0x107   : > { %v2165_v22 = vsel %vm2164_vm5, %v10132_v45, %v2161_v38  ;;  %v9985_v45 = vld [vmem:[%s17171_s2 + $0xb0] sm:$0xff]  ;;  %v2188_v63 = vmul.f32 %v10134_v35, %v2187_v37  ;;  %v17183_v44 = vmax.f32 %v11450_v7, 0.0  ;;  %vm2222_vm10 = vweird.f32 %v11436_v42 }
 0x108   : > { %v11456_v10 = vmul.f32 %v2165_v22, %v11361_v11  ;;  %v1567_v55 = vadd.f32 %v1519_v3, %v1471_v34  ;;  %v11468_v24 = vmul.f32 %v2165_v22, %v11359_v46  ;;  %v1763_v11 = vmul.f32 %v11445_v58, %v11445_v58  ;;  %17293 = vst [vmem:[#allocation9_spill] sm:$0xff] %v11474_v26  ;;  %v983_v38 = vpop.f32.mrf.mxu2 }
 0x109   : > { %2971 = vmatpush.bf16.msra.mxu0 %v9985_v45  ;;  %v2189_v8 = vmul.f32 0.5, %v2188_v63 }
 0x10a   : > { %17291 = vst [vmem:[#allocation7_spill] sm:$0xff] %v11456_v10  ;;  %v1622_v12 = vmul.f32 %v11235_v49, %v1567_v55  ;;  %v1859_v33 = vadd.f32 %v1811_v50, %v1763_v11  ;;  %v946_v60 = vpop.f32.mrf.mxu0 }
 0x10b   : > { %17292 = vst [vmem:[#allocation8_spill] sm:$0xff] %v11468_v24  ;;  %v1072_v51 = vpop.f32.mrf.mxu3  ;;  %v1035_v47 = vpop.f32.mrf.mxu1  ;;  %v2190_v2 = vsub.f32 1.5, %v2189_v8 }
 0x10c   : > { %v10136_v22 = vpop.eup %10135  ;;  %v11479_v37 = vsub.f32 %v1471_v34, %v1622_v12  ;;  %v11481_v10 = vsub.f32 %v1519_v3, %v1622_v12  ;;  %v1073_v28 = vadd.f32 %v1072_v51, %v983_v38  ;;  %v1907_v45 = vmul.f32 %v1859_v33, %v11235_v49 }
 0x10d   : > { %v2217_v55 = vmul.f32 %v10136_v22, %v11436_v42  ;;  %v1036_v3 = vadd.f32 %v1035_v47, %v946_v60  ;;  %1123 = vmatmul.bf16.gmra.mxu2 %v11196_v53  ;;  %1301 = vmatmul.bf16.gmra.mxu0 %v11196_v53  ;;  %v2191_v12 = vmul.f32 %v10134_v35, %v2190_v2  ;;  %vm2223_vm9 = vweird.f32 %v10136_v22 }
 0x10e   : > { %v1766_v50 = vmul.f32 %v11479_v37, %v11479_v37  ;;  %v1814_v34 = vmul.f32 %v11481_v10, %v11481_v10  ;;  %v1522_v63 = vmax.f32 %v1073_v28, 0.0  ;;  %v11493_v8 = vadd.f32 1e-05, %v1907_v45  ;;  %1390 = vmatmul.bf16.gmra.mxu1 %v11203_v61  ;;  %vm2224_vm11 = vmor %vm2222_vm10, %vm2223_vm9 }
 0x10f   : > { %v2218_v11 = vmul.f32 %v10136_v22, %v2217_v55  ;;  %v11500_v51 = vsel %vm2194_vm8, %v10134_v35, %v2191_v12  ;;  %v1477_v2 = vmax.f32 %v1036_v3, 0.0  ;;  %v11528_v42 = vmul.f32 %v11434_v20, %v11328_v30 }
 0x110   : > { %v1862_v38 = vadd.f32 %v1814_v34, %v1766_v50  ;;  %v1570_v33 = vadd.f32 %v1522_v63, %v17183_v44  ;;  %1212 = vmatmul.bf16.gmra.mxu3 %v11203_v61  ;;  %10137 = vrsqrt.f32 %v11493_v8  ;;  %v986_v28 = vpop.f32.mrf.mxu2  ;;  %v11507_v55 = vmul.f32 %v11500_v51, %v11393_v13 }
 0x111   : > { %v2219_v60 = vmul.f32 0.5, %v2218_v11  ;;  %17298 = vst [vmem:[#allocation14_spill] sm:$0xff] %v11528_v42  ;;  %vm2252_vm13 = vweird.f32 %v11493_v8 }
 0x112   : > { %v1910_v53 = vmul.f32 %v1862_v38, %v11235_v49  ;;  %v1625_v23 = vmul.f32 %v11235_v49, %v1570_v33  ;;  %17294 = vst [vmem:[#allocation10_spill] sm:$0xff] %v11507_v55  ;;  %v948_v34 = vpop.f32.mrf.mxu0 }
 0x113   : > { %v2220_v47 = vsub.f32 1.5, %v2219_v60  ;;  %v1075_v61 = vpop.f32.mrf.mxu3  ;;  %v1037_v38 = vpop.f32.mrf.mxu1 }
 0x114   : > { %v11509_v45 = vadd.f32 1e-05, %v1910_v53  ;;  %v11511_v50 = vsub.f32 %v1522_v63, %v1625_v23  ;;  %v1076_v35 = vadd.f32 %v1075_v61, %v986_v28  ;;  %v11517_v60 = vadd.f32 %v1037_v38, %v948_v34 }
 0x115   : > { %v2221_v12 = vmul.f32 %v10136_v22, %v2220_v47 }
 0x116   : > { %17295 = vst [vmem:[#allocation11_spill] sm:$0xff] %v11511_v50  ;;  %10139 = vrsqrt.f32 %v11509_v45  ;;  %v1525_v13 = vmax.f32 %v1076_v35, 0.0  ;;  %v10138_v33 = vpop.eup %10137  ;;  %v1817_v20 = vmul.f32 %v11511_v50, %v11511_v50  ;;  %vm2282_vm0 = vweird.f32 %v11509_v45 }
 0x117   : > { %v2225_v3 = vsel %vm2224_vm11, %v10136_v22, %v2221_v12  ;;  %v2247_v28 = vmul.f32 %v10138_v33, %v11493_v8  ;;  %vm2253_vm12 = vweird.f32 %v10138_v33 }
 0x118   : > { %v11520_v63 = vmul.f32 %v2225_v3, %v11417_v40  ;;  %v1573_v53 = vadd.f32 %v1525_v13, %v1477_v2  ;;  %v11524_v61 = vmul.f32 %v2225_v3, %v11415_v0  ;;  %v988_v35 = vpop.f32.mrf.mxu2  ;;  %vm2254_vm15 = vmor %vm2252_vm13, %vm2253_vm12 }
 0x119   : > { %v2248_v46 = vmul.f32 %v10138_v33, %v2247_v28  ;;  %v17299_v28 = vmax.f32 %v11450_v7, 0.0 }
 0x11a   : > { %17296 = vst [vmem:[#allocation12_spill] sm:$0xff] %v11520_v63  ;;  %v1628_v47 = vmul.f32 %v11235_v49, %v1573_v53  ;;  %v951_v3 = vpop.f32.mrf.mxu0 }
 0x11b   : > { %17297 = vst [vmem:[#allocation13_spill] sm:$0xff] %v11524_v61  ;;  %v1077_v34 = vpop.f32.mrf.mxu3  ;;  %v2249_v44 = vmul.f32 0.5, %v2248_v46  ;;  %v1040_v53 = vpop.f32.mrf.mxu1  ;;  %v11543_v22 = vsub.f32 %v17299_v28, %v1625_v23 }
 0x11c   : > { %v10140_v12 = vpop.eup %10139  ;;  %v11534_v38 = vsub.f32 %v1477_v2, %v1628_v47  ;;  %v11536_v11 = vsub.f32 %v1525_v13, %v1628_v47  ;;  %v1078_v0 = vadd.f32 %v1077_v34, %v988_v35  ;;  %v1041_v47 = vadd.f32 %v1040_v53, %v951_v3 }
 0x11d   : > { %v2277_v30 = vmul.f32 %v10140_v12, %v11509_v45  ;;  %1128 = vmatmul.bf16.gmra.mxu2 %v11219_v16  ;;  %1306 = vmatmul.bf16.gmra.mxu0 %v11219_v16  ;;  %v2250_v46 = vsub.f32 1.5, %v2249_v44  ;;  %v1769_v7 = vmul.f32 %v11543_v22, %v11543_v22  ;;  %v17300_v34 = vmax.f32 %v11517_v60, 0.0 }
 0x11e   : > { %v1772_v40 = vmul.f32 %v11534_v38, %v11534_v38  ;;  %v1820_v2 = vmul.f32 %v11536_v11, %v11536_v11  ;;  %v1528_v13 = vmax.f32 %v1078_v0, 0.0  ;;  %1395 = vmatmul.bf16.gmra.mxu1 %v11223_v18  ;;  %vm2283_vm14 = vweird.f32 %v10140_v12 }
 0x11f   : > { %v2278_v35 = vmul.f32 %v10140_v12, %v2277_v30  ;;  %v2251_v3 = vmul.f32 %v10138_v33, %v2250_v46  ;;  %v1865_v30 = vadd.f32 %v1817_v20, %v1769_v7  ;;  %vm2284_vm1 = vmor %vm2282_vm0, %vm2283_vm14 }
 0x120   : > { %v1868_v23 = vadd.f32 %v1820_v2, %v1772_v40  ;;  %v1576_v28 = vadd.f32 %v1528_v13, %v17300_v34  ;;  %1217 = vmatmul.bf16.gmra.mxu3 %v11223_v18  ;;  %v991_v53 = vpop.f32.mrf.mxu2  ;;  %v1483_v2 = vmax.f32 %v1041_v47, 0.0 }
 0x121   : > { %v2279_v0 = vmul.f32 0.5, %v2278_v35  ;;  %v11562_v50 = vsel %vm2254_vm15, %v10138_v33, %v2251_v3  ;;  %v1913_v18 = vmul.f32 %v1865_v30, %v11235_v49  ;;  %v9968_v30 = vld [vmem:[%s17171_s2 + $0x28] sm:$0xff] }
 0x122   : > { %v1916_v16 = vmul.f32 %v1868_v23, %v11235_v49  ;;  %v11560_v44 = vmul.f32 %v11235_v49, %v1576_v28  ;;  %17301 = vst [vmem:[#allocation15_spill] sm:$0xff] %v11562_v50  ;;  %v953_v46 = vpop.f32.mrf.mxu0  ;;  %v11572_v7 = vmul.f32 %v11562_v50, %v11445_v58  ;;  %2794 = vmatpush.bf16.msra.mxu2 %v9968_v30 }
 0x123   : > { %v2280_v40 = vsub.f32 1.5, %v2279_v0  ;;  %v1080_v34 = vpop.f32.mrf.mxu3  ;;  %v1042_v47 = vpop.f32.mrf.mxu1  ;;  %v11575_v28 = vadd.f32 1e-05, %v1913_v18 }
 0x124   : > { %v11565_v35 = vadd.f32 1e-05, %v1916_v16  ;;  %v11568_v8 = vsub.f32 %v1528_v13, %v11560_v44  ;;  %v1081_v20 = vadd.f32 %v1080_v34, %v991_v53  ;;  %17303 = vst [vmem:[#allocation17_spill] sm:$0xff] %v11572_v7  ;;  %v11579_v13 = vadd.f32 %v1042_v47, %v953_v46  ;;  %v9976_v16 = vld [vmem:[%s17171_s2 + $0x68] sm:$0xff]  ;;  %v9975_v34 = vld [vmem:[%s17171_s2 + $0x60] sm:$0xff] }
 0x125   : > { %v2281_v23 = vmul.f32 %v10140_v12, %v2280_v40  ;;  %2883 = vmatpush.bf16.msra.mxu3 %v9976_v16  ;;  %vm2312_vm6 = vweird.f32 %v11575_v28 }
 0x126   : > { %17302 = vst [vmem:[#allocation16_spill] sm:$0xff] %v11568_v8  ;;  %10141 = vrsqrt.f32 %v11565_v35  ;;  %v1531_v33 = vmax.f32 %v1081_v20, 0.0  ;;  %v1486_v47 = vmax.f32 %v11579_v13, 0.0  ;;  %vm2342_vm2 = vweird.f32 %v11565_v35 }
 0x127   : > { %v2285_v0 = vsel %vm2284_vm1, %v10140_v12, %v2281_v23  ;;  %10143 = vrsqrt.f32 %v11575_v28  ;;  %v9984_v12 = vld [vmem:[%s17171_s2 + $0xa8] sm:$0xff] }
 0x128   : > { %v11585_v58 = vmul.f32 %v2285_v0, %v11481_v10  ;;  %v1579_v45 = vadd.f32 %v1531_v33, %v1483_v2  ;;  %v993_v40 = vpop.f32.mrf.mxu2  ;;  %v9967_v10 = vld [vmem:[%s17171_s2 + $0x20] sm:$0xff]  ;;  %2972 = vmatpush.bf16.msra.mxu0 %v9984_v12 }
 0x129   : > { %2795 = vmatpush.bf16.msra.mxu2 %v9967_v10  ;;  %2884 = vmatpush.bf16.msra.mxu3 %v9975_v34  ;;  %v11626_v34 = vmul.f32 %v2285_v0, %v11479_v37 }
 0x12a   : > { %17304 = vst [vmem:[#allocation18_spill] sm:$0xff] %v11585_v58  ;;  %v1634_v53 = vmul.f32 %v11235_v49, %v1579_v45  ;;  %v1272_v30 = vpop.f32.mrf.mxu0 }
 0x12b   : > { %v1082_v18 = vpop.f32.mrf.mxu3  ;;  %v1361_v58 = vpop.f32.mrf.mxu1  ;;  %17305 = vst [vmem:[#allocation19_spill] sm:$0xff] %v11626_v34 }
 0x12c   : > { %v10142_v20 = vpop.eup %10141  ;;  %v11603_v46 = vsub.f32 %v1483_v2, %v1634_v53  ;;  %v11605_v23 = vsub.f32 %v1531_v33, %v1634_v53  ;;  %v1083_v45 = vadd.f32 %v1082_v18, %v993_v40  ;;  %v11613_v21 = vadd.f32 %v1361_v58, %v1272_v30  ;;  %v9983_v2 = vld [vmem:[%s17171_s2 + $0xa0] sm:$0xff] }
 0x12d   : > { %v10144_v16 = vpop.eup %10143  ;;  %v2337_v3 = vmul.f32 %v10142_v20, %v11565_v35  ;;  %1133 = vmatmul.bf16.gmra.mxu2 %v10916_v4  ;;  %1311 = vmatmul.bf16.gmra.mxu0 %v10916_v4  ;;  %vm2343_vm3 = vweird.f32 %v10142_v20  ;;  %v17307_v35 = vmax.f32 %v11517_v60, 0.0 }
 0x12e   : > { %v1778_v63 = vmul.f32 %v11603_v46, %v11603_v46  ;;  %v1826_v50 = vmul.f32 %v11605_v23, %v11605_v23  ;;  %v1534_v12 = vmax.f32 %v1083_v45, 0.0  ;;  %v2307_v53 = vmul.f32 %v10144_v16, %v11575_v28  ;;  %1400 = vmatmul.bf16.gmra.mxu1 %v10929_v9  ;;  %2973 = vmatpush.bf16.msra.mxu0 %v9983_v2  ;;  %vm2344_vm5 = vmor %vm2342_vm2, %vm2343_vm3 }
 0x12f   : > { %v2338_v33 = vmul.f32 %v10142_v20, %v2337_v3  ;;  %vm2313_vm4 = vweird.f32 %v10144_v16 }
 0x130   : > { %v1874_v40 = vadd.f32 %v1826_v50, %v1778_v63  ;;  %v1582_v18 = vadd.f32 %v1534_v12, %v1486_v47  ;;  %1222 = vmatmul.bf16.gmra.mxu3 %v10929_v9  ;;  %v2308_v10 = vmul.f32 %v10144_v16, %v2307_v53  ;;  %v1094_v45 = vpop.f32.mrf.mxu2  ;;  %v1823_v9 = vmul.f32 %v11568_v8, %v11568_v8  ;;  %vm2314_vm7 = vmor %vm2312_vm6, %vm2313_vm4 }
 0x131   : > { %v2339_v58 = vmul.f32 0.5, %v2338_v33 }
 0x132   : > { %v1922_v3 = vmul.f32 %v1874_v40, %v11235_v49  ;;  %v11630_v4 = vmul.f32 %v11235_v49, %v1582_v18  ;;  %v2309_v30 = vmul.f32 0.5, %v2308_v10  ;;  %v1274_v0 = vpop.f32.mrf.mxu0 }
 0x133   : > { %v2340_v50 = vsub.f32 1.5, %v2339_v58  ;;  %v1183_v63 = vpop.f32.mrf.mxu3  ;;  %v1363_v40 = vpop.f32.mrf.mxu1  ;;  %v11643_v58 = vsub.f32 %v17307_v35, %v11560_v44 }
 0x134   : > { %v1970_v2 = vadd.f32 1e-05, %v1922_v3  ;;  %v11636_v33 = vsub.f32 %v1534_v12, %v11630_v4  ;;  %v11638_v37 = vadd.f32 %v1183_v63, %v1094_v45  ;;  %v2310_v18 = vsub.f32 1.5, %v2309_v30 }
 0x135   : > { %v2341_v53 = vmul.f32 %v10142_v20, %v2340_v50  ;;  %v11646_v3 = vadd.f32 %v1363_v40, %v1274_v0  ;;  %v1775_v45 = vmul.f32 %v11643_v58, %v11643_v58 }
 0x136   : > { %17306 = vst [vmem:[#allocation20_spill] sm:$0xff] %v11636_v33  ;;  %10145 = vrsqrt.f32 %v1970_v2  ;;  %v2311_v12 = vmul.f32 %v10144_v16, %v2310_v18  ;;  %vm2402_vm9 = vweird.f32 %v1970_v2  ;;  %v1442_v7 = vmax.f32 %v11638_v37, 0.0 }
 0x137   : > { %v2345_v10 = vsel %vm2344_vm5, %v10142_v20, %v2341_v53  ;;  %v1871_v60 = vadd.f32 %v1823_v9, %v1775_v45 }
 0x138   : > { %v11651_v50 = vmul.f32 %v2345_v10, %v11536_v11  ;;  %v11653_v63 = vsel %vm2314_vm7, %v10144_v16, %v2311_v12  ;;  %v1096_v44 = vpop.f32.mrf.mxu2 }
 0x139   : > { %17309 = vst [vmem:[#allocation22_spill] sm:$0xff] %v11653_v63  ;;  %v11657_v30 = vmul.f32 %v11653_v63, %v11543_v22  ;;  %v1919_v20 = vmul.f32 %v1871_v60, %v11235_v49 }
 0x13a   : > { %17308 = vst [vmem:[#allocation21_spill] sm:$0xff] %v11651_v50  ;;  %v1277_v40 = vpop.f32.mrf.mxu0 }
 0x13b   : > { %17310 = vst [vmem:[#allocation23_spill] sm:$0xff] %v11657_v30  ;;  %v1185_v28 = vpop.f32.mrf.mxu3  ;;  %v1366_v35 = vpop.f32.mrf.mxu1  ;;  %v1967_v16 = vadd.f32 1e-05, %v1919_v20 }
 0x13c   : > { %v10146_v0 = vpop.eup %10145  ;;  %v11660_v53 = vadd.f32 %v1185_v28, %v1096_v44  ;;  %v11664_v12 = vadd.f32 %v1366_v35, %v1277_v40 }
 0x13d   : > { %v2397_v18 = vmul.f32 %v10146_v0, %v1970_v2  ;;  %1138 = vmatmul.bf16.gmra.mxu2 %v10981_v41  ;;  %1316 = vmatmul.bf16.gmra.mxu0 %v10981_v41  ;;  %10147 = vrsqrt.f32 %v1967_v16  ;;  %vm2403_vm8 = vweird.f32 %v10146_v0  ;;  %v9966_v41 = vld [vmem:[%s17171_s2 + $0x18] sm:$0xff]  ;;  %v1685_v2 = vsub.f32 %v1486_v47, %v11630_v4 }
 0x13e   : > { %1405 = vmatmul.bf16.gmra.mxu1 %v10985_v43  ;;  %vm2404_vm10 = vmor %vm2402_vm9, %vm2403_vm8  ;;  %2796 = vmatpush.bf16.msra.mxu2 %v9966_v41  ;;  %vm2372_vm12 = vweird.f32 %v1967_v16 }
 0x13f   : > { %v2398_v9 = vmul.f32 %v10146_v0, %v2397_v18 }
 0x140   : > { %1227 = vmatmul.bf16.gmra.mxu3 %v10985_v43  ;;  %v1099_v45 = vpop.f32.mrf.mxu2  ;;  %v9974_v43 = vld [vmem:[%s17171_s2 + $0x58] sm:$0xff] }
 0x141   : > { %v2399_v22 = vmul.f32 0.5, %v2398_v9  ;;  %2885 = vmatpush.bf16.msra.mxu3 %v9974_v43 }
 0x142   : > { %v1279_v20 = vpop.f32.mrf.mxu0 }
 0x143   : > { %v2400_v60 = vsub.f32 1.5, %v2399_v22  ;;  %v1188_v44 = vpop.f32.mrf.mxu3  ;;  %v10148_v40 = vpop.eup %10147 }
 0x144   : > { %v11670_v28 = vadd.f32 %v1188_v44, %v1099_v45  ;;  %v1368_v18 = vpop.f32.mrf.mxu1  ;;  %v2367_v9 = vmul.f32 %v10148_v40, %v1967_v16  ;;  %v1829_v45 = vmul.f32 %v11636_v33, %v11636_v33  ;;  %vm2373_vm11 = vweird.f32 %v10148_v40  ;;  %v9980_v16 = vld [vmem:[%s17171_s2 + $0x88] sm:$0xff] }
 0x145   : > { %v2401_v35 = vmul.f32 %v10146_v0, %v2400_v60  ;;  %v11672_v11 = vadd.f32 %v1368_v18, %v1279_v20  ;;  %v11689_v20 = vmul.f32 %v2345_v10, %v11534_v38  ;;  %v1781_v18 = vmul.f32 %v1685_v2, %v1685_v2  ;;  %v9982_v38 = vld [vmem:[%s17171_s2 + $0x98] sm:$0xff]  ;;  %vm2374_vm13 = vmor %vm2372_vm12, %vm2373_vm11 }
 0x146   : > { %v2368_v44 = vmul.f32 %v10148_v40, %v2367_v9  ;;  %2974 = vmatpush.bf16.msra.mxu0 %v9982_v38 }
 0x147   : > { %v2405_v22 = vsel %vm2404_vm10, %v10146_v0, %v2401_v35  ;;  %17312 = vst [vmem:[#allocation25_spill] sm:$0xff] %v11689_v20  ;;  %v1877_v35 = vadd.f32 %v1829_v45, %v1781_v18 }
 0x148   : > { %v11686_v60 = vmul.f32 %v2405_v22, %v11605_v23  ;;  %v1101_v50 = vpop.f32.mrf.mxu2  ;;  %v2369_v8 = vmul.f32 0.5, %v2368_v44 }
 0x149   : > { %v1925_v23 = vmul.f32 %v1877_v35, %v11235_v49 }
 0x14a   : > { %17311 = vst [vmem:[#allocation24_spill] sm:$0xff] %v11686_v60  ;;  %v1282_v33 = vpop.f32.mrf.mxu0  ;;  %v2370_v42 = vsub.f32 1.5, %v2369_v8 }
 0x14b   : > { %v1190_v0 = vpop.f32.mrf.mxu3  ;;  %v1973_v10 = vadd.f32 1e-05, %v1925_v23 }
 0x14c   : > { %v11691_v63 = vadd.f32 %v1190_v0, %v1101_v50  ;;  %v1371_v13 = vpop.f32.mrf.mxu1  ;;  %v2371_v4 = vmul.f32 %v10148_v40, %v2370_v42 }
 0x14d   : > { %v11694_v47 = vadd.f32 %v1371_v13, %v1282_v33  ;;  %1143 = vmatmul.bf16.gmra.mxu2 %v11025_v1  ;;  %1321 = vmatmul.bf16.gmra.mxu0 %v11025_v1  ;;  %10149 = vrsqrt.f32 %v1973_v10  ;;  %vm2432_vm15 = vweird.f32 %v1973_v10 }
 0x14e   : > { %1410 = vmatmul.bf16.gmra.mxu1 %v11029_v5  ;;  %v11703_v8 = vsel %vm2374_vm13, %v10148_v40, %v2371_v4 }
 0x14f   : > { %17313 = vst [vmem:[#allocation26_spill] sm:$0xff] %v11703_v8  ;;  %v11707_v33 = vmul.f32 %v11703_v8, %v11643_v58  ;;  %v11716_v58 = vmul.f32 %v2405_v22, %v11603_v46 }
 0x150   : > { %1232 = vmatmul.bf16.gmra.mxu3 %v11029_v5  ;;  %v1104_v42 = vpop.f32.mrf.mxu2 }
 0x151   : > { %17314 = vst [vmem:[#allocation27_spill] sm:$0xff] %v11707_v33 }
 0x152   : > { %v1284_v41 = vpop.f32.mrf.mxu0  ;;  %17315 = vst [vmem:[#allocation28_spill] sm:$0xff] %v11716_v58 }
 0x153   : > { %v1193_v50 = vpop.f32.mrf.mxu3  ;;  %v10150_v5 = vpop.eup %10149 }
 0x154   : > { %v11711_v1 = vadd.f32 %v1193_v50, %v1104_v42  ;;  %v1373_v43 = vpop.f32.mrf.mxu1  ;;  %v2427_v40 = vmul.f32 %v10150_v5, %v1973_v10  ;;  %vm2433_vm14 = vweird.f32 %v10150_v5  ;;  %v9973_v10 = vld [vmem:[%s17171_s2 + $0x50] sm:$0xff] }
 0x155   : > { %v11713_v9 = vadd.f32 %v1373_v43, %v1284_v41  ;;  %vm2434_vm0 = vmor %vm2432_vm15, %vm2433_vm14  ;;  %2886 = vmatpush.bf16.msra.mxu3 %v9973_v10 }
 0x156   : > { %v2428_v44 = vmul.f32 %v10150_v5, %v2427_v40 }
 0x158   : > { %v1106_v45 = vpop.f32.mrf.mxu2  ;;  %v2429_v13 = vmul.f32 0.5, %v2428_v44 }
 0x15a   : > { %v1287_v35 = vpop.f32.mrf.mxu0  ;;  %v2430_v4 = vsub.f32 1.5, %v2429_v13 }
 0x15b   : > { %v1195_v18 = vpop.f32.mrf.mxu3 }
 0x15c   : > { %v11718_v0 = vadd.f32 %v1195_v18, %v1106_v45  ;;  %v1376_v23 = vpop.f32.mrf.mxu1  ;;  %v2431_v42 = vmul.f32 %v10150_v5, %v2430_v4  ;;  %v9981_v4 = vld [vmem:[%s17171_s2 + $0x90] sm:$0xff] }
 0x15d   : > { %v11720_v38 = vadd.f32 %v1376_v23, %v1287_v35  ;;  %1148 = vmatmul.bf16.gmra.mxu2 %v11069_v29  ;;  %1326 = vmatmul.bf16.gmra.mxu0 %v11069_v29 }
 0x15e   : > { %1415 = vmatmul.bf16.gmra.mxu1 %v11073_v31  ;;  %v11726_v22 = vsel %vm2434_vm0, %v10150_v5, %v2431_v42  ;;  %2975 = vmatpush.bf16.msra.mxu0 %v9981_v4 }
 0x15f   : > { %17316 = vst [vmem:[#allocation29_spill] sm:$0xff] %v11726_v22  ;;  %v11729_v41 = vmul.f32 %v11726_v22, %v1685_v2 }
 0x160   : > { %1237 = vmatmul.bf16.gmra.mxu3 %v11073_v31  ;;  %v1109_v46 = vpop.f32.mrf.mxu2  ;;  %v9965_v31 = vld [vmem:[%s17171_s2 + $0x10] sm:$0xff] }
 0x161   : > { %17317 = vst [vmem:[#allocation30_spill] sm:$0xff] %v11729_v41  ;;  %2797 = vmatpush.bf16.msra.mxu2 %v9965_v31 }
 0x162   : > { %v1289_v40 = vpop.f32.mrf.mxu0  ;;  %2976 = vmatpush.bf16.msra.mxu0 %v9980_v16 }
 0x163   : > { %v1198_v50 = vpop.f32.mrf.mxu3 }
 0x164   : > { %v11731_v43 = vadd.f32 %v1198_v50, %v1109_v46  ;;  %v1378_v45 = vpop.f32.mrf.mxu1 }
 0x165   : > { %v11735_v44 = vadd.f32 %v1378_v45, %v1289_v40 }
 0x168   : > { %v1111_v2 = vpop.f32.mrf.mxu2 }
 0x16a   : > { %v1292_v35 = vpop.f32.mrf.mxu0 }
 0x16b   : > { %v1200_v5 = vpop.f32.mrf.mxu3 }
 0x16c   : > { %v11743_v18 = vadd.f32 %v1200_v5, %v1111_v2  ;;  %v1381_v13 = vpop.f32.mrf.mxu1 }
 0x16d   : > { %v11745_v23 = vadd.f32 %v1381_v13, %v1292_v35  ;;  %1153 = vmatmul.bf16.gmra.mxu2 %v11113_v57  ;;  %1331 = vmatmul.bf16.gmra.mxu0 %v11113_v57 }
 0x16e   : > { %1420 = vmatmul.bf16.gmra.mxu1 %v11117_v59 }
 0x170   : > { %1242 = vmatmul.bf16.gmra.mxu3 %v11117_v59  ;;  %v1114_v42 = vpop.f32.mrf.mxu2 }
 0x172   : > { %v11756_v40 = vpop.f32.mrf.mxu0 }
 0x173   : > { %v1203_v46 = vpop.f32.mrf.mxu3 }
 0x174   : > { %v11754_v50 = vadd.f32 %v1203_v46, %v1114_v42  ;;  %v11758_v45 = vpop.f32.mrf.mxu1  ;;  %v9964_v46 = vld [vmem:[%s17171_s2 + $0x8] sm:$0xff] }
 0x175   : > { %2798 = vmatpush.bf16.msra.mxu2 %v9964_v46  ;;  %v11860_v24 = vadd.f32 %v11758_v45, %v11756_v40  ;;  %v17323_v40 = vpack.c.bf16 %v11384_v36, %v11355_v15  ;;  %v17324_v36 = vmax.f32 %v11660_v53, 0.0 }
 0x178   : > { %v11760_v31 = vpop.f32.mrf.mxu2 }
 0x17a   : > { %v1297_v2 = vpop.f32.mrf.mxu0 }
 0x17b   : > { %v11762_v10 = vpop.f32.mrf.mxu3 }
 0x17c   : > { %v1386_v5 = vpop.f32.mrf.mxu1  ;;  %v11878_v45 = vadd.f32 %v11762_v10, %v11760_v31 }
 0x17d   : > { %v11764_v57 = vadd.f32 %v1386_v5, %v1297_v2  ;;  %1158 = vmatmul.bf16.gmra.mxu2 %v11157_v25  ;;  %1336 = vmatmul.bf16.gmra.mxu0 %v11157_v25  ;;  %v9972_v25 = vld [vmem:[%s17171_s2 + $0x48] sm:$0xff] }
 0x17e   : > { %1425 = vmatmul.bf16.gmra.mxu1 %v11161_v27  ;;  %2887 = vmatpush.bf16.msra.mxu3 %v9972_v25 }
 0x180   : > { %1247 = vmatmul.bf16.gmra.mxu3 %v11161_v27  ;;  %v1119_v59 = vpop.f32.mrf.mxu2 }
 0x182   : > { %v11772_v4 = vpop.f32.mrf.mxu0 }
 0x183   : > { %v1208_v35 = vpop.f32.mrf.mxu3 }
 0x184   : > { %v11770_v13 = vadd.f32 %v1208_v35, %v1119_v59  ;;  %v11774_v42 = vpop.f32.mrf.mxu1  ;;  %v9963_v59 = vld [vmem:[%s17171_s2] sm:$0xff] }
 0x185   : > { %2799 = vmatpush.bf16.msra.mxu2 %v9963_v59 }
 0x188   : > { %v11782_v2 = vpop.f32.mrf.mxu2 }
 0x18a   : > { %v1302_v5 = vpop.f32.mrf.mxu0 }
 0x18b   : > { %v11784_v27 = vpop.f32.mrf.mxu3 }
 0x18c   : > { %v1391_v35 = vpop.f32.mrf.mxu1 }
 0x18d   : > { %v11789_v29 = vadd.f32 %v1391_v35, %v1302_v5  ;;  %1163 = vmatmul.bf16.gmra.mxu2 %v11198_v54  ;;  %1341 = vmatmul.bf16.gmra.mxu0 %v11198_v54 }
 0x18e   : > { %1430 = vmatmul.bf16.gmra.mxu1 %v11205_v62 }
 0x190   : > { %1252 = vmatmul.bf16.gmra.mxu3 %v11205_v62  ;;  %v1124_v46 = vpop.f32.mrf.mxu2 }
 0x192   : > { %v11800_v5 = vpop.f32.mrf.mxu0 }
 0x193   : > { %v1213_v25 = vpop.f32.mrf.mxu3 }
 0x194   : > { %v11798_v60 = vadd.f32 %v1213_v25, %v1124_v46  ;;  %v11802_v35 = vpop.f32.mrf.mxu1 }
 0x196   : > { %17318 = vst [vmem:[#allocation31_spill] sm:$0xff] %v11798_v60 }
 0x198   : > { %v11804_v22 = vpop.f32.mrf.mxu2 }
 0x19a   : > { %v1307_v8 = vpop.f32.mrf.mxu0 }
 0x19b   : > { %v11806_v59 = vpop.f32.mrf.mxu3 }
 0x19c   : > { %v1396_v14 = vpop.f32.mrf.mxu1 }
 0x19d   : > { %v11808_v54 = vadd.f32 %v1396_v14, %v1307_v8  ;;  %1168 = vmatmul.bf16.gmra.mxu2 %v11221_v17  ;;  %1346 = vmatmul.bf16.gmra.mxu0 %v11221_v17  ;;  %v17321_v17 = vpack.c.bf16 %v11318_v52, %v11292_v32  ;;  %v1446_v52 = vmax.f32 %v11646_v3, 0.0 }
 0x19e   : > { %1435 = vmatmul.bf16.gmra.mxu1 %v11225_v19 }
 0x19f   : > { %17319 = vst [vmem:[#allocation32_spill] sm:$0xff] %v11808_v54 }
 0x1a0   : > { %1257 = vmatmul.bf16.gmra.mxu3 %v11225_v19  ;;  %v1129_v62 = vpop.f32.mrf.mxu2  ;;  %v1443_v19 = vmax.f32 %v11613_v21, 0.0 }
 0x1a2   : > { %v11816_v25 = vpop.f32.mrf.mxu0 }
 0x1a3   : > { %v1218_v16 = vpop.f32.mrf.mxu3 }
 0x1a4   : > { %v11814_v46 = vadd.f32 %v1218_v16, %v1129_v62  ;;  %v11818_v26 = vpop.f32.mrf.mxu1 }
 0x1a6   : > { %17320 = vst [vmem:[#allocation33_spill] sm:$0xff] %v11814_v46 }
 0x1a8   : > { %v11820_v48 = vpop.f32.mrf.mxu2 }
 0x1aa   : > { %v1312_v8 = vpop.f32.mrf.mxu0 }
 0x1ab   : > { %v11822_v14 = vpop.f32.mrf.mxu3 }
 0x1ac   : > { %v1401_v58 = vpop.f32.mrf.mxu1 }
 0x1ad   : > { %v1402_v41 = vadd.f32 %v1401_v58, %v1312_v8  ;;  %2800 = vmatmul.bf16.vlgmr.msra.gmra.mxu2 %v17321_v17 }
 0x1af   : > { %v1491_v20 = vmax.f32 %v1402_v41, 0.0 }
 0x1b0   : > { %v1134_v16 = vpop.f32.mrf.mxu2 }
 0x1b1   : > { %v1539_v62 = vadd.f32 %v1491_v20, %v1443_v19 }
 0x1b2   : > { %v1314_v61 = vpop.f32.mrf.mxu0 }
 0x1b3   : > { %v1223_v33 = vpop.f32.mrf.mxu3  ;;  %v1594_v34 = vmul.f32 %v11235_v49, %v1539_v62 }
 0x1b4   : > { %v1224_v30 = vadd.f32 %v1223_v33, %v1134_v16  ;;  %v1403_v46 = vpop.f32.mrf.mxu1 }
 0x1b5   : > { %v11830_v54 = vsub.f32 %v1443_v19, %v1594_v34  ;;  %v11832_v58 = vsub.f32 %v1491_v20, %v1594_v34  ;;  %v1404_v32 = vadd.f32 %v1403_v46, %v1314_v61 }
 0x1b6   : > { %v1490_v8 = vmax.f32 %v1224_v30, 0.0 }
 0x1b7   : > { %v1738_v41 = vmul.f32 %v11830_v54, %v11830_v54  ;;  %v1786_v33 = vmul.f32 %v11832_v58, %v11832_v58  ;;  %v1494_v62 = vmax.f32 %v1404_v32, 0.0 }
 0x1b8   : > { %v1538_v17 = vadd.f32 %v1490_v8, %v1442_v7  ;;  %v1136_v16 = vpop.f32.mrf.mxu2 }
 0x1b9   : > { %v1834_v30 = vadd.f32 %v1786_v33, %v1738_v41  ;;  %v1542_v46 = vadd.f32 %v1494_v62, %v1446_v52 }
 0x1ba   : > { %v1593_v20 = vmul.f32 %v11235_v49, %v1538_v17  ;;  %v1317_v33 = vpop.f32.mrf.mxu0 }
 0x1bb   : > { %v1225_v19 = vpop.f32.mrf.mxu3  ;;  %v1882_v34 = vmul.f32 %v1834_v30, %v11235_v49  ;;  %v1597_v41 = vmul.f32 %v11235_v49, %v1542_v46 }
 0x1bc   : > { %v11851_v55 = vsub.f32 %v1442_v7, %v1593_v20  ;;  %v11853_v61 = vsub.f32 %v1490_v8, %v1593_v20  ;;  %v1226_v32 = vadd.f32 %v1225_v19, %v1136_v16  ;;  %v1406_v37 = vpop.f32.mrf.mxu1 }
 0x1bd   : > { %v11862_v3 = vadd.f32 1e-05, %v1882_v34  ;;  %v11868_v30 = vsub.f32 %v1446_v52, %v1597_v41  ;;  %v11871_v46 = vsub.f32 %v1494_v62, %v1597_v41  ;;  %v1407_v17 = vadd.f32 %v1406_v37, %v1317_v33  ;;  %2805 = vmatmul.bf16.gmra.mxu2 %v17323_v40  ;;  %v9979_v62 = vld [vmem:[%s17171_s2 + $0x80] sm:$0xff] }
 0x1be   : > { %v1737_v7 = vmul.f32 %v11851_v55, %v11851_v55  ;;  %v1785_v8 = vmul.f32 %v11853_v61, %v11853_v61  ;;  %v1493_v21 = vmax.f32 %v1226_v32, 0.0  ;;  %v9971_v33 = vld [vmem:[%s17171_s2 + $0x40] sm:$0xff]  ;;  %2977 = vmatpush.bf16.msra.mxu0 %v9979_v62  ;;  %v11911_v62 = vadd.f32 %v11784_v27, %v11782_v2 }
 0x1bf   : > { %17322 = vst [vmem:[#allocation34_spill] sm:$0xff] %v11871_v46  ;;  %10151 = vrsqrt.f32 %v11862_v3  ;;  %v1741_v52 = vmul.f32 %v11868_v30, %v11868_v30  ;;  %v1789_v15 = vmul.f32 %v11871_v46, %v11871_v46  ;;  %v1497_v31 = vmax.f32 %v1407_v17, 0.0  ;;  %2888 = vmatpush.bf16.msra.mxu3 %v9971_v33 }
 0x1c0   : > { %v1833_v19 = vadd.f32 %v1785_v8, %v1737_v7  ;;  %v1541_v34 = vadd.f32 %v1493_v21, %v17324_v36  ;;  %v1139_v41 = vpop.f32.mrf.mxu2  ;;  %v11899_v7 = vmul.f32 %v11500_v51, %v11388_v6  ;;  %v11903_v8 = vadd.f32 %v11774_v42, %v11772_v4 }
 0x1c1   : > { %v1837_v17 = vadd.f32 %v1789_v15, %v1741_v52  ;;  %v17326_v36 = vmax.f32 %v11664_v12, 0.0  ;;  %v17327_v42 = vmax.f32 %v11660_v53, 0.0  ;;  %vm2002_vm2 = vweird.f32 %v11862_v3 }
 0x1c2   : > { %v1881_v32 = vmul.f32 %v1833_v19, %v11235_v49  ;;  %17325 = vst [vmem:[#allocation35_spill] sm:$0xff] %v11899_v7  ;;  %v1596_v40 = vmul.f32 %v11235_v49, %v1541_v34  ;;  %v1319_v51 = vpop.f32.mrf.mxu0 }
 0x1c3   : > { %v1545_v19 = vadd.f32 %v1497_v31, %v17326_v36  ;;  %v1228_v16 = vpop.f32.mrf.mxu3  ;;  %v1885_v4 = vmul.f32 %v1837_v17, %v11235_v49  ;;  %v17329_v17 = vmax.f32 %v11664_v12, 0.0 }
 0x1c4   : > { %v11913_v20 = vadd.f32 1e-05, %v1881_v32  ;;  %v1229_v6 = vadd.f32 %v1228_v16, %v1139_v41  ;;  %v11918_v52 = vsub.f32 %v17327_v42, %v1596_v40  ;;  %v11920_v15 = vsub.f32 %v1493_v21, %v1596_v40  ;;  %v1408_v36 = vpop.f32.mrf.mxu1 }
 0x1c5   : > { %v1600_v34 = vmul.f32 %v11235_v49, %v1545_v19  ;;  %v10152_v10 = vpop.eup %10151  ;;  %v11928_v53 = vadd.f32 1e-05, %v1885_v4  ;;  %v11944_v4 = vadd.f32 %v1408_v36, %v1319_v51 }
 0x1c6   : > { %17328 = vst [vmem:[#allocation36_spill] sm:$0xff] %v11920_v15  ;;  %10153 = vrsqrt.f32 %v11913_v20  ;;  %v1496_v16 = vmax.f32 %v1229_v6, 0.0  ;;  %v1997_v41 = vmul.f32 %v10152_v10, %v11862_v3  ;;  %v1740_v21 = vmul.f32 %v11918_v52, %v11918_v52 }
 0x1c7   : > { %v1788_v33 = vmul.f32 %v11920_v15, %v11920_v15  ;;  %v11936_v40 = vsub.f32 %v17329_v17, %v1600_v34  ;;  %v11938_v19 = vsub.f32 %v1497_v31, %v1600_v34  ;;  %v17330_v6 = vmax.f32 %v11670_v28, 0.0 }
 0x1c8   : > { %v1998_v27 = vmul.f32 %v10152_v10, %v1997_v41  ;;  %10155 = vrsqrt.f32 %v11928_v53  ;;  %v1141_v34 = vpop.f32.mrf.mxu2  ;;  %v11955_v41 = vadd.f32 %v11802_v35, %v11800_v5  ;;  %vm2003_vm1 = vweird.f32 %v10152_v10 }
 0x1c9   : > { %v1544_v42 = vadd.f32 %v1496_v16, %v17330_v6  ;;  %v1836_v2 = vadd.f32 %v1788_v33, %v1740_v21  ;;  %v1744_v37 = vmul.f32 %v11936_v40, %v11936_v40  ;;  %v1792_v12 = vmul.f32 %v11938_v19, %v11938_v19  ;;  %vm2004_vm3 = vmor %vm2002_vm2, %vm2003_vm1 }
 0x1ca   : > { %v1999_v51 = vmul.f32 0.5, %v1998_v27  ;;  %v17331_v15 = vmov %v17330_v6  ;;  %v1322_v7 = vpop.f32.mrf.mxu0  ;;  %v17212_v5 = vmax.f32 %v11944_v4, 0.0  ;;  %vm1992_vm5 = vweird.f32 %v11913_v20 }
 0x1cb   : > { %v1599_v31 = vmul.f32 %v11235_v49, %v1544_v42  ;;  %v1230_v36 = vpop.f32.mrf.mxu3  ;;  %v1884_v33 = vmul.f32 %v1836_v2, %v11235_v49  ;;  %v1840_v32 = vadd.f32 %v1792_v12, %v1744_v37  ;;  %vm2032_vm6 = vweird.f32 %v11928_v53 }
 0x1cc   : > { %v10154_v21 = vpop.eup %10153  ;;  %v2000_v17 = vsub.f32 1.5, %v1999_v51  ;;  %v1411_v35 = vpop.f32.mrf.mxu1  ;;  %v11986_v51 = vadd.f32 %v11818_v26, %v11816_v25  ;;  %v17335_v26 = vmax.f32 %v11672_v11, 0.0  ;;  %v12002_v25 = vadd.f32 %v1230_v36, %v1141_v34 }
 0x1cd   : > { %v11960_v46 = vsub.f32 %v17331_v15, %v1599_v31  ;;  %v11962_v42 = vsub.f32 %v1496_v16, %v1599_v31  ;;  %v1987_v6 = vmul.f32 %v10154_v21, %v11913_v20  ;;  %v11966_v27 = vadd.f32 1e-05, %v1884_v33 }
 0x1ce   : > { %v1888_v60 = vmul.f32 %v1840_v32, %v11235_v49  ;;  %v11973_v15 = vpop.eup %10155  ;;  %v2001_v16 = vmul.f32 %v10152_v10, %v2000_v17  ;;  %v17332_v31 = vpack.c.bf16 %v11442_v39, %v11405_v56  ;;  %v11982_v32 = vadd.f32 %v11806_v59, %v11804_v22  ;;  %17333 = vst [vmem:[#allocation37_spill] sm:$0xff] %v11986_v51 }
 0x1cf   : > { %v1743_v37 = vmul.f32 %v11960_v46, %v11960_v46  ;;  %v1791_v28 = vmul.f32 %v11962_v42, %v11962_v42  ;;  %v1988_v12 = vmul.f32 %v10154_v21, %v1987_v6  ;;  %v2027_v17 = vmul.f32 %v11973_v15, %v11928_v53 }
 0x1d0   : > { %2810 = vmatmul.bf16.gmra.mxu2 %v17332_v31  ;;  %10157 = vrsqrt.f32 %v11966_v27  ;;  %v2005_v3 = vsel %vm2004_vm3, %v10152_v10, %v2001_v16  ;;  %v11992_v33 = vadd.f32 1e-05, %v1888_v60  ;;  %v1548_v59 = vadd.f32 %v17212_v5, %v17335_v26  ;;  %v1144_v31 = vpop.f32.mrf.mxu2 }
 0x1d1   : > { %v1989_v6 = vmul.f32 0.5, %v1988_v12  ;;  %v1839_v56 = vadd.f32 %v1791_v28, %v1743_v37  ;;  %v11995_v39 = vmul.f32 %v2005_v3, %v11832_v58  ;;  %v2028_v22 = vmul.f32 %v11973_v15, %v2027_v17 }
 0x1d2   : > { %vm1993_vm4 = vweird.f32 %v10154_v21  ;;  %10159 = vrsqrt.f32 %v11992_v33  ;;  %v12008_v58 = vadd.f32 %v11822_v14, %v11820_v48  ;;  %v1412_v28 = vadd.f32 %v1411_v35, %v1322_v7  ;;  %v1324_v12 = vpop.f32.mrf.mxu0 }
 0x1d3   : > { %17334 = vst [vmem:[#allocation38_spill] sm:$0xff] %v11995_v39  ;;  %v1990_v2 = vsub.f32 1.5, %v1989_v6  ;;  %v1887_v60 = vmul.f32 %v1839_v56, %v11235_v49  ;;  %v1233_v10 = vpop.f32.mrf.mxu3  ;;  %v2029_v37 = vmul.f32 0.5, %v2028_v22  ;;  %vm1994_vm7 = vmor %vm1992_vm5, %vm1993_vm4  ;;  %v17213_v26 = vmax.f32 %v12002_v25, 0.0 }
 0x1d4   : > { %17336 = vst [vmem:[#allocation39_spill] sm:$0xff] %v12008_v58  ;;  %v1234_v16 = vadd.f32 %v1233_v10, %v1144_v31  ;;  %v1413_v36 = vpop.f32.mrf.mxu1  ;;  %v1503_v48 = vmax.f32 %v1412_v28, 0.0  ;;  %v12019_v20 = vmul.f32 %v11235_v49, %v1548_v59  ;;  %vm2033_vm8 = vweird.f32 %v11973_v15 }
 0x1d5   : > { %v1991_v17 = vmul.f32 %v10154_v21, %v1990_v2  ;;  %v12012_v34 = vadd.f32 1e-05, %v1887_v60  ;;  %v2030_v56 = vsub.f32 1.5, %v2029_v37  ;;  %vm2022_vm9 = vweird.f32 %v11966_v27  ;;  %vm2034_vm11 = vmor %vm2032_vm6, %vm2033_vm8 }
 0x1d6   : > { %v10158_v6 = vpop.eup %10157  ;;  %v1502_v14 = vmax.f32 %v1234_v16, 0.0  ;;  %v12028_v60 = vmul.f32 %v2005_v3, %v11830_v54  ;;  %v17338_v10 = vmax.f32 %v11694_v47, 0.0  ;;  %v17339_v59 = vmax.f32 %v11711_v1, 0.0 }
 0x1d7   : > { %v1995_v22 = vsel %vm1994_vm7, %v10154_v21, %v1991_v17  ;;  %v2017_v7 = vmul.f32 %v10158_v6, %v11966_v27  ;;  %10161 = vrsqrt.f32 %v12012_v34  ;;  %v2031_v2 = vmul.f32 %v11973_v15, %v2030_v56 }
 0x1d8   : > { %v12022_v35 = vmul.f32 %v1995_v22, %v11853_v61  ;;  %v10160_v31 = vpop.eup %10159  ;;  %v1551_v37 = vadd.f32 %v1503_v48, %v17338_v10  ;;  %v1550_v28 = vadd.f32 %v1502_v14, %v17339_v59  ;;  %vm2062_vm10 = vweird.f32 %v11992_v33  ;;  %v1146_v54 = vpop.f32.mrf.mxu2 }
 0x1d9   : > { %v2018_v21 = vmul.f32 %v10158_v6, %v2017_v7  ;;  %v2057_v61 = vmul.f32 %v10160_v31, %v11992_v33  ;;  %v17340_v16 = vmax.f32 %v11691_v63, 0.0  ;;  %v12040_v56 = vadd.f32 %v1413_v36, %v1324_v12 }
 0x1da   : > { %17337 = vst [vmem:[#allocation40_spill] sm:$0xff] %v12022_v35  ;;  %v12043_v3 = vmul.f32 %v1995_v22, %v11851_v55  ;;  %vm2023_vm12 = vweird.f32 %v10158_v6  ;;  %v1606_v10 = vmul.f32 %v11235_v49, %v1551_v37  ;;  %v12049_v5 = vsel %vm2034_vm11, %v11973_v15, %v2031_v2  ;;  %v1327_v36 = vpop.f32.mrf.mxu0 }
 0x1db   : > { %v1547_v17 = vadd.f32 %v17213_v26, %v17340_v16  ;;  %v2019_v7 = vmul.f32 0.5, %v2018_v21  ;;  %v1235_v59 = vpop.f32.mrf.mxu3  ;;  %17341 = vst [vmem:[#allocation41_spill] sm:$0xff] %v12049_v5  ;;  %v2058_v35 = vmul.f32 %v10160_v31, %v2057_v61  ;;  %vm2063_vm13 = vweird.f32 %v10160_v31  ;;  %vm2024_vm15 = vmor %vm2022_vm9, %vm2023_vm12 }
 0x1dc   : > { %v1605_v12 = vmul.f32 %v11235_v49, %v1550_v28  ;;  %v17342_v55 = vmax.f32 %v11694_v47, 0.0  ;;  %v12056_v53 = vsub.f32 %v1503_v48, %v1606_v10  ;;  %v1506_v21 = vmax.f32 %v12040_v56, 0.0  ;;  %v1416_v37 = vpop.f32.mrf.mxu1  ;;  %vm2064_vm0 = vmor %vm2062_vm10, %vm2063_vm13 }
 0x1dd   : > { %v10162_v16 = vpop.eup %10161  ;;  %v2020_v26 = vsub.f32 1.5, %v2019_v7  ;;  %v2059_v39 = vmul.f32 0.5, %v2058_v35  ;;  %vm2052_vm14 = vweird.f32 %v12012_v34  ;;  %v17343_v2 = vmax.f32 %v11711_v1, 0.0  ;;  %v17344_v35 = vld [vmem:[#allocation10_spill] sm:$0xff] }
 0x1de   : > { %v12054_v22 = vsub.f32 %v17342_v55, %v1606_v10  ;;  %v2047_v15 = vmul.f32 %v10162_v16, %v12012_v34  ;;  %v12065_v61 = vadd.f32 %v1235_v59, %v1146_v54  ;;  %v1798_v48 = vmul.f32 %v12056_v53, %v12056_v53  ;;  %v17345_v10 = vld [vmem:[#allocation8_spill] sm:$0xff] }
 0x1df   : > { %v12063_v28 = vsub.f32 %v17343_v2, %v1605_v12  ;;  %v2021_v7 = vmul.f32 %v10158_v6, %v2020_v26  ;;  %v12071_v56 = vsub.f32 %v1502_v14, %v1605_v12  ;;  %v17346_v55 = vpack.c.bf16 %v17344_v35, %v17345_v10 }
 0x1e0   : > { %v1750_v47 = vmul.f32 %v12054_v22, %v12054_v22  ;;  %v2461_v1 = vmul.f32 %v12049_v5, %v11868_v30  ;;  %v2060_v26 = vsub.f32 1.5, %v2059_v39  ;;  %v2048_v54 = vmul.f32 %v10162_v16, %v2047_v15  ;;  %v1149_v39 = vpop.f32.mrf.mxu2 }
 0x1e1   : > { %2815 = vmatmul.bf16.gmra.mxu2 %v17346_v55  ;;  %v1749_v59 = vmul.f32 %v12063_v28, %v12063_v28  ;;  %v12083_v2 = vsel %vm2024_vm15, %v10158_v6, %v2021_v7  ;;  %v1797_v12 = vmul.f32 %v12071_v56, %v12071_v56  ;;  %v17348_v35 = vmax.f32 %v11713_v9, 0.0 }
 0x1e2   : > { %17347 = vst [vmem:[#allocation10_spill] sm:$0xff] %v12083_v2  ;;  %v1846_v14 = vadd.f32 %v1798_v48, %v1750_v47  ;;  %v2061_v55 = vmul.f32 %v10160_v31, %v2060_v26  ;;  %v2049_v30 = vmul.f32 0.5, %v2048_v54  ;;  %v12090_v5 = vmul.f32 %v11235_v49, %v1547_v17 }
 0x1e3   : > { %v1554_v10 = vadd.f32 %v1506_v21, %v17348_v35  ;;  %v1505_v27 = vmax.f32 %v12065_v61, 0.0  ;;  %vm2053_vm1 = vweird.f32 %v10162_v16  ;;  %v1845_v15 = vadd.f32 %v1797_v12, %v1749_v59  ;;  %v1238_v47 = vpop.f32.mrf.mxu3 }
 0x1e4   : > { %v1894_v6 = vmul.f32 %v1846_v14, %v11235_v49  ;;  %v1417_v7 = vadd.f32 %v1416_v37, %v1327_v36  ;;  %v2460_v48 = vmul.f32 %v12083_v2, %v11918_v52  ;;  %v12099_v26 = vsel %vm2064_vm0, %v10160_v31, %v2061_v55  ;;  %v1329_v36 = vpop.f32.mrf.mxu0  ;;  %v1418_v37 = vpop.f32.mrf.mxu1  ;;  %vm2054_vm2 = vmor %vm2052_vm14, %vm2053_vm1 }
 0x1e5   : > { %v2050_v17 = vsub.f32 1.5, %v2049_v30  ;;  %v2554_v54 = vpack.c.bf16 %v2461_v1, %v12028_v60  ;;  %v12104_v61 = vmul.f32 %v12099_v26, %v11938_v19  ;;  %v1893_v35 = vmul.f32 %v1845_v15, %v11235_v49 }
 0x1e6   : > { %v12106_v33 = vadd.f32 1e-05, %v1894_v6  ;;  %v12110_v59 = vmul.f32 %v11235_v49, %v1554_v10  ;;  %v17350_v52 = vmax.f32 %v11718_v0, 0.0  ;;  %v1509_v12 = vmax.f32 %v1417_v7, 0.0 }
 0x1e7   : > { %17349 = vst [vmem:[#allocation8_spill] sm:$0xff] %v12104_v61  ;;  %v2051_v14 = vmul.f32 %v10162_v16, %v2050_v17  ;;  %2978 = vmatmul.bf16.vlgmr.msra.gmra.mxu0 %v2554_v54  ;;  %v1239_v60 = vadd.f32 %v1238_v47, %v1149_v39  ;;  %v17351_v19 = vmax.f32 %v11944_v4, 0.0  ;;  %v12123_v10 = vadd.f32 1e-05, %v1893_v35  ;;  %v17360_v54 = vld [vmem:[#allocation32_spill] sm:$0xff]  ;;  %v17365_v61 = vld [vmem:[#allocation13_spill] sm:$0xff] }
 0x1e8   : > { %v1553_v31 = vadd.f32 %v1505_v27, %v17350_v52  ;;  %10163 = vrsqrt.f32 %v12106_v33  ;;  %v17353_v55 = vmax.f32 %v11672_v11, 0.0  ;;  %v17354_v39 = vmax.f32 %v11720_v38, 0.0 }
 0x1e9   : > { %v12120_v1 = vsub.f32 %v17351_v19, %v12019_v20  ;;  %v12130_v6 = vsel %vm2054_vm2, %v10162_v16, %v2051_v14  ;;  %v1508_v15 = vmax.f32 %v1239_v60, 0.0  ;;  %v2553_v7 = vpack.c.bf16 %v2460_v48, %v12043_v3 }
 0x1ea   : > { %v12128_v30 = vsub.f32 %v17353_v55, %v12019_v20  ;;  %v1557_v34 = vadd.f32 %v1509_v12, %v17354_v39  ;;  %v12137_v4 = vmul.f32 %v12130_v6, %v11962_v42  ;;  %v17356_v47 = vmax.f32 %v12002_v25, 0.0 }
 0x1eb   : > { %17352 = vst [vmem:[#allocation42_spill] sm:$0xff] %v12120_v1  ;;  %10165 = vrsqrt.f32 %v12123_v10  ;;  %v12146_v11 = vsub.f32 %v1506_v21, %v12110_v59  ;;  %v12150_v16 = vmul.f32 %v11235_v49, %v1553_v31  ;;  %v17359_v42 = vmax.f32 %v11731_v43, 0.0  ;;  %2889 = vmatmul.bf16.vlgmr.msra.gmra.mxu3 %v2553_v7  ;;  %v1151_v21 = vpop.f32.mrf.mxu2  ;;  %v1240_v60 = vpop.f32.mrf.mxu3 }
 0x1ec   : > { %17355 = vst [vmem:[#allocation43_spill] sm:$0xff] %v12137_v4  ;;  %v12142_v17 = vsub.f32 %v17356_v47, %v12090_v5  ;;  %v1612_v3 = vmul.f32 %v11235_v49, %v1557_v34  ;;  %v1795_v52 = vmul.f32 %v12120_v1, %v12120_v1  ;;  %v1747_v19 = vmul.f32 %v12128_v30, %v12128_v30 }
 0x1ed   : > { %17358 = vst [vmem:[#allocation45_spill] sm:$0xff] %v12146_v11  ;;  %v1556_v48 = vadd.f32 %v1508_v15, %v17359_v42  ;;  %v17362_v55 = vmov %v17354_v39  ;;  %v12176_v25 = vmul.f32 %v12146_v11, %v12146_v11  ;;  %v12178_v31 = vadd.f32 %v1418_v37, %v1329_v36  ;;  %v1332_v37 = vpop.f32.mrf.mxu0  ;;  %v1421_v11 = vpop.f32.mrf.mxu1 }
 0x1ee   : > { %17357 = vst [vmem:[#allocation44_spill] sm:$0xff] %v12142_v17  ;;  %v12164_v39 = vsub.f32 %v17362_v55, %v1612_v3  ;;  %v12166_v34 = vsub.f32 %v1509_v12, %v1612_v3  ;;  %v10164_v47 = vpop.eup %10163  ;;  %v12172_v14 = vmul.f32 %v12142_v17, %v12142_v17  ;;  %vm2122_vm3 = vweird.f32 %v12106_v33  ;;  %v17364_v17 = vld [vmem:[#allocation17_spill] sm:$0xff] }
 0x1ef   : > { %v1611_v7 = vmul.f32 %v11235_v49, %v1556_v48  ;;  %v2117_v38 = vmul.f32 %v10164_v47, %v12106_v33  ;;  %v12183_v12 = vsub.f32 %v1505_v27, %v12150_v16  ;;  %v1843_v4 = vadd.f32 %v1795_v52, %v1747_v19 }
 0x1f0   : > { %v1756_v3 = vmul.f32 %v12164_v39, %v12164_v39  ;;  %v1804_v48 = vmul.f32 %v12166_v34, %v12166_v34  ;;  %v17366_v27 = vpack.c.bf16 %v17364_v17, %v17365_v61  ;;  %v17367_v1 = vmax.f32 %v11691_v63, 0.0 }
 0x1f1   : > { %17363 = vst [vmem:[#allocation32_spill] sm:$0xff] %v12183_v12  ;;  %v10166_v55 = vpop.eup %10165  ;;  %v12191_v20 = vsub.f32 %v17359_v42, %v1611_v7  ;;  %v12193_v36 = vsub.f32 %v1508_v15, %v1611_v7  ;;  %v2118_v58 = vmul.f32 %v10164_v47, %v2117_v38  ;;  %vm2112_vm4 = vweird.f32 %v12123_v10 }
 0x1f2   : > { %2820 = vmatmul.bf16.gmra.mxu2 %v17366_v27  ;;  %v12201_v2 = vsub.f32 %v17367_v1, %v12090_v5  ;;  %v2107_v51 = vmul.f32 %v10166_v55, %v12123_v10  ;;  %v1852_v43 = vadd.f32 %v1804_v48, %v1756_v3  ;;  %v1512_v61 = vmax.f32 %v12178_v31, 0.0 }
 0x1f3   : > { %v1755_v15 = vmul.f32 %v12191_v20, %v12191_v20  ;;  %v1803_v52 = vmul.f32 %v12193_v36, %v12193_v36  ;;  %v12210_v17 = vadd.f32 %v1240_v60, %v1151_v21  ;;  %v2119_v19 = vmul.f32 0.5, %v2118_v58  ;;  %v1154_v31 = vpop.f32.mrf.mxu2 }
 0x1f4   : > { %v2108_v63 = vmul.f32 %v10166_v55, %v2107_v51  ;;  %v1900_v5 = vmul.f32 %v1852_v43, %v11235_v49  ;;  %v1422_v1 = vadd.f32 %v1421_v11, %v1332_v37  ;;  %vm2123_vm5 = vweird.f32 %v10164_v47  ;;  %v1243_v37 = vpop.f32.mrf.mxu3 }
 0x1f5   : > { %v1851_v7 = vadd.f32 %v1803_v52, %v1755_v15  ;;  %v1891_v42 = vmul.f32 %v1843_v4, %v11235_v49  ;;  %v1746_v38 = vmul.f32 %v12201_v2, %v12201_v2  ;;  %v2120_v3 = vsub.f32 1.5, %v2119_v19  ;;  %vm2124_vm7 = vmor %vm2122_vm3, %vm2123_vm5 }
 0x1f6   : > { %v2109_v48 = vmul.f32 0.5, %v2108_v63  ;;  %v12216_v27 = vadd.f32 1e-05, %v1900_v5  ;;  %v1515_v35 = vmax.f32 %v1422_v1, 0.0  ;;  %v17368_v58 = vmax.f32 %v11735_v44, 0.0 }
 0x1f7   : > { %v1899_v21 = vmul.f32 %v1851_v7, %v11235_v49  ;;  %v17223_v60 = vmax.f32 %v12210_v17, 0.0  ;;  %v12222_v11 = vadd.f32 1e-05, %v1891_v42  ;;  %v2121_v4 = vmul.f32 %v10164_v47, %v2120_v3 }
 0x1f8   : > { %v1560_v51 = vadd.f32 %v1512_v61, %v17368_v58  ;;  %v2110_v43 = vsub.f32 1.5, %v2109_v48  ;;  %vm2113_vm6 = vweird.f32 %v10166_v55  ;;  %10167 = vrsqrt.f32 %v12216_v27  ;;  %v1334_v48 = vpop.f32.mrf.mxu0 }
 0x1f9   : > { %v12230_v15 = vmul.f32 %v12183_v12, %v12183_v12  ;;  %v12232_v52 = vadd.f32 1e-05, %v1899_v21  ;;  %v17369_v19 = vmax.f32 %v11745_v23, 0.0  ;;  %10169 = vrsqrt.f32 %v12222_v11  ;;  %vm2114_vm8 = vmor %vm2112_vm4, %vm2113_vm6  ;;  %v1423_v21 = vpop.f32.mrf.mxu1 }
 0x1fa   : > { %v12237_v5 = vsel %vm2124_vm7, %v10164_v47, %v2121_v4  ;;  %v2111_v1 = vmul.f32 %v10166_v55, %v2110_v43  ;;  %v12241_v7 = vmul.f32 %v12099_v26, %v11936_v40  ;;  %v1244_v33 = vadd.f32 %v1243_v37, %v1154_v31 }
 0x1fb   : > { %v1563_v63 = vadd.f32 %v1515_v35, %v17369_v19  ;;  %v12245_v42 = vmul.f32 %v12237_v5, %v12056_v53  ;;  %10171 = vrsqrt.f32 %v12232_v52  ;;  %v12251_v3 = vmul.f32 %v11235_v49, %v1560_v51 }
 0x1fc   : > { %v12254_v58 = vsel %vm2114_vm8, %v10166_v55, %v2111_v1  ;;  %v17371_v40 = vmax.f32 %v11743_v18, 0.0  ;;  %v1514_v26 = vmax.f32 %v1244_v33, 0.0  ;;  %v1842_v10 = vadd.f32 %v12172_v14, %v1746_v38 }
 0x1fd   : > { %17370 = vst [vmem:[#allocation17_spill] sm:$0xff] %v12245_v42  ;;  %v1618_v47 = vmul.f32 %v11235_v49, %v1563_v63  ;;  %v12263_v31 = vmul.f32 %v12254_v58, %v12071_v56  ;;  %v17373_v51 = vmov %v17369_v19  ;;  %v17375_v55 = vmax.f32 %v11713_v9, 0.0  ;;  %v1245_v42 = vpop.f32.mrf.mxu3 }
 0x1fe   : > { %v1559_v53 = vadd.f32 %v17223_v60, %v17371_v40  ;;  %v10168_v19 = vpop.eup %10167  ;;  %v17376_v63 = vmax.f32 %v11754_v50, 0.0  ;;  %v1890_v14 = vmul.f32 %v1842_v10, %v11235_v49  ;;  %v12281_v56 = vmul.f32 %v12130_v6, %v11960_v46  ;;  %v17377_v10 = vld [vmem:[#allocation23_spill] sm:$0xff]  ;;  %v1156_v60 = vpop.f32.mrf.mxu2 }
 0x1ff   : > { %17372 = vst [vmem:[#allocation13_spill] sm:$0xff] %v12263_v31  ;;  %v12267_v37 = vsub.f32 %v17373_v51, %v1618_v47  ;;  %v12269_v4 = vsub.f32 %v1515_v35, %v1618_v47  ;;  %v12274_v43 = vsub.f32 %v17375_v55, %v12110_v59  ;;  %v12283_v23 = vadd.f32 %v1423_v21, %v1334_v48  ;;  %v10170_v38 = vpop.eup %10169  ;;  %v17378_v51 = vld [vmem:[#allocation19_spill] sm:$0xff] }
 0x200   : > { %v1562_v1 = vadd.f32 %v1514_v26, %v17376_v63  ;;  %v2177_v35 = vmul.f32 %v10168_v19, %v12216_v27  ;;  %v12287_v33 = vsub.f32 %v1512_v61, %v12251_v3  ;;  %v12294_v47 = vmul.f32 %v11235_v49, %v1559_v53 }
 0x201   : > { %17374 = vst [vmem:[#allocation46_spill] sm:$0xff] %v12267_v37  ;;  %v1762_v9 = vmul.f32 %v12267_v37, %v12267_v37  ;;  %v1810_v59 = vmul.f32 %v12269_v4, %v12269_v4  ;;  %v2087_v46 = vmul.f32 %v10170_v38, %v12222_v11  ;;  %v12298_v48 = vadd.f32 1e-05, %v1890_v14  ;;  %v10172_v21 = vpop.eup %10171 }
 0x202   : > { %v1617_v6 = vmul.f32 %v11235_v49, %v1562_v1  ;;  %v2178_v40 = vmul.f32 %v10168_v19, %v2177_v35  ;;  %vm2182_vm9 = vweird.f32 %v12216_v27  ;;  %vm2092_vm10 = vweird.f32 %v12222_v11 }
 0x203   : > { %v1858_v61 = vadd.f32 %v1810_v59, %v1762_v9  ;;  %v17379_v55 = vpack.c.bf16 %v17377_v10, %v17378_v51  ;;  %v2167_v53 = vmul.f32 %v10172_v21, %v12232_v52  ;;  %vm2172_vm11 = vweird.f32 %v12232_v52  ;;  %v1337_v10 = vpop.f32.mrf.mxu0  ;;  %v1426_v51 = vpop.f32.mrf.mxu1 }
 0x204   : > { %v2088_v63 = vmul.f32 %v10170_v38, %v2087_v46  ;;  %v17380_v1 = vmax.f32 %v11754_v50, 0.0  ;;  %v2179_v9 = vmul.f32 0.5, %v2178_v40  ;;  %v12313_v31 = vsub.f32 %v1514_v26, %v1617_v6 }
 0x205   : > { %2825 = vmatmul.bf16.gmra.mxu2 %v17379_v55  ;;  %v1906_v59 = vmul.f32 %v1858_v61, %v11235_v49  ;;  %10173 = vrsqrt.f32 %v12298_v48  ;;  %vm2183_vm12 = vweird.f32 %v10168_v19  ;;  %v2168_v55 = vmul.f32 %v10172_v21, %v2167_v53 }
 0x206   : > { %v12309_v14 = vsub.f32 %v17380_v1, %v1617_v6  ;;  %v2089_v46 = vmul.f32 0.5, %v2088_v63  ;;  %v2180_v1 = vsub.f32 1.5, %v2179_v9  ;;  %v1809_v40 = vmul.f32 %v12313_v31, %v12313_v31  ;;  %vm2184_vm14 = vmor %vm2182_vm9, %vm2183_vm12 }
 0x207   : > { %v12318_v12 = vadd.f32 1e-05, %v1906_v59  ;;  %v12322_v35 = vadd.f32 %v1245_v42, %v1156_v60  ;;  %v2169_v26 = vmul.f32 0.5, %v2168_v55  ;;  %vm2093_vm13 = vweird.f32 %v10170_v38 }
 0x208   : > { %v1761_v50 = vmul.f32 %v12309_v14, %v12309_v14  ;;  %v2090_v6 = vsub.f32 1.5, %v2089_v46  ;;  %v1427_v61 = vadd.f32 %v1426_v51, %v1337_v10  ;;  %v2181_v37 = vmul.f32 %v10168_v19, %v2180_v1  ;;  %vm2094_vm0 = vmor %vm2092_vm10, %vm2093_vm13 }
 0x209   : > { %10175 = vrsqrt.f32 %v12318_v12  ;;  %v1753_v63 = vmul.f32 %v12274_v43, %v12274_v43  ;;  %v2170_v9 = vsub.f32 1.5, %v2169_v26  ;;  %vm2173_vm15 = vweird.f32 %v10172_v21 }
 0x20a   : > { %v1857_v53 = vadd.f32 %v1809_v40, %v1761_v50  ;;  %v2091_v59 = vmul.f32 %v10170_v38, %v2090_v6  ;;  %v17381_v60 = vmax.f32 %v11860_v24, 0.0  ;;  %v17382_v42 = vmax.f32 %v12283_v23, 0.0  ;;  %vm2174_vm1 = vmor %vm2172_vm11, %vm2173_vm15 }
 0x20b   : > { %v10174_v10 = vpop.eup %10173  ;;  %v12334_v51 = vsel %vm2184_vm14, %v10168_v19, %v2181_v37  ;;  %v17229_v50 = vmax.f32 %v12322_v35, 0.0  ;;  %v1521_v27 = vmax.f32 %v1427_v61, 0.0  ;;  %v2171_v40 = vmul.f32 %v10172_v21, %v2170_v9 }
 0x20c   : > { %v1566_v55 = vadd.f32 %v17382_v42, %v17381_v60  ;;  %v1905_v46 = vmul.f32 %v1857_v53, %v11235_v49  ;;  %v12342_v1 = vmul.f32 %v12334_v51, %v12166_v34  ;;  %v12344_v26 = vsel %vm2094_vm0, %v10170_v38, %v2091_v59 }
 0x20d   : > { %17384 = vst [vmem:[#allocation19_spill] sm:$0xff] %v12344_v26  ;;  %v2077_v6 = vmul.f32 %v10174_v10, %v12298_v48  ;;  %v12351_v11 = vmul.f32 %v12287_v33, %v12287_v33  ;;  %v2467_v37 = vmul.f32 %v12344_v26, %v12128_v30  ;;  %v1849_v34 = vadd.f32 %v12176_v25, %v1753_v63  ;;  %v1159_v25 = vpop.f32.mrf.mxu2 }
 0x20e   : > { %17383 = vst [vmem:[#allocation23_spill] sm:$0xff] %v12342_v1  ;;  %v12355_v19 = vadd.f32 1e-05, %v1905_v46  ;;  %v12358_v61 = vsel %vm2174_vm1, %v10172_v21, %v2171_v40  ;;  %v17385_v38 = vmax.f32 %v12210_v17, 0.0  ;;  %v17386_v9 = vmax.f32 %v11764_v57, 0.0  ;;  %v1248_v21 = vpop.f32.mrf.mxu3 }
 0x20f   : > { %v2078_v52 = vmul.f32 %v10174_v10, %v2077_v6  ;;  %v10176_v60 = vpop.eup %10175  ;;  %v12369_v42 = vmul.f32 %v12358_v61, %v12193_v36  ;;  %v2557_v30 = vpack.c.bf16 %v2467_v37, %v12241_v7  ;;  %vm2082_vm2 = vweird.f32 %v12298_v48 }
 0x210   : > { %v12363_v53 = vsub.f32 %v17385_v38, %v12294_v47  ;;  %v1569_v59 = vadd.f32 %v1521_v27, %v17386_v9  ;;  %10177 = vrsqrt.f32 %v12355_v19  ;;  %v2237_v17 = vmul.f32 %v10176_v60, %v12318_v12 }
 0x211   : > { %17387 = vst [vmem:[#allocation47_spill] sm:$0xff] %v12369_v42  ;;  %v2079_v63 = vmul.f32 0.5, %v2078_v52  ;;  %v12376_v46 = vmul.f32 %v11235_v49, %v1566_v55  ;;  %v17388_v40 = vmax.f32 %v11878_v45, 0.0  ;;  %2983 = vmatmul.bf16.gmra.mxu0 %v2557_v30  ;;  %v1897_v6 = vmul.f32 %v1849_v34, %v11235_v49 }
 0x212   : > { %v1624_v7 = vmul.f32 %v11235_v49, %v1569_v59  ;;  %v1249_v37 = vadd.f32 %v1248_v21, %v1159_v25  ;;  %v17389_v38 = vmax.f32 %v11718_v0, 0.0  ;;  %v2238_v52 = vmul.f32 %v10176_v60, %v2237_v17  ;;  %v17391_v25 = vld [vmem:[#allocation27_spill] sm:$0xff]  ;;  %v17392_v21 = vld [vmem:[#allocation25_spill] sm:$0xff] }
 0x213   : > { %v1565_v36 = vadd.f32 %v17229_v50, %v17388_v40  ;;  %vm2242_vm3 = vweird.f32 %v12318_v12  ;;  %v2080_v55 = vsub.f32 1.5, %v2079_v63  ;;  %vm2083_vm4 = vweird.f32 %v10174_v10 }
 0x214   : > { %v12387_v9 = vsub.f32 %v17389_v38, %v12150_v16  ;;  %v17390_v26 = vmax.f32 %v11764_v57, 0.0  ;;  %v12394_v30 = vsub.f32 %v1521_v27, %v1624_v7  ;;  %v12396_v59 = vadd.f32 1e-05, %v1897_v6  ;;  %vm2084_vm5 = vmor %vm2082_vm2, %vm2083_vm4 }
 0x215   : > { %v1520_v34 = vmax.f32 %v1249_v37, 0.0  ;;  %v17393_v40 = vpack.c.bf16 %v17391_v25, %v17392_v21  ;;  %v2239_v0 = vmul.f32 0.5, %v2238_v52  ;;  %v2081_v16 = vmul.f32 %v10174_v10, %v2080_v55  ;;  %v1428_v37 = vpop.f32.mrf.mxu1 }
 0x216   : > { %v12392_v42 = vsub.f32 %v17390_v26, %v1624_v7  ;;  %v12402_v17 = vmul.f32 %v11235_v49, %v1565_v36  ;;  %v1752_v63 = vmul.f32 %v12387_v9, %v12387_v9  ;;  %v10178_v57 = vpop.eup %10177  ;;  %v17394_v27 = vmax.f32 %v12283_v23, 0.0  ;;  %v1339_v36 = vpop.f32.mrf.mxu0 }
 0x217   : > { %2830 = vmatmul.bf16.gmra.mxu2 %v17393_v40  ;;  %v1816_v6 = vmul.f32 %v12394_v30, %v12394_v30  ;;  %10179 = vrsqrt.f32 %v12396_v59  ;;  %v2240_v38 = vsub.f32 1.5, %v2239_v0  ;;  %vm2243_vm6 = vweird.f32 %v10176_v60 }
 0x218   : > { %v12411_v26 = vsub.f32 %v17394_v27, %v12376_v46  ;;  %v1768_v7 = vmul.f32 %v12392_v42, %v12392_v42  ;;  %v2227_v48 = vmul.f32 %v10178_v57, %v12355_v19  ;;  %v12419_v52 = vsel %vm2084_vm5, %v10174_v10, %v2081_v16  ;;  %vm2244_vm8 = vmor %vm2242_vm3, %vm2243_vm6 }
 0x219   : > { %17395 = vst [vmem:[#allocation27_spill] sm:$0xff] %v12419_v52  ;;  %v2466_v23 = vmul.f32 %v12419_v52, %v12201_v2  ;;  %v17396_v25 = vmax.f32 %v11770_v13, 0.0  ;;  %v1848_v40 = vadd.f32 %v12230_v15, %v1752_v63  ;;  %v2241_v27 = vmul.f32 %v10176_v60, %v2240_v38  ;;  %v1161_v38 = vpop.f32.mrf.mxu2 }
 0x21a   : > { %v1864_v55 = vadd.f32 %v1816_v6, %v1768_v7  ;;  %v2228_v50 = vmul.f32 %v10178_v57, %v2227_v48  ;;  %vm2232_vm7 = vweird.f32 %v12355_v19  ;;  %v17397_v0 = vmax.f32 %v12322_v35, 0.0  ;;  %v1250_v35 = vpop.f32.mrf.mxu3 }
 0x21b   : > { %v1568_v21 = vadd.f32 %v1520_v34, %v17396_v25  ;;  %v2556_v2 = vpack.c.bf16 %v2466_v23, %v12281_v56  ;;  %v1896_v15 = vmul.f32 %v1848_v40, %v11235_v49  ;;  %v12438_v63 = vsel %vm2244_vm8, %v10176_v60, %v2241_v27 }
 0x21c   : > { %v12430_v1 = vsub.f32 %v17397_v0, %v12402_v17  ;;  %v1912_v10 = vmul.f32 %v1864_v55, %v11235_v49  ;;  %v2229_v7 = vmul.f32 0.5, %v2228_v50  ;;  %v12440_v6 = vadd.f32 %v1428_v37, %v1339_v36 }
 0x21d   : > { %v1623_v16 = vmul.f32 %v11235_v49, %v1568_v21  ;;  %v17399_v48 = vmax.f32 %v11735_v44, 0.0  ;;  %v10180_v25 = vpop.eup %10179  ;;  %v12449_v56 = vmul.f32 %v12438_v63, %v12269_v4  ;;  %2894 = vmatmul.bf16.gmra.mxu3 %v2556_v2  ;;  %v17400_v60 = vmax.f32 %v11770_v13, 0.0  ;;  %v1431_v40 = vpop.f32.mrf.mxu1 }
 0x21e   : > { %17398 = vst [vmem:[#allocation25_spill] sm:$0xff] %v12430_v1  ;;  %v12451_v23 = vadd.f32 1e-05, %v1912_v10  ;;  %v2230_v37 = vsub.f32 1.5, %v2229_v7  ;;  %vm2233_vm9 = vweird.f32 %v10178_v57  ;;  %v2147_v44 = vmul.f32 %v10180_v25, %v12396_v59  ;;  %v1342_v13 = vpop.f32.mrf.mxu0 }
 0x21f   : > { %v12445_v12 = vsub.f32 %v17399_v48, %v12251_v3  ;;  %v12455_v50 = vsub.f32 %v17400_v60, %v1623_v16  ;;  %v12457_v36 = vsub.f32 %v1520_v34, %v1623_v16  ;;  %v12460_v3 = vadd.f32 1e-05, %v1896_v15  ;;  %vm2234_vm10 = vmor %vm2232_vm7, %vm2233_vm9 }
 0x220   : > { %10181 = vrsqrt.f32 %v12451_v23  ;;  %v12467_v21 = vadd.f32 %v1250_v35, %v1161_v38  ;;  %v2231_v34 = vmul.f32 %v10178_v57, %v2230_v37  ;;  %v2148_v27 = vmul.f32 %v10180_v25, %v2147_v44 }
 0x221   : > { %v1767_v4 = vmul.f32 %v12455_v50, %v12455_v50  ;;  %v1815_v55 = vmul.f32 %v12457_v36, %v12457_v36  ;;  %10183 = vrsqrt.f32 %v12460_v3  ;;  %v17231_v0 = vmax.f32 %v12440_v6, 0.0 }
 0x222   : > { %v1806_v2 = vmul.f32 %v12363_v53, %v12363_v53  ;;  %v2470_v10 = vmul.f32 %v12237_v5, %v12054_v22  ;;  %v1432_v15 = vadd.f32 %v1431_v40, %v1342_v13  ;;  %v12477_v7 = vsel %vm2234_vm10, %v10178_v57, %v2231_v34  ;;  %v17403_v34 = vld [vmem:[#allocation30_spill] sm:$0xff] }
 0x223   : > { %v1863_v16 = vadd.f32 %v1815_v55, %v1767_v4  ;;  %v12481_v38 = vmul.f32 %v12411_v26, %v12411_v26  ;;  %v2149_v35 = vmul.f32 0.5, %v2148_v27  ;;  %v1759_v48 = vmul.f32 %v12445_v12, %v12445_v12  ;;  %v17404_v27 = vld [vmem:[#allocation28_spill] sm:$0xff] }
 0x224   : > { %v12487_v60 = vmul.f32 %v12477_v7, %v12313_v31  ;;  %v12491_v19 = vmul.f32 %v12430_v1, %v12430_v1  ;;  %vm2153_vm11 = vweird.f32 %v10180_v25  ;;  %v17402_v37 = vmax.f32 %v11903_v8, 0.0 }
 0x225   : > { %v1911_v22 = vmul.f32 %v1863_v16, %v11235_v49  ;;  %v2150_v57 = vsub.f32 1.5, %v2149_v35  ;;  %v1527_v4 = vmax.f32 %v1432_v15, 0.0  ;;  %vm2152_vm12 = vweird.f32 %v12396_v59 }
 0x226   : > { %17401 = vst [vmem:[#allocation48_spill] sm:$0xff] %v12487_v60  ;;  %v1572_v44 = vadd.f32 %v17231_v0, %v17402_v37  ;;  %v10182_v55 = vpop.eup %10181  ;;  %v12504_v13 = vmul.f32 %v12254_v58, %v12063_v28  ;;  %v1855_v40 = vadd.f32 %v12351_v11, %v1759_v48  ;;  %v17405_v16 = vpack.c.bf16 %v17403_v34, %v17404_v27  ;;  %vm2154_vm14 = vmor %vm2152_vm12, %vm2153_vm11  ;;  %v1164_v34 = vpop.f32.mrf.mxu2 }
 0x227   : > { %v12500_v31 = vadd.f32 1e-05, %v1911_v22  ;;  %v10184_v35 = vpop.eup %10183  ;;  %v2297_v5 = vmul.f32 %v10182_v55, %v12451_v23  ;;  %vm2302_vm13 = vweird.f32 %v12451_v23  ;;  %v2151_v15 = vmul.f32 %v10180_v25, %v2150_v57  ;;  %v1253_v27 = vpop.f32.mrf.mxu3 }
 0x228   : > { %2835 = vmatmul.bf16.gmra.mxu2 %v17405_v16  ;;  %v17406_v59 = vmax.f32 %v11789_v29, 0.0  ;;  %v17407_v37 = vmax.f32 %v11743_v18, 0.0  ;;  %v2137_v58 = vmul.f32 %v10184_v35, %v12460_v3  ;;  %vm2142_vm15 = vweird.f32 %v12460_v3 }
 0x229   : > { %10185 = vrsqrt.f32 %v12500_v31  ;;  %v17408_v11 = vmax.f32 %v11911_v62, 0.0  ;;  %v17409_v48 = vmax.f32 %v12467_v21, 0.0  ;;  %v2298_v16 = vmul.f32 %v10182_v55, %v2297_v5 }
 0x22a   : > { %v1575_v22 = vadd.f32 %v1527_v4, %v17406_v59  ;;  %v12517_v28 = vsub.f32 %v17407_v37, %v12294_v47  ;;  %v12527_v59 = vsel %vm2154_vm14, %v10180_v25, %v2151_v15  ;;  %v12530_v18 = vmul.f32 %v11235_v49, %v1572_v44 }
 0x22b   : > { %v1571_v57 = vadd.f32 %v17409_v48, %v17408_v11  ;;  %17410 = vst [vmem:[#allocation30_spill] sm:$0xff] %v12527_v59  ;;  %v12534_v47 = vmul.f32 %v12334_v51, %v12164_v39  ;;  %v2473_v37 = vmul.f32 %v12527_v59, %v12274_v43  ;;  %v2138_v0 = vmul.f32 %v10184_v35, %v2137_v58 }
 0x22c   : > { %v1630_v52 = vmul.f32 %v11235_v49, %v1575_v22  ;;  %v1903_v11 = vmul.f32 %v1855_v40, %v11235_v49  ;;  %v2299_v48 = vmul.f32 0.5, %v2298_v16  ;;  %vm2303_vm0 = vweird.f32 %v10182_v55  ;;  %v1344_v40 = vpop.f32.mrf.mxu0  ;;  %v1433_v16 = vpop.f32.mrf.mxu1 }
 0x22d   : > { %v1254_v5 = vadd.f32 %v1253_v27, %v1164_v34  ;;  %v1758_v25 = vmul.f32 %v12517_v28, %v12517_v28  ;;  %v2560_v44 = vpack.c.bf16 %v2473_v37, %v2470_v10  ;;  %v2139_v15 = vmul.f32 0.5, %v2138_v0  ;;  %vm2304_vm2 = vmor %vm2302_vm13, %vm2303_vm0  ;;  %v17412_v27 = vld [vmem:[#allocation31_spill] sm:$0xff] }
 0x22e   : > { %v17411_v60 = vmax.f32 %v11789_v29, 0.0  ;;  %v12546_v51 = vsub.f32 %v1527_v4, %v1630_v52  ;;  %v2300_v43 = vsub.f32 1.5, %v2299_v48  ;;  %v12548_v58 = vadd.f32 1e-05, %v1903_v11 }
 0x22f   : > { %v1526_v22 = vmax.f32 %v1254_v5, 0.0  ;;  %v1854_v59 = vadd.f32 %v1806_v2, %v1758_v25  ;;  %v10186_v1 = vpop.eup %10185  ;;  %2988 = vmatmul.bf16.gmra.mxu0 %v2560_v44  ;;  %v2140_v34 = vsub.f32 1.5, %v2139_v15  ;;  %vm2143_vm1 = vweird.f32 %v10184_v35  ;;  %v9994_v15 = vld [vmem:[%s17172_s3 + $0x38] sm:$0xff] }
 0x230   : > { %v12544_v39 = vsub.f32 %v17411_v60, %v1630_v52  ;;  %v1822_v29 = vmul.f32 %v12546_v51, %v12546_v51  ;;  %v2301_v10 = vmul.f32 %v10182_v55, %v2300_v43  ;;  %v2287_v52 = vmul.f32 %v10186_v1, %v12500_v31  ;;  %vm2144_vm3 = vmor %vm2142_vm15, %vm2143_vm1  ;;  %v1166_v43 = vpop.f32.mrf.mxu2  ;;  %3507 = vmatpush.bf16.msra.mxu1 %v9994_v15  ;;  %v17421_v15 = vld [vmem:[#allocation2_spill] sm:$0xff] }
 0x231   : > { %v12556_v60 = vmul.f32 %v11235_v49, %v1571_v57  ;;  %10187 = vrsqrt.f32 %v12548_v58  ;;  %v2141_v2 = vmul.f32 %v10184_v35, %v2140_v34  ;;  %v17413_v37 = vmax.f32 %v17412_v27, 0.0  ;;  %v1255_v34 = vpop.f32.mrf.mxu3 }
 0x232   : > { %v1774_v0 = vmul.f32 %v12544_v39, %v12544_v39  ;;  %v17414_v48 = vmax.f32 %v11860_v24, 0.0  ;;  %v12569_v25 = vsel %vm2304_vm2, %v10182_v55, %v2301_v10  ;;  %v2288_v57 = vmul.f32 %v10186_v1, %v2287_v52 }
 0x233   : > { %v1574_v11 = vadd.f32 %v1526_v22, %v17413_v37  ;;  %v1902_v44 = vmul.f32 %v1854_v59, %v11235_v49  ;;  %v12574_v23 = vadd.f32 %v1433_v16, %v1344_v40  ;;  %v12581_v24 = vmul.f32 %v12569_v25, %v12394_v30 }
 0x234   : > { %v1870_v4 = vadd.f32 %v1822_v29, %v1774_v0  ;;  %v12567_v5 = vsub.f32 %v17414_v48, %v12376_v46  ;;  %v12583_v46 = vsel %vm2144_vm3, %v10184_v35, %v2141_v2  ;;  %v2289_v0 = vmul.f32 0.5, %v2288_v57 }
 0x235   : > { %17415 = vst [vmem:[#allocation28_spill] sm:$0xff] %v12581_v24  ;;  %v1629_v3 = vmul.f32 %v11235_v49, %v1574_v11  ;;  %vm2293_vm4 = vweird.f32 %v10186_v1  ;;  %v2472_v59 = vmul.f32 %v12583_v46, %v12387_v9  ;;  %v12589_v40 = vadd.f32 1e-05, %v1902_v44  ;;  %v1436_v11 = vpop.f32.mrf.mxu1  ;;  %v17420_v44 = vld [vmem:[#allocation5_spill] sm:$0xff] }
 0x236   : > { %v1918_v55 = vmul.f32 %v1870_v4, %v11235_v49  ;;  %v17416_v29 = vmov %v17413_v37  ;;  %v12599_v10 = vadd.f32 %v1255_v34, %v1166_v43  ;;  %v2290_v2 = vsub.f32 1.5, %v2289_v0  ;;  %v1347_v37 = vpop.f32.mrf.mxu0 }
 0x237   : > { %v12595_v30 = vsub.f32 %v17416_v29, %v1629_v3  ;;  %v12597_v35 = vsub.f32 %v1526_v22, %v1629_v3  ;;  %v10188_v52 = vpop.eup %10187  ;;  %v2559_v4 = vpack.c.bf16 %v2472_v59, %v12504_v13  ;;  %10189 = vrsqrt.f32 %v12589_v40 }
 0x238   : > { %v12591_v16 = vadd.f32 1e-05, %v1918_v55  ;;  %v17236_v9 = vmax.f32 %v12574_v23, 0.0  ;;  %v17417_v48 = vmax.f32 %v12440_v6, 0.0  ;;  %v17418_v22 = vmax.f32 %v12467_v21, 0.0 }
 0x239   : > { %v2207_v13 = vmul.f32 %v10188_v52, %v12548_v58  ;;  %v17422_v43 = vpack.c.bf16 %v17420_v44, %v17421_v15  ;;  %v2291_v34 = vmul.f32 %v10186_v1, %v2290_v2  ;;  %vm2292_vm5 = vweird.f32 %v12500_v31  ;;  %2899 = vmatmul.bf16.gmra.mxu3 %v2559_v4 }
 0x23a   : > { %v12607_v27 = vsub.f32 %v17417_v48, %v12530_v18  ;;  %v12612_v57 = vsub.f32 %v17418_v22, %v12556_v60  ;;  %10191 = vrsqrt.f32 %v12591_v16  ;;  %v1773_v6 = vmul.f32 %v12595_v30, %v12595_v30  ;;  %vm2294_vm6 = vmor %vm2292_vm5, %vm2293_vm4 }
 0x23b   : > { %2840 = vmatmul.bf16.gmra.mxu2 %v17422_v43  ;;  %v1821_v21 = vmul.f32 %v12597_v35, %v12597_v35  ;;  %v2208_v55 = vmul.f32 %v10188_v52, %v2207_v13  ;;  %v17238_v3 = vmax.f32 %v12599_v10, 0.0  ;;  %v1437_v0 = vadd.f32 %v1436_v11, %v1347_v37 }
 0x23c   : > { %17419 = vst [vmem:[#allocation31_spill] sm:$0xff] %v12612_v57  ;;  %v1765_v59 = vmul.f32 %v12567_v5, %v12567_v5  ;;  %v12628_v29 = vsel %vm2294_vm6, %v10186_v1, %v2291_v34  ;;  %v12632_v31 = vmul.f32 %v12358_v61, %v12191_v20  ;;  %v17423_v4 = vmax.f32 %v11955_v41, 0.0 }
 0x23d   : > { %v1869_v2 = vadd.f32 %v1821_v21, %v1773_v6  ;;  %v12640_v22 = vmul.f32 %v12628_v29, %v12457_v36  ;;  %v12644_v37 = vmul.f32 %v12607_v27, %v12607_v27  ;;  %v2209_v1 = vmul.f32 0.5, %v2208_v55  ;;  %v10190_v13 = vpop.eup %10189 }
 0x23e   : > { %v1578_v48 = vadd.f32 %v17236_v9, %v17423_v4  ;;  %v1533_v11 = vmax.f32 %v1437_v0, 0.0  ;;  %v12648_v20 = vmul.f32 %v12612_v57, %v12612_v57  ;;  %vm2212_vm7 = vweird.f32 %v12548_v58 }
 0x23f   : > { %17424 = vst [vmem:[#allocation5_spill] sm:$0xff] %v12640_v22  ;;  %v1917_v61 = vmul.f32 %v1869_v2, %v11235_v49  ;;  %v1861_v44 = vadd.f32 %v12481_v38, %v1765_v59  ;;  %v2210_v36 = vsub.f32 1.5, %v2209_v1  ;;  %vm2213_vm8 = vweird.f32 %v10188_v52 }
 0x240   : > { %v10192_v15 = vpop.eup %10191  ;;  %v2197_v43 = vmul.f32 %v10190_v13, %v12589_v40  ;;  %v17425_v34 = vmax.f32 %v11982_v32, 0.0  ;;  %v12662_v0 = vmul.f32 %v11235_v49, %v1578_v48  ;;  %v17426_v2 = vmax.f32 %v17360_v54, 0.0  ;;  %vm2214_vm9 = vmor %vm2212_vm7, %vm2213_vm8 }
 0x241   : > { %v2357_v21 = vmul.f32 %v10192_v15, %v12591_v16  ;;  %v12659_v55 = vadd.f32 1e-05, %v1917_v61  ;;  %v2211_v59 = vmul.f32 %v10188_v52, %v2210_v36  ;;  %v1909_v1 = vmul.f32 %v1861_v44, %v11235_v49  ;;  %v1169_v61 = vpop.f32.mrf.mxu2 }
 0x242   : > { %v1577_v6 = vadd.f32 %v17238_v3, %v17425_v34  ;;  %v1581_v38 = vadd.f32 %v1533_v11, %v17426_v2  ;;  %v2198_v4 = vmul.f32 %v10190_v13, %v2197_v43  ;;  %v17427_v9 = vmax.f32 %v11878_v45, 0.0  ;;  %v1258_v2 = vpop.f32.mrf.mxu3 }
 0x243   : > { %v2358_v34 = vmul.f32 %v10192_v15, %v2357_v21  ;;  %10193 = vrsqrt.f32 %v12659_v55  ;;  %vm2203_vm10 = vweird.f32 %v10190_v13  ;;  %v12676_v36 = vsel %vm2214_vm9, %v10188_v52, %v2211_v59 }
 0x244   : > { %v12670_v22 = vsub.f32 %v17427_v9, %v12402_v17  ;;  %v1636_v48 = vmul.f32 %v11235_v49, %v1581_v38  ;;  %v2199_v43 = vmul.f32 0.5, %v2198_v4  ;;  %v12679_v44 = vmul.f32 %v11235_v49, %v1577_v6 }
 0x245   : > { %v12681_v45 = vadd.f32 1e-05, %v1909_v1  ;;  %v2359_v17 = vmul.f32 0.5, %v2358_v34  ;;  %v2479_v58 = vmul.f32 %v12676_v36, %v12445_v12  ;;  %v17428_v9 = vmax.f32 %v17360_v54, 0.0 }
 0x246   : > { %v12689_v3 = vsub.f32 %v1533_v11, %v1636_v48  ;;  %vm2363_vm11 = vweird.f32 %v10192_v15  ;;  %v2200_v38 = vsub.f32 1.5, %v2199_v43  ;;  %v1259_v52 = vadd.f32 %v1258_v2, %v1169_v61  ;;  %v1349_v43 = vpop.f32.mrf.mxu0 }
 0x247   : > { %v12687_v21 = vsub.f32 %v17428_v9, %v1636_v48  ;;  %10195 = vrsqrt.f32 %v12681_v45  ;;  %v2360_v59 = vsub.f32 1.5, %v2359_v17  ;;  %v2563_v6 = vpack.c.bf16 %v2479_v58, %v12534_v47  ;;  %v1438_v17 = vpop.f32.mrf.mxu1 }
 0x248   : > { %v1828_v12 = vmul.f32 %v12689_v3, %v12689_v3  ;;  %v2201_v1 = vmul.f32 %v10190_v13, %v2200_v38  ;;  %vm2202_vm12 = vweird.f32 %v12589_v40  ;;  %v1532_v54 = vmax.f32 %v1259_v52, 0.0  ;;  %v17432_v38 = vld [vmem:[#allocation33_spill] sm:$0xff] }
 0x249   : > { %v1780_v4 = vmul.f32 %v12687_v21, %v12687_v21  ;;  %v1764_v11 = vmul.f32 %v12670_v22, %v12670_v22  ;;  %v10194_v34 = vpop.eup %10193  ;;  %v2361_v48 = vmul.f32 %v10192_v15, %v2360_v59  ;;  %vm2362_vm13 = vweird.f32 %v12591_v16  ;;  %2993 = vmatmul.bf16.gmra.mxu0 %v2563_v6  ;;  %vm2204_vm14 = vmor %vm2202_vm12, %vm2203_vm10  ;;  %v17435_v6 = vld [vmem:[#allocation3_spill] sm:$0xff] }
 0x24a   : > { %v17429_v47 = vmax.f32 %v12574_v23, 0.0  ;;  %vm2364_vm15 = vmor %vm2362_vm13, %vm2363_vm11  ;;  %v2347_v40 = vmul.f32 %v10194_v34, %v12659_v55  ;;  %v12709_v58 = vsel %vm2204_vm14, %v10190_v13, %v2201_v1  ;;  %v17430_v16 = vmax.f32 %v12599_v10, 0.0  ;;  %v17434_v23 = vld [vmem:[#allocation9_spill] sm:$0xff] }
 0x24b   : > { %v1876_v2 = vadd.f32 %v1828_v12, %v1780_v4  ;;  %v17433_v52 = vmax.f32 %v17432_v38, 0.0  ;;  %v12721_v4 = vsel %vm2364_vm15, %v10192_v15, %v2361_v48  ;;  %v2478_v12 = vmul.f32 %v12709_v58, %v12517_v28 }
 0x24c   : > { %v12705_v61 = vsub.f32 %v17429_v47, %v12662_v0  ;;  %v12714_v9 = vsub.f32 %v17430_v16, %v12679_v44  ;;  %v17436_v47 = vpack.c.bf16 %v17434_v23, %v17435_v6  ;;  %v1860_v1 = vadd.f32 %v12491_v19, %v1764_v11 }
 0x24d   : > { %v1580_v59 = vadd.f32 %v1532_v54, %v17433_v52  ;;  %v1924_v13 = vmul.f32 %v1876_v2, %v11235_v49  ;;  %v10196_v57 = vpop.eup %10195  ;;  %v12729_v10 = vmul.f32 %v12721_v4, %v12546_v51  ;;  %v2348_v16 = vmul.f32 %v10194_v34, %v2347_v40 }
 0x24e   : > { %17431 = vst [vmem:[#allocation2_spill] sm:$0xff] %v12714_v9  ;;  %2845 = vmatmul.bf16.gmra.mxu2 %v17436_v47  ;;  %v1439_v24 = vadd.f32 %v1438_v17, %v1349_v43  ;;  %v2562_v23 = vpack.c.bf16 %v2478_v12, %v12632_v31  ;;  %v2267_v48 = vmul.f32 %v10196_v57, %v12681_v45  ;;  %v17438_v28 = vmax.f32 %v11903_v8, 0.0  ;;  %v1171_v17 = vpop.f32.mrf.mxu2  ;;  %v1260_v31 = vpop.f32.mrf.mxu3  ;;  %v17440_v12 = vld [vmem:[#allocation37_spill] sm:$0xff] }
 0x24f   : > { %17437 = vst [vmem:[#allocation33_spill] sm:$0xff] %v12729_v10  ;;  %v1635_v52 = vmul.f32 %v11235_v49, %v1580_v59  ;;  %v12733_v15 = vadd.f32 1e-05, %v1924_v13  ;;  %v2349_v19 = vmul.f32 0.5, %v2348_v16  ;;  %v17439_v11 = vmax.f32 %v17432_v38, 0.0 }
 0x250   : > { %v12739_v2 = vsub.f32 %v17438_v28, %v12530_v18  ;;  %v1908_v43 = vmul.f32 %v1860_v1, %v11235_v49  ;;  %vm2353_vm0 = vweird.f32 %v10194_v34  ;;  %2904 = vmatmul.bf16.gmra.mxu3 %v2562_v23  ;;  %v2268_v59 = vmul.f32 %v10196_v57, %v2267_v48 }
 0x251   : > { %v12743_v51 = vsub.f32 %v17439_v11, %v1635_v52  ;;  %v12745_v40 = vsub.f32 %v1532_v54, %v1635_v52  ;;  %10197 = vrsqrt.f32 %v12733_v15  ;;  %v1536_v6 = vmax.f32 %v1439_v24, 0.0 }
 0x252   : > { %v2350_v8 = vsub.f32 1.5, %v2349_v19  ;;  %v12753_v47 = vadd.f32 1e-05, %v1908_v43  ;;  %v2269_v54 = vmul.f32 0.5, %v2268_v59  ;;  %v17441_v13 = vmax.f32 %v17440_v12, 0.0 }
 0x253   : > { %v1779_v18 = vmul.f32 %v12743_v51, %v12743_v51  ;;  %v1827_v38 = vmul.f32 %v12745_v40, %v12745_v40  ;;  %v1261_v16 = vadd.f32 %v1260_v31, %v1171_v17  ;;  %v1771_v52 = vmul.f32 %v12739_v2, %v12739_v2 }
 0x254   : > { %v1584_v1 = vadd.f32 %v1536_v6, %v17441_v13  ;;  %v2351_v23 = vmul.f32 %v10194_v34, %v2350_v8  ;;  %vm2352_vm1 = vweird.f32 %v12659_v55  ;;  %10199 = vrsqrt.f32 %v12753_v47 }
 0x255   : > { %v1875_v24 = vadd.f32 %v1827_v38, %v1779_v18  ;;  %vm2354_vm2 = vmor %vm2352_vm1, %vm2353_vm0  ;;  %v2270_v48 = vsub.f32 1.5, %v2269_v54  ;;  %vm2273_vm3 = vweird.f32 %v10196_v57  ;;  %v1535_v28 = vmax.f32 %v1261_v16, 0.0  ;;  %v17446_v54 = vld [vmem:[#allocation46_spill] sm:$0xff] }
 0x256   : > { %v1867_v19 = vadd.f32 %v12644_v37, %v1771_v52  ;;  %v12763_v11 = vsel %vm2354_vm2, %v10194_v34, %v2351_v23  ;;  %vm2272_vm4 = vweird.f32 %v12681_v45  ;;  %v17442_v17 = vmax.f32 %v11911_v62, 0.0  ;;  %v17444_v37 = vld [vmem:[#allocation39_spill] sm:$0xff] }
 0x257   : > { %v1923_v43 = vmul.f32 %v1875_v24, %v11235_v49  ;;  %v10198_v31 = vpop.eup %10197  ;;  %v12774_v59 = vmul.f32 %v12763_v11, %v12597_v35  ;;  %v2271_v8 = vmul.f32 %v10196_v57, %v2270_v48  ;;  %v1639_v18 = vmul.f32 %v11235_v49, %v1584_v1  ;;  %vm2274_vm5 = vmor %vm2272_vm4, %vm2273_vm3 }
 0x258   : > { %v12770_v55 = vsub.f32 %v17442_v17, %v12556_v60  ;;  %v17445_v34 = vmax.f32 %v17444_v37, 0.0  ;;  %v2417_v45 = vmul.f32 %v10198_v31, %v12733_v15  ;;  %v2482_v13 = vmul.f32 %v12438_v63, %v17446_v54  ;;  %v17448_v54 = vld [vmem:[#allocation14_spill] sm:$0xff] }
 0x259   : > { %17443 = vst [vmem:[#allocation9_spill] sm:$0xff] %v12774_v59  ;;  %v12782_v62 = vadd.f32 1e-05, %v1923_v43  ;;  %v1915_v60 = vmul.f32 %v1867_v19, %v11235_v49  ;;  %v1825_v35 = vmul.f32 %v12705_v61, %v12705_v61  ;;  %v1824_v16 = vmul.f32 %v12714_v9, %v12714_v9  ;;  %v9993_v19 = vld [vmem:[%s17172_s3 + $0x30] sm:$0xff] }
 0x25a   : > { %v1583_v38 = vadd.f32 %v1535_v28, %v17445_v34  ;;  %v12789_v1 = vsel %vm2274_vm5, %v10196_v57, %v2271_v8  ;;  %v1770_v52 = vmul.f32 %v12770_v55, %v12770_v55  ;;  %v10200_v23 = vpop.eup %10199  ;;  %v2418_v24 = vmul.f32 %v10198_v31, %v2417_v45  ;;  %3508 = vmatpush.bf16.msra.mxu1 %v9993_v19  ;;  %v17449_v59 = vld [vmem:[#allocation4_spill] sm:$0xff] }
 0x25b   : > { %v2485_v63 = vmul.f32 %v12789_v1, %v12567_v5  ;;  %10201 = vrsqrt.f32 %v12782_v62  ;;  %vm2422_vm6 = vweird.f32 %v12733_v15  ;;  %v2257_v57 = vmul.f32 %v10200_v23, %v12753_v47 }
 0x25c   : > { %v1638_v48 = vmul.f32 %v11235_v49, %v1583_v38  ;;  %v12802_v43 = vsub.f32 %v1536_v6, %v1639_v18  ;;  %v12804_v17 = vadd.f32 1e-05, %v1915_v60  ;;  %v2419_v8 = vmul.f32 0.5, %v2418_v24 }
 0x25d   : > { %v2566_v34 = vpack.c.bf16 %v2485_v63, %v2482_v13  ;;  %v1866_v5 = vadd.f32 %v12648_v20, %v1770_v52  ;;  %v17447_v38 = vmax.f32 %v11955_v41, 0.0  ;;  %v17450_v9 = vpack.c.bf16 %v17448_v54, %v17449_v59 }
 0x25e   : > { %vm2423_vm7 = vweird.f32 %v10198_v31  ;;  %v2258_v10 = vmul.f32 %v10200_v23, %v2257_v57  ;;  %vm2262_vm8 = vweird.f32 %v12753_v47  ;;  %10203 = vrsqrt.f32 %v12804_v17 }
 0x25f   : > { %v12810_v45 = vsub.f32 %v17447_v38, %v12662_v0  ;;  %2850 = vmatmul.bf16.gmra.mxu2 %v17450_v9  ;;  %v2420_v6 = vsub.f32 1.5, %v2419_v8  ;;  %2998 = vmatmul.bf16.gmra.mxu0 %v2566_v34  ;;  %v12817_v13 = vsub.f32 %v1535_v28, %v1638_v48  ;;  %v1914_v20 = vmul.f32 %v1866_v5, %v11235_v49  ;;  %vm2424_vm10 = vmor %vm2422_vm6, %vm2423_vm7 }
 0x260   : > { %v2259_v0 = vmul.f32 0.5, %v2258_v10  ;;  %vm2263_vm9 = vweird.f32 %v10200_v23  ;;  %v1831_v9 = vmul.f32 %v12802_v43, %v12802_v43  ;;  %v17451_v59 = vmax.f32 %v11982_v32, 0.0 }
 0x261   : > { %v1777_v41 = vmul.f32 %v12810_v45, %v12810_v45  ;;  %v10202_v52 = vpop.eup %10201  ;;  %v2421_v24 = vmul.f32 %v10198_v31, %v2420_v6  ;;  %v12829_v63 = vadd.f32 1e-05, %v1914_v20  ;;  %v17452_v19 = vmax.f32 %v17440_v12, 0.0  ;;  %vm2264_vm11 = vmor %vm2262_vm8, %vm2263_vm9 }
 0x262   : > { %v12827_v60 = vsub.f32 %v17451_v59, %v12679_v44  ;;  %v2407_v10 = vmul.f32 %v10202_v52, %v12782_v62  ;;  %v2260_v8 = vsub.f32 1.5, %v2259_v0  ;;  %v17453_v44 = vmax.f32 %v17444_v37, 0.0 }
 0x263   : > { %v1873_v28 = vadd.f32 %v1825_v35, %v1777_v41  ;;  %v12833_v57 = vsub.f32 %v17452_v19, %v1639_v18  ;;  %v12845_v5 = vsel %vm2424_vm10, %v10198_v31, %v2421_v24  ;;  %v1830_v12 = vmul.f32 %v12817_v13, %v12817_v13 }
 0x264   : > { %v1776_v32 = vmul.f32 %v12827_v60, %v12827_v60  ;;  %v12843_v34 = vsub.f32 %v17453_v44, %v1638_v48  ;;  %10205 = vrsqrt.f32 %v12829_v63  ;;  %v10204_v18 = vpop.eup %10203  ;;  %v12853_v35 = vmul.f32 %v12845_v5, %v12689_v3  ;;  %v17455_v44 = vld [vmem:[#allocation35_spill] sm:$0xff] }
 0x265   : > { %v1921_v15 = vmul.f32 %v1873_v28, %v11235_v49  ;;  %v2408_v38 = vmul.f32 %v10202_v52, %v2407_v10  ;;  %v2261_v54 = vmul.f32 %v10200_v23, %v2260_v8  ;;  %v2481_v31 = vmul.f32 %v12477_v7, %v12309_v14  ;;  %v12872_v7 = vpop.f32.mrf.mxu2 }
 0x266   : > { %v1872_v6 = vadd.f32 %v1824_v16, %v1776_v32  ;;  %v2327_v37 = vmul.f32 %v10204_v18, %v12804_v17  ;;  %v1783_v20 = vmul.f32 %v12833_v57, %v12833_v57  ;;  %v1782_v16 = vmul.f32 %v12843_v34, %v12843_v34  ;;  %v17454_v32 = vld [vmem:[#allocation7_spill] sm:$0xff] }
 0x267   : > { %v12861_v48 = vadd.f32 1e-05, %v1921_v15  ;;  %v2409_v41 = vmul.f32 0.5, %v2408_v38  ;;  %v12865_v3 = vsel %vm2264_vm11, %v10200_v23, %v2261_v54  ;;  %vm2413_vm12 = vweird.f32 %v10202_v52 }
 0x268   : > { %v1920_v0 = vmul.f32 %v1872_v6, %v11235_v49  ;;  %v2484_v47 = vmul.f32 %v12865_v3, %v12670_v22  ;;  %v2328_v14 = vmul.f32 %v10204_v18, %v2327_v37  ;;  %v1879_v28 = vadd.f32 %v1831_v9, %v1783_v20 }
 0x269   : > { %10207 = vrsqrt.f32 %v12861_v48  ;;  %v2410_v59 = vsub.f32 1.5, %v2409_v41  ;;  %v1878_v23 = vadd.f32 %v1830_v12, %v1782_v16  ;;  %v2585_v15 = vpack.c.bf16 %v17455_v44, %v17454_v32  ;;  %v17456_v32 = vld [vmem:[#allocation32_spill] sm:$0xff] }
 0x26a   : > { %v12875_v24 = vadd.f32 1e-05, %v1920_v0  ;;  %v10206_v19 = vpop.eup %10205  ;;  %v2565_v10 = vpack.c.bf16 %v2484_v47, %v2481_v31  ;;  %v2329_v8 = vmul.f32 0.5, %v2328_v14  ;;  %vm2412_vm13 = vweird.f32 %v12782_v62 }
 0x26b   : > { %v2411_v38 = vmul.f32 %v10202_v52, %v2410_v59  ;;  %v2317_v22 = vmul.f32 %v10206_v19, %v12829_v63  ;;  %vm2414_vm14 = vmor %vm2412_vm13, %vm2413_vm12  ;;  %vm2333_vm15 = vweird.f32 %v10204_v18  ;;  %v1927_v9 = vmul.f32 %v1879_v28, %v11235_v49 }
 0x26c   : > { %10209 = vrsqrt.f32 %v12875_v24  ;;  %2909 = vmatmul.bf16.gmra.mxu3 %v2565_v10  ;;  %v2330_v54 = vsub.f32 1.5, %v2329_v8  ;;  %v1926_v12 = vmul.f32 %v1878_v23, %v11235_v49  ;;  %vm2332_vm0 = vweird.f32 %v12804_v17 }
 0x26d   : > { %v12885_v6 = vsel %vm2414_vm14, %v10202_v52, %v2411_v38  ;;  %v2318_v31 = vmul.f32 %v10206_v19, %v2317_v22  ;;  %v12892_v41 = vadd.f32 1e-05, %v1927_v9  ;;  %vm2334_vm1 = vmor %vm2332_vm0, %vm2333_vm15  ;;  %v2488_v17 = vmul.f32 %v12569_v25, %v12392_v42  ;;  %v12905_v23 = vpop.f32.mrf.mxu2  ;;  %v17457_v9 = vld [vmem:[#allocation13_spill] sm:$0xff] }
 0x26e   : > { %v12890_v62 = vmul.f32 %v12885_v6, %v12745_v40  ;;  %v2331_v20 = vmul.f32 %v10204_v18, %v2330_v54  ;;  %v12894_v0 = vadd.f32 1e-05, %v1926_v12  ;;  %vm2323_vm2 = vweird.f32 %v10206_v19 }
 0x26f   : > { %v10208_v37 = vpop.eup %10207  ;;  %2855 = vmatmul.bf16.gmra.mxu2 %v2585_v15  ;;  %v2319_v16 = vmul.f32 0.5, %v2318_v31  ;;  %10211 = vrsqrt.f32 %v12892_v41  ;;  %vm2322_vm3 = vweird.f32 %v12829_v63  ;;  %v12911_v44 = vmul.f32 %v12583_v46, %v17456_v32 }
 0x270   : > { %v2387_v47 = vmul.f32 %v10208_v37, %v12861_v48  ;;  %v12897_v52 = vsel %vm2334_vm1, %v10204_v18, %v2331_v20  ;;  %10213 = vrsqrt.f32 %v12894_v0  ;;  %vm2324_vm4 = vmor %vm2322_vm3, %vm2323_vm2  ;;  %v2487_v15 = vmul.f32 %v12628_v29, %v12455_v50 }
 0x271   : > { %v2491_v14 = vmul.f32 %v12897_v52, %v12739_v2  ;;  %v2320_v59 = vsub.f32 1.5, %v2319_v16  ;;  %vm2393_vm5 = vweird.f32 %v10208_v37  ;;  %v2583_v12 = vpack.c.bf16 %v12911_v44, %v17457_v9  ;;  %v17459_v16 = vld [vmem:[#allocation15_spill] sm:$0xff] }
 0x272   : > { %v10210_v40 = vpop.eup %10209  ;;  %v2388_v28 = vmul.f32 %v10208_v37, %v2387_v47  ;;  %vm2392_vm6 = vweird.f32 %v12861_v48  ;;  %vm2382_vm9 = vweird.f32 %v12875_v24  ;;  %v12931_v48 = vmul.f32 %v12676_v36, %v12287_v33  ;;  %v17461_v36 = vld [vmem:[#allocation23_spill] sm:$0xff] }
 0x273   : > { %v2377_v10 = vmul.f32 %v10210_v40, %v12875_v24  ;;  %v2569_v18 = vpack.c.bf16 %v2491_v14, %v2488_v17  ;;  %v2321_v8 = vmul.f32 %v10206_v19, %v2320_v59  ;;  %vm2383_vm7 = vweird.f32 %v10210_v40  ;;  %vm2394_vm8 = vmor %vm2392_vm6, %vm2393_vm5  ;;  %v9992_v24 = vld [vmem:[%s17172_s3 + $0x28] sm:$0xff] }
 0x274   : > { %v2389_v42 = vmul.f32 0.5, %v2388_v28  ;;  %vm2384_vm10 = vmor %vm2382_vm9, %vm2383_vm7  ;;  %v2493_v32 = vmul.f32 %v12763_v11, %v12595_v30  ;;  %3509 = vmatpush.bf16.msra.mxu1 %v9992_v24  ;;  %vm2442_vm12 = vweird.f32 %v12894_v0  ;;  %v12954_v30 = vmul.f32 %v12709_v58, %v12363_v53  ;;  %v17463_v53 = vld [vmem:[#allocation11_spill] sm:$0xff]  ;;  %v17464_v58 = vld [vmem:[#allocation22_spill] sm:$0xff] }
 0x275   : > { %v2378_v25 = vmul.f32 %v10210_v40, %v2377_v10  ;;  %3003 = vmatmul.bf16.gmra.mxu0 %v2569_v18  ;;  %v12913_v2 = vsel %vm2324_vm4, %v10206_v19, %v2321_v8  ;;  %v10212_v22 = vpop.eup %10211  ;;  %v17458_v19 = vld [vmem:[#allocation6_spill] sm:$0xff]  ;;  %v12933_v10 = vpop.f32.mrf.mxu2  ;;  %vm2452_vm15 = vweird.f32 %v12892_v41 }
 0x276   : > { %v2390_v38 = vsub.f32 1.5, %v2389_v42  ;;  %v2490_v54 = vmul.f32 %v12913_v2, %v12770_v55  ;;  %v10214_v31 = vpop.eup %10213  ;;  %v2447_v46 = vmul.f32 %v10212_v22, %v12892_v41  ;;  %v2531_v47 = vmul.f32 %v17459_v16, %v17458_v19 }
 0x277   : > { %v2379_v63 = vmul.f32 0.5, %v2378_v25  ;;  %v2437_v17 = vmul.f32 %v10214_v31, %v12894_v0  ;;  %vm2443_vm11 = vweird.f32 %v10214_v31  ;;  %vm2453_vm14 = vweird.f32 %v10212_v22 }
 0x278   : > { %v2391_v20 = vmul.f32 %v10208_v37, %v2390_v38  ;;  %v2568_v50 = vpack.c.bf16 %v2490_v54, %v2487_v15  ;;  %v2448_v59 = vmul.f32 %v10212_v22, %v2447_v46  ;;  %v2494_v54 = vmul.f32 %v12721_v4, %v12544_v39  ;;  %vm2444_vm13 = vmor %vm2442_vm12, %vm2443_vm11  ;;  %v17462_v39 = vld [vmem:[#allocation47_spill] sm:$0xff] }
 0x279   : > { %v2380_v29 = vsub.f32 1.5, %v2379_v63  ;;  %v2438_v28 = vmul.f32 %v10214_v31, %v2437_v17  ;;  %v2499_v46 = vmul.f32 %v12885_v6, %v12743_v51  ;;  %v2586_v4 = vpack.c.bf16 %v12954_v30, %v17462_v39  ;;  %vm2454_vm0 = vmor %vm2452_vm15, %vm2453_vm14  ;;  %v17465_v6 = vld [vmem:[#allocation18_spill] sm:$0xff] }
 0x27a   : > { %v12927_v55 = vsel %vm2394_vm8, %v10208_v37, %v2391_v20  ;;  %v17460_v37 = vld [vmem:[#allocation12_spill] sm:$0xff]  ;;  %v2449_v15 = vmul.f32 0.5, %v2448_v59  ;;  %v12971_v51 = vmul.f32 %v12789_v1, %v12411_v26  ;;  %v2979_v59 = vpop.f32.mrf.mxu0 }
 0x27b   : > { %v2381_v14 = vmul.f32 %v10210_v40, %v2380_v29  ;;  %v2439_v8 = vmul.f32 0.5, %v2438_v28  ;;  %v2588_v42 = vpack.c.bf16 %v2531_v47, %v17460_v37  ;;  %v2497_v25 = vmul.f32 %v12927_v55, %v12810_v45  ;;  %v17467_v37 = vld [vmem:[#allocation48_spill] sm:$0xff] }
 0x27c   : > { %2914 = vmatmul.bf16.gmra.mxu3 %v2568_v50  ;;  %v2450_v11 = vsub.f32 1.5, %v2449_v15  ;;  %v2590_v41 = vpack.c.bf16 %v12971_v51, %v12449_v56 }
 0x27d   : > { %v12935_v18 = vsel %vm2384_vm10, %v10210_v40, %v2381_v14  ;;  %v2587_v40 = vpack.c.bf16 %v12931_v48, %v17461_v36  ;;  %v2440_v38 = vsub.f32 1.5, %v2439_v8  ;;  %v2572_v45 = vpack.c.bf16 %v2497_v25, %v2494_v54  ;;  %v12964_v16 = vpop.f32.mrf.mxu2  ;;  %v17466_v8 = vld [vmem:[#allocation25_spill] sm:$0xff]  ;;  %v17469_v25 = vld [vmem:[#allocation26_spill] sm:$0xff]  ;;  %v9989_v48 = vld [vmem:[%s17172_s3 + $0x10] sm:$0xff] }
 0x27e   : > { %v2496_v33 = vmul.f32 %v12935_v18, %v12827_v60  ;;  %v2451_v47 = vmul.f32 %v10212_v22, %v2450_v11  ;;  %v12984_v24 = vmul.f32 %v12865_v3, %v17466_v8  ;;  %v17470_v3 = vld [vmem:[#allocation21_spill] sm:$0xff]  ;;  %v13023_v8 = vmul.f32 %v12927_v55, %v12705_v61  ;;  %v17487_v61 = vld [vmem:[#allocation8_spill] sm:$0xff] }
 0x27f   : > { %2860 = vmatmul.bf16.gmra.mxu2 %v2588_v42  ;;  %v2441_v20 = vmul.f32 %v10214_v31, %v2440_v38  ;;  %v17468_v42 = vld [vmem:[#allocation16_spill] sm:$0xff] }
 0x280   : > { %v2571_v63 = vpack.c.bf16 %v2496_v33, %v2493_v32  ;;  %v2455_v50 = vsel %vm2454_vm0, %v10212_v22, %v2451_v47  ;;  %v2500_v22 = vmul.f32 %v12845_v5, %v12687_v21  ;;  %v2543_v32 = vmul.f32 %v17469_v25, %v17468_v42  ;;  %v9991_v5 = vld [vmem:[%s17172_s3 + $0x20] sm:$0xff]  ;;  %v17471_v38 = vld [vmem:[#allocation28_spill] sm:$0xff]  ;;  %v17476_v47 = vld [vmem:[#allocation5_spill] sm:$0xff] }
 0x281   : > { %v12956_v60 = vsel %vm2444_vm13, %v10214_v31, %v2441_v20  ;;  %v2537_v31 = vmul.f32 %v17464_v58, %v17463_v53  ;;  %v2503_v17 = vmul.f32 %v2455_v50, %v12833_v57  ;;  %v2589_v57 = vpack.c.bf16 %v12984_v24, %v17467_v37  ;;  %3510 = vmatpush.bf16.msra.mxu1 %v9991_v5  ;;  %v17473_v20 = vld [vmem:[#allocation41_spill] sm:$0xff] }
 0x282   : > { %v2502_v19 = vmul.f32 %v12956_v60, %v12843_v34  ;;  %v2890_v34 = vpop.f32.mrf.mxu3  ;;  %v12996_v21 = vmul.f32 %v12897_v52, %v12607_v27  ;;  %v2594_v15 = vpack.c.bf16 %v2543_v32, %v17470_v3  ;;  %v17482_v32 = vld [vmem:[#allocation24_spill] sm:$0xff]  ;;  %v17483_v3 = vld [vmem:[#allocation33_spill] sm:$0xff] }
 0x283   : > { %v2591_v29 = vpack.c.bf16 %v2537_v31, %v17465_v6  ;;  %v2891_v14 = vadd.f32 %v2890_v34, %v12872_v7  ;;  %v2575_v1 = vpack.c.bf16 %v2503_v17, %v2500_v22  ;;  %v12988_v7 = vpop.f32.mrf.mxu0  ;;  %v17477_v31 = vld [vmem:[#allocation36_spill] sm:$0xff]  ;;  %v17478_v34 = vld [vmem:[#allocation10_spill] sm:$0xff]  ;;  %v17480_v17 = vld [vmem:[#allocation29_spill] sm:$0xff] }
 0x284   : > { %v2574_v0 = vpack.c.bf16 %v2502_v19, %v2499_v46  ;;  %v2593_v54 = vpack.c.bf16 %v12996_v21, %v17471_v38  ;;  %v17474_v46 = vld [vmem:[#allocation31_spill] sm:$0xff]  ;;  %v17475_v19 = vld [vmem:[#allocation38_spill] sm:$0xff]  ;;  %v2508_v6 = vmul.f32 %v17478_v34, %v17477_v31  ;;  %v17481_v22 = vld [vmem:[#allocation40_spill] sm:$0xff] }
 0x285   : > { %3008 = vmatmul.bf16.gmra.mxu0 %v2572_v45  ;;  %v12980_v28 = vadd.f32 %v2979_v59, %v2891_v14  ;;  %v2811_v26 = vpop.f32.mrf.mxu2  ;;  %v13010_v27 = vmul.f32 %v12913_v2, %v17474_v46  ;;  %v17489_v31 = vld [vmem:[#allocation44_spill] sm:$0xff]  ;;  %v17490_v34 = vld [vmem:[#allocation27_spill] sm:$0xff] }
 0x287   : > { %v2592_v53 = vpack.c.bf16 %v13010_v27, %v17476_v47 }
 0x28a   : > { %v13006_v11 = vpop.f32.mrf.mxu3 }
 0x28c   : > { %2919 = vmatmul.bf16.gmra.mxu3 %v2571_v63  ;;  %v17472_v63 = vld [vmem:[#allocation34_spill] sm:$0xff] }
 0x28d   : > { %v12992_v33 = vpop.f32.mrf.mxu2  ;;  %v2509_v45 = vmul.f32 %v17473_v20, %v17472_v63  ;;  %v17484_v20 = vld [vmem:[#allocation42_spill] sm:$0xff] }
 0x28e   : > { %v2984_v52 = vpop.f32.mrf.mxu0 }
 0x28f   : > { %2865 = vmatmul.bf16.gmra.mxu2 %v2591_v29  ;;  %v17479_v29 = vld [vmem:[#allocation20_spill] sm:$0xff] }
 0x290   : > { %v2549_v14 = vmul.f32 %v17480_v17, %v17479_v29 }
 0x292   : > { %v2597_v5 = vpack.c.bf16 %v2549_v14, %v17482_v32  ;;  %v17491_v14 = vld [vmem:[#allocation43_spill] sm:$0xff]  ;;  %v17493_v32 = vld [vmem:[#allocation30_spill] sm:$0xff] }
 0x295   : > { %3013 = vmatmul.bf16.gmra.mxu0 %v2575_v1  ;;  %v2816_v58 = vpop.f32.mrf.mxu2  ;;  %v2577_v1 = vpack.c.bf16 %v2508_v6, %v17481_v22  ;;  %v2514_v6 = vmul.f32 %v17490_v34, %v17489_v31  ;;  %v13047_v22 = vmul.f32 %v2455_v50, %v12802_v43  ;;  %v17494_v50 = vld [vmem:[#allocation17_spill] sm:$0xff] }
 0x296   : > { %v13025_v42 = vpop.f32.mrf.mxu0 }
 0x29c   : > { %2924 = vmatmul.bf16.gmra.mxu3 %v2574_v0  ;;  %v2578_v0 = vpack.c.bf16 %v2509_v45, %v17475_v19  ;;  %v17485_v45 = vld [vmem:[#allocation19_spill] sm:$0xff] }
 0x29d   : > { %v2818_v63 = vpop.f32.mrf.mxu2  ;;  %v2515_v46 = vmul.f32 %v17485_v45, %v17484_v20 }
 0x29f   : > { %2870 = vmatmul.bf16.gmra.mxu2 %v2594_v15  ;;  %v2596_v15 = vpack.c.bf16 %v13023_v8, %v17483_v3  ;;  %v2581_v55 = vpack.c.bf16 %v2515_v46, %v17487_v61  ;;  %v2550_v46 = vmul.f32 %v12956_v60, %v12817_v13 }
 0x2a0   : > { %v2895_v59 = vpop.f32.mrf.mxu3 }
 0x2a1   : > { %v2896_v2 = vadd.f32 %v2895_v59, %v12933_v10  ;;  %v17486_v10 = vld [vmem:[#allocation2_spill] sm:$0xff]  ;;  %v2580_v59 = vpack.c.bf16 %v2514_v6, %v17491_v14  ;;  %v2598_v61 = vpack.c.bf16 %v2550_v46, %v12890_v62 }
 0x2a2   : > { %v13036_v19 = vmul.f32 %v12935_v18, %v17486_v10  ;;  %v9990_v18 = vld [vmem:[%s17172_s3 + $0x18] sm:$0xff] }
 0x2a3   : > { %v13027_v25 = vadd.f32 %v2984_v52, %v2896_v2  ;;  %3511 = vmatpush.bf16.msra.mxu1 %v9990_v18  ;;  %v17492_v2 = vld [vmem:[#allocation45_spill] sm:$0xff] }
 0x2a5   : > { %3018 = vmatmul.bf16.gmra.mxu0 %v2578_v0  ;;  %v17488_v0 = vld [vmem:[#allocation9_spill] sm:$0xff]  ;;  %v2821_v45 = vpop.f32.mrf.mxu2 }
 0x2a6   : > { %v2595_v52 = vpack.c.bf16 %v13036_v19, %v17488_v0 }
 0x2a7   : > { %3512 = vmatpush.bf16.msra.mxu1 %v9989_v48 }
 0x2a8   : > { %v13043_v17 = vpop.f32.mrf.mxu3 }
 0x2ac   : > { %2929 = vmatmul.bf16.gmra.mxu3 %v2577_v1  ;;  %v2989_v29 = vpop.f32.mrf.mxu0  ;;  %v2599_v1 = vpack.c.bf16 %v13047_v22, %v12853_v35 }
 0x2ad   : > { %v13064_v0 = vpop.f32.mrf.mxu2 }
 0x2af   : > { %2875 = vmatmul.bf16.gmra.mxu2 %v2597_v5  ;;  %v2521_v5 = vmul.f32 %v17493_v32, %v17492_v2 }
 0x2b1   : > { %v2584_v10 = vpack.c.bf16 %v2521_v5, %v17494_v50 }
 0x2b4   : > { %v13056_v20 = vpop.f32.mrf.mxu0 }
 0x2b5   : > { %3023 = vmatmul.bf16.gmra.mxu0 %v2581_v55  ;;  %v2826_v13 = vpop.f32.mrf.mxu2 }
 0x2bc   : > { %2934 = vmatmul.bf16.gmra.mxu3 %v2580_v59  ;;  %v2900_v43 = vpop.f32.mrf.mxu3  ;;  %v9988_v59 = vld [vmem:[%s17172_s3 + $0x8] sm:$0xff] }
 0x2bd   : > { %v2901_v19 = vadd.f32 %v2900_v43, %v2811_v26  ;;  %v13079_v44 = vpop.f32.mrf.mxu2  ;;  %3513 = vmatpush.bf16.msra.mxu1 %v9988_v59 }
 0x2bf   : > { %v13062_v55 = vadd.f32 %v2989_v29, %v2901_v19 }
 0x2c4   : > { %v13069_v31 = vpop.f32.mrf.mxu3 }
 0x2c5   : > { %3028 = vmatmul.bf16.gmra.mxu0 %v2584_v10 }
 0x2c6   : > { %v2994_v35 = vpop.f32.mrf.mxu0 }
 0x2cc   : > { %2939 = vmatmul.bf16.gmra.mxu3 %v2583_v12 }
 0x2ce   : > { %v2996_v34 = vpop.f32.mrf.mxu0 }
 0x2d3   : > { %v2905_v60 = vpop.f32.mrf.mxu3 }
 0x2d4   : > { %v2906_v62 = vadd.f32 %v2905_v60, %v2816_v58 }
 0x2d5   : > { %3033 = vmatmul.bf16.gmra.mxu0 %v2587_v40  ;;  %v2831_v40 = vpop.f32.mrf.mxu2 }
 0x2d6   : > { %v13074_v26 = vadd.f32 %v2994_v35, %v2906_v62 }
 0x2db   : > { %v2907_v29 = vpop.f32.mrf.mxu3 }
 0x2dc   : > { %2944 = vmatmul.bf16.gmra.mxu3 %v2586_v4  ;;  %v2999_v6 = vpop.f32.mrf.mxu0  ;;  %v2908_v9 = vadd.f32 %v2907_v29, %v2818_v63 }
 0x2dd   : > { %v13096_v63 = vpop.f32.mrf.mxu2 }
 0x2de   : > { %v13081_v12 = vadd.f32 %v2996_v34, %v2908_v9  ;;  %v2893_v34 = vadd.f32 %v13006_v11, %v12905_v23 }
 0x2e4   : > { %v13089_v36 = vpop.f32.mrf.mxu0 }
 0x2e5   : > { %3038 = vmatmul.bf16.gmra.mxu0 %v2590_v41  ;;  %v2836_v41 = vpop.f32.mrf.mxu2 }
 0x2ec   : > { %2949 = vmatmul.bf16.gmra.mxu3 %v2589_v57 }
 0x2ed   : > { %v13116_v21 = vpop.f32.mrf.mxu2 }
 0x2ef   : > { %v2910_v30 = vpop.f32.mrf.mxu3 }
 0x2f0   : > { %v2911_v39 = vadd.f32 %v2910_v30, %v2821_v45 }
 0x2f2   : > { %v13094_v4 = vadd.f32 %v2999_v6, %v2911_v39  ;;  %v3004_v58 = vpop.f32.mrf.mxu0  ;;  %v2982_v6 = vadd.f32 %v12988_v7, %v2893_v34 }
 0x2f5   : > { %3043 = vmatmul.bf16.gmra.mxu0 %v2593_v54 }
 0x2f7   : > { %v13101_v56 = vpop.f32.mrf.mxu3 }
 0x2fa   : > { %v13103_v51 = vpop.f32.mrf.mxu0 }
 0x2fc   : > { %2954 = vmatmul.bf16.gmra.mxu3 %v2592_v53  ;;  %v2841_v53 = vpop.f32.mrf.mxu2 }
 0x2ff   : > { %v2915_v24 = vpop.f32.mrf.mxu3 }
 0x300   : > { %v2916_v37 = vadd.f32 %v2915_v24, %v2826_v13 }
 0x302   : > { %v13108_v57 = vadd.f32 %v3004_v58, %v2916_v37  ;;  %v3009_v14 = vpop.f32.mrf.mxu0  ;;  %v3060_v58 = vmax.f32 %v2982_v6, 0.0  ;;  %v9987_v37 = vld [vmem:[%s17172_s3] sm:$0xff] }
 0x303   : > { %3514 = vmatpush.bf16.msra.mxu1 %v9987_v37 }
 0x304   : > { %v2843_v8 = vpop.f32.mrf.mxu2 }
 0x305   : > { %3048 = vmatmul.bf16.gmra.mxu0 %v2596_v15 }
 0x307   : > { %v13118_v38 = vpop.f32.mrf.mxu3 }
 0x30a   : > { %v13120_v54 = vpop.f32.mrf.mxu0 }
 0x30c   : > { %2959 = vmatmul.bf16.gmra.mxu3 %v2595_v52  ;;  %v2846_v46 = vpop.f32.mrf.mxu2 }
 0x30f   : > { %v2920_v27 = vpop.f32.mrf.mxu3 }
 0x310   : > { %v2921_v47 = vadd.f32 %v2920_v27, %v2831_v40 }
 0x312   : > { %v13122_v22 = vadd.f32 %v3009_v14, %v2921_v47  ;;  %v3014_v18 = vpop.f32.mrf.mxu0 }
 0x314   : > { %v2848_v50 = vpop.f32.mrf.mxu2 }
 0x315   : > { %3053 = vmatmul.bf16.gmra.mxu0 %v2599_v1  ;;  %v3059_v1 = vmax.f32 %v12980_v28, 0.0 }
 0x317   : > { %v13124_v2 = vpop.f32.mrf.mxu3 }
 0x31a   : > { %v13126_v32 = vpop.f32.mrf.mxu0 }
 0x31c   : > { %2964 = vmatmul.bf16.gmra.mxu3 %v2598_v61  ;;  %v2851_v48 = vpop.f32.mrf.mxu2 }
 0x31f   : > { %v2925_v3 = vpop.f32.mrf.mxu3 }
 0x320   : > { %v2926_v15 = vadd.f32 %v2925_v3, %v2836_v41 }
 0x322   : > { %v13128_v5 = vadd.f32 %v3014_v18, %v2926_v15  ;;  %v3019_v45 = vpop.f32.mrf.mxu0 }
 0x327   : > { %v13130_v52 = vpop.f32.mrf.mxu3 }
 0x32a   : > { %v3021_v43 = vpop.f32.mrf.mxu0 }
 0x32f   : > { %v2930_v10 = vpop.f32.mrf.mxu3 }
 0x330   : > { %v2931_v19 = vadd.f32 %v2930_v10, %v2841_v53 }
 0x332   : > { %v3020_v35 = vadd.f32 %v3019_v45, %v2931_v19  ;;  %v3024_v60 = vpop.f32.mrf.mxu0  ;;  %v2898_v19 = vadd.f32 %v13043_v17, %v12964_v16 }
 0x334   : > { %v3075_v13 = vmax.f32 %v3020_v35, 0.0 }
 0x336   : > { %v3091_v61 = vadd.f32 %v3075_v13, %v3059_v1 }
 0x337   : > { %v2932_v62 = vpop.f32.mrf.mxu3 }
 0x338   : > { %v3107_v29 = vmul.f32 %v3091_v61, %v11235_v49  ;;  %v2933_v9 = vadd.f32 %v2932_v62, %v2843_v8  ;;  %v2853_v8 = vpop.f32.mrf.mxu2 }
 0x33a   : > { %v13137_v40 = vsub.f32 %v3059_v1, %v3107_v29  ;;  %v13139_v30 = vsub.f32 %v3075_v13, %v3107_v29  ;;  %v3022_v39 = vadd.f32 %v3021_v43, %v2933_v9  ;;  %v3026_v7 = vpop.f32.mrf.mxu0  ;;  %v2987_v29 = vadd.f32 %v13025_v42, %v2898_v19 }
 0x33c   : > { %v3155_v28 = vmul.f32 %v13137_v40, %v13137_v40  ;;  %v3171_v23 = vmul.f32 %v13139_v30, %v13139_v30  ;;  %v3076_v11 = vmax.f32 %v3022_v39, 0.0  ;;  %v3062_v17 = vmax.f32 %v2987_v29, 0.0 }
 0x33e   : > { %v3187_v41 = vadd.f32 %v3171_v23, %v3155_v28  ;;  %v3092_v24 = vadd.f32 %v3076_v11, %v3060_v58  ;;  %v3061_v23 = vmax.f32 %v13027_v25, 0.0 }
 0x33f   : > { %v2935_v14 = vpop.f32.mrf.mxu3 }
 0x340   : > { %v3203_v59 = vmul.f32 %v3187_v41, %v11235_v49  ;;  %v3108_v27 = vmul.f32 %v3092_v24, %v11235_v49  ;;  %v2936_v45 = vadd.f32 %v2935_v14, %v2846_v46 }
 0x342   : > { %v3219_v47 = vadd.f32 1e-05, %v3203_v59  ;;  %v13150_v53 = vsub.f32 %v3060_v58, %v3108_v27  ;;  %v13152_v18 = vsub.f32 %v3076_v11, %v3108_v27  ;;  %v3029_v10 = vpop.f32.mrf.mxu0  ;;  %v3025_v34 = vadd.f32 %v3024_v60, %v2936_v45  ;;  %v13162_v58 = vpop.f32.mrf.mxu2 }
 0x344   : > { %10215 = vrsqrt.f32 %v3219_v47  ;;  %v3156_v3 = vmul.f32 %v13150_v53, %v13150_v53  ;;  %v3172_v15 = vmul.f32 %v13152_v18, %v13152_v18  ;;  %v3077_v39 = vmax.f32 %v3025_v34, 0.0 }
 0x345   : > { %vm3241_vm2 = vweird.f32 %v3219_v47 }
 0x346   : > { %v3188_v43 = vadd.f32 %v3172_v15, %v3156_v3  ;;  %v3093_v60 = vadd.f32 %v3077_v39, %v3061_v23  ;;  %v2903_v15 = vadd.f32 %v13069_v31, %v12992_v33 }
 0x347   : > { %v2937_v35 = vpop.f32.mrf.mxu3 }
 0x348   : > { %v3204_v1 = vmul.f32 %v3188_v43, %v11235_v49  ;;  %v2938_v13 = vadd.f32 %v2937_v35, %v2848_v50  ;;  %v3109_v42 = vmul.f32 %v3093_v60, %v11235_v49  ;;  %v2992_v29 = vadd.f32 %v13056_v20, %v2903_v15 }
 0x34a   : > { %v10216_v61 = vpop.eup %10215  ;;  %v3220_v62 = vadd.f32 1e-05, %v3204_v1  ;;  %v3027_v6 = vadd.f32 %v3026_v7, %v2938_v13  ;;  %v3031_v16 = vpop.f32.mrf.mxu0  ;;  %v13169_v35 = vsub.f32 %v3077_v39, %v3109_v42 }
 0x34b   : > { %v3236_v9 = vmul.f32 %v10216_v61, %v3219_v47  ;;  %vm3242_vm1 = vweird.f32 %v10216_v61  ;;  %v2858_v45 = vpop.f32.mrf.mxu2 }
 0x34c   : > { %10217 = vrsqrt.f32 %v3220_v62  ;;  %v3078_v28 = vmax.f32 %v3027_v6, 0.0  ;;  %vm3243_vm4 = vmor %vm3241_vm2, %vm3242_vm1  ;;  %vm3251_vm5 = vweird.f32 %v3220_v62  ;;  %v3173_v31 = vmul.f32 %v13169_v35, %v13169_v35 }
 0x34d   : > { %v3237_v46 = vmul.f32 %v10216_v61, %v3236_v9 }
 0x34e   : > { %v3094_v50 = vadd.f32 %v3078_v28, %v3062_v17 }
 0x34f   : > { %v3238_v11 = vmul.f32 0.5, %v3237_v46  ;;  %v2940_v41 = vpop.f32.mrf.mxu3 }
 0x350   : > { %v2941_v14 = vadd.f32 %v2940_v41, %v2851_v48  ;;  %v3110_v27 = vmul.f32 %v3094_v50, %v11235_v49 }
 0x351   : > { %v3239_v37 = vsub.f32 1.5, %v3238_v11 }
 0x352   : > { %v10218_v24 = vpop.eup %10217  ;;  %v3034_v3 = vpop.f32.mrf.mxu0  ;;  %v3030_v1 = vadd.f32 %v3029_v10, %v2941_v14  ;;  %v13171_v48 = vsub.f32 %v3078_v28, %v3110_v27  ;;  %v13178_v10 = vsub.f32 %v3061_v23, %v3109_v42  ;;  %v13180_v47 = vsub.f32 %v3062_v17, %v3110_v27 }
 0x353   : > { %v3246_v7 = vmul.f32 %v10218_v24, %v3220_v62  ;;  %v3240_v25 = vmul.f32 %v10216_v61, %v3239_v37  ;;  %vm3252_vm3 = vweird.f32 %v10218_v24 }
 0x354   : > { %vm3253_vm6 = vmor %vm3251_vm5, %vm3252_vm3  ;;  %v3079_v39 = vmax.f32 %v3030_v1, 0.0  ;;  %v3174_v20 = vmul.f32 %v13171_v48, %v13171_v48  ;;  %v3157_v23 = vmul.f32 %v13178_v10, %v13178_v10  ;;  %v3158_v17 = vmul.f32 %v13180_v47, %v13180_v47 }
 0x355   : > { %v3247_v59 = vmul.f32 %v10218_v24, %v3246_v7  ;;  %v13174_v9 = vsel %vm3243_vm4, %v10216_v61, %v3240_v25 }
 0x356   : > { %v3395_v62 = vmul.f32 %v13174_v9, %v13137_v40  ;;  %v3189_v50 = vadd.f32 %v3173_v31, %v3157_v23  ;;  %v3190_v7 = vadd.f32 %v3174_v20, %v3158_v17 }
 0x357   : > { %v3248_v43 = vmul.f32 0.5, %v3247_v59  ;;  %v2942_v19 = vpop.f32.mrf.mxu3 }
 0x358   : > { %v2943_v34 = vadd.f32 %v2942_v19, %v2853_v8  ;;  %v3063_v8 = vmax.f32 %v13062_v55, 0.0  ;;  %v3064_v55 = vmax.f32 %v2992_v29, 0.0  ;;  %v3205_v40 = vmul.f32 %v3189_v50, %v11235_v49 }
 0x359   : > { %v3249_v13 = vsub.f32 1.5, %v3248_v43 }
 0x35a   : > { %v3032_v6 = vadd.f32 %v3031_v16, %v2943_v34  ;;  %v3036_v16 = vpop.f32.mrf.mxu0  ;;  %v3095_v41 = vadd.f32 %v3079_v39, %v3063_v8  ;;  %v3221_v59 = vadd.f32 1e-05, %v3205_v40 }
 0x35b   : > { %v3250_v33 = vmul.f32 %v10218_v24, %v3249_v13 }
 0x35c   : > { %v3080_v61 = vmax.f32 %v3032_v6, 0.0  ;;  %v3111_v42 = vmul.f32 %v3095_v41, %v11235_v49  ;;  %10219 = vrsqrt.f32 %v3221_v59  ;;  %vm3261_vm9 = vweird.f32 %v3221_v59 }
 0x35d   : > { %v13183_v46 = vsel %vm3253_vm6, %v10218_v24, %v3250_v33  ;;  %v2861_v24 = vpop.f32.mrf.mxu2 }
 0x35e   : > { %v3396_v28 = vmul.f32 %v13183_v46, %v13150_v53  ;;  %v3096_v37 = vadd.f32 %v3080_v61, %v3064_v55  ;;  %v3206_v53 = vmul.f32 %v3190_v7, %v11235_v49  ;;  %v13200_v19 = vsub.f32 %v3079_v39, %v3111_v42 }
 0x35f   : > { %v2945_v11 = vpop.f32.mrf.mxu3  ;;  %v13206_v20 = vsub.f32 %v3063_v8, %v3111_v42 }
 0x360   : > { %v3427_v60 = vpack.c.bf16 %v3396_v28, %v3395_v62  ;;  %v2946_v14 = vadd.f32 %v2945_v11, %v13162_v58  ;;  %v3112_v27 = vmul.f32 %v3096_v37, %v11235_v49  ;;  %v3222_v15 = vadd.f32 1e-05, %v3206_v53 }
 0x361   : > { %v3175_v58 = vmul.f32 %v13200_v19, %v13200_v19  ;;  %v3159_v17 = vmul.f32 %v13206_v20, %v13206_v20  ;;  %v3066_v11 = vmax.f32 %v13081_v12, 0.0 }
 0x362   : > { %3515 = vmatmul.bf16.vlgmr.msra.gmra.mxu1 %v3427_v60  ;;  %v3039_v25 = vpop.f32.mrf.mxu0  ;;  %10221 = vrsqrt.f32 %v3222_v15  ;;  %v3035_v1 = vadd.f32 %v3034_v3, %v2946_v14  ;;  %v13202_v13 = vsub.f32 %v3080_v61, %v3112_v27  ;;  %v10220_v33 = vpop.eup %10219  ;;  %v13208_v62 = vsub.f32 %v3064_v55, %v3112_v27 }
 0x363   : > { %v3256_v3 = vmul.f32 %v10220_v33, %v3221_v59  ;;  %v3191_v37 = vadd.f32 %v3175_v58, %v3159_v17  ;;  %vm3262_vm7 = vweird.f32 %v10220_v33  ;;  %vm3271_vm11 = vweird.f32 %v3222_v15 }
 0x364   : > { %v3081_v31 = vmax.f32 %v3035_v1, 0.0  ;;  %v3176_v39 = vmul.f32 %v13202_v13, %v13202_v13  ;;  %v3160_v55 = vmul.f32 %v13208_v62, %v13208_v62  ;;  %vm3263_vm10 = vmor %vm3261_vm9, %vm3262_vm7  ;;  %v2913_v17 = vadd.f32 %v13101_v56, %v13064_v0 }
 0x365   : > { %v2863_v29 = vpop.f32.mrf.mxu2  ;;  %v3257_v8 = vmul.f32 %v10220_v33, %v3256_v3 }
 0x366   : > { %v3192_v53 = vadd.f32 %v3176_v39, %v3160_v55 }
 0x367   : > { %v2947_v43 = vpop.f32.mrf.mxu3  ;;  %v3258_v40 = vmul.f32 0.5, %v3257_v8 }
 0x368   : > { %v2948_v34 = vadd.f32 %v2947_v43, %v2858_v45  ;;  %v10222_v28 = vpop.eup %10221  ;;  %v3065_v45 = vmax.f32 %v13074_v26, 0.0  ;;  %v3207_v26 = vmul.f32 %v3191_v37, %v11235_v49  ;;  %v3208_v43 = vmul.f32 %v3192_v53, %v11235_v49 }
 0x369   : > { %v3259_v27 = vsub.f32 1.5, %v3258_v40  ;;  %vm3272_vm8 = vweird.f32 %v10222_v28  ;;  %v3067_v53 = vmax.f32 %v13094_v4, 0.0  ;;  %v3071_v4 = vmax.f32 %v13122_v22, 0.0 }
 0x36a   : > { %v3037_v6 = vadd.f32 %v3036_v16, %v2948_v34  ;;  %v3041_v61 = vpop.f32.mrf.mxu0  ;;  %v3266_v16 = vmul.f32 %v10222_v28, %v3222_v15  ;;  %v3097_v60 = vadd.f32 %v3081_v31, %v3065_v45  ;;  %v13221_v34 = vadd.f32 1e-05, %v3207_v26  ;;  %vm3273_vm12 = vmor %vm3271_vm11, %vm3272_vm8 }
 0x36b   : > { %v3260_v3 = vmul.f32 %v10220_v33, %v3259_v27  ;;  %v3073_v22 = vmax.f32 %v13128_v5, 0.0 }
 0x36c   : > { %v3082_v23 = vmax.f32 %v3037_v6, 0.0  ;;  %v3267_v50 = vmul.f32 %v10222_v28, %v3266_v16  ;;  %v3113_v12 = vmul.f32 %v3097_v60, %v11235_v49  ;;  %v10002_v6 = vld [vmem:[%s17173_s4 + $0x38] sm:$0xff]  ;;  %10223 = vrsqrt.f32 %v13221_v34 }
 0x36d   : > { %v2866_v58 = vpop.f32.mrf.mxu2  ;;  %4048 = vmatpush.bf16.msrb.mxu2 %v10002_v6  ;;  %v13234_v8 = vsel %vm3263_vm10, %v10220_v33, %v3260_v3  ;;  %v13251_v33 = vadd.f32 %v13089_v36, %v2913_v17  ;;  %vm3281_vm15 = vweird.f32 %v13221_v34 }
 0x36e   : > { %v3098_v7 = vadd.f32 %v3082_v23, %v3066_v11  ;;  %v3268_v42 = vmul.f32 0.5, %v3267_v50  ;;  %v13238_v59 = vsub.f32 %v3081_v31, %v3113_v12  ;;  %v3397_v0 = vmul.f32 %v13234_v8, %v13178_v10 }
 0x36f   : > { %v2950_v41 = vpop.f32.mrf.mxu3 }
 0x370   : > { %v2951_v14 = vadd.f32 %v2950_v41, %v2861_v24  ;;  %v3269_v1 = vsub.f32 1.5, %v3268_v42  ;;  %v3114_v39 = vmul.f32 %v3098_v7, %v11235_v49  ;;  %v13227_v24 = vadd.f32 1e-05, %v3208_v43 }
 0x371   : > { %v2918_v42 = vadd.f32 %v13118_v38, %v13079_v44  ;;  %v3069_v44 = vmax.f32 %v13108_v57, 0.0 }
 0x372   : > { %v3270_v16 = vmul.f32 %v10222_v28, %v3269_v1  ;;  %v13232_v41 = vadd.f32 %v3039_v25, %v2951_v14  ;;  %v3044_v55 = vpop.f32.mrf.mxu0  ;;  %10225 = vrsqrt.f32 %v13227_v24  ;;  %v13242_v37 = vsub.f32 %v3082_v23, %v3114_v39  ;;  %v10224_v40 = vpop.eup %10223 }
 0x373   : > { %v13258_v23 = vsub.f32 %v3066_v11, %v3114_v39  ;;  %v3068_v11 = vmax.f32 %v13251_v33, 0.0  ;;  %vm3282_vm13 = vweird.f32 %v10224_v40  ;;  %vm3291_vm1 = vweird.f32 %v13227_v24 }
 0x374   : > { %v13240_v50 = vsel %vm3273_vm12, %v10222_v28, %v3270_v16  ;;  %v3083_v7 = vmax.f32 %v13232_v41, 0.0  ;;  %v13256_v28 = vsub.f32 %v3065_v45, %v3113_v12  ;;  %vm3283_vm0 = vmor %vm3281_vm15, %vm3282_vm13 }
 0x375   : > { %v3398_v56 = vmul.f32 %v13240_v50, %v13180_v47  ;;  %v3178_v47 = vmul.f32 %v13242_v37, %v13242_v37  ;;  %v2868_v14 = vpop.f32.mrf.mxu2  ;;  %v3162_v1 = vmul.f32 %v13258_v23, %v13258_v23 }
 0x376   : > { %v3161_v45 = vmul.f32 %v13256_v28, %v13256_v28  ;;  %v3099_v27 = vadd.f32 %v3083_v7, %v3067_v53 }
 0x377   : > { %v2952_v60 = vpop.f32.mrf.mxu3  ;;  %v3428_v31 = vpack.c.bf16 %v3398_v56, %v3397_v0  ;;  %v3194_v41 = vadd.f32 %v3178_v47, %v3162_v1 }
 0x378   : > { %v2953_v15 = vadd.f32 %v2952_v60, %v2863_v29  ;;  %v3177_v29 = vmul.f32 %v13238_v59, %v13238_v59  ;;  %v10226_v10 = vpop.eup %10225  ;;  %v13277_v60 = vadd.f32 %v13103_v51, %v2918_v42 }
 0x379   : > { %3520 = vmatmul.bf16.gmra.mxu1 %v3428_v31  ;;  %v3286_v26 = vmul.f32 %v10226_v10, %v13227_v24  ;;  %vm3292_vm14 = vweird.f32 %v10226_v10 }
 0x37a   : > { %v13248_v25 = vadd.f32 %v3041_v61, %v2953_v15  ;;  %v3276_v61 = vmul.f32 %v10224_v40, %v13221_v34  ;;  %v3193_v3 = vadd.f32 %v3177_v29, %v3161_v45  ;;  %v3046_v16 = vpop.f32.mrf.mxu0  ;;  %vm3293_vm2 = vmor %vm3291_vm1, %vm3292_vm14  ;;  %v13297_v34 = vmul.f32 %v13174_v9, %v13139_v30 }
 0x37b   : > { %v3287_v39 = vmul.f32 %v10226_v10, %v3286_v26 }
 0x37c   : > { %v3084_v36 = vmax.f32 %v13248_v25, 0.0  ;;  %v3277_v12 = vmul.f32 %v10224_v40, %v3276_v61  ;;  %v3209_v56 = vmul.f32 %v3193_v3, %v11235_v49  ;;  %v3115_v25 = vmul.f32 %v3099_v27, %v11235_v49 }
 0x37d   : > { %v3288_v0 = vmul.f32 0.5, %v3287_v39 }
 0x37e   : > { %v3100_v38 = vadd.f32 %v3084_v36, %v3068_v11  ;;  %v3278_v17 = vmul.f32 0.5, %v3277_v12  ;;  %v13282_v61 = vadd.f32 1e-05, %v3209_v56  ;;  %v13303_v12 = vsub.f32 %v3083_v7, %v3115_v25 }
 0x37f   : > { %v2955_v43 = vpop.f32.mrf.mxu3  ;;  %v3289_v29 = vsub.f32 1.5, %v3288_v0  ;;  %v2923_v7 = vadd.f32 %v13124_v2, %v13096_v63 }
 0x380   : > { %v2956_v6 = vadd.f32 %v2955_v43, %v2866_v58  ;;  %v3279_v33 = vsub.f32 1.5, %v3278_v17  ;;  %v3210_v58 = vmul.f32 %v3194_v41, %v11235_v49  ;;  %v3116_v47 = vmul.f32 %v3100_v38, %v11235_v49 }
 0x381   : > { %v3290_v42 = vmul.f32 %v10226_v10, %v3289_v29  ;;  %10227 = vrsqrt.f32 %v13282_v61  ;;  %v13301_v43 = vmul.f32 %v13183_v46, %v13152_v18  ;;  %v3070_v46 = vmax.f32 %v13277_v60, 0.0 }
 0x382   : > { %v3045_v15 = vadd.f32 %v3044_v55, %v2956_v6  ;;  %v3280_v26 = vmul.f32 %v10224_v40, %v3279_v33  ;;  %v13286_v51 = vadd.f32 1e-05, %v3210_v58  ;;  %v2871_v6 = vpop.f32.mrf.mxu2  ;;  %v13325_v17 = vsub.f32 %v3068_v11, %v3116_v47 }
 0x383   : > { %v13305_v1 = vsel %vm3293_vm2, %v10226_v10, %v3290_v42  ;;  %v3435_v30 = vpack.c.bf16 %v13301_v43, %v13297_v34  ;;  %vm3301_vm3 = vweird.f32 %v13282_v61  ;;  %v10010_v34 = vld [vmem:[%s17175_s6 + $0x38] sm:$0xff] }
 0x384   : > { %v3085_v31 = vmax.f32 %v3045_v15, 0.0  ;;  %v13292_v45 = vsel %vm3283_vm0, %v10224_v40, %v3280_v26  ;;  %10229 = vrsqrt.f32 %v13286_v51  ;;  %v13307_v40 = vsub.f32 %v3084_v36, %v3116_v47  ;;  %v3049_v36 = vpop.f32.mrf.mxu0  ;;  %4217 = vmatpush.bf16.msrb.mxu3 %v10010_v34 }
 0x385   : > { %v3399_v39 = vmul.f32 %v13292_v45, %v13206_v20  ;;  %v3400_v3 = vmul.f32 %v13305_v1, %v13208_v62  ;;  %v3179_v20 = vmul.f32 %v13303_v12, %v13303_v12  ;;  %v13323_v62 = vsub.f32 %v3067_v53, %v3115_v25 }
 0x386   : > { %v3101_v55 = vadd.f32 %v3085_v31, %v3069_v44  ;;  %v13337_v53 = vadd.f32 %v13120_v54, %v2923_v7  ;;  %v3164_v25 = vmul.f32 %v13325_v17, %v13325_v17  ;;  %vm3311_vm4 = vweird.f32 %v13286_v51 }
 0x387   : > { %v2957_v27 = vpop.f32.mrf.mxu3  ;;  %v3429_v10 = vpack.c.bf16 %v3400_v3, %v3399_v39  ;;  %v3163_v0 = vmul.f32 %v13323_v62, %v13323_v62 }
 0x388   : > { %v2958_v24 = vadd.f32 %v2957_v27, %v2868_v14  ;;  %v3117_v18 = vmul.f32 %v3101_v55, %v11235_v49  ;;  %v10228_v14 = vpop.eup %10227 }
 0x389   : > { %3525 = vmatmul.bf16.gmra.mxu1 %v3429_v10  ;;  %v3296_v63 = vmul.f32 %v10228_v14, %v13282_v61  ;;  %v3195_v29 = vadd.f32 %v3179_v20, %v3163_v0  ;;  %vm3302_vm5 = vweird.f32 %v10228_v14  ;;  %v10001_v20 = vld [vmem:[%s17173_s4 + $0x30] sm:$0xff] }
 0x38a   : > { %v3047_v9 = vadd.f32 %v3046_v16, %v2958_v24  ;;  %v10230_v41 = vpop.eup %10229  ;;  %v3180_v16 = vmul.f32 %v13307_v40, %v13307_v40  ;;  %v13330_v2 = vsub.f32 %v3085_v31, %v3117_v18  ;;  %v2873_v24 = vpop.f32.mrf.mxu2  ;;  %vm3303_vm7 = vmor %vm3301_vm3, %vm3302_vm5  ;;  %4049 = vmatpush.bf16.msrb.mxu2 %v10001_v20 }
 0x38b   : > { %v3306_v15 = vmul.f32 %v10230_v41, %v13286_v51  ;;  %v3297_v56 = vmul.f32 %v10228_v14, %v3296_v63  ;;  %v3211_v27 = vmul.f32 %v3195_v29, %v11235_v49  ;;  %vm3312_vm6 = vweird.f32 %v10230_v41 }
 0x38c   : > { %v3086_v38 = vmax.f32 %v3047_v9, 0.0  ;;  %v3196_v26 = vadd.f32 %v3180_v16, %v3164_v25  ;;  %v3181_v54 = vmul.f32 %v13330_v2, %v13330_v2  ;;  %vm3313_vm8 = vmor %vm3311_vm4, %vm3312_vm6 }
 0x38d   : > { %v3307_v31 = vmul.f32 %v10230_v41, %v3306_v15  ;;  %v3298_v47 = vmul.f32 0.5, %v3297_v56  ;;  %v13350_v10 = vadd.f32 1e-05, %v3211_v27 }
 0x38e   : > { %v3102_v60 = vadd.f32 %v3086_v38, %v3070_v46 }
 0x38f   : > { %v2960_v11 = vpop.f32.mrf.mxu3  ;;  %v3308_v42 = vmul.f32 0.5, %v3307_v31  ;;  %v3299_v3 = vsub.f32 1.5, %v3298_v47  ;;  %10231 = vrsqrt.f32 %v13350_v10  ;;  %vm3321_vm11 = vweird.f32 %v13350_v10 }
 0x390   : > { %v3118_v33 = vmul.f32 %v3102_v60, %v11235_v49  ;;  %v2961_v58 = vadd.f32 %v2960_v11, %v2871_v6  ;;  %v3212_v6 = vmul.f32 %v3196_v26, %v11235_v49  ;;  %v13370_v11 = vmul.f32 %v13234_v8, %v13169_v35 }
 0x391   : > { %v3309_v7 = vsub.f32 1.5, %v3308_v42  ;;  %v3300_v16 = vmul.f32 %v10228_v14, %v3299_v3 }
 0x392   : > { %v3050_v55 = vadd.f32 %v3049_v36, %v2961_v58  ;;  %v13347_v39 = vsub.f32 %v3086_v38, %v3118_v33  ;;  %v3051_v36 = vpop.f32.mrf.mxu0  ;;  %v13355_v63 = vadd.f32 1e-05, %v3212_v6  ;;  %v13359_v38 = vsub.f32 %v3069_v44, %v3117_v18 }
 0x393   : > { %v13361_v60 = vsub.f32 %v3070_v46, %v3118_v33  ;;  %v3310_v0 = vmul.f32 %v10230_v41, %v3309_v7  ;;  %v13374_v44 = vsel %vm3303_vm7, %v10228_v14, %v3300_v16  ;;  %v13393_v33 = vmul.f32 %v13240_v50, %v13171_v48 }
 0x394   : > { %v3087_v9 = vmax.f32 %v3050_v55, 0.0  ;;  %v3182_v57 = vmul.f32 %v13347_v39, %v13347_v39  ;;  %10233 = vrsqrt.f32 %v13355_v63  ;;  %v3165_v61 = vmul.f32 %v13359_v38, %v13359_v38 }
 0x395   : > { %v13383_v56 = vsel %vm3313_vm8, %v10230_v41, %v3310_v0  ;;  %v3401_v35 = vmul.f32 %v13374_v44, %v13256_v28  ;;  %v3166_v51 = vmul.f32 %v13361_v60, %v13361_v60  ;;  %v3436_v28 = vpack.c.bf16 %v13393_v33, %v13370_v11  ;;  %v10232_v26 = vpop.eup %10231  ;;  %v9997_v11 = vld [vmem:[%s17173_s4 + $0x10] sm:$0xff] }
 0x396   : > { %v3103_v15 = vadd.f32 %v3087_v9, %v3071_v4  ;;  %v3402_v14 = vmul.f32 %v13383_v56, %v13258_v23  ;;  %v3197_v25 = vadd.f32 %v3181_v54, %v3165_v61  ;;  %v3072_v23 = vmax.f32 %v13337_v53, 0.0  ;;  %v2876_v54 = vpop.f32.mrf.mxu2 }
 0x397   : > { %v2962_v18 = vpop.f32.mrf.mxu3  ;;  %v3198_v29 = vadd.f32 %v3182_v57, %v3166_v51  ;;  %v3316_v48 = vmul.f32 %v10232_v26, %v13350_v10  ;;  %vm3322_vm9 = vweird.f32 %v10232_v26  ;;  %vm3331_vm13 = vweird.f32 %v13355_v63 }
 0x398   : > { %v3119_v46 = vmul.f32 %v3103_v15, %v11235_v49  ;;  %v2963_v8 = vadd.f32 %v2962_v18, %v2873_v24  ;;  %v3430_v41 = vpack.c.bf16 %v3402_v14, %v3401_v35  ;;  %v3213_v47 = vmul.f32 %v3197_v25, %v11235_v49  ;;  %vm3323_vm12 = vmor %vm3321_vm11, %vm3322_vm9 }
 0x399   : > { %v3214_v50 = vmul.f32 %v3198_v29, %v11235_v49  ;;  %v3317_v20 = vmul.f32 %v10232_v26, %v3316_v48  ;;  %v13445_v10 = vmul.f32 %v13292_v45, %v13200_v19 }
 0x39a   : > { %v13395_v58 = vsub.f32 %v3087_v9, %v3119_v46  ;;  %v3052_v31 = vadd.f32 %v3051_v36, %v2963_v8  ;;  %v10234_v42 = vpop.eup %10233  ;;  %3530 = vmatmul.bf16.gmra.mxu1 %v3430_v41  ;;  %v13403_v27 = vadd.f32 1e-05, %v3213_v47  ;;  %v13408_v6 = vsub.f32 %v3071_v4, %v3119_v46  ;;  %v3054_v9 = vpop.f32.mrf.mxu0 }
 0x39b   : > { %v3326_v3 = vmul.f32 %v10234_v42, %v13355_v63  ;;  %v13412_v36 = vadd.f32 1e-05, %v3214_v50  ;;  %v2928_v4 = vadd.f32 %v13130_v52, %v13116_v21  ;;  %v3318_v18 = vmul.f32 0.5, %v3317_v20 }
 0x39c   : > { %v3088_v55 = vmax.f32 %v3052_v31, 0.0  ;;  %v3183_v53 = vmul.f32 %v13395_v58, %v13395_v58  ;;  %10235 = vrsqrt.f32 %v13403_v27  ;;  %v3167_v57 = vmul.f32 %v13408_v6, %v13408_v6 }
 0x39d   : > { %v3327_v0 = vmul.f32 %v10234_v42, %v3326_v3  ;;  %10237 = vrsqrt.f32 %v13412_v36  ;;  %v3319_v14 = vsub.f32 1.5, %v3318_v18  ;;  %vm3332_vm10 = vweird.f32 %v10234_v42 }
 0x39e   : > { %v3104_v24 = vadd.f32 %v3088_v55, %v3072_v23  ;;  %v3199_v51 = vadd.f32 %v3183_v53, %v3167_v57  ;;  %v3017_v41 = vadd.f32 %v13126_v32, %v2928_v4  ;;  %v2878_v50 = vpop.f32.mrf.mxu2  ;;  %vm3333_vm14 = vmor %vm3331_vm13, %vm3332_vm10  ;;  %v13452_v20 = vmul.f32 %v13305_v1, %v13202_v13 }
 0x39f   : > { %v2965_v7 = vpop.f32.mrf.mxu3  ;;  %v3328_v35 = vmul.f32 0.5, %v3327_v0  ;;  %v3320_v29 = vmul.f32 %v10232_v26, %v3319_v14  ;;  %vm3341_vm1 = vweird.f32 %v13403_v27  ;;  %vm3351_vm3 = vweird.f32 %v13412_v36 }
 0x3a0   : > { %v3120_v16 = vmul.f32 %v3104_v24, %v11235_v49  ;;  %v2966_v15 = vadd.f32 %v2965_v7, %v2876_v54  ;;  %v3215_v47 = vmul.f32 %v3199_v51, %v11235_v49  ;;  %v3074_v18 = vmax.f32 %v3017_v41, 0.0  ;;  %v10000_v51 = vld [vmem:[%s17173_s4 + $0x28] sm:$0xff] }
 0x3a1   : > { %v3329_v31 = vsub.f32 1.5, %v3328_v35  ;;  %v13438_v24 = vsel %vm3323_vm12, %v10232_v26, %v3320_v29  ;;  %4050 = vmatpush.bf16.msrb.mxu2 %v10000_v51 }
 0x3a2   : > { %v13422_v61 = vsub.f32 %v3088_v55, %v3120_v16  ;;  %v3055_v46 = vadd.f32 %v3054_v9, %v2966_v15  ;;  %v13424_v8 = vsub.f32 %v3072_v23, %v3120_v16  ;;  %v13430_v52 = vpop.eup %10235  ;;  %v13441_v53 = vadd.f32 1e-05, %v3215_v47  ;;  %v3056_v26 = vpop.f32.mrf.mxu0 }
 0x3a3   : > { %v3330_v55 = vmul.f32 %v10234_v42, %v3329_v31  ;;  %v3336_v54 = vmul.f32 %v13430_v52, %v13403_v27  ;;  %v10238_v48 = vpop.eup %10237  ;;  %v3403_v16 = vmul.f32 %v13438_v24, %v13323_v62  ;;  %vm3342_vm15 = vweird.f32 %v13430_v52 }
 0x3a4   : > { %v3184_v25 = vmul.f32 %v13422_v61, %v13422_v61  ;;  %v3089_v5 = vmax.f32 %v3055_v46, 0.0  ;;  %v3168_v21 = vmul.f32 %v13424_v8, %v13424_v8  ;;  %v3346_v19 = vmul.f32 %v10238_v48, %v13412_v36  ;;  %vm3343_vm2 = vmor %vm3341_vm1, %vm3342_vm15 }
 0x3a5   : > { %v13448_v63 = vsel %vm3333_vm14, %v10234_v42, %v3330_v55  ;;  %v3337_v0 = vmul.f32 %v13430_v52, %v3336_v54  ;;  %10239 = vrsqrt.f32 %v13441_v53  ;;  %vm3352_vm0 = vweird.f32 %v10238_v48 }
 0x3a6   : > { %v3105_v23 = vadd.f32 %v3089_v5, %v3073_v22  ;;  %v3200_v3 = vadd.f32 %v3184_v25, %v3168_v21  ;;  %v3404_v15 = vmul.f32 %v13448_v63, %v13325_v17  ;;  %v3347_v4 = vmul.f32 %v10238_v48, %v3346_v19  ;;  %vm3353_vm4 = vmor %vm3351_vm3, %vm3352_vm0 }
 0x3a7   : > { %v2967_v32 = vpop.f32.mrf.mxu3  ;;  %v3338_v1 = vmul.f32 0.5, %v3337_v0  ;;  %v3437_v17 = vpack.c.bf16 %v13452_v20, %v13445_v10  ;;  %vm3361_vm9 = vweird.f32 %v13441_v53 }
 0x3a8   : > { %v3121_v9 = vmul.f32 %v3105_v23, %v11235_v49  ;;  %v2968_v7 = vadd.f32 %v2967_v32, %v2878_v50  ;;  %v3216_v57 = vmul.f32 %v3200_v3, %v11235_v49  ;;  %v3431_v13 = vpack.c.bf16 %v3404_v15, %v3403_v16 }
 0x3a9   : > { %v3339_v35 = vsub.f32 1.5, %v3338_v1  ;;  %v3348_v14 = vmul.f32 0.5, %v3347_v4 }
 0x3aa   : > { %v13460_v45 = vsub.f32 %v3089_v5, %v3121_v9  ;;  %v3057_v42 = vadd.f32 %v3056_v26, %v2968_v7  ;;  %v3232_v62 = vadd.f32 1e-05, %v3216_v57  ;;  %3535 = vmatmul.bf16.gmra.mxu1 %v3431_v13  ;;  %v13469_v25 = vsub.f32 %v3073_v22, %v3121_v9 }
 0x3ab   : > { %v3340_v21 = vmul.f32 %v13430_v52, %v3339_v35  ;;  %v3349_v41 = vsub.f32 1.5, %v3348_v14  ;;  %v10240_v47 = vpop.eup %10239  ;;  %v13501_v57 = vmul.f32 %v13374_v44, %v13238_v59  ;;  %v13505_v13 = vmul.f32 %v13383_v56, %v13242_v37 }
 0x3ac   : > { %v3090_v46 = vmax.f32 %v3057_v42, 0.0  ;;  %v3185_v5 = vmul.f32 %v13460_v45, %v13460_v45  ;;  %10241 = vrsqrt.f32 %v3232_v62  ;;  %v3169_v29 = vmul.f32 %v13469_v25, %v13469_v25 }
 0x3ad   : > { %v3350_v22 = vmul.f32 %v10238_v48, %v3349_v41  ;;  %v3356_v55 = vmul.f32 %v10240_v47, %v13441_v53  ;;  %v13486_v3 = vsel %vm3343_vm2, %v13430_v52, %v3340_v21  ;;  %vm3362_vm6 = vweird.f32 %v10240_v47 }
 0x3ae   : > { %v3106_v31 = vadd.f32 %v3090_v46, %v3074_v18  ;;  %v3201_v32 = vadd.f32 %v3185_v5, %v3169_v29  ;;  %v3405_v52 = vmul.f32 %v13486_v3, %v13359_v38  ;;  %vm3371_vm7 = vweird.f32 %v3232_v62  ;;  %vm3363_vm10 = vmor %vm3361_vm9, %vm3362_vm6 }
 0x3af   : > { %v13488_v9 = vsel %vm3353_vm4, %v10238_v48, %v3350_v22  ;;  %v3357_v26 = vmul.f32 %v10240_v47, %v3356_v55 }
 0x3b0   : > { %v3122_v23 = vmul.f32 %v3106_v31, %v11235_v49  ;;  %v3217_v16 = vmul.f32 %v3201_v32, %v11235_v49  ;;  %v3406_v15 = vmul.f32 %v13488_v9, %v13361_v60  ;;  %v3419_v32 = vmul.f32 %v13438_v24, %v13303_v12 }
 0x3b1   : > { %v3358_v1 = vmul.f32 0.5, %v3357_v26 }
 0x3b2   : > { %v13481_v54 = vsub.f32 %v3090_v46, %v3122_v23  ;;  %v13483_v50 = vsub.f32 %v3074_v18, %v3122_v23  ;;  %v10242_v7 = vpop.eup %10241  ;;  %v3233_v42 = vadd.f32 1e-05, %v3217_v16  ;;  %v3432_v60 = vpack.c.bf16 %v3406_v15, %v3405_v52 }
 0x3b3   : > { %v3366_v0 = vmul.f32 %v10242_v7, %v3232_v62  ;;  %v3438_v46 = vpack.c.bf16 %v13505_v13, %v13501_v57  ;;  %v3359_v14 = vsub.f32 1.5, %v3358_v1  ;;  %vm3372_vm5 = vweird.f32 %v10242_v7  ;;  %v10008_v57 = vld [vmem:[%s17175_s6 + $0x28] sm:$0xff] }
 0x3b4   : > { %v3186_v27 = vmul.f32 %v13481_v54, %v13481_v54  ;;  %v3170_v36 = vmul.f32 %v13483_v50, %v13483_v50  ;;  %10243 = vrsqrt.f32 %v3233_v42  ;;  %vm3373_vm8 = vmor %vm3371_vm7, %vm3372_vm5  ;;  %v3420_v62 = vmul.f32 %v13448_v63, %v13307_v40 }
 0x3b5   : > { %v3367_v48 = vmul.f32 %v10242_v7, %v3366_v0  ;;  %v3360_v51 = vmul.f32 %v10240_v47, %v3359_v14  ;;  %vm3381_vm15 = vweird.f32 %v3233_v42  ;;  %v3421_v16 = vmul.f32 %v13486_v3, %v13330_v2  ;;  %v9998_v2 = vld [vmem:[%s17173_s4 + $0x18] sm:$0xff] }
 0x3b6   : > { %v3202_v19 = vadd.f32 %v3186_v27, %v3170_v36  ;;  %v3439_v53 = vpack.c.bf16 %v3420_v62, %v3419_v32  ;;  %v3422_v15 = vmul.f32 %v13488_v9, %v13347_v39 }
 0x3b7   : > { %v3368_v18 = vmul.f32 0.5, %v3367_v48  ;;  %v3364_v21 = vsel %vm3363_vm10, %v10240_v47, %v3360_v51 }
 0x3b8   : > { %v3218_v4 = vmul.f32 %v3202_v19, %v11235_v49  ;;  %v3407_v22 = vmul.f32 %v3364_v21, %v13408_v6  ;;  %v3440_v19 = vpack.c.bf16 %v3422_v15, %v3421_v16  ;;  %v3423_v48 = vmul.f32 %v3364_v21, %v13395_v58 }
 0x3b9   : > { %v3369_v38 = vsub.f32 1.5, %v3368_v18 }
 0x3ba   : > { %v3234_v35 = vadd.f32 1e-05, %v3218_v4  ;;  %3540 = vmatmul.bf16.gmra.mxu1 %v3432_v60  ;;  %v10244_v59 = vpop.eup %10243 }
 0x3bb   : > { %v3370_v44 = vmul.f32 %v10242_v7, %v3369_v38  ;;  %v3376_v37 = vmul.f32 %v10244_v59, %v3233_v42  ;;  %vm3382_vm12 = vweird.f32 %v10244_v59 }
 0x3bc   : > { %10245 = vrsqrt.f32 %v3234_v35  ;;  %vm3391_vm13 = vweird.f32 %v3234_v35  ;;  %vm3383_vm0 = vmor %vm3381_vm15, %vm3382_vm12 }
 0x3bd   : > { %v3374_v5 = vsel %vm3373_vm8, %v10242_v7, %v3370_v44  ;;  %v3377_v41 = vmul.f32 %v10244_v59, %v3376_v37 }
 0x3be   : > { %v3408_v29 = vmul.f32 %v3374_v5, %v13424_v8  ;;  %v9999_v8 = vld [vmem:[%s17173_s4 + $0x20] sm:$0xff]  ;;  %v3424_v42 = vmul.f32 %v3374_v5, %v13422_v61  ;;  %v10009_v61 = vld [vmem:[%s17175_s6 + $0x30] sm:$0xff] }
 0x3bf   : > { %v3378_v27 = vmul.f32 0.5, %v3377_v41  ;;  %4051 = vmatpush.bf16.msrb.mxu2 %v9999_v8  ;;  %4218 = vmatpush.bf16.msrb.mxu3 %v10009_v61 }
 0x3c0   : > { %v3433_v26 = vpack.c.bf16 %v3408_v29, %v3407_v22  ;;  %v3441_v1 = vpack.c.bf16 %v3424_v42, %v3423_v48 }
 0x3c1   : > { %v3379_v36 = vsub.f32 1.5, %v3378_v27 }
 0x3c2   : > { %v10246_v56 = vpop.eup %10245 }
 0x3c3   : > { %v3386_v31 = vmul.f32 %v10246_v56, %v3234_v35  ;;  %vm3392_vm11 = vweird.f32 %v10246_v56  ;;  %v3380_v6 = vmul.f32 %v10244_v59, %v3379_v36  ;;  %4052 = vmatpush.bf16.msrb.mxu2 %v9998_v2  ;;  %4219 = vmatpush.bf16.msrb.mxu3 %v10008_v57 }
 0x3c4   : > { %vm3393_vm14 = vmor %vm3391_vm13, %vm3392_vm11 }
 0x3c5   : > { %v3387_v23 = vmul.f32 %v10246_v56, %v3386_v31  ;;  %v3384_v40 = vsel %vm3383_vm0, %v10244_v59, %v3380_v6 }
 0x3c6   : > { %v3409_v63 = vmul.f32 %v3384_v40, %v13469_v25  ;;  %v3425_v39 = vmul.f32 %v3384_v40, %v13460_v45  ;;  %v9996_v45 = vld [vmem:[%s17173_s4 + $0x8] sm:$0xff] }
 0x3c7   : > { %v3388_v55 = vmul.f32 0.5, %v3387_v23  ;;  %4053 = vmatpush.bf16.msrb.mxu2 %v9997_v11 }
 0x3c9   : > { %v3389_v7 = vsub.f32 1.5, %v3388_v55  ;;  %v9995_v55 = vld [vmem:[%s17173_s4] sm:$0xff] }
 0x3ca   : > { %3545 = vmatmul.bf16.gmra.mxu1 %v3433_v26 }
 0x3cb   : > { %v3390_v47 = vmul.f32 %v10246_v56, %v3389_v7  ;;  %4054 = vmatpush.bf16.msrb.mxu2 %v9996_v45 }
 0x3cd   : > { %v3394_v12 = vsel %vm3393_vm14, %v10246_v56, %v3390_v47 }
 0x3ce   : > { %v3410_v24 = vmul.f32 %v3394_v12, %v13483_v50  ;;  %v3426_v50 = vmul.f32 %v3394_v12, %v13481_v54 }
 0x3cf   : > { %4055 = vmatpush.bf16.msrb.mxu2 %v9995_v55 }
 0x3d0   : > { %v3434_v0 = vpack.c.bf16 %v3410_v24, %v3409_v63  ;;  %v3442_v3 = vpack.c.bf16 %v3426_v50, %v3425_v39  ;;  %v10007_v39 = vld [vmem:[%s17175_s6 + $0x20] sm:$0xff] }
 0x3d1   : > { %4220 = vmatpush.bf16.msrb.mxu3 %v10007_v39 }
 0x3da   : > { %3550 = vmatmul.bf16.gmra.mxu1 %v3434_v0 }
 0x3df   : > { %v3516_v52 = vpop.f32.mrf.mxu1 }
 0x3e0   : > { %v3596_v35 = vmax.f32 %v3516_v52, 0.0 }
 0x3e7   : > { %v3518_v25 = vpop.f32.mrf.mxu1 }
 0x3e8   : > { %v3597_v56 = vmax.f32 %v3518_v25, 0.0 }
 0x3ea   : > { %3555 = vmatmul.bf16.gmra.mxu1 %v3435_v30 }
 0x3f6   : > { %v13536_v9 = vpop.f32.mrf.mxu1 }
 0x3f7   : > { %v3598_v36 = vmax.f32 %v13536_v9, 0.0 }
 0x3fa   : > { %3560 = vmatmul.bf16.gmra.mxu1 %v3436_v28 }
 0x3fe   : > { %v13541_v58 = vpop.f32.mrf.mxu1 }
 0x3ff   : > { %v3599_v52 = vmax.f32 %v13541_v58, 0.0 }
 0x406   : > { %v13546_v43 = vpop.f32.mrf.mxu1 }
 0x40a   : > { %3565 = vmatmul.bf16.gmra.mxu1 %v3437_v17 }
 0x40e   : > { %v13551_v30 = vpop.f32.mrf.mxu1 }
 0x417   : > { %v13556_v33 = vpop.f32.mrf.mxu1 }
 0x41a   : > { %3570 = vmatmul.bf16.gmra.mxu1 %v3438_v46 }
 0x41f   : > { %v13561_v28 = vpop.f32.mrf.mxu1 }
 0x427   : > { %v13566_v10 = vpop.f32.mrf.mxu1 }
 0x42a   : > { %3575 = vmatmul.bf16.gmra.mxu1 %v3439_v53 }
 0x42f   : > { %v13568_v20 = vpop.f32.mrf.mxu1 }
 0x437   : > { %v13573_v17 = vpop.f32.mrf.mxu1 }
 0x43a   : > { %3580 = vmatmul.bf16.gmra.mxu1 %v3440_v19 }
 0x43f   : > { %v13575_v54 = vpop.f32.mrf.mxu1 }
 0x447   : > { %v13580_v13 = vpop.f32.mrf.mxu1 }
 0x44a   : > { %3585 = vmatmul.bf16.gmra.mxu1 %v3441_v1 }
 0x44f   : > { %v13582_v4 = vpop.f32.mrf.mxu1 }
 0x457   : > { %v13584_v60 = vpop.f32.mrf.mxu1 }
 0x45a   : > { %3590 = vmatmul.bf16.gmra.mxu1 %v3442_v3 }
 0x45f   : > { %v13586_v18 = vpop.f32.mrf.mxu1 }
 0x467   : > { %v3556_v46 = vpop.f32.mrf.mxu1 }
 0x468   : > { %v3612_v38 = vmax.f32 %v3556_v46, 0.0 }
 0x46a   : > { %v3628_v14 = vadd.f32 %v3612_v38, %v3596_v35 }
 0x46c   : > { %v3644_v59 = vmul.f32 %v3628_v14, %v11235_v49  ;;  %v3600_v14 = vmax.f32 %v13546_v43, 0.0 }
 0x46e   : > { %v13589_v44 = vsub.f32 %v3596_v35, %v3644_v59  ;;  %v3676_v51 = vsub.f32 %v3612_v38, %v3644_v59 }
 0x46f   : > { %v3558_v37 = vpop.f32.mrf.mxu1 }
 0x470   : > { %v3692_v5 = vmul.f32 %v13589_v44, %v13589_v44  ;;  %v3708_v31 = vmul.f32 %v3676_v51, %v3676_v51  ;;  %v3613_v21 = vmax.f32 %v3558_v37, 0.0 }
 0x472   : > { %v3724_v41 = vadd.f32 %v3708_v31, %v3692_v5  ;;  %v3629_v29 = vadd.f32 %v3613_v21, %v3597_v56 }
 0x474   : > { %v3740_v23 = vmul.f32 %v3724_v41, %v11235_v49  ;;  %v3645_v22 = vmul.f32 %v3629_v29, %v11235_v49 }
 0x476   : > { %v3756_v32 = vadd.f32 1e-05, %v3740_v23  ;;  %v13598_v62 = vsub.f32 %v3597_v56, %v3645_v22  ;;  %v13600_v27 = vsub.f32 %v3613_v21, %v3645_v22 }
 0x477   : > { %v3561_v26 = vpop.f32.mrf.mxu1 }
 0x478   : > { %10247 = vrsqrt.f32 %v3756_v32  ;;  %v3693_v53 = vmul.f32 %v13598_v62, %v13598_v62  ;;  %v3709_v7 = vmul.f32 %v13600_v27, %v13600_v27  ;;  %v3614_v8 = vmax.f32 %v3561_v26, 0.0 }
 0x479   : > { %vm3778_vm2 = vweird.f32 %v3756_v32 }
 0x47a   : > { %v3725_v47 = vadd.f32 %v3709_v7, %v3693_v53  ;;  %v3630_v6 = vadd.f32 %v3614_v8, %v3598_v36 }
 0x47c   : > { %v3741_v12 = vmul.f32 %v3725_v47, %v11235_v49  ;;  %v3646_v40 = vmul.f32 %v3630_v6, %v11235_v49 }
 0x47e   : > { %v10248_v24 = vpop.eup %10247  ;;  %v3757_v63 = vadd.f32 1e-05, %v3741_v12  ;;  %v13609_v15 = vsub.f32 %v3598_v36, %v3646_v40  ;;  %v13611_v0 = vsub.f32 %v3614_v8, %v3646_v40 }
 0x47f   : > { %v3773_v16 = vmul.f32 %v10248_v24, %v3756_v32  ;;  %v3563_v19 = vpop.f32.mrf.mxu1  ;;  %vm3779_vm1 = vweird.f32 %v10248_v24 }
 0x480   : > { %10249 = vrsqrt.f32 %v3757_v63  ;;  %v3615_v48 = vmax.f32 %v3563_v19, 0.0  ;;  %v3694_v1 = vmul.f32 %v13609_v15, %v13609_v15  ;;  %v3710_v25 = vmul.f32 %v13611_v0, %v13611_v0  ;;  %vm3780_vm3 = vmor %vm3778_vm2, %vm3779_vm1 }
 0x481   : > { %v3774_v42 = vmul.f32 %v10248_v24, %v3773_v16  ;;  %vm3788_vm5 = vweird.f32 %v3757_v63 }
 0x482   : > { %v3631_v2 = vadd.f32 %v3615_v48, %v3599_v52  ;;  %v3726_v3 = vadd.f32 %v3710_v25, %v3694_v1 }
 0x483   : > { %v3775_v50 = vmul.f32 0.5, %v3774_v42 }
 0x484   : > { %v3647_v9 = vmul.f32 %v3631_v2, %v11235_v49  ;;  %v3742_v34 = vmul.f32 %v3726_v3, %v11235_v49 }
 0x485   : > { %v3776_v58 = vsub.f32 1.5, %v3775_v50 }
 0x486   : > { %v10250_v11 = vpop.eup %10249  ;;  %v13623_v61 = vsub.f32 %v3599_v52, %v3647_v9  ;;  %v13625_v45 = vsub.f32 %v3615_v48, %v3647_v9  ;;  %v3758_v35 = vadd.f32 1e-05, %v3742_v34 }
 0x487   : > { %v3777_v57 = vmul.f32 %v10248_v24, %v3776_v58  ;;  %v3783_v46 = vmul.f32 %v10250_v11, %v3757_v63  ;;  %v3566_v38 = vpop.f32.mrf.mxu1  ;;  %vm3789_vm4 = vweird.f32 %v10250_v11 }
 0x488   : > { %v3695_v59 = vmul.f32 %v13623_v61, %v13623_v61  ;;  %v3711_v37 = vmul.f32 %v13625_v45, %v13625_v45  ;;  %v3616_v56 = vmax.f32 %v3566_v38, 0.0  ;;  %10251 = vrsqrt.f32 %v3758_v35  ;;  %vm3790_vm6 = vmor %vm3788_vm5, %vm3789_vm4 }
 0x489   : > { %v3781_v5 = vsel %vm3780_vm3, %v10248_v24, %v3777_v57  ;;  %v3784_v31 = vmul.f32 %v10250_v11, %v3783_v46  ;;  %vm3798_vm8 = vweird.f32 %v3758_v35 }
 0x48a   : > { %v13632_v21 = vmul.f32 %v3781_v5, %v3676_v51  ;;  %v3727_v41 = vadd.f32 %v3711_v37, %v3695_v59  ;;  %v3632_v29 = vadd.f32 %v3616_v56, %v3600_v14  ;;  %v3601_v51 = vmax.f32 %v13551_v30, 0.0 }
 0x48b   : > { %v3785_v23 = vmul.f32 0.5, %v3784_v31  ;;  %v3932_v16 = vmul.f32 %v3781_v5, %v13589_v44  ;;  %v3602_v44 = vmax.f32 %v13556_v33, 0.0 }
 0x48c   : > { %v3743_v22 = vmul.f32 %v3727_v41, %v11235_v49  ;;  %v3648_v43 = vmul.f32 %v3632_v29, %v11235_v49 }
 0x48d   : > { %v3786_v55 = vsub.f32 1.5, %v3785_v23 }
 0x48e   : > { %v3759_v32 = vadd.f32 1e-05, %v3743_v22  ;;  %v13636_v26 = vsub.f32 %v3600_v14, %v3648_v43  ;;  %v13638_v53 = vsub.f32 %v3616_v56, %v3648_v43  ;;  %v10252_v7 = vpop.eup %10251 }
 0x48f   : > { %v3787_v36 = vmul.f32 %v10250_v11, %v3786_v55  ;;  %v3568_v8 = vpop.f32.mrf.mxu1  ;;  %v3793_v47 = vmul.f32 %v10252_v7, %v3758_v35  ;;  %vm3799_vm7 = vweird.f32 %v10252_v7 }
 0x490   : > { %10253 = vrsqrt.f32 %v3759_v32  ;;  %v3696_v12 = vmul.f32 %v13636_v26, %v13636_v26  ;;  %v3712_v40 = vmul.f32 %v13638_v53, %v13638_v53  ;;  %v3617_v24 = vmax.f32 %v3568_v8, 0.0  ;;  %vm3800_vm9 = vmor %vm3798_vm8, %vm3799_vm7 }
 0x491   : > { %v3791_v6 = vsel %vm3790_vm6, %v10250_v11, %v3787_v36  ;;  %v3794_v52 = vmul.f32 %v10252_v7, %v3793_v47  ;;  %vm3808_vm11 = vweird.f32 %v3759_v32  ;;  %v3603_v36 = vmax.f32 %v13561_v28, 0.0  ;;  %v10006_v28 = vld [vmem:[%s17175_s6 + $0x18] sm:$0xff] }
 0x492   : > { %v3933_v19 = vmul.f32 %v3791_v6, %v13598_v62  ;;  %v13648_v63 = vmul.f32 %v3791_v6, %v13600_v27  ;;  %v3728_v30 = vadd.f32 %v3712_v40, %v3696_v12  ;;  %v3633_v48 = vadd.f32 %v3617_v24, %v3601_v51  ;;  %4221 = vmatpush.bf16.msrb.mxu3 %v10006_v28 }
 0x493   : > { %v3795_v1 = vmul.f32 0.5, %v3794_v52 }
 0x494   : > { %v3964_v42 = vpack.c.bf16 %v3933_v19, %v3932_v16  ;;  %v3744_v25 = vmul.f32 %v3728_v30, %v11235_v49  ;;  %v3649_v2 = vmul.f32 %v3633_v48, %v11235_v49 }
 0x495   : > { %v3796_v50 = vsub.f32 1.5, %v3795_v1 }
 0x496   : > { %v10254_v39 = vpop.eup %10253  ;;  %4056 = vmatmul.bf16.vlgmr.msrb.gmra.mxu2 %v3964_v42  ;;  %v3760_v62 = vadd.f32 1e-05, %v3744_v25  ;;  %v13653_v9 = vsub.f32 %v3601_v51, %v3649_v2  ;;  %v13655_v34 = vsub.f32 %v3617_v24, %v3649_v2  ;;  %v3604_v2 = vmax.f32 %v13566_v10, 0.0 }
 0x497   : > { %v3803_v3 = vmul.f32 %v10254_v39, %v3759_v32  ;;  %v3571_v27 = vpop.f32.mrf.mxu1  ;;  %v3797_v58 = vmul.f32 %v10252_v7, %v3796_v50  ;;  %vm3809_vm10 = vweird.f32 %v10254_v39 }
 0x498   : > { %v3618_v11 = vmax.f32 %v3571_v27, 0.0  ;;  %10255 = vrsqrt.f32 %v3760_v62  ;;  %v3697_v46 = vmul.f32 %v13653_v9, %v13653_v9  ;;  %v3713_v33 = vmul.f32 %v13655_v34, %v13655_v34  ;;  %vm3810_vm12 = vmor %vm3808_vm11, %vm3809_vm10 }
 0x499   : > { %v3804_v57 = vmul.f32 %v10254_v39, %v3803_v3  ;;  %v3801_v38 = vsel %vm3800_vm9, %v10252_v7, %v3797_v58  ;;  %vm3818_vm14 = vweird.f32 %v3760_v62 }
 0x49a   : > { %v3634_v14 = vadd.f32 %v3618_v11, %v3602_v44  ;;  %v13662_v59 = vmul.f32 %v3801_v38, %v13611_v0  ;;  %v3729_v56 = vadd.f32 %v3713_v33, %v3697_v46  ;;  %v3934_v16 = vmul.f32 %v3801_v38, %v13609_v15 }
 0x49b   : > { %v3805_v37 = vmul.f32 0.5, %v3804_v57 }
 0x49c   : > { %v3650_v35 = vmul.f32 %v3634_v14, %v11235_v49  ;;  %v3745_v31 = vmul.f32 %v3729_v56, %v11235_v49 }
 0x49d   : > { %v3806_v5 = vsub.f32 1.5, %v3805_v37 }
 0x49e   : > { %v13666_v41 = vsub.f32 %v3602_v44, %v3650_v35  ;;  %v13668_v29 = vsub.f32 %v3618_v11, %v3650_v35  ;;  %v10256_v23 = vpop.eup %10255  ;;  %v3761_v0 = vadd.f32 1e-05, %v3745_v31  ;;  %v3605_v31 = vmax.f32 %v13568_v20, 0.0 }
 0x49f   : > { %v3807_v22 = vmul.f32 %v10254_v39, %v3806_v5  ;;  %v3573_v43 = vpop.f32.mrf.mxu1  ;;  %v3813_v55 = vmul.f32 %v10256_v23, %v3760_v62  ;;  %vm3819_vm13 = vweird.f32 %v10256_v23 }
 0x4a0   : > { %v3698_v7 = vmul.f32 %v13666_v41, %v13666_v41  ;;  %v3714_v51 = vmul.f32 %v13668_v29, %v13668_v29  ;;  %v3619_v47 = vmax.f32 %v3573_v43, 0.0  ;;  %10257 = vrsqrt.f32 %v3761_v0  ;;  %vm3820_vm15 = vmor %vm3818_vm14, %vm3819_vm13 }
 0x4a1   : > { %v3811_v8 = vsel %vm3810_vm12, %v10254_v39, %v3807_v22  ;;  %v3814_v12 = vmul.f32 %v10256_v23, %v3813_v55  ;;  %vm3828_vm1 = vweird.f32 %v3761_v0 }
 0x4a2   : > { %v13676_v6 = vmul.f32 %v3811_v8, %v13625_v45  ;;  %v3730_v32 = vadd.f32 %v3714_v51, %v3698_v7  ;;  %v3635_v40 = vadd.f32 %v3619_v47, %v3603_v36  ;;  %v3935_v19 = vmul.f32 %v3811_v8, %v13623_v61 }
 0x4a3   : > { %v3815_v24 = vmul.f32 0.5, %v3814_v12  ;;  %v3972_v8 = vpack.c.bf16 %v13648_v63, %v13632_v21 }
 0x4a4   : > { %v3746_v52 = vmul.f32 %v3730_v32, %v11235_v49  ;;  %v3651_v30 = vmul.f32 %v3635_v40, %v11235_v49  ;;  %v3965_v45 = vpack.c.bf16 %v3935_v19, %v3934_v16 }
 0x4a5   : > { %v3816_v48 = vsub.f32 1.5, %v3815_v24 }
 0x4a6   : > { %v13685_v42 = vadd.f32 1e-05, %v3746_v52  ;;  %v13687_v1 = vsub.f32 %v3603_v36, %v3651_v30  ;;  %v13689_v25 = vsub.f32 %v3619_v47, %v3651_v30  ;;  %v10258_v61 = vpop.eup %10257  ;;  %4061 = vmatmul.bf16.gmra.mxu2 %v3965_v45 }
 0x4a7   : > { %v3576_v15 = vpop.f32.mrf.mxu1  ;;  %v3817_v39 = vmul.f32 %v10256_v23, %v3816_v48  ;;  %v3823_v44 = vmul.f32 %v10258_v61, %v3761_v0  ;;  %vm3829_vm0 = vweird.f32 %v10258_v61 }
 0x4a8   : > { %v3620_v50 = vmax.f32 %v3576_v15, 0.0  ;;  %10259 = vrsqrt.f32 %v13685_v42  ;;  %v3699_v27 = vmul.f32 %v13687_v1, %v13687_v1  ;;  %v3715_v58 = vmul.f32 %v13689_v25, %v13689_v25  ;;  %vm3830_vm2 = vmor %vm3828_vm1, %vm3829_vm0 }
 0x4a9   : > { %v3821_v3 = vsel %vm3820_vm15, %v10256_v23, %v3817_v39  ;;  %v3824_v10 = vmul.f32 %v10258_v61, %v3823_v44  ;;  %v3606_v15 = vmax.f32 %v13573_v17, 0.0  ;;  %vm3838_vm4 = vweird.f32 %v13685_v42 }
 0x4aa   : > { %v3636_v11 = vadd.f32 %v3620_v50, %v3604_v2  ;;  %v13698_v57 = vmul.f32 %v3821_v3, %v13638_v53  ;;  %v3731_v46 = vadd.f32 %v3715_v58, %v3699_v27  ;;  %v3936_v40 = vmul.f32 %v3821_v3, %v13636_v26 }
 0x4ab   : > { %v3825_v38 = vmul.f32 0.5, %v3824_v10 }
 0x4ac   : > { %v3652_v62 = vmul.f32 %v3636_v11, %v11235_v49  ;;  %v3747_v33 = vmul.f32 %v3731_v46, %v11235_v49 }
 0x4ad   : > { %v3826_v35 = vsub.f32 1.5, %v3825_v38 }
 0x4ae   : > { %v13702_v14 = vsub.f32 %v3604_v2, %v3652_v62  ;;  %v13704_v37 = vsub.f32 %v3620_v50, %v3652_v62  ;;  %v10260_v56 = vpop.eup %10259  ;;  %v3763_v23 = vadd.f32 1e-05, %v3747_v33 }
 0x4af   : > { %v3578_v5 = vpop.f32.mrf.mxu1  ;;  %v3833_v53 = vmul.f32 %v10260_v56, %v13685_v42  ;;  %v3827_v43 = vmul.f32 %v10258_v61, %v3826_v35  ;;  %vm3839_vm3 = vweird.f32 %v10260_v56 }
 0x4b0   : > { %v3700_v22 = vmul.f32 %v13702_v14, %v13702_v14  ;;  %v3716_v55 = vmul.f32 %v13704_v37, %v13704_v37  ;;  %v3621_v7 = vmax.f32 %v3578_v5, 0.0  ;;  %10261 = vrsqrt.f32 %v3763_v23  ;;  %vm3840_vm5 = vmor %vm3838_vm4, %vm3839_vm3 }
 0x4b1   : > { %v3834_v36 = vmul.f32 %v10260_v56, %v3833_v53  ;;  %v3831_v51 = vsel %vm3830_vm2, %v10258_v61, %v3827_v43  ;;  %vm3848_vm7 = vweird.f32 %v3763_v23 }
 0x4b2   : > { %v3732_v20 = vadd.f32 %v3716_v55, %v3700_v22  ;;  %v3637_v47 = vadd.f32 %v3621_v7, %v3605_v31  ;;  %v13715_v12 = vmul.f32 %v3831_v51, %v13655_v34  ;;  %v3937_v0 = vmul.f32 %v3831_v51, %v13653_v9 }
 0x4b3   : > { %v3835_v32 = vmul.f32 0.5, %v3834_v36  ;;  %v3973_v55 = vpack.c.bf16 %v13676_v6, %v13662_v59 }
 0x4b4   : > { %v3748_v24 = vmul.f32 %v3732_v20, %v11235_v49  ;;  %v3653_v16 = vmul.f32 %v3637_v47, %v11235_v49  ;;  %v3966_v28 = vpack.c.bf16 %v3937_v0, %v3936_v40 }
 0x4b5   : > { %v3836_v19 = vsub.f32 1.5, %v3835_v32  ;;  %v10005_v32 = vld [vmem:[%s17175_s6 + $0x10] sm:$0xff] }
 0x4b6   : > { %v13721_v52 = vadd.f32 1e-05, %v3748_v24  ;;  %v13723_v30 = vsub.f32 %v3605_v31, %v3653_v16  ;;  %v13725_v48 = vsub.f32 %v3621_v7, %v3653_v16  ;;  %v10262_v45 = vpop.eup %10261  ;;  %4066 = vmatmul.bf16.gmra.mxu2 %v3966_v28  ;;  %4222 = vmatpush.bf16.msrb.mxu3 %v10005_v32 }
 0x4b7   : > { %v3581_v34 = vpop.f32.mrf.mxu1  ;;  %v3837_v26 = vmul.f32 %v10260_v56, %v3836_v19  ;;  %v3843_v61 = vmul.f32 %v10262_v45, %v3763_v23  ;;  %vm3849_vm6 = vweird.f32 %v10262_v45 }
 0x4b8   : > { %v3622_v9 = vmax.f32 %v3581_v34, 0.0  ;;  %10263 = vrsqrt.f32 %v13721_v52  ;;  %v3701_v39 = vmul.f32 %v13723_v30, %v13723_v30  ;;  %v3717_v50 = vmul.f32 %v13725_v48, %v13725_v48  ;;  %vm3850_vm8 = vmor %vm3848_vm7, %vm3849_vm6 }
 0x4b9   : > { %v3841_v2 = vsel %vm3840_vm5, %v10260_v56, %v3837_v26  ;;  %v3844_v17 = vmul.f32 %v10262_v45, %v3843_v61  ;;  %v3607_v56 = vmax.f32 %v13575_v54, 0.0  ;;  %v3608_v34 = vmax.f32 %v13580_v13, 0.0 }
 0x4ba   : > { %v3638_v44 = vadd.f32 %v3622_v9, %v3606_v15  ;;  %v13735_v3 = vmul.f32 %v3841_v2, %v13668_v29  ;;  %v3733_v27 = vadd.f32 %v3717_v50, %v3701_v39  ;;  %v3938_v47 = vmul.f32 %v3841_v2, %v13666_v41 }
 0x4bb   : > { %v3845_v58 = vmul.f32 0.5, %v3844_v17  ;;  %vm3858_vm10 = vweird.f32 %v13721_v52 }
 0x4bc   : > { %v3654_v42 = vmul.f32 %v3638_v44, %v11235_v49  ;;  %v3749_v11 = vmul.f32 %v3733_v27, %v11235_v49 }
 0x4bd   : > { %v3846_v38 = vsub.f32 1.5, %v3845_v58 }
 0x4be   : > { %v13739_v10 = vsub.f32 %v3606_v15, %v3654_v42  ;;  %v13741_v46 = vsub.f32 %v3622_v9, %v3654_v42  ;;  %v10264_v62 = vpop.eup %10263  ;;  %v3765_v35 = vadd.f32 1e-05, %v3749_v11 }
 0x4bf   : > { %v3583_v33 = vpop.f32.mrf.mxu1  ;;  %v3853_v29 = vmul.f32 %v10264_v62, %v13721_v52  ;;  %v3847_v31 = vmul.f32 %v10262_v45, %v3846_v38  ;;  %vm3859_vm9 = vweird.f32 %v10264_v62 }
 0x4c0   : > { %v3702_v5 = vmul.f32 %v13739_v10, %v13739_v10  ;;  %v3718_v53 = vmul.f32 %v13741_v46, %v13741_v46  ;;  %v3623_v22 = vmax.f32 %v3583_v33, 0.0  ;;  %10265 = vrsqrt.f32 %v3765_v35  ;;  %vm3860_vm11 = vmor %vm3858_vm10, %vm3859_vm9 }
 0x4c1   : > { %v3854_v43 = vmul.f32 %v10264_v62, %v3853_v29  ;;  %v3851_v7 = vsel %vm3850_vm8, %v10262_v45, %v3847_v31  ;;  %v3609_v33 = vmax.f32 %v13582_v4, 0.0  ;;  %vm3868_vm13 = vweird.f32 %v3765_v35 }
 0x4c2   : > { %v3734_v54 = vadd.f32 %v3718_v53, %v3702_v5  ;;  %v3639_v36 = vadd.f32 %v3623_v22, %v3607_v56  ;;  %v13752_v51 = vmul.f32 %v3851_v7, %v13689_v25  ;;  %v3939_v23 = vmul.f32 %v3851_v7, %v13687_v1 }
 0x4c3   : > { %v3855_v20 = vmul.f32 0.5, %v3854_v43  ;;  %v3974_v43 = vpack.c.bf16 %v13715_v12, %v13698_v57 }
 0x4c4   : > { %v3750_v40 = vmul.f32 %v3734_v54, %v11235_v49  ;;  %v3655_v0 = vmul.f32 %v3639_v36, %v11235_v49  ;;  %v3967_v16 = vpack.c.bf16 %v3939_v23, %v3938_v47 }
 0x4c5   : > { %v3856_v24 = vsub.f32 1.5, %v3855_v20 }
 0x4c6   : > { %v13761_v19 = vadd.f32 1e-05, %v3750_v40  ;;  %v13763_v25 = vsub.f32 %v3607_v56, %v3655_v0  ;;  %v13765_v28 = vsub.f32 %v3623_v22, %v3655_v0  ;;  %v10266_v1 = vpop.eup %10265  ;;  %4071 = vmatmul.bf16.gmra.mxu2 %v3967_v16 }
 0x4c7   : > { %v3586_v41 = vpop.f32.mrf.mxu1  ;;  %v3857_v45 = vmul.f32 %v10264_v62, %v3856_v24  ;;  %v3863_v26 = vmul.f32 %v10266_v1, %v3765_v35  ;;  %vm3869_vm12 = vweird.f32 %v10266_v1 }
 0x4c8   : > { %v3624_v15 = vmax.f32 %v3586_v41, 0.0  ;;  %10267 = vrsqrt.f32 %v13761_v19  ;;  %v3703_v61 = vmul.f32 %v13763_v25, %v13763_v25  ;;  %v3719_v2 = vmul.f32 %v13765_v28, %v13765_v28  ;;  %vm3870_vm14 = vmor %vm3868_vm13, %vm3869_vm12 }
 0x4c9   : > { %v3861_v9 = vsel %vm3860_vm11, %v10264_v62, %v3857_v45  ;;  %v3864_v13 = vmul.f32 %v10266_v1, %v3863_v26  ;;  %vm3878_vm0 = vweird.f32 %v13761_v19 }
 0x4ca   : > { %v3640_v39 = vadd.f32 %v3624_v15, %v3608_v34  ;;  %v13775_v50 = vmul.f32 %v3861_v9, %v13704_v37  ;;  %v3735_v44 = vadd.f32 %v3719_v2, %v3703_v61  ;;  %v3940_v47 = vmul.f32 %v3861_v9, %v13702_v14 }
 0x4cb   : > { %v3865_v17 = vmul.f32 0.5, %v3864_v13 }
 0x4cc   : > { %v3656_v52 = vmul.f32 %v3640_v39, %v11235_v49  ;;  %v3751_v27 = vmul.f32 %v3735_v44, %v11235_v49 }
 0x4cd   : > { %v3866_v62 = vsub.f32 1.5, %v3865_v17 }
 0x4ce   : > { %v13779_v42 = vsub.f32 %v3608_v34, %v3656_v52  ;;  %v13781_v58 = vsub.f32 %v3624_v15, %v3656_v52  ;;  %v10268_v11 = vpop.eup %10267  ;;  %v3767_v56 = vadd.f32 1e-05, %v3751_v27  ;;  %v3610_v34 = vmax.f32 %v13584_v60, 0.0 }
 0x4cf   : > { %v3588_v38 = vpop.f32.mrf.mxu1  ;;  %v3873_v37 = vmul.f32 %v10268_v11, %v13761_v19  ;;  %v3867_v5 = vmul.f32 %v10266_v1, %v3866_v62  ;;  %vm3879_vm15 = vweird.f32 %v10268_v11 }
 0x4d0   : > { %v3704_v29 = vmul.f32 %v13779_v42, %v13779_v42  ;;  %v3720_v31 = vmul.f32 %v13781_v58, %v13781_v58  ;;  %v3625_v53 = vmax.f32 %v3588_v38, 0.0  ;;  %10269 = vrsqrt.f32 %v3767_v56  ;;  %vm3880_vm1 = vmor %vm3878_vm0, %vm3879_vm15 }
 0x4d1   : > { %v3874_v22 = vmul.f32 %v10268_v11, %v3873_v37  ;;  %v3871_v7 = vsel %vm3870_vm14, %v10266_v1, %v3867_v5  ;;  %v3611_v38 = vmax.f32 %v13586_v18, 0.0  ;;  %vm3888_vm3 = vweird.f32 %v3767_v56 }
 0x4d2   : > { %v3736_v4 = vadd.f32 %v3720_v31, %v3704_v29  ;;  %v3641_v54 = vadd.f32 %v3625_v53, %v3609_v33  ;;  %v13792_v36 = vmul.f32 %v3871_v7, %v13725_v48  ;;  %v3941_v35 = vmul.f32 %v3871_v7, %v13723_v30 }
 0x4d3   : > { %v3875_v20 = vmul.f32 0.5, %v3874_v22  ;;  %v3975_v22 = vpack.c.bf16 %v13752_v51, %v13735_v3 }
 0x4d4   : > { %v3752_v23 = vmul.f32 %v3736_v4, %v11235_v49  ;;  %v3657_v32 = vmul.f32 %v3641_v54, %v11235_v49  ;;  %v3968_v0 = vpack.c.bf16 %v3941_v35, %v3940_v47  ;;  %v10004_v35 = vld [vmem:[%s17175_s6 + $0x8] sm:$0xff] }
 0x4d5   : > { %v3876_v40 = vsub.f32 1.5, %v3875_v20  ;;  %4223 = vmatpush.bf16.msrb.mxu3 %v10004_v35 }
 0x4d6   : > { %v13798_v24 = vadd.f32 1e-05, %v3752_v23  ;;  %v13800_v16 = vsub.f32 %v3609_v33, %v3657_v32  ;;  %v13802_v41 = vsub.f32 %v3625_v53, %v3657_v32  ;;  %v10270_v1 = vpop.eup %10269  ;;  %4076 = vmatmul.bf16.gmra.mxu2 %v3968_v0 }
 0x4d7   : > { %v3591_v48 = vpop.f32.mrf.mxu1  ;;  %v3877_v14 = vmul.f32 %v10268_v11, %v3876_v40  ;;  %v3883_v45 = vmul.f32 %v10270_v1, %v3767_v56  ;;  %vm3889_vm2 = vweird.f32 %v10270_v1 }
 0x4d8   : > { %v3626_v30 = vmax.f32 %v3591_v48, 0.0  ;;  %10271 = vrsqrt.f32 %v13798_v24  ;;  %v3705_v26 = vmul.f32 %v13800_v16, %v13800_v16  ;;  %v3721_v9 = vmul.f32 %v13802_v41, %v13802_v41  ;;  %vm3890_vm4 = vmor %vm3888_vm3, %vm3889_vm2 }
 0x4d9   : > { %v3881_v15 = vsel %vm3880_vm1, %v10268_v11, %v3877_v14  ;;  %v3884_v60 = vmul.f32 %v10270_v1, %v3883_v45  ;;  %vm3898_vm6 = vweird.f32 %v13798_v24 }
 0x4da   : > { %v3642_v61 = vadd.f32 %v3626_v30, %v3610_v34  ;;  %v13812_v2 = vmul.f32 %v3881_v15, %v13741_v46  ;;  %v3737_v39 = vadd.f32 %v3721_v9, %v3705_v26  ;;  %v3942_v47 = vmul.f32 %v3881_v15, %v13739_v10  ;;  %v10003_v10 = vld [vmem:[%s17175_s6] sm:$0xff] }
 0x4db   : > { %v3885_v13 = vmul.f32 0.5, %v3884_v60  ;;  %4224 = vmatpush.bf16.msrb.mxu3 %v10003_v10  ;;  %v10018_v10 = vld [vmem:[%s17176_s7 + $0x38] sm:$0xff] }
 0x4dc   : > { %v3658_v19 = vmul.f32 %v3642_v61, %v11235_v49  ;;  %v3753_v44 = vmul.f32 %v3737_v39, %v11235_v49  ;;  %4754 = vmatpush.bf16.msrb.mxu0 %v10018_v10 }
 0x4dd   : > { %v3886_v11 = vsub.f32 1.5, %v3885_v13 }
 0x4de   : > { %v13816_v52 = vsub.f32 %v3610_v34, %v3658_v19  ;;  %v13818_v17 = vsub.f32 %v3626_v30, %v3658_v19  ;;  %v10272_v27 = vpop.eup %10271  ;;  %v3769_v33 = vadd.f32 1e-05, %v3753_v44 }
 0x4df   : > { %v3593_v62 = vpop.f32.mrf.mxu1  ;;  %v3893_v46 = vmul.f32 %v10272_v27, %v13798_v24  ;;  %v3887_v29 = vmul.f32 %v10270_v1, %v3886_v11  ;;  %vm3899_vm5 = vweird.f32 %v10272_v27 }
 0x4e0   : > { %v3706_v37 = vmul.f32 %v13816_v52, %v13816_v52  ;;  %v3722_v5 = vmul.f32 %v13818_v17, %v13818_v17  ;;  %v3627_v31 = vmax.f32 %v3593_v62, 0.0  ;;  %10273 = vrsqrt.f32 %v3769_v33  ;;  %vm3900_vm7 = vmor %vm3898_vm6, %vm3899_vm5 }
 0x4e1   : > { %v3894_v53 = vmul.f32 %v10272_v27, %v3893_v46  ;;  %v3891_v7 = vsel %vm3890_vm4, %v10270_v1, %v3887_v29  ;;  %vm3908_vm9 = vweird.f32 %v3769_v33  ;;  %v3976_v62 = vpack.c.bf16 %v13792_v36, %v13775_v50 }
 0x4e2   : > { %v3738_v18 = vadd.f32 %v3722_v5, %v3706_v37  ;;  %v3643_v4 = vadd.f32 %v3627_v31, %v3611_v38  ;;  %v13829_v54 = vmul.f32 %v3891_v7, %v13765_v28  ;;  %v3943_v56 = vmul.f32 %v3891_v7, %v13763_v25 }
 0x4e3   : > { %v3895_v20 = vmul.f32 0.5, %v3894_v53 }
 0x4e4   : > { %v3754_v23 = vmul.f32 %v3738_v18, %v11235_v49  ;;  %v3659_v32 = vmul.f32 %v3643_v4, %v11235_v49  ;;  %v3969_v0 = vpack.c.bf16 %v3943_v56, %v3942_v47 }
 0x4e5   : > { %v3896_v40 = vsub.f32 1.5, %v3895_v20 }
 0x4e6   : > { %v3770_v48 = vadd.f32 1e-05, %v3754_v23  ;;  %v3675_v28 = vsub.f32 %v3611_v38, %v3659_v32  ;;  %v3691_v1 = vsub.f32 %v3627_v31, %v3659_v32  ;;  %v10274_v34 = vpop.eup %10273  ;;  %4081 = vmatmul.bf16.gmra.mxu2 %v3969_v0 }
 0x4e7   : > { %v3897_v14 = vmul.f32 %v10272_v27, %v3896_v40  ;;  %v3903_v25 = vmul.f32 %v10274_v34, %v3769_v33  ;;  %vm3909_vm8 = vweird.f32 %v10274_v34 }
 0x4e8   : > { %10275 = vrsqrt.f32 %v3770_v48  ;;  %v3707_v45 = vmul.f32 %v3675_v28, %v3675_v28  ;;  %v3723_v15 = vmul.f32 %v3691_v1, %v3691_v1  ;;  %vm3910_vm10 = vmor %vm3908_vm9, %vm3909_vm8  ;;  %vm3918_vm12 = vweird.f32 %v3770_v48 }
 0x4e9   : > { %v3901_v30 = vsel %vm3900_vm7, %v10272_v27, %v3897_v14  ;;  %v3904_v9 = vmul.f32 %v10274_v34, %v3903_v25 }
 0x4ea   : > { %v13843_v26 = vmul.f32 %v3901_v30, %v13781_v58  ;;  %v3739_v61 = vadd.f32 %v3723_v15, %v3707_v45  ;;  %v3944_v37 = vmul.f32 %v3901_v30, %v13779_v42 }
 0x4eb   : > { %v3905_v60 = vmul.f32 0.5, %v3904_v9 }
 0x4ec   : > { %v3755_v24 = vmul.f32 %v3739_v61, %v11235_v49 }
 0x4ed   : > { %v3906_v19 = vsub.f32 1.5, %v3905_v60 }
 0x4ee   : > { %v10276_v39 = vpop.eup %10275  ;;  %v3771_v44 = vadd.f32 1e-05, %v3755_v24 }
 0x4ef   : > { %v3913_v13 = vmul.f32 %v10276_v39, %v3770_v48  ;;  %v3907_v11 = vmul.f32 %v10274_v34, %v3906_v19  ;;  %vm3919_vm11 = vweird.f32 %v10276_v39  ;;  %v13867_v48 = vld [vmem:[%s17174_s5] ss:$0 sm:$0xff]  ;;  %v10016_v19 = vld [vmem:[%s17176_s7 + $0x28] sm:$0xff] }
 0x4f0   : > { %10277 = vrsqrt.f32 %v3771_v44  ;;  %vm3920_vm13 = vmor %vm3918_vm12, %vm3919_vm11  ;;  %vm3928_vm15 = vweird.f32 %v3771_v44 }
 0x4f1   : > { %v3914_v27 = vmul.f32 %v10276_v39, %v3913_v13  ;;  %v3911_v58 = vsel %vm3910_vm10, %v10274_v34, %v3907_v11 }
 0x4f2   : > { %v13849_v38 = vmul.f32 %v3911_v58, %v13802_v41  ;;  %v3945_v29 = vmul.f32 %v3911_v58, %v13800_v16  ;;  %v3977_v16 = vpack.c.bf16 %v13829_v54, %v13812_v2 }
 0x4f3   : > { %v3915_v46 = vmul.f32 0.5, %v3914_v27 }
 0x4f4   : > { %v3970_v31 = vpack.c.bf16 %v3945_v29, %v3944_v37 }
 0x4f5   : > { %v3916_v5 = vsub.f32 1.5, %v3915_v46 }
 0x4f6   : > { %v10278_v53 = vpop.eup %10277  ;;  %4086 = vmatmul.bf16.gmra.mxu2 %v3970_v31 }
 0x4f7   : > { %v3917_v33 = vmul.f32 %v10276_v39, %v3916_v5  ;;  %v3923_v7 = vmul.f32 %v10278_v53, %v3771_v44  ;;  %vm3929_vm14 = vweird.f32 %v10278_v53  ;;  %v10015_v5 = vld [vmem:[%s17176_s7 + $0x20] sm:$0xff] }
 0x4f8   : > { %vm3930_vm0 = vmor %vm3928_vm15, %vm3929_vm14 }
 0x4f9   : > { %v3921_v18 = vsel %vm3920_vm13, %v10276_v39, %v3917_v33  ;;  %v3924_v41 = vmul.f32 %v10278_v53, %v3923_v7 }
 0x4fa   : > { %v13854_v4 = vmul.f32 %v3921_v18, %v13818_v17  ;;  %v3946_v23 = vmul.f32 %v3921_v18, %v13816_v52  ;;  %v3978_v17 = vpack.c.bf16 %v13849_v38, %v13843_v26  ;;  %v10017_v26 = vld [vmem:[%s17176_s7 + $0x30] sm:$0xff] }
 0x4fb   : > { %v3925_v20 = vmul.f32 0.5, %v3924_v41  ;;  %4755 = vmatpush.bf16.msrb.mxu0 %v10017_v26 }
 0x4fd   : > { %v3926_v47 = vsub.f32 1.5, %v3925_v20 }
 0x4ff   : > { %v3927_v42 = vmul.f32 %v10278_v53, %v3926_v47  ;;  %4756 = vmatpush.bf16.msrb.mxu0 %v10016_v19 }
 0x501   : > { %v3931_v56 = vsel %vm3930_vm0, %v10278_v53, %v3927_v42 }
 0x502   : > { %v3963_v35 = vmul.f32 %v3931_v56, %v3691_v1  ;;  %v3947_v32 = vmul.f32 %v3931_v56, %v3675_v28 }
 0x503   : > { %4757 = vmatpush.bf16.msrb.mxu0 %v10015_v5 }
 0x504   : > { %v3971_v40 = vpack.c.bf16 %v3947_v32, %v3946_v23  ;;  %v3979_v28 = vpack.c.bf16 %v3963_v35, %v13854_v4  ;;  %v10014_v35 = vld [vmem:[%s17176_s7 + $0x18] sm:$0xff] }
 0x506   : > { %4091 = vmatmul.bf16.gmra.mxu2 %v3971_v40 }
 0x507   : > { %4758 = vmatpush.bf16.msrb.mxu0 %v10014_v35 }
 0x516   : > { %4096 = vmatmul.bf16.gmra.mxu2 %v3972_v8 }
 0x519   : > { %v4057_v0 = vpop.f32.mrf.mxu2 }
 0x51a   : > { %v4058_v54 = vadd.f32 %v13867_v48, %v4057_v0 }
 0x521   : > { %v4059_v2 = vpop.f32.mrf.mxu2 }
 0x522   : > { %v4060_v52 = vadd.f32 %v13867_v48, %v4059_v2 }
 0x524   : > { %v4137_v1 = vpack.c.bf16 %v4060_v52, %v4058_v54 }
 0x526   : > { %4225 = vmatmul.bf16.vlgmr.msrb.gmra.mxu3 %v4137_v1  ;;  %4101 = vmatmul.bf16.gmra.mxu2 %v3973_v55 }
 0x529   : > { %v4062_v21 = vpop.f32.mrf.mxu2 }
 0x52a   : > { %v4063_v8 = vadd.f32 %v13867_v48, %v4062_v21 }
 0x531   : > { %v4064_v63 = vpop.f32.mrf.mxu2 }
 0x532   : > { %v4065_v34 = vadd.f32 %v13867_v48, %v4064_v63 }
 0x534   : > { %v4138_v14 = vpack.c.bf16 %v4065_v34, %v4063_v8 }
 0x536   : > { %4106 = vmatmul.bf16.gmra.mxu2 %v3974_v43  ;;  %4230 = vmatmul.bf16.gmra.mxu3 %v4138_v14  ;;  %v10013_v14 = vld [vmem:[%s17176_s7 + $0x10] sm:$0xff] }
 0x537   : > { %4759 = vmatpush.bf16.msrb.mxu0 %v10013_v14 }
 0x539   : > { %v4067_v25 = vpop.f32.mrf.mxu2 }
 0x53a   : > { %v4068_v6 = vadd.f32 %v13867_v48, %v4067_v25 }
 0x541   : > { %v4069_v59 = vpop.f32.mrf.mxu2 }
 0x542   : > { %v4070_v55 = vadd.f32 %v13867_v48, %v4069_v59 }
 0x544   : > { %v4139_v30 = vpack.c.bf16 %v4070_v55, %v4068_v6 }
 0x546   : > { %4111 = vmatmul.bf16.gmra.mxu2 %v3975_v22  ;;  %4235 = vmatmul.bf16.gmra.mxu3 %v4139_v30 }
 0x549   : > { %v4072_v57 = vpop.f32.mrf.mxu2 }
 0x54a   : > { %v4073_v43 = vadd.f32 %v13867_v48, %v4072_v57 }
 0x551   : > { %v4074_v12 = vpop.f32.mrf.mxu2 }
 0x552   : > { %v4075_v45 = vadd.f32 %v13867_v48, %v4074_v12 }
 0x554   : > { %v4140_v15 = vpack.c.bf16 %v4075_v45, %v4073_v43 }
 0x556   : > { %4116 = vmatmul.bf16.gmra.mxu2 %v3976_v62  ;;  %4240 = vmatmul.bf16.gmra.mxu3 %v4140_v15 }
 0x559   : > { %v4077_v3 = vpop.f32.mrf.mxu2 }
 0x55a   : > { %v4078_v22 = vadd.f32 %v13867_v48, %v4077_v3 }
 0x561   : > { %v4079_v51 = vpop.f32.mrf.mxu2 }
 0x562   : > { %v4080_v9 = vadd.f32 %v13867_v48, %v4079_v51 }
 0x564   : > { %v4141_v61 = vpack.c.bf16 %v4080_v9, %v4078_v22  ;;  %v10012_v22 = vld [vmem:[%s17176_s7 + $0x8] sm:$0xff] }
 0x565   : > { %4760 = vmatpush.bf16.msrb.mxu0 %v10012_v22 }
 0x566   : > { %4121 = vmatmul.bf16.gmra.mxu2 %v3977_v16  ;;  %4245 = vmatmul.bf16.gmra.mxu3 %v4141_v61 }
 0x569   : > { %v4082_v60 = vpop.f32.mrf.mxu2 }
 0x56a   : > { %v4083_v50 = vadd.f32 %v13867_v48, %v4082_v60 }
 0x571   : > { %v4084_v24 = vpop.f32.mrf.mxu2 }
 0x572   : > { %v4085_v36 = vadd.f32 %v13867_v48, %v4084_v24 }
 0x574   : > { %v4142_v39 = vpack.c.bf16 %v4085_v36, %v4083_v50 }
 0x576   : > { %4126 = vmatmul.bf16.gmra.mxu2 %v3978_v17  ;;  %4250 = vmatmul.bf16.gmra.mxu3 %v4142_v39 }
 0x579   : > { %v4087_v13 = vpop.f32.mrf.mxu2 }
 0x57a   : > { %v4088_v11 = vadd.f32 %v13867_v48, %v4087_v13 }
 0x581   : > { %v4089_v44 = vpop.f32.mrf.mxu2 }
 0x582   : > { %v4090_v27 = vadd.f32 %v13867_v48, %v4089_v44 }
 0x584   : > { %v4143_v62 = vpack.c.bf16 %v4090_v27, %v4088_v11 }
 0x586   : > { %4131 = vmatmul.bf16.gmra.mxu2 %v3979_v28  ;;  %4255 = vmatmul.bf16.gmra.mxu3 %v4143_v62 }
 0x589   : > { %v4092_v58 = vpop.f32.mrf.mxu2 }
 0x58a   : > { %v4093_v46 = vadd.f32 %v13867_v48, %v4092_v58 }
 0x591   : > { %v4094_v38 = vpop.f32.mrf.mxu2 }
 0x592   : > { %v4095_v37 = vadd.f32 %v13867_v48, %v4094_v38 }
 0x594   : > { %v4144_v29 = vpack.c.bf16 %v4095_v37, %v4093_v46 }
 0x596   : > { %4260 = vmatmul.bf16.gmra.mxu3 %v4144_v29 }
 0x599   : > { %v4097_v31 = vpop.f32.mrf.mxu2 }
 0x59a   : > { %v4098_v33 = vadd.f32 %v13867_v48, %v4097_v31 }
 0x5a1   : > { %v4099_v53 = vpop.f32.mrf.mxu2 }
 0x5a2   : > { %v4100_v7 = vadd.f32 %v13867_v48, %v4099_v53 }
 0x5a4   : > { %v4145_v18 = vpack.c.bf16 %v4100_v7, %v4098_v33 }
 0x5a6   : > { %4265 = vmatmul.bf16.gmra.mxu3 %v4145_v18 }
 0x5a9   : > { %v13912_v4 = vpop.f32.mrf.mxu3  ;;  %v4102_v41 = vpop.f32.mrf.mxu2 }
 0x5aa   : > { %v4103_v42 = vadd.f32 %v13867_v48, %v4102_v41  ;;  %v4306_v29 = vmax.f32 %v13912_v4, 0.0 }
 0x5b1   : > { %v13914_v20 = vpop.f32.mrf.mxu3  ;;  %v4104_v47 = vpop.f32.mrf.mxu2 }
 0x5b2   : > { %v4105_v16 = vadd.f32 %v13867_v48, %v4104_v47  ;;  %v4307_v41 = vmax.f32 %v13914_v20, 0.0 }
 0x5b4   : > { %v4146_v56 = vpack.c.bf16 %v4105_v16, %v4103_v42 }
 0x5b6   : > { %4270 = vmatmul.bf16.gmra.mxu3 %v4146_v56 }
 0x5b9   : > { %v4107_v23 = vpop.f32.mrf.mxu2  ;;  %v13921_v32 = vpop.f32.mrf.mxu3 }
 0x5ba   : > { %v4108_v0 = vadd.f32 %v13867_v48, %v4107_v23  ;;  %v10011_v23 = vld [vmem:[%s17176_s7] sm:$0xff] }
 0x5bb   : > { %4761 = vmatpush.bf16.msrb.mxu0 %v10011_v23 }
 0x5c1   : > { %v4109_v40 = vpop.f32.mrf.mxu2  ;;  %v13923_v17 = vpop.f32.mrf.mxu3 }
 0x5c2   : > { %v4110_v2 = vadd.f32 %v13867_v48, %v4109_v40 }
 0x5c4   : > { %v4147_v54 = vpack.c.bf16 %v4110_v2, %v4108_v0 }
 0x5c6   : > { %4275 = vmatmul.bf16.gmra.mxu3 %v4147_v54 }
 0x5c9   : > { %v4112_v52 = vpop.f32.mrf.mxu2  ;;  %v13927_v28 = vpop.f32.mrf.mxu3 }
 0x5ca   : > { %v4113_v63 = vadd.f32 %v13867_v48, %v4112_v52 }
 0x5d1   : > { %v4114_v1 = vpop.f32.mrf.mxu2  ;;  %v13929_v21 = vpop.f32.mrf.mxu3 }
 0x5d2   : > { %v4115_v8 = vadd.f32 %v13867_v48, %v4114_v1  ;;  %v4308_v1 = vmax.f32 %v13921_v32, 0.0 }
 0x5d4   : > { %v4148_v34 = vpack.c.bf16 %v4115_v8, %v4113_v63 }
 0x5d6   : > { %4280 = vmatmul.bf16.gmra.mxu3 %v4148_v34 }
 0x5d9   : > { %v4117_v10 = vpop.f32.mrf.mxu2  ;;  %v13936_v25 = vpop.f32.mrf.mxu3 }
 0x5da   : > { %v4118_v55 = vadd.f32 %v13867_v48, %v4117_v10 }
 0x5e1   : > { %v4119_v59 = vpop.f32.mrf.mxu2  ;;  %v13938_v6 = vpop.f32.mrf.mxu3 }
 0x5e2   : > { %v4120_v30 = vadd.f32 %v13867_v48, %v4119_v59 }
 0x5e4   : > { %v4149_v57 = vpack.c.bf16 %v4120_v30, %v4118_v55 }
 0x5e6   : > { %4285 = vmatmul.bf16.gmra.mxu3 %v4149_v57 }
 0x5e9   : > { %v4122_v12 = vpop.f32.mrf.mxu2  ;;  %v13942_v43 = vpop.f32.mrf.mxu3 }
 0x5ea   : > { %v4123_v26 = vadd.f32 %v13867_v48, %v4122_v12 }
 0x5f1   : > { %v4124_v45 = vpop.f32.mrf.mxu2  ;;  %v13944_v15 = vpop.f32.mrf.mxu3 }
 0x5f2   : > { %v4125_v3 = vadd.f32 %v13867_v48, %v4124_v45 }
 0x5f4   : > { %v4150_v51 = vpack.c.bf16 %v4125_v3, %v4123_v26  ;;  %v4309_v26 = vmax.f32 %v13923_v17, 0.0 }
 0x5f6   : > { %4290 = vmatmul.bf16.gmra.mxu3 %v4150_v51 }
 0x5f9   : > { %v4127_v9 = vpop.f32.mrf.mxu2  ;;  %v13951_v61 = vpop.f32.mrf.mxu3 }
 0x5fa   : > { %v4128_v50 = vadd.f32 %v13867_v48, %v4127_v9 }
 0x601   : > { %v4129_v60 = vpop.f32.mrf.mxu2  ;;  %v13953_v24 = vpop.f32.mrf.mxu3 }
 0x602   : > { %v4130_v36 = vadd.f32 %v13867_v48, %v4129_v60 }
 0x604   : > { %v4151_v39 = vpack.c.bf16 %v4130_v36, %v4128_v50 }
 0x606   : > { %4295 = vmatmul.bf16.gmra.mxu3 %v4151_v39 }
 0x609   : > { %v4132_v19 = vpop.f32.mrf.mxu2  ;;  %v13957_v13 = vpop.f32.mrf.mxu3 }
 0x60a   : > { %v4133_v27 = vadd.f32 %v13867_v48, %v4132_v19 }
 0x611   : > { %v4134_v44 = vpop.f32.mrf.mxu2  ;;  %v13959_v11 = vpop.f32.mrf.mxu3 }
 0x612   : > { %v4135_v62 = vadd.f32 %v13867_v48, %v4134_v44 }
 0x614   : > { %v4152_v58 = vpack.c.bf16 %v4135_v62, %v4133_v27 }
 0x616   : > { %4300 = vmatmul.bf16.gmra.mxu3 %v4152_v58 }
 0x619   : > { %v13963_v38 = vpop.f32.mrf.mxu3 }
 0x621   : > { %v13965_v46 = vpop.f32.mrf.mxu3 }
 0x629   : > { %v4266_v37 = vpop.f32.mrf.mxu3 }
 0x62a   : > { %v4322_v5 = vmax.f32 %v4266_v37, 0.0 }
 0x62c   : > { %v4338_v31 = vadd.f32 %v4322_v5, %v4306_v29 }
 0x62e   : > { %v4354_v53 = vmul.f32 %v4338_v31, %v11235_v49 }
 0x630   : > { %v13969_v33 = vsub.f32 %v4306_v29, %v4354_v53  ;;  %v4386_v7 = vsub.f32 %v4322_v5, %v4354_v53  ;;  %v4310_v5 = vmax.f32 %v13927_v28, 0.0 }
 0x631   : > { %v4268_v18 = vpop.f32.mrf.mxu3 }
 0x632   : > { %v4402_v48 = vmul.f32 %v13969_v33, %v13969_v33  ;;  %v4418_v47 = vmul.f32 %v4386_v7, %v4386_v7  ;;  %v4323_v42 = vmax.f32 %v4268_v18, 0.0 }
 0x634   : > { %v4434_v16 = vadd.f32 %v4418_v47, %v4402_v48  ;;  %v4339_v56 = vadd.f32 %v4323_v42, %v4307_v41 }
 0x636   : > { %v4450_v35 = vmul.f32 %v4434_v16, %v11235_v49  ;;  %v4355_v4 = vmul.f32 %v4339_v56, %v11235_v49 }
 0x638   : > { %v4466_v40 = vadd.f32 1e-05, %v4450_v35  ;;  %v13979_v0 = vsub.f32 %v4307_v41, %v4355_v4  ;;  %v13981_v2 = vsub.f32 %v4323_v42, %v4355_v4 }
 0x639   : > { %v4271_v20 = vpop.f32.mrf.mxu3 }
 0x63a   : > { %10279 = vrsqrt.f32 %v4466_v40  ;;  %v4403_v54 = vmul.f32 %v13979_v0, %v13979_v0  ;;  %v4419_v52 = vmul.f32 %v13981_v2, %v13981_v2  ;;  %v4324_v63 = vmax.f32 %v4271_v20, 0.0 }
 0x63b   : > { %vm4488_vm2 = vweird.f32 %v4466_v40 }
 0x63c   : > { %v4435_v8 = vadd.f32 %v4419_v52, %v4403_v54  ;;  %v4340_v34 = vadd.f32 %v4324_v63, %v4308_v1 }
 0x63e   : > { %v4451_v14 = vmul.f32 %v4435_v8, %v11235_v49  ;;  %v4356_v10 = vmul.f32 %v4340_v34, %v11235_v49 }
 0x640   : > { %v10280_v59 = vpop.eup %10279  ;;  %v4467_v55 = vadd.f32 1e-05, %v4451_v14  ;;  %v13990_v57 = vsub.f32 %v4308_v1, %v4356_v10  ;;  %v13992_v12 = vsub.f32 %v4324_v63, %v4356_v10 }
 0x641   : > { %v4483_v30 = vmul.f32 %v10280_v59, %v4466_v40  ;;  %v4273_v45 = vpop.f32.mrf.mxu3  ;;  %vm4489_vm1 = vweird.f32 %v10280_v59 }
 0x642   : > { %10281 = vrsqrt.f32 %v4467_v55  ;;  %v4325_v3 = vmax.f32 %v4273_v45, 0.0  ;;  %v4404_v51 = vmul.f32 %v13990_v57, %v13990_v57  ;;  %v4420_v22 = vmul.f32 %v13992_v12, %v13992_v12  ;;  %vm4490_vm3 = vmor %vm4488_vm2, %vm4489_vm1 }
 0x643   : > { %v4484_v32 = vmul.f32 %v10280_v59, %v4483_v30  ;;  %vm4498_vm5 = vweird.f32 %v4467_v55 }
 0x644   : > { %v4341_v9 = vadd.f32 %v4325_v3, %v4309_v26  ;;  %v4436_v50 = vadd.f32 %v4420_v22, %v4404_v51 }
 0x645   : > { %v4485_v60 = vmul.f32 0.5, %v4484_v32 }
 0x646   : > { %v4357_v36 = vmul.f32 %v4341_v9, %v11235_v49  ;;  %v4452_v19 = vmul.f32 %v4436_v50, %v11235_v49 }
 0x647   : > { %v4486_v39 = vsub.f32 1.5, %v4485_v60 }
 0x648   : > { %v10282_v44 = vpop.eup %10281  ;;  %v14001_v17 = vsub.f32 %v4309_v26, %v4357_v36  ;;  %v14003_v27 = vsub.f32 %v4325_v3, %v4357_v36  ;;  %v4468_v37 = vadd.f32 1e-05, %v4452_v19 }
 0x649   : > { %v4487_v62 = vmul.f32 %v10280_v59, %v4486_v39  ;;  %v4493_v58 = vmul.f32 %v10282_v44, %v4467_v55  ;;  %v4276_v29 = vpop.f32.mrf.mxu3  ;;  %vm4499_vm4 = vweird.f32 %v10282_v44 }
 0x64a   : > { %v4405_v31 = vmul.f32 %v14001_v17, %v14001_v17  ;;  %v4421_v53 = vmul.f32 %v14003_v27, %v14003_v27  ;;  %v4326_v18 = vmax.f32 %v4276_v29, 0.0  ;;  %10283 = vrsqrt.f32 %v4468_v37  ;;  %vm4500_vm6 = vmor %vm4498_vm5, %vm4499_vm4 }
 0x64b   : > { %v4491_v41 = vsel %vm4490_vm3, %v10280_v59, %v4487_v62  ;;  %v4494_v48 = vmul.f32 %v10282_v44, %v4493_v58  ;;  %vm4508_vm8 = vweird.f32 %v4468_v37 }
 0x64c   : > { %v14010_v47 = vmul.f32 %v4491_v41, %v4386_v7  ;;  %v4437_v42 = vadd.f32 %v4421_v53, %v4405_v31  ;;  %v4342_v16 = vadd.f32 %v4326_v18, %v4310_v5  ;;  %v4311_v7 = vmax.f32 %v13929_v21, 0.0 }
 0x64d   : > { %v4495_v56 = vmul.f32 0.5, %v4494_v48  ;;  %v4642_v59 = vmul.f32 %v4491_v41, %v13969_v33  ;;  %v4312_v33 = vmax.f32 %v13936_v25, 0.0 }
 0x64e   : > { %v4453_v35 = vmul.f32 %v4437_v42, %v11235_v49  ;;  %v4358_v28 = vmul.f32 %v4342_v16, %v11235_v49 }
 0x64f   : > { %v4496_v4 = vsub.f32 1.5, %v4495_v56 }
 0x650   : > { %v4469_v23 = vadd.f32 1e-05, %v4453_v35  ;;  %v14014_v40 = vsub.f32 %v4310_v5, %v4358_v28  ;;  %v14016_v20 = vsub.f32 %v4326_v18, %v4358_v28  ;;  %v10284_v54 = vpop.eup %10283 }
 0x651   : > { %v4497_v52 = vmul.f32 %v10282_v44, %v4496_v4  ;;  %v4278_v1 = vpop.f32.mrf.mxu3  ;;  %v4503_v63 = vmul.f32 %v10284_v54, %v4468_v37  ;;  %vm4509_vm7 = vweird.f32 %v10284_v54 }
 0x652   : > { %10285 = vrsqrt.f32 %v4469_v23  ;;  %v4406_v34 = vmul.f32 %v14014_v40, %v14014_v40  ;;  %v4422_v14 = vmul.f32 %v14016_v20, %v14016_v20  ;;  %v4327_v10 = vmax.f32 %v4278_v1, 0.0  ;;  %vm4510_vm9 = vmor %vm4508_vm8, %vm4509_vm7 }
 0x653   : > { %v4501_v8 = vsel %vm4500_vm6, %v10282_v44, %v4497_v52  ;;  %v4504_v45 = vmul.f32 %v10284_v54, %v4503_v63  ;;  %vm4518_vm11 = vweird.f32 %v4469_v23  ;;  %v4313_v52 = vmax.f32 %v13938_v6, 0.0 }
 0x654   : > { %v4643_v30 = vmul.f32 %v4501_v8, %v13979_v0  ;;  %v14026_v55 = vmul.f32 %v4501_v8, %v13981_v2  ;;  %v4438_v21 = vadd.f32 %v4422_v14, %v4406_v34  ;;  %v4343_v26 = vadd.f32 %v4327_v10, %v4311_v7 }
 0x655   : > { %v4505_v32 = vmul.f32 0.5, %v4504_v45 }
 0x656   : > { %v4674_v3 = vpack.c.bf16 %v4643_v30, %v4642_v59  ;;  %v4454_v51 = vmul.f32 %v4438_v21, %v11235_v49  ;;  %v4359_v22 = vmul.f32 %v4343_v26, %v11235_v49 }
 0x657   : > { %v4506_v60 = vsub.f32 1.5, %v4505_v32 }
 0x658   : > { %v10286_v9 = vpop.eup %10285  ;;  %4762 = vmatmul.bf16.vlgmr.msrb.gmra.mxu0 %v4674_v3  ;;  %v4470_v0 = vadd.f32 1e-05, %v4454_v51  ;;  %v14031_v36 = vsub.f32 %v4311_v7, %v4359_v22  ;;  %v14033_v19 = vsub.f32 %v4327_v10, %v4359_v22 }
 0x659   : > { %v4513_v50 = vmul.f32 %v10286_v9, %v4469_v23  ;;  %v4281_v2 = vpop.f32.mrf.mxu3  ;;  %v4507_v39 = vmul.f32 %v10284_v54, %v4506_v60  ;;  %vm4519_vm10 = vweird.f32 %v10286_v9 }
 0x65a   : > { %v4328_v44 = vmax.f32 %v4281_v2, 0.0  ;;  %10287 = vrsqrt.f32 %v4470_v0  ;;  %v4407_v58 = vmul.f32 %v14031_v36, %v14031_v36  ;;  %v4423_v25 = vmul.f32 %v14033_v19, %v14033_v19  ;;  %vm4520_vm12 = vmor %vm4518_vm11, %vm4519_vm10 }
 0x65b   : > { %v4514_v62 = vmul.f32 %v10286_v9, %v4513_v50  ;;  %v4511_v29 = vsel %vm4510_vm9, %v10284_v54, %v4507_v39  ;;  %vm4528_vm14 = vweird.f32 %v4470_v0 }
 0x65c   : > { %v4344_v5 = vadd.f32 %v4328_v44, %v4312_v33  ;;  %v14040_v31 = vmul.f32 %v4511_v29, %v13992_v12  ;;  %v4439_v18 = vadd.f32 %v4423_v25, %v4407_v58  ;;  %v4644_v59 = vmul.f32 %v4511_v29, %v13990_v57 }
 0x65d   : > { %v4515_v53 = vmul.f32 0.5, %v4514_v62 }
 0x65e   : > { %v4360_v37 = vmul.f32 %v4344_v5, %v11235_v49  ;;  %v4455_v48 = vmul.f32 %v4439_v18, %v11235_v49  ;;  %v4315_v18 = vmax.f32 %v13944_v15, 0.0 }
 0x65f   : > { %v4516_v41 = vsub.f32 1.5, %v4515_v53 }
 0x660   : > { %v14044_v42 = vsub.f32 %v4312_v33, %v4360_v37  ;;  %v14046_v16 = vsub.f32 %v4328_v44, %v4360_v37  ;;  %v10288_v56 = vpop.eup %10287  ;;  %v4471_v12 = vadd.f32 1e-05, %v4455_v48 }
 0x661   : > { %v4517_v35 = vmul.f32 %v10286_v9, %v4516_v41  ;;  %v4283_v28 = vpop.f32.mrf.mxu3  ;;  %v4523_v4 = vmul.f32 %v10288_v56, %v4470_v0  ;;  %vm4529_vm13 = vweird.f32 %v10288_v56 }
 0x662   : > { %v4408_v54 = vmul.f32 %v14044_v42, %v14044_v42  ;;  %v4424_v7 = vmul.f32 %v14046_v16, %v14046_v16  ;;  %v4329_v63 = vmax.f32 %v4283_v28, 0.0  ;;  %10289 = vrsqrt.f32 %v4471_v12  ;;  %vm4530_vm15 = vmor %vm4528_vm14, %vm4529_vm13 }
 0x663   : > { %v4521_v1 = vsel %vm4520_vm12, %v10286_v9, %v4517_v35  ;;  %v4524_v34 = vmul.f32 %v10288_v56, %v4523_v4  ;;  %v4314_v9 = vmax.f32 %v13942_v43, 0.0  ;;  %vm4538_vm1 = vweird.f32 %v4471_v12 }
 0x664   : > { %v14054_v8 = vmul.f32 %v4521_v1, %v14003_v27  ;;  %v4440_v23 = vadd.f32 %v4424_v7, %v4408_v54  ;;  %v4345_v14 = vadd.f32 %v4329_v63, %v4313_v52  ;;  %v4645_v30 = vmul.f32 %v4521_v1, %v14001_v17 }
 0x665   : > { %v4525_v10 = vmul.f32 0.5, %v4524_v34  ;;  %v4682_v54 = vpack.c.bf16 %v14026_v55, %v14010_v47  ;;  %v9565_v47 = vld [vmem:[%s17177_s8 + $0x48] sm:$0xf]  ;;  %v10029_v55 = vld [vmem:[%s17177_s8 + $0x50] sm:$0xf0] }
 0x666   : > { %v4456_v45 = vmul.f32 %v4440_v23, %v11235_v49  ;;  %v4361_v6 = vmul.f32 %v4345_v14, %v11235_v49  ;;  %v4675_v26 = vpack.c.bf16 %v4645_v30, %v4644_v59 }
 0x667   : > { %v4526_v21 = vsub.f32 1.5, %v4525_v10 }
 0x668   : > { %v14060_v3 = vadd.f32 1e-05, %v4456_v45  ;;  %v14062_v27 = vsub.f32 %v4313_v52, %v4361_v6  ;;  %v14064_v32 = vsub.f32 %v4329_v63, %v4361_v6  ;;  %v10290_v22 = vpop.eup %10289  ;;  %4767 = vmatmul.bf16.gmra.mxu0 %v4675_v26 }
 0x669   : > { %v4286_v51 = vpop.f32.mrf.mxu3  ;;  %v4527_v57 = vmul.f32 %v10288_v56, %v4526_v21  ;;  %v4533_v60 = vmul.f32 %v10290_v22, %v4471_v12  ;;  %vm4539_vm0 = vweird.f32 %v10290_v22 }
 0x66a   : > { %v4330_v17 = vmax.f32 %v4286_v51, 0.0  ;;  %10291 = vrsqrt.f32 %v14060_v3  ;;  %v4409_v50 = vmul.f32 %v14062_v27, %v14062_v27  ;;  %v4425_v2 = vmul.f32 %v14064_v32, %v14064_v32  ;;  %vm4540_vm2 = vmor %vm4538_vm1, %vm4539_vm0 }
 0x66b   : > { %v4531_v33 = vsel %vm4530_vm15, %v10288_v56, %v4527_v57  ;;  %v4534_v43 = vmul.f32 %v10290_v22, %v4533_v60  ;;  %v4316_v51 = vmax.f32 %v13951_v61, 0.0  ;;  %vm4548_vm4 = vweird.f32 %v14060_v3 }
 0x66c   : > { %v4346_v39 = vadd.f32 %v4330_v17, %v4314_v9  ;;  %v14073_v44 = vmul.f32 %v4531_v33, %v14016_v20  ;;  %v4441_v62 = vadd.f32 %v4425_v2, %v4409_v50  ;;  %v4646_v34 = vmul.f32 %v4531_v33, %v14014_v40 }
 0x66d   : > { %v4535_v58 = vmul.f32 0.5, %v4534_v43 }
 0x66e   : > { %v4362_v0 = vmul.f32 %v4346_v39, %v11235_v49  ;;  %v4457_v29 = vmul.f32 %v4441_v62, %v11235_v49 }
 0x66f   : > { %v4536_v37 = vsub.f32 1.5, %v4535_v58  ;;  %v4317_v58 = vmax.f32 %v13953_v24, 0.0 }
 0x670   : > { %v14077_v25 = vsub.f32 %v4314_v9, %v4362_v0  ;;  %v14079_v5 = vsub.f32 %v4330_v17, %v4362_v0  ;;  %v10292_v53 = vpop.eup %10291  ;;  %v4473_v48 = vadd.f32 1e-05, %v4457_v29 }
 0x671   : > { %v4288_v41 = vpop.f32.mrf.mxu3  ;;  %v4543_v20 = vmul.f32 %v10292_v53, %v14060_v3  ;;  %v4537_v35 = vmul.f32 %v10290_v22, %v4536_v37  ;;  %vm4549_vm3 = vweird.f32 %v10292_v53 }
 0x672   : > { %v4410_v56 = vmul.f32 %v14077_v25, %v14077_v25  ;;  %v4426_v28 = vmul.f32 %v14079_v5, %v14079_v5  ;;  %v4331_v4 = vmax.f32 %v4288_v41, 0.0  ;;  %10293 = vrsqrt.f32 %v4473_v48  ;;  %vm4550_vm5 = vmor %vm4548_vm4, %vm4549_vm3 }
 0x673   : > { %v4544_v15 = vmul.f32 %v10292_v53, %v4543_v20  ;;  %v4541_v52 = vsel %vm4540_vm2, %v10290_v22, %v4537_v35  ;;  %vm4558_vm7 = vweird.f32 %v4473_v48  ;;  %v4683_v35 = vpack.c.bf16 %v14054_v8, %v14040_v31  ;;  %v10025_v8 = vld [vmem:[%s17177_s8 + $0x34] sm:$0xf] }
 0x674   : > { %v4442_v1 = vadd.f32 %v4426_v28, %v4410_v56  ;;  %v4347_v12 = vadd.f32 %v4331_v4, %v4315_v18  ;;  %v14090_v7 = vmul.f32 %v4541_v52, %v14033_v19  ;;  %v4647_v23 = vmul.f32 %v4541_v52, %v14031_v36 }
 0x675   : > { %v4545_v63 = vmul.f32 0.5, %v4544_v15 }
 0x676   : > { %v4458_v14 = vmul.f32 %v4442_v1, %v11235_v49  ;;  %v4363_v10 = vmul.f32 %v4347_v12, %v11235_v49  ;;  %v4676_v30 = vpack.c.bf16 %v4647_v23, %v4646_v34  ;;  %v10040_v1 = vld [vmem:[%s17177_s8 + $0xac] sm:$0xf]  ;;  %v9615_v12 = vld [vmem:[%s17177_s8 + $0xb4] sm:$0xf0] }
 0x677   : > { %v4546_v59 = vsub.f32 1.5, %v4545_v63 }
 0x678   : > { %v14096_v45 = vadd.f32 1e-05, %v4458_v14  ;;  %v14098_v6 = vsub.f32 %v4315_v18, %v4363_v10  ;;  %v14100_v21 = vsub.f32 %v4331_v4, %v4363_v10  ;;  %v10294_v26 = vpop.eup %10293  ;;  %4772 = vmatmul.bf16.gmra.mxu0 %v4676_v30  ;;  %v9618_v10 = vor.u32 %v10040_v1, %v9615_v12 }
 0x679   : > { %v4291_v19 = vpop.f32.mrf.mxu3  ;;  %v4547_v40 = vmul.f32 %v10292_v53, %v4546_v59  ;;  %v4553_v22 = vmul.f32 %v10294_v26, %v4473_v48  ;;  %vm4559_vm6 = vweird.f32 %v10294_v26  ;;  %v10041_v59 = vld [vmem:[%s17177_s8 + $0xb0] sm:$0xf0] }
 0x67a   : > { %v4332_v36 = vmax.f32 %v4291_v19, 0.0  ;;  %10295 = vrsqrt.f32 %v14096_v45  ;;  %v4411_v57 = vmul.f32 %v14098_v6, %v14098_v6  ;;  %v4427_v17 = vmul.f32 %v14100_v21, %v14100_v21  ;;  %vm4560_vm8 = vmor %vm4558_vm7, %vm4559_vm6  ;;  %5476 = vmatpush.bf16.msra.mxu2 %v9618_v10 }
 0x67b   : > { %v4551_v9 = vsel %vm4550_vm5, %v10292_v53, %v4547_v40  ;;  %v4554_v61 = vmul.f32 %v10294_v26, %v4553_v22  ;;  %v4318_v22 = vmax.f32 %v13957_v13, 0.0  ;;  %vm4568_vm10 = vweird.f32 %v14096_v45 }
 0x67c   : > { %v4348_v60 = vadd.f32 %v4332_v36, %v4316_v51  ;;  %v14110_v33 = vmul.f32 %v4551_v9, %v14046_v16  ;;  %v4443_v50 = vadd.f32 %v4427_v17, %v4411_v57  ;;  %v4648_v63 = vmul.f32 %v4551_v9, %v14044_v42 }
 0x67d   : > { %v4555_v2 = vmul.f32 0.5, %v4554_v61 }
 0x67e   : > { %v4364_v3 = vmul.f32 %v4348_v60, %v11235_v49  ;;  %v4459_v39 = vmul.f32 %v4443_v50, %v11235_v49 }
 0x67f   : > { %v4556_v29 = vsub.f32 1.5, %v4555_v2 }
 0x680   : > { %v14114_v43 = vsub.f32 %v4316_v51, %v4364_v3  ;;  %v14116_v62 = vsub.f32 %v4332_v36, %v4364_v3  ;;  %v10296_v0 = vpop.eup %10295  ;;  %v14120_v18 = vadd.f32 1e-05, %v4459_v39 }
 0x681   : > { %v4293_v53 = vpop.f32.mrf.mxu3  ;;  %v4563_v16 = vmul.f32 %v10296_v0, %v14096_v45  ;;  %v4557_v41 = vmul.f32 %v10294_v26, %v4556_v29  ;;  %vm4569_vm9 = vweird.f32 %v10296_v0 }
 0x682   : > { %v4412_v37 = vmul.f32 %v14114_v43, %v14114_v43  ;;  %v4428_v20 = vmul.f32 %v14116_v62, %v14116_v62  ;;  %v4333_v56 = vmax.f32 %v4293_v53, 0.0  ;;  %10297 = vrsqrt.f32 %v14120_v18  ;;  %vm4570_vm11 = vmor %vm4568_vm10, %vm4569_vm9 }
 0x683   : > { %v4564_v24 = vmul.f32 %v10296_v0, %v4563_v16  ;;  %v4561_v48 = vsel %vm4560_vm8, %v10294_v26, %v4557_v41  ;;  %vm4578_vm13 = vweird.f32 %v14120_v18 }
 0x684   : > { %v4444_v28 = vadd.f32 %v4428_v20, %v4412_v37  ;;  %v4349_v4 = vadd.f32 %v4333_v56, %v4317_v58  ;;  %v14130_v15 = vmul.f32 %v4561_v48, %v14064_v32  ;;  %v4649_v34 = vmul.f32 %v4561_v48, %v14062_v27  ;;  %v9613_v32 = vld [vmem:[%s17177_s8 + $0xa8] sm:$0xf] }
 0x685   : > { %v4565_v52 = vmul.f32 0.5, %v4564_v24  ;;  %v9614_v26 = vor.u32 %v10041_v59, %v9613_v32  ;;  %v4319_v37 = vmax.f32 %v13959_v11, 0.0 }
 0x686   : > { %v4460_v23 = vmul.f32 %v4444_v28, %v11235_v49  ;;  %v4365_v14 = vmul.f32 %v4349_v4, %v11235_v49  ;;  %v4677_v19 = vpack.c.bf16 %v4649_v34, %v4648_v63 }
 0x687   : > { %v4566_v30 = vsub.f32 1.5, %v4565_v52  ;;  %5387 = vmatpush.bf16.msrb.mxu1 %v9614_v26  ;;  %v4684_v52 = vpack.c.bf16 %v14090_v7, %v14073_v44  ;;  %v9553_v44 = vld [vmem:[%s17177_s8 + $0x30] sm:$0xf]  ;;  %v10026_v7 = vld [vmem:[%s17177_s8 + $0x38] sm:$0xf0] }
 0x688   : > { %v14148_v42 = vadd.f32 1e-05, %v4460_v23  ;;  %v14150_v27 = vsub.f32 %v4317_v58, %v4365_v14  ;;  %v14152_v51 = vsub.f32 %v4333_v56, %v4365_v14  ;;  %v10298_v36 = vpop.eup %10297  ;;  %4777 = vmatmul.bf16.gmra.mxu0 %v4677_v19 }
 0x689   : > { %v4296_v40 = vpop.f32.mrf.mxu3  ;;  %v4567_v9 = vmul.f32 %v10296_v0, %v4566_v30  ;;  %v4573_v17 = vmul.f32 %v10298_v36, %v14120_v18  ;;  %vm4579_vm12 = vweird.f32 %v10298_v36 }
 0x68a   : > { %v4334_v57 = vmax.f32 %v4296_v40, 0.0  ;;  %10299 = vrsqrt.f32 %v14148_v42  ;;  %v4413_v61 = vmul.f32 %v14150_v27, %v14150_v27  ;;  %v4429_v50 = vmul.f32 %v14152_v51, %v14152_v51  ;;  %vm4580_vm14 = vmor %vm4578_vm13, %vm4579_vm12 }
 0x68b   : > { %v4571_v60 = vsel %vm4570_vm11, %v10296_v0, %v4567_v9  ;;  %v4574_v45 = vmul.f32 %v10298_v36, %v4573_v17  ;;  %vm4588_vm0 = vweird.f32 %v14148_v42 }
 0x68c   : > { %v4350_v13 = vadd.f32 %v4334_v57, %v4318_v22  ;;  %v14164_v3 = vmul.f32 %v4571_v60, %v14079_v5  ;;  %v4445_v2 = vadd.f32 %v4429_v50, %v4413_v61  ;;  %v4650_v23 = vmul.f32 %v4571_v60, %v14077_v25 }
 0x68d   : > { %v4575_v58 = vmul.f32 0.5, %v4574_v45 }
 0x68e   : > { %v4366_v39 = vmul.f32 %v4350_v13, %v11235_v49  ;;  %v4461_v29 = vmul.f32 %v4445_v2, %v11235_v49 }
 0x68f   : > { %v4576_v41 = vsub.f32 1.5, %v4575_v58 }
 0x690   : > { %v14168_v53 = vsub.f32 %v4318_v22, %v4366_v39  ;;  %v14170_v0 = vsub.f32 %v4334_v57, %v4366_v39  ;;  %v10300_v16 = vpop.eup %10299  ;;  %v4477_v56 = vadd.f32 1e-05, %v4461_v29  ;;  %v4320_v22 = vmax.f32 %v13963_v38, 0.0 }
 0x691   : > { %v4298_v20 = vpop.f32.mrf.mxu3  ;;  %v4583_v5 = vmul.f32 %v10300_v16, %v14148_v42  ;;  %v4577_v48 = vmul.f32 %v10298_v36, %v4576_v41  ;;  %vm4589_vm15 = vweird.f32 %v10300_v16 }
 0x692   : > { %v4414_v24 = vmul.f32 %v14168_v53, %v14168_v53  ;;  %v4430_v28 = vmul.f32 %v14170_v0, %v14170_v0  ;;  %v4335_v4 = vmax.f32 %v4298_v20, 0.0  ;;  %10301 = vrsqrt.f32 %v4477_v56  ;;  %vm4590_vm1 = vmor %vm4588_vm0, %vm4589_vm15 }
 0x693   : > { %v4584_v11 = vmul.f32 %v10300_v16, %v4583_v5  ;;  %v4581_v1 = vsel %vm4580_vm14, %v10298_v36, %v4577_v48  ;;  %vm4598_vm3 = vweird.f32 %v4477_v56 }
 0x694   : > { %v4446_v12 = vadd.f32 %v4430_v28, %v4414_v24  ;;  %v4351_v18 = vadd.f32 %v4335_v4, %v4319_v37  ;;  %v14182_v63 = vmul.f32 %v4581_v1, %v14100_v21  ;;  %v4651_v14 = vmul.f32 %v4581_v1, %v14098_v6 }
 0x695   : > { %v4585_v34 = vmul.f32 0.5, %v4584_v11 }
 0x696   : > { %v4462_v10 = vmul.f32 %v4446_v12, %v11235_v49  ;;  %v4367_v32 = vmul.f32 %v4351_v18, %v11235_v49  ;;  %v4678_v30 = vpack.c.bf16 %v4651_v14, %v4650_v23  ;;  %v9603_v23 = vld [vmem:[%s17177_s8 + $0x9c] sm:$0xf0] }
 0x697   : > { %v4586_v59 = vsub.f32 1.5, %v4585_v34  ;;  %v10037_v34 = vld [vmem:[%s17177_s8 + $0x94] sm:$0xf] }
 0x698   : > { %v14188_v19 = vadd.f32 1e-05, %v4462_v10  ;;  %v14190_v26 = vsub.f32 %v4319_v37, %v4367_v32  ;;  %v14192_v40 = vsub.f32 %v4335_v4, %v4367_v32  ;;  %v10302_v36 = vpop.eup %10301  ;;  %4782 = vmatmul.bf16.gmra.mxu0 %v4678_v30  ;;  %v4685_v4 = vpack.c.bf16 %v14130_v15, %v14110_v33  ;;  %v10022_v15 = vld [vmem:[%s17177_s8 + $0x1c] sm:$0xf] }
 0x699   : > { %v4301_v21 = vpop.f32.mrf.mxu3  ;;  %v4587_v25 = vmul.f32 %v10300_v16, %v4586_v59  ;;  %v4593_v9 = vmul.f32 %v10302_v36, %v4477_v56  ;;  %vm4599_vm2 = vweird.f32 %v10302_v36  ;;  %v9606_v30 = vor.u32 %v10037_v34, %v9603_v23 }
 0x69a   : > { %v4336_v6 = vmax.f32 %v4301_v21, 0.0  ;;  %10303 = vrsqrt.f32 %v14188_v19  ;;  %v4415_v17 = vmul.f32 %v14190_v26, %v14190_v26  ;;  %v4431_v60 = vmul.f32 %v14192_v40, %v14192_v40  ;;  %vm4600_vm4 = vmor %vm4598_vm3, %vm4599_vm2  ;;  %v10038_v21 = vld [vmem:[%s17177_s8 + $0x98] sm:$0xf0] }
 0x69b   : > { %v4591_v57 = vsel %vm4590_vm1, %v10300_v16, %v4587_v25  ;;  %v4594_v38 = vmul.f32 %v10302_v36, %v4593_v9  ;;  %v4321_v16 = vmax.f32 %v13965_v46, 0.0  ;;  %v9591_v25 = vld [vmem:[%s17177_s8 + $0x84] sm:$0xf0]  ;;  %5477 = vmatpush.bf16.msra.mxu2 %v9606_v30  ;;  %vm4608_vm6 = vweird.f32 %v14188_v19 }
 0x69c   : > { %v4352_v61 = vadd.f32 %v4336_v6, %v4320_v22  ;;  %v14202_v50 = vmul.f32 %v4591_v57, %v14116_v62  ;;  %v4447_v13 = vadd.f32 %v4431_v60, %v4415_v17  ;;  %v4652_v14 = vmul.f32 %v4591_v57, %v14114_v43 }
 0x69d   : > { %v4595_v45 = vmul.f32 0.5, %v4594_v38  ;;  %v9589_v38 = vld [vmem:[%s17177_s8 + $0x78] sm:$0xf] }
 0x69e   : > { %v4368_v42 = vmul.f32 %v4352_v61, %v11235_v49  ;;  %v4463_v2 = vmul.f32 %v4447_v13, %v11235_v49  ;;  %v10035_v13 = vld [vmem:[%s17177_s8 + $0x80] sm:$0xf0] }
 0x69f   : > { %v4596_v37 = vsub.f32 1.5, %v4595_v45 }
 0x6a0   : > { %v14206_v39 = vsub.f32 %v4320_v22, %v4368_v42  ;;  %v14208_v58 = vsub.f32 %v4336_v6, %v4368_v42  ;;  %v10304_v29 = vpop.eup %10303  ;;  %v14212_v20 = vadd.f32 1e-05, %v4463_v2 }
 0x6a1   : > { %v4303_v41 = vpop.f32.mrf.mxu3  ;;  %v4603_v62 = vmul.f32 %v10304_v29, %v14188_v19  ;;  %v4597_v24 = vmul.f32 %v10302_v36, %v4596_v37  ;;  %vm4609_vm5 = vweird.f32 %v10304_v29 }
 0x6a2   : > { %v4416_v5 = vmul.f32 %v14206_v39, %v14206_v39  ;;  %v4432_v48 = vmul.f32 %v14208_v58, %v14208_v58  ;;  %v4337_v28 = vmax.f32 %v4303_v41, 0.0  ;;  %10305 = vrsqrt.f32 %v14212_v20  ;;  %vm4610_vm7 = vmor %vm4608_vm6, %vm4609_vm5 }
 0x6a3   : > { %v4604_v46 = vmul.f32 %v10304_v29, %v4603_v62  ;;  %v4601_v56 = vsel %vm4600_vm4, %v10302_v36, %v4597_v24  ;;  %v10034_v36 = vld [vmem:[%s17177_s8 + $0x7c] sm:$0xf]  ;;  %vm4618_vm9 = vweird.f32 %v14212_v20 }
 0x6a4   : > { %v4448_v11 = vadd.f32 %v4432_v48, %v4416_v5  ;;  %v4353_v1 = vadd.f32 %v4337_v28, %v4321_v16  ;;  %v14222_v12 = vmul.f32 %v4601_v56, %v14152_v51  ;;  %v4653_v10 = vmul.f32 %v4601_v56, %v14150_v27  ;;  %v9601_v51 = vld [vmem:[%s17177_s8 + $0x90] sm:$0xf] }
 0x6a5   : > { %v4605_v18 = vmul.f32 0.5, %v4604_v46  ;;  %v9602_v22 = vor.u32 %v10038_v21, %v9601_v51  ;;  %v9594_v17 = vor.u32 %v10034_v36, %v9591_v25  ;;  %v4686_v56 = vpack.c.bf16 %v14182_v63, %v14164_v3  ;;  %v9541_v3 = vld [vmem:[%s17177_s8 + $0x18] sm:$0xf]  ;;  %v10023_v63 = vld [vmem:[%s17177_s8 + $0x20] sm:$0xf0] }
 0x6a6   : > { %v4464_v32 = vmul.f32 %v4448_v11, %v11235_v49  ;;  %v4369_v59 = vmul.f32 %v4353_v1, %v11235_v49  ;;  %v4679_v27 = vpack.c.bf16 %v4653_v10, %v4652_v14 }
 0x6a7   : > { %v4606_v43 = vsub.f32 1.5, %v4605_v18  ;;  %5388 = vmatpush.bf16.msrb.mxu1 %v9602_v22  ;;  %5478 = vmatpush.bf16.msra.mxu2 %v9594_v17  ;;  %v4687_v22 = vpack.c.bf16 %v14222_v12, %v14202_v50  ;;  %v10032_v50 = vld [vmem:[%s17177_s8 + $0x68] sm:$0xf0] }
 0x6a8   : > { %v4480_v6 = vadd.f32 1e-05, %v4464_v32  ;;  %v14246_v9 = vsub.f32 %v4321_v16, %v4369_v59  ;;  %v14248_v57 = vsub.f32 %v4337_v28, %v4369_v59  ;;  %v10306_v60 = vpop.eup %10305  ;;  %4787 = vmatmul.bf16.gmra.mxu0 %v4679_v27  ;;  %v9590_v16 = vor.u32 %v10035_v13, %v9589_v38  ;;  %v9577_v38 = vld [vmem:[%s17177_s8 + $0x60] sm:$0xf] }
 0x6a9   : > { %v4607_v61 = vmul.f32 %v10304_v29, %v4606_v43  ;;  %v4613_v42 = vmul.f32 %v10306_v60, %v14212_v20  ;;  %vm4619_vm8 = vweird.f32 %v10306_v60  ;;  %v9578_v12 = vor.u32 %v10032_v50, %v9577_v38 }
 0x6aa   : > { %10307 = vrsqrt.f32 %v4480_v6  ;;  %v4417_v2 = vmul.f32 %v14246_v9, %v14246_v9  ;;  %v4433_v19 = vmul.f32 %v14248_v57, %v14248_v57  ;;  %vm4620_vm10 = vmor %vm4618_vm9, %vm4619_vm8  ;;  %vm4628_vm12 = vweird.f32 %v4480_v6 }
 0x6ab   : > { %v4611_v45 = vsel %vm4610_vm7, %v10304_v29, %v4607_v61  ;;  %v4614_v41 = vmul.f32 %v10306_v60, %v4613_v42  ;;  %5389 = vmatpush.bf16.msrb.mxu1 %v9590_v16  ;;  %v9567_v42 = vld [vmem:[%s17177_s8 + $0x54] sm:$0xf0] }
 0x6ac   : > { %v14264_v37 = vmul.f32 %v4611_v45, %v14170_v0  ;;  %v4449_v62 = vadd.f32 %v4433_v19, %v4417_v2  ;;  %v4654_v23 = vmul.f32 %v4611_v45, %v14168_v53  ;;  %v10031_v53 = vld [vmem:[%s17177_s8 + $0x64] sm:$0xf] }
 0x6ad   : > { %v4615_v5 = vmul.f32 0.5, %v4614_v41 }
 0x6ae   : > { %v4465_v24 = vmul.f32 %v4449_v62, %v11235_v49 }
 0x6af   : > { %v4616_v28 = vsub.f32 1.5, %v4615_v5  ;;  %5390 = vmatpush.bf16.msrb.mxu1 %v9578_v12 }
 0x6b0   : > { %v10308_v48 = vpop.eup %10307  ;;  %v4481_v46 = vadd.f32 1e-05, %v4465_v24 }
 0x6b1   : > { %v4623_v29 = vmul.f32 %v10308_v48, %v4480_v6  ;;  %v4617_v11 = vmul.f32 %v10306_v60, %v4616_v28  ;;  %vm4629_vm11 = vweird.f32 %v10308_v48 }
 0x6b2   : > { %10309 = vrsqrt.f32 %v4481_v46  ;;  %vm4630_vm13 = vmor %vm4628_vm12, %vm4629_vm11  ;;  %vm4638_vm15 = vweird.f32 %v4481_v46 }
 0x6b3   : > { %v4624_v0 = vmul.f32 %v10308_v48, %v4623_v29  ;;  %v4621_v1 = vsel %vm4620_vm10, %v10306_v60, %v4617_v11  ;;  %v9542_v29 = vor.u32 %v10023_v63, %v9541_v3 }
 0x6b4   : > { %v14271_v18 = vmul.f32 %v4621_v1, %v14192_v40  ;;  %v4655_v14 = vmul.f32 %v4621_v1, %v14190_v26  ;;  %v9579_v26 = vld [vmem:[%s17177_s8 + $0x6c] sm:$0xf0] }
 0x6b5   : > { %v4625_v34 = vmul.f32 0.5, %v4624_v0  ;;  %v9582_v43 = vor.u32 %v10031_v53, %v9579_v26 }
 0x6b6   : > { %v4680_v32 = vpack.c.bf16 %v4655_v14, %v4654_v23  ;;  %v4688_v13 = vpack.c.bf16 %v14271_v18, %v14264_v37 }
 0x6b7   : > { %v4626_v10 = vsub.f32 1.5, %v4625_v34  ;;  %5479 = vmatpush.bf16.msra.mxu2 %v9582_v43 }
 0x6b8   : > { %v10310_v59 = vpop.eup %10309  ;;  %4792 = vmatmul.bf16.gmra.mxu0 %v4680_v32 }
 0x6b9   : > { %v4627_v30 = vmul.f32 %v10308_v48, %v4626_v10  ;;  %v4633_v20 = vmul.f32 %v10310_v59, %v4481_v46  ;;  %vm4639_vm14 = vweird.f32 %v10310_v59 }
 0x6ba   : > { %vm4640_vm0 = vmor %vm4638_vm15, %vm4639_vm14 }
 0x6bb   : > { %v4631_v51 = vsel %vm4630_vm13, %v10308_v48, %v4627_v30  ;;  %v4634_v40 = vmul.f32 %v10310_v59, %v4633_v20 }
 0x6bc   : > { %v14276_v21 = vmul.f32 %v4631_v51, %v14208_v58  ;;  %v4656_v17 = vmul.f32 %v4631_v51, %v14206_v39 }
 0x6bd   : > { %v4635_v36 = vmul.f32 0.5, %v4634_v40 }
 0x6bf   : > { %v4636_v27 = vsub.f32 1.5, %v4635_v36 }
 0x6c1   : > { %v4637_v25 = vmul.f32 %v10310_v59, %v4636_v27  ;;  %v10019_v27 = vld [vmem:[%s17177_s8 + $0x4] sm:$0xf] }
 0x6c3   : > { %v4641_v58 = vsel %vm4640_vm0, %v10310_v59, %v4637_v25 }
 0x6c4   : > { %v4673_v6 = vmul.f32 %v4641_v58, %v14248_v57  ;;  %v4657_v60 = vmul.f32 %v4641_v58, %v14246_v9  ;;  %v10028_v9 = vld [vmem:[%s17177_s8 + $0x4c] sm:$0xf] }
 0x6c5   : > { %v9570_v45 = vor.u32 %v10028_v9, %v9567_v42  ;;  %v10042_v9 = vld [vmem:[%s17177_s8 + $0xb8] sm:$0xf0]  ;;  %v9529_v42 = vld [vmem:[%s17177_s8] sm:$0xf] }
 0x6c6   : > { %v4681_v61 = vpack.c.bf16 %v4657_v60, %v4656_v17  ;;  %v4689_v2 = vpack.c.bf16 %v4673_v6, %v14276_v21 }
 0x6c7   : > { %5480 = vmatpush.bf16.msra.mxu2 %v9570_v45 }
 0x6c8   : > { %4797 = vmatmul.bf16.gmra.mxu0 %v4681_v61 }
 0x6d5   : > { %v4763_v57 = vpop.f32.mrf.mxu0 }
 0x6d6   : > { %v4843_v34 = vmax.f32 %v4763_v57, 0.0 }
 0x6d8   : > { %4802 = vmatmul.bf16.gmra.mxu0 %v4682_v54  ;;  %v9566_v54 = vor.u32 %v10029_v55, %v9565_v47  ;;  %v9609_v47 = vld [vmem:[%s17177_s8 + $0x98] sm:$0xf]  ;;  %v10039_v55 = vld [vmem:[%s17177_s8 + $0xa0] sm:$0xf0] }
 0x6da   : > { %5391 = vmatpush.bf16.msrb.mxu1 %v9566_v54 }
 0x6dd   : > { %v14300_v39 = vpop.f32.mrf.mxu0 }
 0x6de   : > { %v4844_v20 = vmax.f32 %v14300_v39, 0.0  ;;  %v9621_v39 = vld [vmem:[%s17177_s8 + $0xb0] sm:$0xf] }
 0x6e5   : > { %v14309_v19 = vpop.f32.mrf.mxu0 }
 0x6e6   : > { %v4845_v50 = vmax.f32 %v14309_v19, 0.0  ;;  %v10020_v19 = vld [vmem:[%s17177_s8 + $0x8] sm:$0xf0] }
 0x6e8   : > { %4807 = vmatmul.bf16.gmra.mxu0 %v4683_v35  ;;  %v9555_v35 = vld [vmem:[%s17177_s8 + $0x3c] sm:$0xf0] }
 0x6e9   : > { %v9558_v41 = vor.u32 %v10025_v8, %v9555_v35  ;;  %v9530_v8 = vor.u32 %v10020_v19, %v9529_v42 }
 0x6eb   : > { %5481 = vmatpush.bf16.msra.mxu2 %v9558_v41 }
 0x6ed   : > { %v14320_v16 = vpop.f32.mrf.mxu0 }
 0x6f5   : > { %v14322_v37 = vpop.f32.mrf.mxu0 }
 0x6f8   : > { %4812 = vmatmul.bf16.gmra.mxu0 %v4684_v52  ;;  %v9554_v52 = vor.u32 %v10026_v7, %v9553_v44  ;;  %v9610_v44 = vor.u32 %v10039_v55, %v9609_v47 }
 0x6fa   : > { %5392 = vmatpush.bf16.msrb.mxu1 %v9554_v52 }
 0x6fd   : > { %v14327_v31 = vpop.f32.mrf.mxu0 }
 0x6fe   : > { %5393 = vmatpush.bf16.msrb.mxu1 %v9542_v29 }
 0x702   : > { %5394 = vmatpush.bf16.msrb.mxu1 %v9530_v8 }
 0x705   : > { %v14335_v62 = vpop.f32.mrf.mxu0 }
 0x708   : > { %4817 = vmatmul.bf16.gmra.mxu0 %v4685_v4  ;;  %v9543_v4 = vld [vmem:[%s17177_s8 + $0x24] sm:$0xf0] }
 0x709   : > { %v9546_v48 = vor.u32 %v10022_v15, %v9543_v4 }
 0x70b   : > { %5482 = vmatpush.bf16.msra.mxu2 %v9546_v48  ;;  %v4846_v48 = vmax.f32 %v14320_v16, 0.0  ;;  %v10036_v16 = vld [vmem:[%s17177_s8 + $0x88] sm:$0xf0] }
 0x70d   : > { %v14346_v5 = vpop.f32.mrf.mxu0 }
 0x715   : > { %v14348_v24 = vpop.f32.mrf.mxu0 }
 0x718   : > { %4822 = vmatmul.bf16.gmra.mxu0 %v4686_v56 }
 0x71d   : > { %v14353_v33 = vpop.f32.mrf.mxu0 }
 0x725   : > { %v14361_v28 = vpop.f32.mrf.mxu0 }
 0x728   : > { %4827 = vmatmul.bf16.gmra.mxu0 %v4687_v22  ;;  %v9531_v22 = vld [vmem:[%s17177_s8 + $0xc] sm:$0xf0] }
 0x729   : > { %v9534_v25 = vor.u32 %v10019_v27, %v9531_v22 }
 0x72b   : > { %5483 = vmatpush.bf16.msra.mxu2 %v9534_v25 }
 0x72d   : > { %v14369_v46 = vpop.f32.mrf.mxu0 }
 0x735   : > { %v14371_v56 = vpop.f32.mrf.mxu0 }
 0x738   : > { %4832 = vmatmul.bf16.gmra.mxu0 %v4688_v13 }
 0x73d   : > { %v14373_v11 = vpop.f32.mrf.mxu0 }
 0x745   : > { %v14375_v0 = vpop.f32.mrf.mxu0 }
 0x748   : > { %4837 = vmatmul.bf16.gmra.mxu0 %v4689_v2  ;;  %v9622_v2 = vor.u32 %v10042_v9, %v9621_v39 }
 0x74a   : > { %5565 = vmatpush.bf16.msra.mxu3 %v9622_v2  ;;  %v10030_v2 = vld [vmem:[%s17177_s8 + $0x58] sm:$0xf0] }
 0x74d   : > { %v14377_v1 = vpop.f32.mrf.mxu0 }
 0x74e   : > { %5566 = vmatpush.bf16.msra.mxu3 %v9610_v44 }
 0x755   : > { %v4803_v18 = vpop.f32.mrf.mxu0 }
 0x756   : > { %v4859_v23 = vmax.f32 %v4803_v18, 0.0 }
 0x758   : > { %v4875_v14 = vadd.f32 %v4859_v23, %v4843_v34 }
 0x75a   : > { %v4891_v10 = vmul.f32 %v4875_v14, %v11235_v49 }
 0x75c   : > { %v14380_v32 = vsub.f32 %v4843_v34, %v4891_v10  ;;  %v14382_v59 = vsub.f32 %v4859_v23, %v4891_v10  ;;  %v9597_v23 = vld [vmem:[%s17177_s8 + $0x80] sm:$0xf] }
 0x75d   : > { %v4805_v30 = vpop.f32.mrf.mxu0 }
 0x75e   : > { %v4939_v51 = vmul.f32 %v14380_v32, %v14380_v32  ;;  %v4955_v21 = vmul.f32 %v14382_v59, %v14382_v59  ;;  %v4860_v40 = vmax.f32 %v4805_v30, 0.0  ;;  %v9598_v30 = vor.u32 %v10036_v16, %v9597_v23 }
 0x760   : > { %v4971_v53 = vadd.f32 %v4955_v21, %v4939_v51  ;;  %v4876_v26 = vadd.f32 %v4860_v40, %v4844_v20  ;;  %v10033_v51 = vld [vmem:[%s17177_s8 + $0x70] sm:$0xf0]  ;;  %5567 = vmatpush.bf16.msra.mxu3 %v9598_v30 }
 0x762   : > { %v4987_v36 = vmul.f32 %v4971_v53, %v11235_v49  ;;  %v4892_v43 = vmul.f32 %v4876_v26, %v11235_v49 }
 0x764   : > { %v5003_v58 = vadd.f32 1e-05, %v4987_v36  ;;  %v14397_v6 = vsub.f32 %v4844_v20, %v4892_v43  ;;  %v14399_v17 = vsub.f32 %v4860_v40, %v4892_v43  ;;  %v9585_v20 = vld [vmem:[%s17177_s8 + $0x68] sm:$0xf] }
 0x765   : > { %v4808_v60 = vpop.f32.mrf.mxu0  ;;  %v9586_v27 = vor.u32 %v10033_v51, %v9585_v20 }
 0x766   : > { %10311 = vrsqrt.f32 %v5003_v58  ;;  %v4940_v61 = vmul.f32 %v14397_v6, %v14397_v6  ;;  %v4956_v38 = vmul.f32 %v14399_v17, %v14399_v17  ;;  %v4861_v12 = vmax.f32 %v4808_v60, 0.0 }
 0x767   : > { %vm5025_vm2 = vweird.f32 %v5003_v58  ;;  %5568 = vmatpush.bf16.msra.mxu3 %v9586_v27  ;;  %v9537_v27 = vld [vmem:[%s17177_s8 + $0x8] sm:$0xf] }
 0x768   : > { %v4972_v13 = vadd.f32 %v4956_v38, %v4940_v61  ;;  %v4877_v57 = vadd.f32 %v4861_v12, %v4845_v50  ;;  %v4847_v38 = vmax.f32 %v14322_v37, 0.0  ;;  %v9573_v37 = vld [vmem:[%s17177_s8 + $0x50] sm:$0xf] }
 0x769   : > { %v9574_v55 = vor.u32 %v10030_v2, %v9573_v37 }
 0x76a   : > { %v4988_v45 = vmul.f32 %v4972_v13, %v11235_v49  ;;  %v4893_v54 = vmul.f32 %v4877_v57, %v11235_v49 }
 0x76b   : > { %5569 = vmatpush.bf16.msra.mxu3 %v9574_v55 }
 0x76c   : > { %v10312_v35 = vpop.eup %10311  ;;  %v14426_v41 = vadd.f32 1e-05, %v4988_v45  ;;  %v14428_v52 = vsub.f32 %v4845_v50, %v4893_v54  ;;  %v14430_v15 = vsub.f32 %v4861_v12, %v4893_v54  ;;  %v10027_v54 = vld [vmem:[%s17177_s8 + $0x40] sm:$0xf0] }
 0x76d   : > { %v5020_v7 = vmul.f32 %v10312_v35, %v5003_v58  ;;  %v4810_v4 = vpop.f32.mrf.mxu0  ;;  %vm5026_vm1 = vweird.f32 %v10312_v35 }
 0x76e   : > { %10313 = vrsqrt.f32 %v14426_v41  ;;  %v4862_v3 = vmax.f32 %v4810_v4, 0.0  ;;  %v4941_v29 = vmul.f32 %v14428_v52, %v14428_v52  ;;  %v4957_v18 = vmul.f32 %v14430_v15, %v14430_v15  ;;  %vm5027_vm3 = vmor %vm5025_vm2, %vm5026_vm1 }
 0x76f   : > { %v5021_v63 = vmul.f32 %v10312_v35, %v5020_v7  ;;  %vm5035_vm5 = vweird.f32 %v14426_v41 }
 0x770   : > { %v4878_v34 = vadd.f32 %v4862_v3, %v4846_v48  ;;  %v4973_v10 = vadd.f32 %v4957_v18, %v4941_v29  ;;  %v4848_v29 = vmax.f32 %v14327_v31, 0.0 }
 0x771   : > { %v5022_v14 = vmul.f32 0.5, %v5021_v63 }
 0x772   : > { %v4894_v21 = vmul.f32 %v4878_v34, %v11235_v49  ;;  %v4989_v53 = vmul.f32 %v4973_v10, %v11235_v49 }
 0x773   : > { %v5023_v40 = vsub.f32 1.5, %v5022_v14 }
 0x774   : > { %v10314_v26 = vpop.eup %10313  ;;  %v14452_v36 = vsub.f32 %v4846_v48, %v4894_v21  ;;  %v14454_v43 = vsub.f32 %v4862_v3, %v4894_v21  ;;  %v14457_v60 = vadd.f32 1e-05, %v4989_v53  ;;  %v9549_v53 = vld [vmem:[%s17177_s8 + $0x20] sm:$0xf] }
 0x775   : > { %v5024_v22 = vmul.f32 %v10312_v35, %v5023_v40  ;;  %v5030_v25 = vmul.f32 %v10314_v26, %v14426_v41  ;;  %v4813_v61 = vpop.f32.mrf.mxu0  ;;  %vm5036_vm4 = vweird.f32 %v10314_v26 }
 0x776   : > { %v4942_v50 = vmul.f32 %v14452_v36, %v14452_v36  ;;  %v4958_v12 = vmul.f32 %v14454_v43, %v14454_v43  ;;  %v4863_v13 = vmax.f32 %v4813_v61, 0.0  ;;  %10315 = vrsqrt.f32 %v14457_v60  ;;  %vm5037_vm6 = vmor %vm5035_vm5, %vm5036_vm4 }
 0x777   : > { %v5028_v57 = vsel %vm5027_vm3, %v10312_v35, %v5024_v22  ;;  %v5031_v39 = vmul.f32 %v10314_v26, %v5030_v25  ;;  %v10021_v22 = vld [vmem:[%s17177_s8 + $0x10] sm:$0xf0]  ;;  %v4849_v61 = vmax.f32 %v14335_v62, 0.0  ;;  %vm5045_vm8 = vweird.f32 %v14457_v60 }
 0x778   : > { %v14466_v58 = vmul.f32 %v5028_v57, %v14382_v59  ;;  %v4974_v9 = vadd.f32 %v4958_v12, %v4942_v50  ;;  %v4879_v42 = vadd.f32 %v4863_v13, %v4847_v38  ;;  %v9561_v59 = vld [vmem:[%s17177_s8 + $0x38] sm:$0xf]  ;;  %v5179_v10 = vmul.f32 %v5028_v57, %v14380_v32 }
 0x779   : > { %v5032_v45 = vmul.f32 0.5, %v5031_v39  ;;  %v9562_v4 = vor.u32 %v10027_v54, %v9561_v59  ;;  %v9538_v57 = vor.u32 %v10021_v22, %v9537_v27 }
 0x77a   : > { %v4990_v19 = vmul.f32 %v4974_v9, %v11235_v49  ;;  %v4895_v47 = vmul.f32 %v4879_v42, %v11235_v49 }
 0x77b   : > { %v5033_v8 = vsub.f32 1.5, %v5032_v45  ;;  %5570 = vmatpush.bf16.msra.mxu3 %v9562_v4 }
 0x77c   : > { %v14482_v35 = vadd.f32 1e-05, %v4990_v19  ;;  %v14484_v44 = vsub.f32 %v4847_v38, %v4895_v47  ;;  %v14486_v7 = vsub.f32 %v4863_v13, %v4895_v47  ;;  %v10316_v48 = vpop.eup %10315 }
 0x77d   : > { %v5034_v3 = vmul.f32 %v10314_v26, %v5033_v8  ;;  %v4815_v63 = vpop.f32.mrf.mxu0  ;;  %v5040_v18 = vmul.f32 %v10316_v48, %v14457_v60  ;;  %vm5046_vm7 = vweird.f32 %v10316_v48 }
 0x77e   : > { %10317 = vrsqrt.f32 %v14482_v35  ;;  %v4943_v23 = vmul.f32 %v14484_v44, %v14484_v44  ;;  %v4959_v16 = vmul.f32 %v14486_v7, %v14486_v7  ;;  %v4864_v14 = vmax.f32 %v4815_v63, 0.0  ;;  %vm5047_vm9 = vmor %vm5045_vm8, %vm5046_vm7 }
 0x77f   : > { %v5038_v34 = vsel %vm5037_vm6, %v10314_v26, %v5034_v3  ;;  %v5041_v31 = vmul.f32 %v10316_v48, %v5040_v18  ;;  %v10024_v26 = vld [vmem:[%s17177_s8 + $0x28] sm:$0xf0]  ;;  %vm5055_vm11 = vweird.f32 %v14482_v35 }
 0x780   : > { %v5180_v41 = vmul.f32 %v5038_v34, %v14397_v6  ;;  %v14499_v30 = vmul.f32 %v5038_v34, %v14399_v17  ;;  %v4975_v20 = vadd.f32 %v4959_v16, %v4943_v23  ;;  %v4880_v51 = vadd.f32 %v4864_v14, %v4848_v29 }
 0x781   : > { %v5042_v40 = vmul.f32 0.5, %v5041_v31  ;;  %v9550_v17 = vor.u32 %v10024_v26, %v9549_v53  ;;  %v4850_v16 = vmax.f32 %v14346_v5, 0.0 }
 0x782   : > { %v5211_v21 = vpack.c.bf16 %v5180_v41, %v5179_v10  ;;  %v4991_v32 = vmul.f32 %v4975_v20, %v11235_v49  ;;  %v4896_v6 = vmul.f32 %v4880_v51, %v11235_v49 }
 0x783   : > { %v5043_v38 = vsub.f32 1.5, %v5042_v40  ;;  %5571 = vmatpush.bf16.msra.mxu3 %v9550_v17 }
 0x784   : > { %v10318_v25 = vpop.eup %10317  ;;  %5395 = vmatmul.bf16.vlgmr.msrb.gmra.mxu1 %v5211_v21  ;;  %5484 = vmatmul.bf16.vlgmr.msra.gmra.mxu2 %v5211_v21  ;;  %v14517_v12 = vadd.f32 1e-05, %v4991_v32  ;;  %v14519_v13 = vsub.f32 %v4848_v29, %v4896_v6  ;;  %v14522_v42 = vsub.f32 %v4864_v14, %v4896_v6 }
 0x785   : > { %v5050_v50 = vmul.f32 %v10318_v25, %v14482_v35  ;;  %v4818_v39 = vpop.f32.mrf.mxu0  ;;  %v5044_v9 = vmul.f32 %v10316_v48, %v5043_v38  ;;  %vm5056_vm10 = vweird.f32 %v10318_v25 }
 0x786   : > { %v4865_v45 = vmax.f32 %v4818_v39, 0.0  ;;  %10319 = vrsqrt.f32 %v14517_v12  ;;  %v4944_v37 = vmul.f32 %v14519_v13, %v14519_v13  ;;  %v4960_v19 = vmul.f32 %v14522_v42, %v14522_v42  ;;  %vm5057_vm12 = vmor %vm5055_vm11, %vm5056_vm10 }
 0x787   : > { %v5051_v62 = vmul.f32 %v10318_v25, %v5050_v50  ;;  %v5048_v2 = vsel %vm5047_vm9, %v10316_v48, %v5044_v9  ;;  %5572 = vmatpush.bf16.msra.mxu3 %v9538_v57  ;;  %vm5065_vm14 = vweird.f32 %v14517_v12 }
 0x788   : > { %v4881_v47 = vadd.f32 %v4865_v45, %v4849_v61  ;;  %v14530_v55 = vmul.f32 %v5048_v2, %v14430_v15  ;;  %v4976_v60 = vadd.f32 %v4960_v19, %v4944_v37  ;;  %v5181_v40 = vmul.f32 %v5048_v2, %v14428_v52 }
 0x789   : > { %v5052_v59 = vmul.f32 0.5, %v5051_v62 }
 0x78a   : > { %v4897_v54 = vmul.f32 %v4881_v47, %v11235_v49  ;;  %v4992_v4 = vmul.f32 %v4976_v60, %v11235_v49  ;;  %5573 = vmatmul.bf16.vlgmr.msra.gmra.mxu3 %v5211_v21 }
 0x78b   : > { %v5053_v8 = vsub.f32 1.5, %v5052_v59  ;;  %v14576_v59 = vpack.c.bf16 %v14499_v30, %v14466_v58 }
 0x78c   : > { %v14534_v3 = vsub.f32 %v4849_v61, %v4897_v54  ;;  %v14536_v48 = vsub.f32 %v4865_v45, %v4897_v54  ;;  %v10320_v63 = vpop.eup %10319  ;;  %v5008_v34 = vadd.f32 1e-05, %v4992_v4  ;;  %v4851_v61 = vmax.f32 %v14348_v24, 0.0 }
 0x78d   : > { %v5054_v29 = vmul.f32 %v10318_v25, %v5053_v8  ;;  %v4820_v15 = vpop.f32.mrf.mxu0  ;;  %v5060_v18 = vmul.f32 %v10320_v63, %v14517_v12  ;;  %vm5066_vm13 = vweird.f32 %v10320_v63  ;;  %v4852_v8 = vmax.f32 %v14353_v33, 0.0 }
 0x78e   : > { %v4945_v23 = vmul.f32 %v14534_v3, %v14534_v3  ;;  %v4961_v10 = vmul.f32 %v14536_v48, %v14536_v48  ;;  %v4866_v41 = vmax.f32 %v4820_v15, 0.0  ;;  %10321 = vrsqrt.f32 %v5008_v34  ;;  %vm5067_vm15 = vmor %vm5065_vm14, %vm5066_vm13 }
 0x78f   : > { %v5058_v14 = vsel %vm5057_vm12, %v10318_v25, %v5054_v29  ;;  %v5061_v20 = vmul.f32 %v10320_v63, %v5060_v18  ;;  %vm5075_vm1 = vweird.f32 %v5008_v34 }
 0x790   : > { %v14546_v31 = vmul.f32 %v5058_v14, %v14454_v43  ;;  %v4977_v35 = vadd.f32 %v4961_v10, %v4945_v23  ;;  %v4882_v51 = vadd.f32 %v4866_v41, %v4850_v16  ;;  %v5182_v53 = vmul.f32 %v5058_v14, %v14452_v36 }
 0x791   : > { %v5062_v21 = vmul.f32 0.5, %v5061_v20 }
 0x792   : > { %v4993_v26 = vmul.f32 %v4977_v35, %v11235_v49  ;;  %v4898_v5 = vmul.f32 %v4882_v51, %v11235_v49  ;;  %v5212_v6 = vpack.c.bf16 %v5182_v53, %v5181_v40 }
 0x793   : > { %v5063_v32 = vsub.f32 1.5, %v5062_v21 }
 0x794   : > { %v14552_v17 = vadd.f32 1e-05, %v4993_v26  ;;  %v14554_v43 = vsub.f32 %v4850_v16, %v4898_v5  ;;  %v14556_v27 = vsub.f32 %v4866_v41, %v4898_v5  ;;  %v10322_v25 = vpop.eup %10321  ;;  %5400 = vmatmul.bf16.gmra.mxu1 %v5212_v6  ;;  %5489 = vmatmul.bf16.gmra.mxu2 %v5212_v6 }
 0x795   : > { %v4823_v22 = vpop.f32.mrf.mxu0  ;;  %v5064_v52 = vmul.f32 %v10320_v63, %v5063_v32  ;;  %v5070_v38 = vmul.f32 %v10322_v25, %v5008_v34  ;;  %vm5076_vm0 = vweird.f32 %v10322_v25  ;;  %v4853_v32 = vmax.f32 %v14361_v28, 0.0 }
 0x796   : > { %v4867_v36 = vmax.f32 %v4823_v22, 0.0  ;;  %10323 = vrsqrt.f32 %v14552_v17  ;;  %v4946_v57 = vmul.f32 %v14554_v43, %v14554_v43  ;;  %v4962_v39 = vmul.f32 %v14556_v27, %v14556_v27  ;;  %vm5077_vm2 = vmor %vm5075_vm1, %vm5076_vm0 }
 0x797   : > { %v5068_v50 = vsel %vm5067_vm15, %v10320_v63, %v5064_v52  ;;  %v5071_v45 = vmul.f32 %v10322_v25, %v5070_v38  ;;  %vm5085_vm4 = vweird.f32 %v14552_v17 }
 0x798   : > { %v4883_v9 = vadd.f32 %v4867_v36, %v4851_v61  ;;  %v14566_v24 = vmul.f32 %v5068_v50, %v14486_v7  ;;  %v4978_v12 = vadd.f32 %v4962_v39, %v4946_v57  ;;  %v5183_v41 = vmul.f32 %v5068_v50, %v14484_v44 }
 0x799   : > { %v5072_v37 = vmul.f32 0.5, %v5071_v45  ;;  %v14615_v45 = vpack.c.bf16 %v14546_v31, %v14530_v55 }
 0x79a   : > { %v4899_v62 = vmul.f32 %v4883_v9, %v11235_v49  ;;  %v4994_v2 = vmul.f32 %v4978_v12, %v11235_v49  ;;  %5578 = vmatmul.bf16.gmra.mxu3 %v5212_v6 }
 0x79b   : > { %v5073_v54 = vsub.f32 1.5, %v5072_v37  ;;  %v4854_v37 = vmax.f32 %v14369_v46, 0.0 }
 0x79c   : > { %v14570_v19 = vsub.f32 %v4851_v61, %v4899_v62  ;;  %v14572_v47 = vsub.f32 %v4867_v36, %v4899_v62  ;;  %v10324_v60 = vpop.eup %10323  ;;  %v5010_v63 = vadd.f32 1e-05, %v4994_v2 }
 0x79d   : > { %v4825_v7 = vpop.f32.mrf.mxu0  ;;  %v5080_v4 = vmul.f32 %v10324_v60, %v14552_v17  ;;  %v5074_v15 = vmul.f32 %v10322_v25, %v5073_v54  ;;  %vm5086_vm3 = vweird.f32 %v10324_v60 }
 0x79e   : > { %v4947_v29 = vmul.f32 %v14570_v19, %v14570_v19  ;;  %v4963_v18 = vmul.f32 %v14572_v47, %v14572_v47  ;;  %v4868_v23 = vmax.f32 %v4825_v7, 0.0  ;;  %10325 = vrsqrt.f32 %v5010_v63  ;;  %vm5087_vm5 = vmor %vm5085_vm4, %vm5086_vm3 }
 0x79f   : > { %v5081_v58 = vmul.f32 %v10324_v60, %v5080_v4  ;;  %v5078_v30 = vsel %vm5077_vm2, %v10322_v25, %v5074_v15  ;;  %vm5095_vm7 = vweird.f32 %v5010_v63 }
 0x7a0   : > { %v4979_v16 = vadd.f32 %v4963_v18, %v4947_v29  ;;  %v4884_v14 = vadd.f32 %v4868_v23, %v4852_v8  ;;  %v14585_v33 = vmul.f32 %v5078_v30, %v14522_v42  ;;  %v5184_v20 = vmul.f32 %v5078_v30, %v14519_v13  ;;  %v10058_v30 = vld [vmem:[%s17178_s9 + $0x74] sm:$0xf0] }
 0x7a1   : > { %v5082_v10 = vmul.f32 0.5, %v5081_v58 }
 0x7a2   : > { %v4995_v34 = vmul.f32 %v4979_v16, %v11235_v49  ;;  %v4900_v35 = vmul.f32 %v4884_v14, %v11235_v49  ;;  %v5213_v21 = vpack.c.bf16 %v5184_v20, %v5183_v41 }
 0x7a3   : > { %v5083_v51 = vsub.f32 1.5, %v5082_v10 }
 0x7a4   : > { %v14591_v40 = vadd.f32 1e-05, %v4995_v34  ;;  %v14593_v53 = vsub.f32 %v4852_v8, %v4900_v35  ;;  %v14595_v26 = vsub.f32 %v4868_v23, %v4900_v35  ;;  %v10326_v5 = vpop.eup %10325  ;;  %5405 = vmatmul.bf16.gmra.mxu1 %v5213_v21  ;;  %5494 = vmatmul.bf16.gmra.mxu2 %v5213_v21 }
 0x7a5   : > { %v4828_v42 = vpop.f32.mrf.mxu0  ;;  %v5084_v44 = vmul.f32 %v10324_v60, %v5083_v51  ;;  %v5090_v6 = vmul.f32 %v10326_v5, %v5010_v63  ;;  %vm5096_vm6 = vweird.f32 %v10326_v5  ;;  %v9681_v63 = vld [vmem:[%s17178_s9 + $0x70] sm:$0xf]  ;;  %v4855_v51 = vmax.f32 %v14371_v56, 0.0 }
 0x7a6   : > { %v4869_v13 = vmax.f32 %v4828_v42, 0.0  ;;  %10327 = vrsqrt.f32 %v14591_v40  ;;  %v4948_v25 = vmul.f32 %v14593_v53, %v14593_v53  ;;  %v4964_v61 = vmul.f32 %v14595_v26, %v14595_v26  ;;  %vm5097_vm8 = vmor %vm5095_vm7, %vm5096_vm6 }
 0x7a7   : > { %v5088_v22 = vsel %vm5087_vm5, %v10324_v60, %v5084_v44  ;;  %v5091_v36 = vmul.f32 %v10326_v5, %v5090_v6  ;;  %v9682_v10 = vor.u32 %v10058_v30, %v9681_v63  ;;  %vm5105_vm10 = vweird.f32 %v14591_v40 }
 0x7a8   : > { %v4885_v52 = vadd.f32 %v4869_v13, %v4853_v32  ;;  %v14605_v28 = vmul.f32 %v5088_v22, %v14536_v48  ;;  %v4980_v17 = vadd.f32 %v4964_v61, %v4948_v25  ;;  %v5185_v23 = vmul.f32 %v5088_v22, %v14534_v3  ;;  %v9745_v22 = vld [vmem:[%s17178_s9 + $0xf0] sm:$0xf]  ;;  %v10074_v25 = vld [vmem:[%s17178_s9 + $0xf4] sm:$0xf0] }
 0x7a9   : > { %v5092_v50 = vmul.f32 0.5, %v5091_v36  ;;  %7100 = vmatpush.bf16.msra.mxu0 %v9682_v10  ;;  %v9746_v36 = vor.u32 %v10074_v25, %v9745_v22 }
 0x7aa   : > { %v4901_v38 = vmul.f32 %v4885_v52, %v11235_v49  ;;  %v4996_v57 = vmul.f32 %v4980_v17, %v11235_v49  ;;  %5583 = vmatmul.bf16.gmra.mxu3 %v5213_v21 }
 0x7ab   : > { %v5093_v62 = vsub.f32 1.5, %v5092_v50  ;;  %7189 = vmatpush.bf16.msra.mxu1 %v9746_v36 }
 0x7ac   : > { %v14609_v39 = vsub.f32 %v4853_v32, %v4901_v38  ;;  %v14611_v9 = vsub.f32 %v4869_v13, %v4901_v38  ;;  %v10328_v12 = vpop.eup %10327  ;;  %v14619_v60 = vadd.f32 1e-05, %v4996_v57 }
 0x7ad   : > { %v4830_v48 = vpop.f32.mrf.mxu0  ;;  %v5100_v2 = vmul.f32 %v10328_v12, %v14591_v40  ;;  %v5094_v7 = vmul.f32 %v10326_v5, %v5093_v62  ;;  %vm5106_vm9 = vweird.f32 %v10328_v12 }
 0x7ae   : > { %v4949_v54 = vmul.f32 %v14609_v39, %v14609_v39  ;;  %v4965_v8 = vmul.f32 %v14611_v9, %v14611_v9  ;;  %v4870_v55 = vmax.f32 %v4830_v48, 0.0  ;;  %10329 = vrsqrt.f32 %v14619_v60  ;;  %vm5107_vm11 = vmor %vm5105_vm10, %vm5106_vm9 }
 0x7af   : > { %v5101_v31 = vmul.f32 %v10328_v12, %v5100_v2  ;;  %v5098_v4 = vsel %vm5097_vm8, %v10326_v5, %v5094_v7  ;;  %v14670_v48 = vpack.c.bf16 %v14585_v33, %v14566_v24  ;;  %vm5115_vm13 = vweird.f32 %v14619_v60 }
 0x7b0   : > { %v4981_v29 = vadd.f32 %v4965_v8, %v4949_v54  ;;  %v4886_v46 = vadd.f32 %v4870_v55, %v4854_v37  ;;  %v14627_v15 = vmul.f32 %v5098_v4, %v14556_v27  ;;  %v5186_v58 = vmul.f32 %v5098_v4, %v14554_v43 }
 0x7b1   : > { %v5102_v18 = vmul.f32 0.5, %v5101_v31 }
 0x7b2   : > { %v4997_v16 = vmul.f32 %v4981_v29, %v11235_v49  ;;  %v4902_v14 = vmul.f32 %v4886_v46, %v11235_v49  ;;  %v5214_v41 = vpack.c.bf16 %v5186_v58, %v5185_v23  ;;  %v14710_v22 = vpack.c.bf16 %v14627_v15, %v14605_v28 }
 0x7b3   : > { %v5103_v27 = vsub.f32 1.5, %v5102_v18 }
 0x7b4   : > { %v14639_v20 = vadd.f32 1e-05, %v4997_v16  ;;  %v14641_v3 = vsub.f32 %v4854_v37, %v4902_v14  ;;  %v14643_v43 = vsub.f32 %v4870_v55, %v4902_v14  ;;  %v10330_v35 = vpop.eup %10329  ;;  %5410 = vmatmul.bf16.gmra.mxu1 %v5214_v41  ;;  %5499 = vmatmul.bf16.gmra.mxu2 %v5214_v41  ;;  %v4856_v37 = vmax.f32 %v14373_v11, 0.0 }
 0x7b5   : > { %v4833_v34 = vpop.f32.mrf.mxu0  ;;  %v5104_v21 = vmul.f32 %v10328_v12, %v5103_v27  ;;  %v5110_v5 = vmul.f32 %v10330_v35, %v14619_v60  ;;  %vm5116_vm12 = vweird.f32 %v10330_v35 }
 0x7b6   : > { %v4871_v42 = vmax.f32 %v4833_v34, 0.0  ;;  %10331 = vrsqrt.f32 %v14639_v20  ;;  %v4950_v44 = vmul.f32 %v14641_v3, %v14641_v3  ;;  %v4966_v13 = vmul.f32 %v14643_v43, %v14643_v43  ;;  %vm5117_vm14 = vmor %vm5115_vm13, %vm5116_vm12 }
 0x7b7   : > { %v5108_v32 = vsel %vm5107_vm11, %v10328_v12, %v5104_v21  ;;  %v5111_v40 = vmul.f32 %v10330_v35, %v5110_v5  ;;  %vm5125_vm0 = vweird.f32 %v14639_v20 }
 0x7b8   : > { %v4887_v6 = vadd.f32 %v4871_v42, %v4855_v51  ;;  %v14654_v56 = vmul.f32 %v5108_v32, %v14572_v47  ;;  %v4982_v61 = vadd.f32 %v4966_v13, %v4950_v44  ;;  %v5187_v18 = vmul.f32 %v5108_v32, %v14570_v19 }
 0x7b9   : > { %v5112_v17 = vmul.f32 0.5, %v5111_v40 }
 0x7ba   : > { %v4903_v52 = vmul.f32 %v4887_v6, %v11235_v49  ;;  %v4998_v38 = vmul.f32 %v4982_v61, %v11235_v49  ;;  %5588 = vmatmul.bf16.gmra.mxu3 %v5214_v41  ;;  %v4857_v41 = vmax.f32 %v14375_v0, 0.0 }
 0x7bb   : > { %v5113_v12 = vsub.f32 1.5, %v5112_v17 }
 0x7bc   : > { %v14664_v50 = vsub.f32 %v4855_v51, %v4903_v52  ;;  %v14666_v47 = vsub.f32 %v4871_v42, %v4903_v52  ;;  %v10332_v57 = vpop.eup %10331  ;;  %v5014_v54 = vadd.f32 1e-05, %v4998_v38  ;;  %v4858_v52 = vmax.f32 %v14377_v1, 0.0 }
 0x7bd   : > { %v4835_v62 = vpop.f32.mrf.mxu0  ;;  %v5120_v2 = vmul.f32 %v10332_v57, %v14639_v20  ;;  %v5114_v8 = vmul.f32 %v10330_v35, %v5113_v12  ;;  %vm5126_vm15 = vweird.f32 %v10332_v57 }
 0x7be   : > { %v4951_v7 = vmul.f32 %v14664_v50, %v14664_v50  ;;  %v4967_v55 = vmul.f32 %v14666_v47, %v14666_v47  ;;  %v4872_v31 = vmax.f32 %v4835_v62, 0.0  ;;  %10333 = vrsqrt.f32 %v5014_v54  ;;  %vm5127_vm1 = vmor %vm5125_vm0, %vm5126_vm15 }
 0x7bf   : > { %v5121_v4 = vmul.f32 %v10332_v57, %v5120_v2  ;;  %v5118_v24 = vsel %vm5117_vm14, %v10330_v35, %v5114_v8  ;;  %vm5135_vm3 = vweird.f32 %v5014_v54 }
 0x7c0   : > { %v4983_v33 = vadd.f32 %v4967_v55, %v4951_v7  ;;  %v4888_v29 = vadd.f32 %v4872_v31, %v4856_v37  ;;  %v14680_v11 = vmul.f32 %v5118_v24, %v14595_v26  ;;  %v5188_v23 = vmul.f32 %v5118_v24, %v14593_v53 }
 0x7c1   : > { %v5122_v46 = vmul.f32 0.5, %v5121_v4 }
 0x7c2   : > { %v4999_v60 = vmul.f32 %v4983_v33, %v11235_v49  ;;  %v4904_v58 = vmul.f32 %v4888_v29, %v11235_v49  ;;  %v5215_v30 = vpack.c.bf16 %v5188_v23, %v5187_v18 }
 0x7c3   : > { %v5123_v63 = vsub.f32 1.5, %v5122_v46 }
 0x7c4   : > { %v14686_v16 = vadd.f32 1e-05, %v4999_v60  ;;  %v14688_v14 = vsub.f32 %v4856_v37, %v4904_v58  ;;  %v14690_v10 = vsub.f32 %v4872_v31, %v4904_v58  ;;  %v10334_v27 = vpop.eup %10333  ;;  %5415 = vmatmul.bf16.gmra.mxu1 %v5215_v30  ;;  %5504 = vmatmul.bf16.gmra.mxu2 %v5215_v30  ;;  %v10056_v31 = vld [vmem:[%s17178_s9 + $0x64] sm:$0xf0] }
 0x7c5   : > { %v4838_v26 = vpop.f32.mrf.mxu0  ;;  %v5124_v19 = vmul.f32 %v10332_v57, %v5123_v63  ;;  %v5130_v34 = vmul.f32 %v10334_v27, %v5014_v54  ;;  %vm5136_vm2 = vweird.f32 %v10334_v27  ;;  %v9673_v54 = vld [vmem:[%s17178_s9 + $0x60] sm:$0xf] }
 0x7c6   : > { %v4873_v53 = vmax.f32 %v4838_v26, 0.0  ;;  %10335 = vrsqrt.f32 %v14686_v16  ;;  %v4952_v51 = vmul.f32 %v14688_v14, %v14688_v14  ;;  %v4968_v21 = vmul.f32 %v14690_v10, %v14690_v10  ;;  %vm5137_vm4 = vmor %vm5135_vm3, %vm5136_vm2 }
 0x7c7   : > { %v5128_v35 = vsel %vm5127_vm1, %v10332_v57, %v5124_v19  ;;  %v5131_v5 = vmul.f32 %v10334_v27, %v5130_v34  ;;  %v9674_v33 = vor.u32 %v10056_v31, %v9673_v54  ;;  %vm5145_vm6 = vweird.f32 %v14686_v16 }
 0x7c8   : > { %v4889_v42 = vadd.f32 %v4873_v53, %v4857_v41  ;;  %v14700_v0 = vmul.f32 %v5128_v35, %v14611_v9  ;;  %v4984_v20 = vadd.f32 %v4968_v21, %v4952_v51  ;;  %v5189_v8 = vmul.f32 %v5128_v35, %v14609_v39  ;;  %v10072_v39 = vld [vmem:[%s17178_s9 + $0xe4] sm:$0xf0]  ;;  %v9665_v51 = vld [vmem:[%s17178_s9 + $0x50] sm:$0xf]  ;;  %v10054_v21 = vld [vmem:[%s17178_s9 + $0x54] sm:$0xf0] }
 0x7c9   : > { %v5132_v44 = vmul.f32 0.5, %v5131_v5  ;;  %7101 = vmatpush.bf16.msra.mxu0 %v9674_v33 }
 0x7ca   : > { %v4905_v32 = vmul.f32 %v4889_v42, %v11235_v49  ;;  %v5000_v13 = vmul.f32 %v4984_v20, %v11235_v49  ;;  %5593 = vmatmul.bf16.gmra.mxu3 %v5215_v30  ;;  %v9729_v42 = vld [vmem:[%s17178_s9 + $0xd0] sm:$0xf] }
 0x7cb   : > { %v5133_v61 = vsub.f32 1.5, %v5132_v44  ;;  %v10070_v44 = vld [vmem:[%s17178_s9 + $0xd4] sm:$0xf0] }
 0x7cc   : > { %v14704_v6 = vsub.f32 %v4857_v41, %v4905_v32  ;;  %v14706_v40 = vsub.f32 %v4873_v53, %v4905_v32  ;;  %v10336_v25 = vpop.eup %10335  ;;  %v14714_v17 = vadd.f32 1e-05, %v5000_v13  ;;  %v9666_v32 = vor.u32 %v10054_v21, %v9665_v51 }
 0x7cd   : > { %v4840_v9 = vpop.f32.mrf.mxu0  ;;  %v5140_v36 = vmul.f32 %v10336_v25, %v14686_v16  ;;  %v5134_v57 = vmul.f32 %v10334_v27, %v5133_v61  ;;  %vm5146_vm5 = vweird.f32 %v10336_v25  ;;  %v9730_v61 = vor.u32 %v10070_v44, %v9729_v42 }
 0x7ce   : > { %v4953_v38 = vmul.f32 %v14704_v6, %v14704_v6  ;;  %v4969_v12 = vmul.f32 %v14706_v40, %v14706_v40  ;;  %v4874_v28 = vmax.f32 %v4840_v9, 0.0  ;;  %10337 = vrsqrt.f32 %v14714_v17  ;;  %vm5147_vm7 = vmor %vm5145_vm6, %vm5146_vm5  ;;  %7102 = vmatpush.bf16.msra.mxu0 %v9666_v32 }
 0x7cf   : > { %v5141_v15 = vmul.f32 %v10336_v25, %v5140_v36  ;;  %v5138_v62 = vsel %vm5137_vm4, %v10334_v27, %v5134_v57  ;;  %vm5155_vm9 = vweird.f32 %v14714_v17 }
 0x7d0   : > { %v4985_v37 = vadd.f32 %v4969_v12, %v4953_v38  ;;  %v4890_v1 = vadd.f32 %v4874_v28, %v4858_v52  ;;  %v14722_v2 = vmul.f32 %v5138_v62, %v14643_v43  ;;  %v5190_v55 = vmul.f32 %v5138_v62, %v14641_v3  ;;  %v9737_v43 = vld [vmem:[%s17178_s9 + $0xe0] sm:$0xf] }
 0x7d1   : > { %v5142_v7 = vmul.f32 0.5, %v5141_v15  ;;  %v9738_v46 = vor.u32 %v10072_v39, %v9737_v43  ;;  %v10068_v43 = vld [vmem:[%s17178_s9 + $0xc4] sm:$0xf0] }
 0x7d2   : > { %v5001_v4 = vmul.f32 %v4985_v37, %v11235_v49  ;;  %v4906_v24 = vmul.f32 %v4890_v1, %v11235_v49  ;;  %v5216_v29 = vpack.c.bf16 %v5190_v55, %v5189_v8 }
 0x7d3   : > { %v5143_v3 = vsub.f32 1.5, %v5142_v7  ;;  %7190 = vmatpush.bf16.msra.mxu1 %v9738_v46 }
 0x7d4   : > { %v5017_v18 = vadd.f32 1e-05, %v5001_v4  ;;  %v14740_v23 = vsub.f32 %v4858_v52, %v4906_v24  ;;  %v14742_v60 = vsub.f32 %v4874_v28, %v4906_v24  ;;  %v10338_v58 = vpop.eup %10337  ;;  %5420 = vmatmul.bf16.gmra.mxu1 %v5216_v29  ;;  %5509 = vmatmul.bf16.gmra.mxu2 %v5216_v29  ;;  %v9721_v24 = vld [vmem:[%s17178_s9 + $0xc0] sm:$0xf] }
 0x7d5   : > { %v5144_v63 = vmul.f32 %v10336_v25, %v5143_v3  ;;  %v5150_v30 = vmul.f32 %v10338_v58, %v14714_v17  ;;  %vm5156_vm8 = vweird.f32 %v10338_v58  ;;  %v9722_v39 = vor.u32 %v10068_v43, %v9721_v24 }
 0x7d6   : > { %10339 = vrsqrt.f32 %v5017_v18  ;;  %v4954_v27 = vmul.f32 %v14740_v23, %v14740_v23  ;;  %v4970_v41 = vmul.f32 %v14742_v60, %v14742_v60  ;;  %vm5157_vm10 = vmor %vm5155_vm9, %vm5156_vm8  ;;  %vm5165_vm12 = vweird.f32 %v5017_v18 }
 0x7d7   : > { %v5148_v26 = vsel %vm5147_vm7, %v10336_v25, %v5144_v63  ;;  %v5151_v53 = vmul.f32 %v10338_v58, %v5150_v30  ;;  %7191 = vmatpush.bf16.msra.mxu1 %v9730_v61  ;;  %v10048_v61 = vld [vmem:[%s17178_s9 + $0x24] sm:$0xf0] }
 0x7d8   : > { %v5207_v19 = vmul.f32 %v5148_v26, %v14666_v47  ;;  %v4986_v34 = vadd.f32 %v4970_v41, %v4954_v27  ;;  %v14763_v47 = vpack.c.bf16 %v14680_v11, %v14654_v56  ;;  %v5191_v38 = vmul.f32 %v5148_v26, %v14664_v50  ;;  %v10050_v27 = vld [vmem:[%s17178_s9 + $0x34] sm:$0xf0] }
 0x7d9   : > { %v5152_v35 = vmul.f32 0.5, %v5151_v53  ;;  %v14775_v50 = vpack.c.bf16 %v14722_v2, %v14700_v0  ;;  %v9657_v0 = vld [vmem:[%s17178_s9 + $0x40] sm:$0xf]  ;;  %v10052_v2 = vld [vmem:[%s17178_s9 + $0x44] sm:$0xf0] }
 0x7da   : > { %v5002_v16 = vmul.f32 %v4986_v34, %v11235_v49  ;;  %5598 = vmatmul.bf16.gmra.mxu3 %v5216_v29  ;;  %v10066_v53 = vld [vmem:[%s17178_s9 + $0xb4] sm:$0xf0] }
 0x7db   : > { %v5153_v20 = vsub.f32 1.5, %v5152_v35  ;;  %7192 = vmatpush.bf16.msra.mxu1 %v9722_v39 }
 0x7dc   : > { %v10340_v5 = vpop.eup %10339  ;;  %v5018_v25 = vadd.f32 1e-05, %v5002_v16 }
 0x7dd   : > { %v5160_v13 = vmul.f32 %v10340_v5, %v5017_v18  ;;  %v5154_v9 = vmul.f32 %v10338_v58, %v5153_v20  ;;  %vm5166_vm11 = vweird.f32 %v10340_v5 }
 0x7de   : > { %10341 = vrsqrt.f32 %v5018_v25  ;;  %vm5167_vm13 = vmor %vm5165_vm12, %vm5166_vm11  ;;  %vm5175_vm15 = vweird.f32 %v5018_v25 }
 0x7df   : > { %v5161_v52 = vmul.f32 %v10340_v5, %v5160_v13  ;;  %v5158_v56 = vsel %vm5157_vm10, %v10338_v58, %v5154_v9 }
 0x7e0   : > { %v5208_v11 = vmul.f32 %v5158_v56, %v14690_v10  ;;  %v5192_v57 = vmul.f32 %v5158_v56, %v14688_v14  ;;  %v10064_v56 = vld [vmem:[%s17178_s9 + $0xa4] sm:$0xf0] }
 0x7e1   : > { %v5162_v36 = vmul.f32 0.5, %v5161_v52  ;;  %v9705_v52 = vld [vmem:[%s17178_s9 + $0xa0] sm:$0xf] }
 0x7e2   : > { %v5217_v28 = vpack.c.bf16 %v5192_v57, %v5191_v38  ;;  %v14789_v33 = vpack.c.bf16 %v5208_v11, %v5207_v19  ;;  %v9713_v19 = vld [vmem:[%s17178_s9 + $0xb0] sm:$0xf]  ;;  %v9706_v11 = vor.u32 %v10064_v56, %v9705_v52 }
 0x7e3   : > { %v5163_v12 = vsub.f32 1.5, %v5162_v36  ;;  %v9714_v34 = vor.u32 %v10066_v53, %v9713_v19 }
 0x7e4   : > { %v10342_v15 = vpop.eup %10341  ;;  %5425 = vmatmul.bf16.gmra.mxu1 %v5217_v28  ;;  %5514 = vmatmul.bf16.gmra.mxu2 %v5217_v28 }
 0x7e5   : > { %v5164_v62 = vmul.f32 %v10340_v5, %v5163_v12  ;;  %v5170_v17 = vmul.f32 %v10342_v15, %v5018_v25  ;;  %vm5176_vm14 = vweird.f32 %v10342_v15  ;;  %7193 = vmatpush.bf16.msra.mxu1 %v9714_v34 }
 0x7e6   : > { %vm5177_vm0 = vmor %vm5175_vm15, %vm5176_vm14 }
 0x7e7   : > { %v5168_v37 = vsel %vm5167_vm13, %v10340_v5, %v5164_v62  ;;  %v5171_v7 = vmul.f32 %v10342_v15, %v5170_v17 }
 0x7e8   : > { %v5209_v1 = vmul.f32 %v5168_v37, %v14706_v40  ;;  %v5193_v31 = vmul.f32 %v5168_v37, %v14704_v6  ;;  %v9658_v6 = vor.u32 %v10052_v2, %v9657_v0 }
 0x7e9   : > { %v5172_v10 = vmul.f32 0.5, %v5171_v7  ;;  %7194 = vmatpush.bf16.msra.mxu1 %v9706_v11 }
 0x7ea   : > { %5603 = vmatmul.bf16.gmra.mxu3 %v5217_v28  ;;  %7103 = vmatpush.bf16.msra.mxu0 %v9658_v6 }
 0x7eb   : > { %v5173_v14 = vsub.f32 1.5, %v5172_v10  ;;  %v10046_v10 = vld [vmem:[%s17178_s9 + $0x14] sm:$0xf0] }
 0x7ed   : > { %v5174_v8 = vmul.f32 %v10342_v15, %v5173_v14 }
 0x7ef   : > { %v5178_v55 = vsel %vm5177_vm0, %v10342_v15, %v5174_v8  ;;  %v9697_v8 = vld [vmem:[%s17178_s9 + $0x90] sm:$0xf] }
 0x7f0   : > { %v5210_v54 = vmul.f32 %v5178_v55, %v14742_v60  ;;  %v5194_v4 = vmul.f32 %v5178_v55, %v14740_v23  ;;  %v10062_v55 = vld [vmem:[%s17178_s9 + $0x94] sm:$0xf0] }
 0x7f2   : > { %v5218_v40 = vpack.c.bf16 %v5194_v4, %v5193_v31  ;;  %v14803_v18 = vpack.c.bf16 %v5210_v54, %v5209_v1  ;;  %v9698_v54 = vor.u32 %v10062_v55, %v9697_v8 }
 0x7f4   : > { %5430 = vmatmul.bf16.gmra.mxu1 %v5218_v40  ;;  %5519 = vmatmul.bf16.gmra.mxu2 %v5218_v40 }
 0x7f5   : > { %7195 = vmatpush.bf16.msra.mxu1 %v9698_v54 }
 0x7fa   : > { %5608 = vmatmul.bf16.gmra.mxu3 %v5218_v40 }
 0x801   : > { %v14794_v3 = vpop.f32.mrf.mxu1 }
 0x802   : > { %v5654_v53 = vmax.f32 %v14794_v3, 0.0 }
 0x804   : > { %5435 = vmatmul.bf16.gmra.mxu1 %v14576_v59  ;;  %5524 = vmatmul.bf16.gmra.mxu2 %v14576_v59 }
 0x807   : > { %v14798_v29 = vpop.f32.mrf.mxu2 }
 0x808   : > { %v5655_v56 = vmax.f32 %v14798_v29, 0.0 }
 0x809   : > { %v14800_v46 = vpop.f32.mrf.mxu1 }
 0x80a   : > { %5613 = vmatmul.bf16.gmra.mxu3 %v14576_v59  ;;  %v9649_v59 = vld [vmem:[%s17178_s9 + $0x30] sm:$0xf]  ;;  %v5657_v8 = vmax.f32 %v14800_v46, 0.0 }
 0x80b   : > { %v9650_v41 = vor.u32 %v10050_v27, %v9649_v59 }
 0x80d   : > { %v14805_v23 = vpop.f32.mrf.mxu3  ;;  %7104 = vmatpush.bf16.msra.mxu0 %v9650_v41 }
 0x80e   : > { %v5656_v55 = vmax.f32 %v14805_v23, 0.0 }
 0x80f   : > { %v14807_v60 = vpop.f32.mrf.mxu2 }
 0x811   : > { %v14809_v58 = vpop.f32.mrf.mxu1 }
 0x814   : > { %5440 = vmatmul.bf16.gmra.mxu1 %v14615_v45  ;;  %5529 = vmatmul.bf16.gmra.mxu2 %v14615_v45 }
 0x815   : > { %v14813_v63 = vpop.f32.mrf.mxu3 }
 0x817   : > { %v14815_v30 = vpop.f32.mrf.mxu2 }
 0x819   : > { %v14817_v26 = vpop.f32.mrf.mxu1 }
 0x81a   : > { %5618 = vmatmul.bf16.gmra.mxu3 %v14615_v45 }
 0x81d   : > { %v14832_v35 = vpop.f32.mrf.mxu3 }
 0x81f   : > { %v14834_v45 = vpop.f32.mrf.mxu2 }
 0x821   : > { %v14836_v16 = vpop.f32.mrf.mxu1 }
 0x824   : > { %5445 = vmatmul.bf16.gmra.mxu1 %v14670_v48  ;;  %5534 = vmatmul.bf16.gmra.mxu2 %v14670_v48 }
 0x825   : > { %v14840_v51 = vpop.f32.mrf.mxu3 }
 0x827   : > { %v14842_v21 = vpop.f32.mrf.mxu2 }
 0x829   : > { %v14844_v42 = vpop.f32.mrf.mxu1 }
 0x82a   : > { %5623 = vmatmul.bf16.gmra.mxu3 %v14670_v48  ;;  %v9641_v48 = vld [vmem:[%s17178_s9 + $0x20] sm:$0xf] }
 0x82b   : > { %v9642_v9 = vor.u32 %v10048_v61, %v9641_v48 }
 0x82d   : > { %v14847_v5 = vpop.f32.mrf.mxu3  ;;  %7105 = vmatpush.bf16.msra.mxu0 %v9642_v9 }
 0x82f   : > { %v14849_v20 = vpop.f32.mrf.mxu2 }
 0x831   : > { %v14851_v32 = vpop.f32.mrf.mxu1 }
 0x834   : > { %5450 = vmatmul.bf16.gmra.mxu1 %v14710_v22  ;;  %5539 = vmatmul.bf16.gmra.mxu2 %v14710_v22 }
 0x835   : > { %v14855_v44 = vpop.f32.mrf.mxu3 }
 0x837   : > { %v14857_v13 = vpop.f32.mrf.mxu2 }
 0x839   : > { %v14859_v25 = vpop.f32.mrf.mxu1 }
 0x83a   : > { %5628 = vmatmul.bf16.gmra.mxu3 %v14710_v22 }
 0x83d   : > { %v14874_v36 = vpop.f32.mrf.mxu3 }
 0x83f   : > { %v14876_v22 = vpop.f32.mrf.mxu2 }
 0x841   : > { %v14878_v38 = vpop.f32.mrf.mxu1 }
 0x842   : > { %17495 = vst [vmem:[#allocation3_spill] sm:$0xff] %v14878_v38 }
 0x844   : > { %5455 = vmatmul.bf16.gmra.mxu1 %v14763_v47  ;;  %5544 = vmatmul.bf16.gmra.mxu2 %v14763_v47 }
 0x845   : > { %v14882_v57 = vpop.f32.mrf.mxu3 }
 0x846   : > { %17496 = vst [vmem:[#allocation37_spill] sm:$0xff] %v14882_v57 }
 0x847   : > { %v14884_v12 = vpop.f32.mrf.mxu2 }
 0x848   : > { %17497 = vst [vmem:[#allocation39_spill] sm:$0xff] %v14884_v12 }
 0x849   : > { %v14886_v28 = vpop.f32.mrf.mxu1 }
 0x84a   : > { %17498 = vst [vmem:[#allocation46_spill] sm:$0xff] %v14886_v28  ;;  %5633 = vmatmul.bf16.gmra.mxu3 %v14763_v47  ;;  %v9633_v47 = vld [vmem:[%s17178_s9 + $0x10] sm:$0xf] }
 0x84b   : > { %v9634_v14 = vor.u32 %v10046_v10, %v9633_v47 }
 0x84d   : > { %v14889_v15 = vpop.f32.mrf.mxu3  ;;  %7106 = vmatpush.bf16.msra.mxu0 %v9634_v14 }
 0x84e   : > { %17499 = vst [vmem:[#allocation14_spill] sm:$0xff] %v14889_v15 }
 0x84f   : > { %v14891_v62 = vpop.f32.mrf.mxu2 }
 0x851   : > { %v14893_v17 = vpop.f32.mrf.mxu1 }
 0x854   : > { %5460 = vmatmul.bf16.gmra.mxu1 %v14775_v50  ;;  %5549 = vmatmul.bf16.gmra.mxu2 %v14775_v50 }
 0x855   : > { %v14897_v37 = vpop.f32.mrf.mxu3 }
 0x857   : > { %v14899_v1 = vpop.f32.mrf.mxu2 }
 0x859   : > { %v14901_v7 = vpop.f32.mrf.mxu1 }
 0x85a   : > { %17500 = vst [vmem:[#allocation4_spill] sm:$0xff] %v14901_v7  ;;  %5638 = vmatmul.bf16.gmra.mxu3 %v14775_v50 }
 0x85d   : > { %v14916_v31 = vpop.f32.mrf.mxu3 }
 0x85e   : > { %17501 = vst [vmem:[#allocation7_spill] sm:$0xff] %v14916_v31  ;;  %v9801_v31 = vld [vmem:[%s17178_s9 + $0x160] sm:$0xf] }
 0x85f   : > { %v14918_v50 = vpop.f32.mrf.mxu2 }
 0x860   : > { %17502 = vst [vmem:[#allocation35_spill] sm:$0xff] %v14918_v50 }
 0x861   : > { %v14920_v4 = vpop.f32.mrf.mxu1 }
 0x862   : > { %17503 = vst [vmem:[#allocation32_spill] sm:$0xff] %v14920_v4 }
 0x864   : > { %5465 = vmatmul.bf16.gmra.mxu1 %v14789_v33  ;;  %5554 = vmatmul.bf16.gmra.mxu2 %v14789_v33 }
 0x865   : > { %v14924_v40 = vpop.f32.mrf.mxu3 }
 0x866   : > { %17504 = vst [vmem:[#allocation13_spill] sm:$0xff] %v14924_v40  ;;  %v9809_v40 = vld [vmem:[%s17178_s9 + $0x170] sm:$0xf] }
 0x867   : > { %v14926_v0 = vpop.f32.mrf.mxu2 }
 0x868   : > { %17505 = vst [vmem:[#allocation6_spill] sm:$0xff] %v14926_v0 }
 0x869   : > { %v14928_v2 = vpop.f32.mrf.mxu1 }
 0x86a   : > { %17506 = vst [vmem:[#allocation15_spill] sm:$0xff] %v14928_v2  ;;  %5643 = vmatmul.bf16.gmra.mxu3 %v14789_v33 }
 0x86d   : > { %v14931_v24 = vpop.f32.mrf.mxu3 }
 0x86f   : > { %v14933_v6 = vpop.f32.mrf.mxu2 }
 0x870   : > { %17507 = vst [vmem:[#allocation12_spill] sm:$0xff] %v14933_v6 }
 0x871   : > { %v14935_v43 = vpop.f32.mrf.mxu1 }
 0x872   : > { %17508 = vst [vmem:[#allocation23_spill] sm:$0xff] %v14935_v43 }
 0x874   : > { %5470 = vmatmul.bf16.gmra.mxu1 %v14803_v18  ;;  %5559 = vmatmul.bf16.gmra.mxu2 %v14803_v18 }
 0x875   : > { %v14939_v39 = vpop.f32.mrf.mxu3 }
 0x876   : > { %17509 = vst [vmem:[#allocation47_spill] sm:$0xff] %v14939_v39 }
 0x877   : > { %v14941_v59 = vpop.f32.mrf.mxu2 }
 0x878   : > { %17510 = vst [vmem:[#allocation11_spill] sm:$0xff] %v14941_v59 }
 0x879   : > { %v14943_v27 = vpop.f32.mrf.mxu1 }
 0x87a   : > { %17511 = vst [vmem:[#allocation22_spill] sm:$0xff] %v14943_v27  ;;  %5648 = vmatmul.bf16.gmra.mxu3 %v14803_v18 }
 0x87d   : > { %v14946_v41 = vpop.f32.mrf.mxu3 }
 0x87e   : > { %17512 = vst [vmem:[#allocation18_spill] sm:$0xff] %v14946_v41  ;;  %v17515_v41 = vmax.f32 %v14807_v60, 0.0 }
 0x87f   : > { %v14948_v33 = vpop.f32.mrf.mxu2 }
 0x880   : > { %17513 = vst [vmem:[#allocation25_spill] sm:$0xff] %v14948_v33  ;;  %v17516_v38 = vmov %v17515_v41 }
 0x881   : > { %v5436_v19 = vpop.f32.mrf.mxu1 }
 0x882   : > { %v5702_v34 = vmax.f32 %v5436_v19, 0.0 }
 0x884   : > { %v5750_v48 = vadd.f32 %v5702_v34, %v5654_v53 }
 0x885   : > { %v14951_v61 = vpop.f32.mrf.mxu3 }
 0x886   : > { %17514 = vst [vmem:[#allocation48_spill] sm:$0xff] %v14951_v61  ;;  %v5798_v9 = vmul.f32 %v5750_v48, %v11235_v49 }
 0x887   : > { %v5525_v52 = vpop.f32.mrf.mxu2 }
 0x888   : > { %v14955_v11 = vsub.f32 %v5654_v53, %v5798_v9  ;;  %v14957_v47 = vsub.f32 %v5702_v34, %v5798_v9  ;;  %v5703_v18 = vmax.f32 %v5525_v52, 0.0 }
 0x88a   : > { %v5942_v10 = vmul.f32 %v14955_v11, %v14955_v11  ;;  %v5990_v3 = vmul.f32 %v14957_v47, %v14957_v47  ;;  %v5751_v14 = vadd.f32 %v5703_v18, %v5655_v56 }
 0x88c   : > { %v6038_v19 = vadd.f32 %v5990_v3, %v5942_v10  ;;  %v5799_v29 = vmul.f32 %v5751_v14, %v11235_v49 }
 0x88d   : > { %v5614_v52 = vpop.f32.mrf.mxu3 }
 0x88e   : > { %v6086_v61 = vmul.f32 %v6038_v19, %v11235_v49  ;;  %v14972_v33 = vsub.f32 %v5655_v56, %v5799_v29  ;;  %v14974_v46 = vsub.f32 %v5703_v18, %v5799_v29  ;;  %v5704_v23 = vmax.f32 %v5614_v52, 0.0  ;;  %v5438_v18 = vpop.f32.mrf.mxu1 }
 0x88f   : > { %v5705_v10 = vmax.f32 %v5438_v18, 0.0  ;;  %v5527_v54 = vpop.f32.mrf.mxu2 }
 0x890   : > { %v14980_v53 = vadd.f32 1e-05, %v6086_v61  ;;  %v5943_v9 = vmul.f32 %v14972_v33, %v14972_v33  ;;  %v5991_v56 = vmul.f32 %v14974_v46, %v14974_v46  ;;  %v5752_v19 = vadd.f32 %v5704_v23, %v5656_v55 }
 0x891   : > { %v5753_v27 = vadd.f32 %v5705_v10, %v5657_v8 }
 0x892   : > { %10343 = vrsqrt.f32 %v14980_v53  ;;  %v6039_v61 = vadd.f32 %v5991_v56, %v5943_v9  ;;  %v5800_v34 = vmul.f32 %v5752_v19, %v11235_v49  ;;  %vm6188_vm2 = vweird.f32 %v14980_v53 }
 0x893   : > { %v5801_v19 = vmul.f32 %v5753_v27, %v11235_v49 }
 0x894   : > { %v6087_v52 = vmul.f32 %v6039_v61, %v11235_v49  ;;  %v14997_v3 = vsub.f32 %v5656_v55, %v5800_v34  ;;  %v14999_v18 = vsub.f32 %v5704_v23, %v5800_v34  ;;  %v5706_v61 = vmax.f32 %v5527_v54, 0.0 }
 0x895   : > { %v15013_v14 = vsub.f32 %v5657_v8, %v5801_v19  ;;  %v15015_v9 = vsub.f32 %v5705_v10, %v5801_v19 }
 0x896   : > { %v15005_v48 = vadd.f32 1e-05, %v6087_v52  ;;  %v5944_v29 = vmul.f32 %v14997_v3, %v14997_v3  ;;  %v5992_v55 = vmul.f32 %v14999_v18, %v14999_v18  ;;  %v5754_v59 = vadd.f32 %v5706_v61, %v17515_v41  ;;  %v5441_v15 = vpop.f32.mrf.mxu1 }
 0x897   : > { %v5945_v23 = vmul.f32 %v15013_v14, %v15013_v14  ;;  %v5993_v8 = vmul.f32 %v15015_v9, %v15015_v9  ;;  %v17517_v41 = vmax.f32 %v14813_v63, 0.0  ;;  %v15120_v2 = vpop.f32.mrf.mxu2 }
 0x898   : > { %v10344_v56 = vpop.eup %10343  ;;  %10345 = vrsqrt.f32 %v15005_v48  ;;  %v6040_v52 = vadd.f32 %v5992_v55, %v5944_v29  ;;  %v5802_v29 = vmul.f32 %v5754_v59, %v11235_v49  ;;  %v5616_v55 = vpop.f32.mrf.mxu3  ;;  %vm6198_vm5 = vweird.f32 %v15005_v48 }
 0x899   : > { %v6183_v54 = vmul.f32 %v10344_v56, %v14980_v53  ;;  %v6041_v34 = vadd.f32 %v5993_v8, %v5945_v23  ;;  %v5707_v28 = vmax.f32 %v5616_v55, 0.0  ;;  %vm6189_vm1 = vweird.f32 %v10344_v56 }
 0x89a   : > { %v6088_v27 = vmul.f32 %v6040_v52, %v11235_v49  ;;  %v15037_v57 = vsub.f32 %v17516_v38, %v5802_v29  ;;  %v15039_v10 = vsub.f32 %v5706_v61, %v5802_v29  ;;  %vm6190_vm3 = vmor %vm6188_vm2, %vm6189_vm1  ;;  %v5708_v29 = vmax.f32 %v5441_v15, 0.0 }
 0x89b   : > { %v6184_v39 = vmul.f32 %v10344_v56, %v6183_v54  ;;  %v6089_v59 = vmul.f32 %v6041_v34, %v11235_v49  ;;  %v5755_v54 = vadd.f32 %v5707_v28, %v17517_v41 }
 0x89c   : > { %v15033_v12 = vadd.f32 1e-05, %v6088_v27  ;;  %v5946_v60 = vmul.f32 %v15037_v57, %v15037_v57  ;;  %v5994_v38 = vmul.f32 %v15039_v10, %v15039_v10 }
 0x89d   : > { %v6185_v19 = vmul.f32 0.5, %v6184_v39  ;;  %v15052_v27 = vadd.f32 1e-05, %v6089_v59  ;;  %v5803_v41 = vmul.f32 %v5755_v54, %v11235_v49  ;;  %v17518_v59 = vmax.f32 %v14813_v63, 0.0 }
 0x89e   : > { %v10346_v23 = vpop.eup %10345  ;;  %10347 = vrsqrt.f32 %v15033_v12  ;;  %v6042_v55 = vadd.f32 %v5994_v38, %v5946_v60  ;;  %vm6208_vm6 = vweird.f32 %v15033_v12 }
 0x89f   : > { %v6186_v61 = vsub.f32 1.5, %v6185_v19  ;;  %v6193_v39 = vmul.f32 %v10346_v23, %v15005_v48  ;;  %10349 = vrsqrt.f32 %v15052_v27  ;;  %v15062_v7 = vsub.f32 %v17518_v59, %v5803_v41 }
 0x8a0   : > { %v6090_v19 = vmul.f32 %v6042_v55, %v11235_v49  ;;  %v15064_v34 = vsub.f32 %v5707_v28, %v5803_v41  ;;  %vm6199_vm4 = vweird.f32 %v10346_v23  ;;  %vm6218_vm8 = vweird.f32 %v15052_v27 }
 0x8a1   : > { %v6187_v52 = vmul.f32 %v10344_v56, %v6186_v61  ;;  %v6194_v8 = vmul.f32 %v10346_v23, %v6193_v39  ;;  %v5947_v63 = vmul.f32 %v15062_v7, %v15062_v7  ;;  %vm6200_vm7 = vmor %vm6198_vm5, %vm6199_vm4 }
 0x8a2   : > { %v15073_v55 = vadd.f32 1e-05, %v6090_v19  ;;  %v9683_v19 = vld [vmem:[%s17178_s9 + $0x78] sm:$0xf0] }
 0x8a3   : > { %v6191_v38 = vsel %vm6190_vm3, %v10344_v56, %v6187_v52  ;;  %v6195_v53 = vmul.f32 0.5, %v6194_v8  ;;  %v5995_v56 = vmul.f32 %v15064_v34, %v15064_v34  ;;  %v10057_v8 = vld [vmem:[%s17178_s9 + $0x74] sm:$0xf] }
 0x8a4   : > { %v15068_v61 = vpop.eup %10347  ;;  %v15071_v39 = vmul.f32 %v6191_v38, %v14957_v47  ;;  %10351 = vrsqrt.f32 %v15073_v55  ;;  %v17520_v47 = vmax.f32 %v14809_v58, 0.0  ;;  %v9686_v54 = vor.u32 %v10057_v8, %v9683_v19  ;;  %v9689_v19 = vld [vmem:[%s17178_s9 + $0x80] sm:$0xf] }
 0x8a5   : > { %v6196_v15 = vsub.f32 1.5, %v6195_v53  ;;  %v6203_v41 = vmul.f32 %v15068_v61, %v15033_v12  ;;  %v15093_v59 = vpop.eup %10349  ;;  %v6043_v28 = vadd.f32 %v5995_v56, %v5947_v63  ;;  %v15098_v60 = vmul.f32 %v6191_v38, %v14955_v11  ;;  %v10055_v11 = vld [vmem:[%s17178_s9 + $0x64] sm:$0xf] }
 0x8a6   : > { %17519 = vst [vmem:[#allocation16_spill] sm:$0xff] %v15071_v39  ;;  %v5756_v52 = vadd.f32 %v5708_v29, %v17520_v47  ;;  %v6213_v47 = vmul.f32 %v15093_v59, %v15052_v27  ;;  %7367 = vmatpush.bf16.msrb.mxu3 %v9686_v54  ;;  %vm6209_vm9 = vweird.f32 %v15068_v61  ;;  %v17522_v54 = vmax.f32 %v14809_v58, 0.0 }
 0x8a7   : > { %v6197_v53 = vmul.f32 %v10346_v23, %v6196_v15  ;;  %v6204_v48 = vmul.f32 %v15068_v61, %v6203_v41  ;;  %v9625_v15 = vld [vmem:[%s17178_s9] sm:$0xf]  ;;  %v10044_v41 = vld [vmem:[%s17178_s9 + $0x4] sm:$0xf0]  ;;  %v6091_v56 = vmul.f32 %v6043_v28, %v11235_v49  ;;  %vm6228_vm10 = vweird.f32 %v15073_v55  ;;  %vm6210_vm11 = vmor %vm6208_vm6, %vm6209_vm9 }
 0x8a8   : > { %v5804_v39 = vmul.f32 %v5756_v52, %v11235_v49  ;;  %v9626_v8 = vor.u32 %v10044_v41, %v9625_v15  ;;  %v9675_v52 = vld [vmem:[%s17178_s9 + $0x68] sm:$0xf0]  ;;  %vm6219_vm12 = vweird.f32 %v15093_v59 }
 0x8a9   : > { %v6201_v38 = vsel %vm6200_vm7, %v10346_v23, %v6197_v53  ;;  %v6205_v63 = vmul.f32 0.5, %v6204_v48  ;;  %v6214_v23 = vmul.f32 %v15093_v59, %v6213_v47  ;;  %v10060_v53 = vld [vmem:[%s17178_s9 + $0x84] sm:$0xf0]  ;;  %v15134_v15 = vadd.f32 1e-05, %v6091_v56  ;;  %vm6220_vm13 = vmor %vm6218_vm8, %vm6219_vm12 }
 0x8aa   : > { %v15123_v0 = vmul.f32 %v6201_v38, %v14974_v46  ;;  %v15129_v28 = vsub.f32 %v17522_v54, %v5804_v39  ;;  %v15136_v41 = vsub.f32 %v5708_v29, %v5804_v39  ;;  %7107 = vmatpush.bf16.msra.mxu0 %v9626_v8  ;;  %v9678_v46 = vor.u32 %v10055_v11, %v9675_v52  ;;  %v10090_v29 = vld [vmem:[%s17178_s9 + $0x174] sm:$0xf0]  ;;  %v10053_v52 = vld [vmem:[%s17178_s9 + $0x54] sm:$0xf] }
 0x8ab   : > { %v6206_v48 = vsub.f32 1.5, %v6205_v63  ;;  %v6215_v4 = vmul.f32 0.5, %v6214_v23  ;;  %v9690_v58 = vor.u32 %v10060_v53, %v9689_v19  ;;  %v5709_v54 = vmax.f32 %v15120_v2, 0.0  ;;  %v9667_v19 = vld [vmem:[%s17178_s9 + $0x58] sm:$0xf0]  ;;  %v5619_v23 = vpop.f32.mrf.mxu3 }
 0x8ac   : > { %17521 = vst [vmem:[#allocation26_spill] sm:$0xff] %v15123_v0  ;;  %v15138_v0 = vpop.eup %10351  ;;  %v5948_v47 = vmul.f32 %v15129_v28, %v15129_v28  ;;  %10353 = vrsqrt.f32 %v15134_v15  ;;  %7368 = vmatpush.bf16.msrb.mxu3 %v9678_v46  ;;  %v5996_v63 = vmul.f32 %v15136_v41, %v15136_v41  ;;  %v17523_v56 = vmax.f32 %v14815_v30, 0.0 }
 0x8ad   : > { %v6207_v39 = vmul.f32 %v15068_v61, %v6206_v48  ;;  %v6223_v11 = vmul.f32 %v15138_v0, %v15073_v55  ;;  %v6216_v2 = vsub.f32 1.5, %v6215_v4  ;;  %7196 = vmatpush.bf16.msra.mxu1 %v9690_v58  ;;  %v9810_v53 = vor.u32 %v10090_v29, %v9809_v40 }
 0x8ae   : > { %v5757_v8 = vadd.f32 %v5709_v54, %v17523_v56  ;;  %v9670_v48 = vor.u32 %v10053_v52, %v9667_v19  ;;  %v6663_v46 = vmul.f32 %v6201_v38, %v14972_v33  ;;  %v6044_v50 = vadd.f32 %v5996_v63, %v5948_v47  ;;  %v5443_v38 = vpop.f32.mrf.mxu1 }
 0x8af   : > { %v15170_v12 = vsel %vm6210_vm11, %v15068_v61, %v6207_v39  ;;  %v6224_v4 = vmul.f32 %v15138_v0, %v6223_v11  ;;  %v6217_v56 = vmul.f32 %v15093_v59, %v6216_v2  ;;  %v10088_v61 = vld [vmem:[%s17178_s9 + $0x164] sm:$0xf0]  ;;  %7278 = vmatpush.bf16.msrb.mxu2 %v9810_v53  ;;  %vm6229_vm14 = vweird.f32 %v15138_v0 }
 0x8b0   : > { %v15176_v58 = vmul.f32 %v15170_v12, %v14999_v18  ;;  %v5805_v33 = vmul.f32 %v5757_v8, %v11235_v49  ;;  %v5710_v18 = vmax.f32 %v5619_v23, 0.0  ;;  %7369 = vmatpush.bf16.msrb.mxu3 %v9670_v48  ;;  %v9802_v47 = vor.u32 %v10088_v61, %v9801_v31  ;;  %vm6230_vm0 = vmor %vm6228_vm10, %vm6229_vm14 }
 0x8b1   : > { %v6225_v40 = vmul.f32 0.5, %v6224_v4  ;;  %v6221_v29 = vsel %vm6220_vm13, %v15093_v59, %v6217_v56  ;;  %v6092_v39 = vmul.f32 %v6044_v50, %v11235_v49  ;;  %v5711_v11 = vmax.f32 %v5443_v38, 0.0  ;;  %v10051_v50 = vld [vmem:[%s17178_s9 + $0x44] sm:$0xf] }
 0x8b2   : > { %17524 = vst [vmem:[#allocation21_spill] sm:$0xff] %v15176_v58  ;;  %v10354_v2 = vpop.eup %10353  ;;  %v6665_v63 = vmul.f32 %v6221_v29, %v15013_v14  ;;  %v15195_v27 = vmul.f32 %v6221_v29, %v15015_v9  ;;  %v17526_v8 = vmax.f32 %v14815_v30, 0.0  ;;  %vm6238_vm15 = vweird.f32 %v15134_v15  ;;  %v9659_v14 = vld [vmem:[%s17178_s9 + $0x48] sm:$0xf0] }
 0x8b3   : > { %v6226_v52 = vsub.f32 1.5, %v6225_v40  ;;  %v6233_v31 = vmul.f32 %v10354_v2, %v15134_v15  ;;  %v15203_v59 = vadd.f32 1e-05, %v6092_v39  ;;  %v15205_v4 = vsub.f32 %v5709_v54, %v5805_v33  ;;  %7279 = vmatpush.bf16.msrb.mxu2 %v9802_v47  ;;  %v5532_v47 = vpop.f32.mrf.mxu2  ;;  %v5621_v29 = vpop.f32.mrf.mxu3 }
 0x8b4   : > { %17525 = vst [vmem:[#allocation28_spill] sm:$0xff] %v15195_v27  ;;  %v15199_v19 = vsub.f32 %v17526_v8, %v5805_v33  ;;  %v15214_v30 = vpack.c.bf16 %v6665_v63, %v15098_v60  ;;  %v17527_v53 = vmax.f32 %v14832_v35, 0.0  ;;  %vm6239_vm1 = vweird.f32 %v10354_v2 }
 0x8b5   : > { %v6227_v9 = vmul.f32 %v15138_v0, %v6226_v52  ;;  %v6234_v48 = vmul.f32 %v10354_v2, %v6233_v31  ;;  %10355 = vrsqrt.f32 %v15203_v59  ;;  %v5997_v60 = vmul.f32 %v15205_v4, %v15205_v4  ;;  %vm6240_vm2 = vmor %vm6238_vm15, %vm6239_vm1 }
 0x8b6   : > { %v5949_v23 = vmul.f32 %v15199_v19, %v15199_v19  ;;  %v5758_v54 = vadd.f32 %v5710_v18, %v17527_v53  ;;  %v17528_v40 = vmax.f32 %v14817_v26, 0.0  ;;  %v9662_v38 = vor.u32 %v10051_v50, %v9659_v14  ;;  %7108 = vmatmul.bf16.vlgmr.msra.gmra.mxu0 %v15214_v30 }
 0x8b7   : > { %v6231_v56 = vsel %vm6230_vm0, %v15138_v0, %v6227_v9  ;;  %v6235_v63 = vmul.f32 0.5, %v6234_v48  ;;  %v17530_v8 = vmov %v17527_v53  ;;  %v5712_v50 = vmax.f32 %v5532_v47, 0.0 }
 0x8b8   : > { %v5806_v61 = vmul.f32 %v5758_v54, %v11235_v49  ;;  %v5759_v33 = vadd.f32 %v5711_v11, %v17528_v40  ;;  %v6666_v55 = vmul.f32 %v6231_v56, %v15037_v57  ;;  %v15235_v39 = vmul.f32 %v6231_v56, %v15039_v10  ;;  %7370 = vmatpush.bf16.msrb.mxu3 %v9662_v38 }
 0x8b9   : > { %v6045_v52 = vadd.f32 %v5997_v60, %v5949_v23  ;;  %v6236_v53 = vsub.f32 1.5, %v6235_v63  ;;  %v5713_v54 = vmax.f32 %v5621_v29, 0.0  ;;  %v17532_v23 = vmov %v17528_v40  ;;  %v10086_v63 = vld [vmem:[%s17178_s9 + $0x154] sm:$0xf0] }
 0x8ba   : > { %17529 = vst [vmem:[#allocation34_spill] sm:$0xff] %v15235_v39  ;;  %v15239_v0 = vsub.f32 %v17530_v8, %v5806_v61  ;;  %v15241_v31 = vsub.f32 %v5710_v18, %v5806_v61  ;;  %v5807_v9 = vmul.f32 %v5759_v33, %v11235_v49  ;;  %v15244_v14 = vpack.c.bf16 %v6666_v55, %v6663_v46  ;;  %v9793_v55 = vld [vmem:[%s17178_s9 + $0x150] sm:$0xf] }
 0x8bb   : > { %v6093_v57 = vmul.f32 %v6045_v52, %v11235_v49  ;;  %v10356_v60 = vpop.eup %10355  ;;  %v6237_v56 = vmul.f32 %v10354_v2, %v6236_v53  ;;  %v17533_v61 = vmax.f32 %v14834_v45, 0.0  ;;  %v17534_v33 = vmax.f32 %v14840_v51, 0.0 }
 0x8bc   : > { %17531 = vst [vmem:[#allocation41_spill] sm:$0xff] %v15244_v14  ;;  %v5950_v10 = vmul.f32 %v15239_v0, %v15239_v0  ;;  %v5998_v35 = vmul.f32 %v15241_v31, %v15241_v31  ;;  %v15253_v18 = vsub.f32 %v17532_v23, %v5807_v9  ;;  %v15255_v48 = vsub.f32 %v5711_v11, %v5807_v9  ;;  %v15282_v9 = vpop.f32.mrf.mxu1 }
 0x8bd   : > { %v15257_v46 = vadd.f32 1e-05, %v6093_v57  ;;  %v5760_v40 = vadd.f32 %v5712_v50, %v17533_v61  ;;  %v5761_v38 = vadd.f32 %v5713_v54, %v17534_v33  ;;  %7197 = vmatmul.bf16.vlgmr.msra.gmra.mxu1 %v15244_v14  ;;  %v6243_v26 = vmul.f32 %v10356_v60, %v15203_v59 }
 0x8be   : > { %v6046_v11 = vadd.f32 %v5998_v35, %v5950_v10  ;;  %v5951_v29 = vmul.f32 %v15253_v18, %v15253_v18  ;;  %v6664_v52 = vmul.f32 %v15170_v12, %v14997_v3  ;;  %v6241_v8 = vsel %vm6240_vm2, %v10354_v2, %v6237_v56 }
 0x8bf   : > { %10357 = vrsqrt.f32 %v15257_v46  ;;  %v5999_v15 = vmul.f32 %v15255_v48, %v15255_v48  ;;  %v6667_v53 = vmul.f32 %v6241_v8, %v15062_v7  ;;  %v15286_v57 = vmul.f32 %v6241_v8, %v15064_v34  ;;  %v10049_v8 = vld [vmem:[%s17178_s9 + $0x34] sm:$0xf] }
 0x8c0   : > { %v6244_v10 = vmul.f32 %v10356_v60, %v6243_v26  ;;  %v6094_v35 = vmul.f32 %v6046_v11, %v11235_v49  ;;  %v5808_v61 = vmul.f32 %v5760_v40, %v11235_v49  ;;  %v5809_v3 = vmul.f32 %v5761_v38, %v11235_v49 }
 0x8c1   : > { %17535 = vst [vmem:[#allocation31_spill] sm:$0xff] %v15286_v57  ;;  %v6047_v23 = vadd.f32 %v5999_v15, %v5951_v29  ;;  %v9794_v12 = vor.u32 %v10086_v63, %v9793_v55  ;;  %v15291_v2 = vpack.c.bf16 %v6667_v53, %v6664_v52  ;;  %v5714_v47 = vmax.f32 %v15282_v9, 0.0 }
 0x8c2   : > { %v6245_v56 = vmul.f32 0.5, %v6244_v10  ;;  %v15293_v33 = vadd.f32 1e-05, %v6094_v35  ;;  %v17537_v34 = vmax.f32 %v14834_v45, 0.0  ;;  %v15301_v11 = vsub.f32 %v5712_v50, %v5808_v61  ;;  %v9785_v10 = vld [vmem:[%s17178_s9 + $0x140] sm:$0xf] }
 0x8c3   : > { %17536 = vst [vmem:[#allocation38_spill] sm:$0xff] %v15291_v2  ;;  %v6095_v7 = vmul.f32 %v6047_v23, %v11235_v49  ;;  %v17538_v40 = vmax.f32 %v14840_v51, 0.0  ;;  %7280 = vmatpush.bf16.msrb.mxu2 %v9794_v12  ;;  %vm6249_vm3 = vweird.f32 %v10356_v60  ;;  %v15308_v55 = vsub.f32 %v5713_v54, %v5809_v3  ;;  %v9651_v54 = vld [vmem:[%s17178_s9 + $0x38] sm:$0xf0]  ;;  %v10084_v35 = vld [vmem:[%s17178_s9 + $0x144] sm:$0xf0] }
 0x8c4   : > { %v15299_v26 = vsub.f32 %v17537_v34, %v5808_v61  ;;  %v6246_v38 = vsub.f32 1.5, %v6245_v56  ;;  %10359 = vrsqrt.f32 %v15293_v33  ;;  %v6000_v50 = vmul.f32 %v15301_v11, %v15301_v11  ;;  %v9643_v12 = vld [vmem:[%s17178_s9 + $0x28] sm:$0xf0]  ;;  %v5535_v56 = vpop.f32.mrf.mxu2 }
 0x8c5   : > { %v15305_v29 = vsub.f32 %v17538_v40, %v5809_v3  ;;  %v15310_v63 = vpop.eup %10357  ;;  %v15312_v52 = vadd.f32 1e-05, %v6095_v7  ;;  %vm6248_vm4 = vweird.f32 %v15203_v59  ;;  %v6001_v53 = vmul.f32 %v15308_v55, %v15308_v55  ;;  %v10047_v3 = vld [vmem:[%s17178_s9 + $0x24] sm:$0xf] }
 0x8c6   : > { %v5952_v45 = vmul.f32 %v15299_v26, %v15299_v26  ;;  %v6247_v15 = vmul.f32 %v10356_v60, %v6246_v38  ;;  %v6253_v9 = vmul.f32 %v15310_v63, %v15257_v46  ;;  %vm6250_vm5 = vmor %vm6248_vm4, %vm6249_vm3  ;;  %vm6258_vm6 = vweird.f32 %v15257_v46  ;;  %v10045_v46 = vld [vmem:[%s17178_s9 + $0x14] sm:$0xf] }
 0x8c7   : > { %v5953_v51 = vmul.f32 %v15305_v29, %v15305_v29  ;;  %10361 = vrsqrt.f32 %v15312_v52  ;;  %v17539_v23 = vmax.f32 %v14836_v16, 0.0  ;;  %v9654_v38 = vor.u32 %v10049_v8, %v9651_v54 }
 0x8c8   : > { %v6048_v59 = vadd.f32 %v6000_v50, %v5952_v45  ;;  %v15348_v7 = vsel %vm6250_vm5, %v10356_v60, %v6247_v15  ;;  %v6254_v34 = vmul.f32 %v15310_v63, %v6253_v9  ;;  %v9786_v14 = vor.u32 %v10084_v35, %v9785_v10 }
 0x8c9   : > { %v5762_v61 = vadd.f32 %v5714_v47, %v17539_v23  ;;  %v6049_v40 = vadd.f32 %v6001_v53, %v5953_v51  ;;  %v15353_v45 = vmul.f32 %v15348_v7, %v15136_v41  ;;  %7371 = vmatpush.bf16.msrb.mxu3 %v9654_v38  ;;  %v9646_v60 = vor.u32 %v10047_v3, %v9643_v12  ;;  %v15378_v12 = vpop.f32.mrf.mxu3 }
 0x8ca   : > { %v6096_v50 = vmul.f32 %v6048_v59, %v11235_v49  ;;  %v10360_v57 = vpop.eup %10359  ;;  %v6255_v58 = vmul.f32 0.5, %v6254_v34  ;;  %v5715_v15 = vmax.f32 %v5535_v56, 0.0  ;;  %vm6259_vm7 = vweird.f32 %v15310_v63  ;;  %7281 = vmatpush.bf16.msrb.mxu2 %v9786_v14 }
 0x8cb   : > { %17540 = vst [vmem:[#allocation5_spill] sm:$0xff] %v15353_v45  ;;  %v5810_v23 = vmul.f32 %v5762_v61, %v11235_v49  ;;  %v6097_v39 = vmul.f32 %v6049_v40, %v11235_v49  ;;  %v6263_v51 = vmul.f32 %v10360_v57, %v15293_v33  ;;  %v17541_v41 = vmax.f32 %v14836_v16, 0.0  ;;  %vm6260_vm10 = vmor %vm6258_vm6, %vm6259_vm7 }
 0x8cc   : > { %v15360_v8 = vadd.f32 1e-05, %v6096_v50  ;;  %v6256_v9 = vsub.f32 1.5, %v6255_v58  ;;  %v17542_v35 = vmax.f32 %v14842_v21, 0.0  ;;  %vm6268_vm8 = vweird.f32 %v15293_v33  ;;  %v9777_v58 = vld [vmem:[%s17178_s9 + $0x130] sm:$0xf] }
 0x8cd   : > { %v15364_v54 = vsub.f32 %v17541_v41, %v5810_v23  ;;  %v15366_v53 = vadd.f32 1e-05, %v6097_v39  ;;  %v15368_v10 = vsub.f32 %v5714_v47, %v5810_v23  ;;  %v15372_v61 = vpop.eup %10361  ;;  %v6264_v3 = vmul.f32 %v10360_v57, %v6263_v51  ;;  %v10082_v39 = vld [vmem:[%s17178_s9 + $0x134] sm:$0xf0]  ;;  %7372 = vmatpush.bf16.msrb.mxu3 %v9646_v60  ;;  %v9635_v51 = vld [vmem:[%s17178_s9 + $0x18] sm:$0xf0] }
 0x8ce   : > { %v5763_v59 = vadd.f32 %v5715_v15, %v17542_v35  ;;  %10363 = vrsqrt.f32 %v15360_v8  ;;  %v6257_v14 = vmul.f32 %v15310_v63, %v6256_v9  ;;  %v6273_v47 = vmul.f32 %v15372_v61, %v15312_v52 }
 0x8cf   : > { %v5954_v16 = vmul.f32 %v15364_v54, %v15364_v54  ;;  %vm6278_vm9 = vweird.f32 %v15312_v52  ;;  %10365 = vrsqrt.f32 %v15366_v53  ;;  %v6265_v56 = vmul.f32 0.5, %v6264_v3  ;;  %v15417_v3 = vpop.f32.mrf.mxu1 }
 0x8d0   : > { %vm6269_vm11 = vweird.f32 %v10360_v57  ;;  %v6002_v34 = vmul.f32 %v15368_v10, %v15368_v10  ;;  %v5811_v40 = vmul.f32 %v5763_v59, %v11235_v49  ;;  %v15399_v38 = vsel %vm6260_vm10, %v15310_v63, %v6257_v14 }
 0x8d1   : > { %v6274_v50 = vmul.f32 %v15372_v61, %v6273_v47  ;;  %v5716_v23 = vmax.f32 %v15378_v12, 0.0  ;;  %v9778_v60 = vor.u32 %v10082_v39, %v9777_v58  ;;  %v15411_v41 = vmul.f32 %v15399_v38, %v15205_v4  ;;  %vm6270_vm13 = vmor %vm6268_vm8, %vm6269_vm11 }
 0x8d2   : > { %v6266_v9 = vsub.f32 1.5, %v6265_v56  ;;  %v6050_v63 = vadd.f32 %v6002_v34, %v5954_v16  ;;  %v15415_v59 = vsub.f32 %v17542_v35, %v5811_v40  ;;  %vm6279_vm12 = vweird.f32 %v15372_v61 }
 0x8d3   : > { %17543 = vst [vmem:[#allocation36_spill] sm:$0xff] %v15411_v41  ;;  %v6275_v12 = vmul.f32 0.5, %v6274_v50  ;;  %v15420_v58 = vsub.f32 %v5715_v15, %v5811_v40  ;;  %v17544_v39 = vmax.f32 %v14847_v5, 0.0  ;;  %7282 = vmatpush.bf16.msrb.mxu2 %v9778_v60  ;;  %v9638_v16 = vor.u32 %v10045_v46, %v9635_v51  ;;  %vm6280_vm0 = vmor %vm6278_vm9, %vm6279_vm12  ;;  %v5537_v41 = vpop.f32.mrf.mxu2 }
 0x8d4   : > { %v10364_v47 = vpop.eup %10363  ;;  %v6267_v4 = vmul.f32 %v10360_v57, %v6266_v9  ;;  %v6098_v56 = vmul.f32 %v6050_v63, %v11235_v49  ;;  %v5955_v21 = vmul.f32 %v15415_v59, %v15415_v59  ;;  %vm6288_vm14 = vweird.f32 %v15360_v8 }
 0x8d5   : > { %v5764_v14 = vadd.f32 %v5716_v23, %v17544_v39  ;;  %v15427_v34 = vpop.eup %10365  ;;  %v6276_v15 = vsub.f32 1.5, %v6275_v12  ;;  %v6283_v40 = vmul.f32 %v10364_v47, %v15360_v8  ;;  %v6003_v50 = vmul.f32 %v15420_v58, %v15420_v58  ;;  %7373 = vmatpush.bf16.msrb.mxu3 %v9638_v16  ;;  %v10080_v39 = vld [vmem:[%s17178_s9 + $0x124] sm:$0xf0] }
 0x8d6   : > { %v5717_v60 = vmax.f32 %v15417_v3, 0.0  ;;  %v15437_v9 = vsel %vm6270_vm13, %v10360_v57, %v6267_v4  ;;  %vm6289_vm15 = vweird.f32 %v10364_v47  ;;  %v6293_v46 = vmul.f32 %v15427_v34, %v15366_v53 }
 0x8d7   : > { %v15441_v51 = vadd.f32 1e-05, %v6098_v56  ;;  %v15445_v33 = vmul.f32 %v15437_v9, %v15241_v31  ;;  %v6277_v63 = vmul.f32 %v15372_v61, %v6276_v15  ;;  %v6284_v35 = vmul.f32 %v10364_v47, %v6283_v40  ;;  %v9769_v31 = vld [vmem:[%s17178_s9 + $0x120] sm:$0xf]  ;;  %v9627_v15 = vld [vmem:[%s17178_s9 + $0x8] sm:$0xf0]  ;;  %vm6290_vm3 = vmor %vm6288_vm14, %vm6289_vm15 }
 0x8d8   : > { %v6051_v12 = vadd.f32 %v6003_v50, %v5955_v21  ;;  %v6294_v57 = vmul.f32 %v15427_v34, %v6293_v46  ;;  %vm6299_vm1 = vweird.f32 %v15427_v34  ;;  %v5812_v3 = vmul.f32 %v5764_v14, %v11235_v49  ;;  %v10043_v14 = vld [vmem:[%s17178_s9 + $0x4] sm:$0xf] }
 0x8d9   : > { %17545 = vst [vmem:[#allocation10_spill] sm:$0xff] %v15445_v33  ;;  %10367 = vrsqrt.f32 %v15441_v51  ;;  %v15463_v4 = vsel %vm6280_vm0, %v15372_v61, %v6277_v63  ;;  %v6285_v52 = vmul.f32 0.5, %v6284_v35  ;;  %v17546_v21 = vmax.f32 %v14844_v42, 0.0 }
 0x8da   : > { %v6099_v56 = vmul.f32 %v6051_v12, %v11235_v49  ;;  %v15476_v40 = vmul.f32 %v15463_v4, %v15255_v48  ;;  %v6295_v61 = vmul.f32 0.5, %v6294_v57  ;;  %v17548_v50 = vmax.f32 %v14847_v5, 0.0 }
 0x8db   : > { %v5765_v16 = vadd.f32 %v5717_v60, %v17546_v21  ;;  %v15482_v63 = vsub.f32 %v5716_v23, %v5812_v3  ;;  %v6286_v35 = vsub.f32 1.5, %v6285_v52  ;;  %v9770_v33 = vor.u32 %v10080_v39, %v9769_v31 }
 0x8dc   : > { %17547 = vst [vmem:[#allocation20_spill] sm:$0xff] %v15476_v40  ;;  %v15480_v46 = vsub.f32 %v17548_v50, %v5812_v3  ;;  %v15484_v12 = vadd.f32 1e-05, %v6099_v56  ;;  %v6296_v45 = vsub.f32 1.5, %v6295_v61  ;;  %v9630_v57 = vor.u32 %v10043_v14, %v9627_v15 }
 0x8dd   : > { %v5813_v21 = vmul.f32 %v5765_v16, %v11235_v49  ;;  %v6004_v48 = vmul.f32 %v15482_v63, %v15482_v63  ;;  %v6287_v5 = vmul.f32 %v10364_v47, %v6286_v35  ;;  %vm6298_vm2 = vweird.f32 %v15366_v53  ;;  %7283 = vmatpush.bf16.msrb.mxu2 %v9770_v33  ;;  %v5626_v53 = vpop.f32.mrf.mxu3 }
 0x8de   : > { %v5956_v27 = vmul.f32 %v15480_v46, %v15480_v46  ;;  %10369 = vrsqrt.f32 %v15484_v12  ;;  %v17549_v23 = vmax.f32 %v14844_v42, 0.0  ;;  %v6297_v39 = vmul.f32 %v15427_v34, %v6296_v45  ;;  %7374 = vmatpush.bf16.msrb.mxu3 %v9630_v57  ;;  %vm6300_vm4 = vmor %vm6298_vm2, %vm6299_vm1  ;;  %v10078_v45 = vld [vmem:[%s17178_s9 + $0x114] sm:$0xf0] }
 0x8df   : > { %v10368_v31 = vpop.eup %10367  ;;  %v15501_v56 = vsub.f32 %v5717_v60, %v5813_v21  ;;  %v5718_v16 = vmax.f32 %v5537_v41, 0.0  ;;  %v15504_v15 = vsel %vm6290_vm3, %v10364_v47, %v6287_v5  ;;  %v15517_v41 = vpop.f32.mrf.mxu1  ;;  %v5719_v57 = vmax.f32 %v5626_v53, 0.0 }
 0x8e0   : > { %v15495_v3 = vsub.f32 %v17549_v23, %v5813_v21  ;;  %v6052_v52 = vadd.f32 %v6004_v48, %v5956_v27  ;;  %v6303_v42 = vmul.f32 %v10368_v31, %v15441_v51  ;;  %v9761_v27 = vld [vmem:[%s17178_s9 + $0x110] sm:$0xf]  ;;  %v15521_v47 = vmul.f32 %v15504_v15, %v15301_v11  ;;  %v9753_v11 = vld [vmem:[%s17178_s9 + $0x100] sm:$0xf] }
 0x8e1   : > { %v15524_v60 = vsel %vm6300_vm4, %v15427_v34, %v6297_v39  ;;  %v6005_v61 = vmul.f32 %v15501_v56, %v15501_v56  ;;  %v17552_v21 = vmax.f32 %v14849_v20, 0.0  ;;  %7375 = vmatmul.bf16.vlgmr.msrb.gmra.mxu3 %v15214_v30  ;;  %v10076_v34 = vld [vmem:[%s17178_s9 + $0x104] sm:$0xf0]  ;;  %v5720_v39 = vmax.f32 %v15517_v41, 0.0 }
 0x8e2   : > { %v5957_v8 = vmul.f32 %v15495_v3, %v15495_v3  ;;  %17550 = vst [vmem:[#allocation29_spill] sm:$0xff] %v15521_v47  ;;  %v6100_v33 = vmul.f32 %v6052_v52, %v11235_v49  ;;  %v15531_v50 = vmul.f32 %v15524_v60, %v15308_v55  ;;  %v6304_v35 = vmul.f32 %v10368_v31, %v6303_v42  ;;  %v15561_v47 = vpop.f32.mrf.mxu2 }
 0x8e3   : > { %v5766_v48 = vadd.f32 %v5718_v16, %v17552_v21  ;;  %v9762_v55 = vor.u32 %v10078_v45, %v9761_v27  ;;  %vm6308_vm5 = vweird.f32 %v15441_v51  ;;  %v17553_v53 = vmax.f32 %v14855_v44, 0.0  ;;  %v10073_v51 = vld [vmem:[%s17178_s9 + $0xf4] sm:$0xf] }
 0x8e4   : > { %17551 = vst [vmem:[#allocation40_spill] sm:$0xff] %v15531_v50  ;;  %v15542_v5 = vadd.f32 1e-05, %v6100_v33  ;;  %v6053_v23 = vadd.f32 %v6005_v61, %v5957_v8  ;;  %v10370_v52 = vpop.eup %10369  ;;  %v6305_v42 = vmul.f32 0.5, %v6304_v35  ;;  %vm6309_vm6 = vweird.f32 %v10368_v31 }
 0x8e5   : > { %v5814_v30 = vmul.f32 %v5766_v48, %v11235_v49  ;;  %v5767_v21 = vadd.f32 %v5719_v57, %v17553_v53  ;;  %v6313_v14 = vmul.f32 %v10370_v52, %v15484_v12  ;;  %7284 = vmatpush.bf16.msrb.mxu2 %v9762_v55  ;;  %v9754_v33 = vor.u32 %v10076_v34, %v9753_v11  ;;  %vm6310_vm8 = vmor %vm6308_vm5, %vm6309_vm6 }
 0x8e6   : > { %10371 = vrsqrt.f32 %v15542_v5  ;;  %v6306_v8 = vsub.f32 1.5, %v6305_v42  ;;  %v6101_v27 = vmul.f32 %v6053_v23, %v11235_v49  ;;  %v17554_v45 = vmax.f32 %v14849_v20, 0.0 }
 0x8e7   : > { %v15556_v61 = vsub.f32 %v5718_v16, %v5814_v30  ;;  %v6314_v35 = vmul.f32 %v10370_v52, %v6313_v14  ;;  %vm6319_vm7 = vweird.f32 %v10370_v52  ;;  %v5815_v48 = vmul.f32 %v5767_v21, %v11235_v49 }
 0x8e8   : > { %v15554_v41 = vsub.f32 %v17554_v45, %v5814_v30  ;;  %v17555_v53 = vmax.f32 %v14851_v32, 0.0  ;;  %v6307_v55 = vmul.f32 %v10368_v31, %v6306_v8  ;;  %v15563_v11 = vadd.f32 1e-05, %v6101_v27 }
 0x8e9   : > { %v6006_v20 = vmul.f32 %v15556_v61, %v15556_v61  ;;  %v6315_v16 = vmul.f32 0.5, %v6314_v35  ;;  %v17556_v14 = vmax.f32 %v14855_v44, 0.0  ;;  %v15576_v42 = vsub.f32 %v5719_v57, %v5815_v48  ;;  %7285 = vmatpush.bf16.msrb.mxu2 %v9754_v33  ;;  %v9747_v44 = vld [vmem:[%s17178_s9 + $0xf8] sm:$0xf0]  ;;  %v10089_v35 = vld [vmem:[%s17178_s9 + $0x174] sm:$0xf] }
 0x8ea   : > { %v5768_v50 = vadd.f32 %v5720_v39, %v17555_v53  ;;  %v5958_v34 = vmul.f32 %v15554_v41, %v15554_v41  ;;  %v15579_v21 = vsel %vm6310_vm8, %v10368_v31, %v6307_v55  ;;  %10373 = vrsqrt.f32 %v15563_v11 }
 0x8eb   : > { %v15574_v23 = vsub.f32 %v17556_v14, %v5815_v48  ;;  %v5721_v27 = vmax.f32 %v15561_v47, 0.0  ;;  %v6316_v31 = vsub.f32 1.5, %v6315_v16  ;;  %v6007_v45 = vmul.f32 %v15576_v42, %v15576_v42  ;;  %v9811_v47 = vld [vmem:[%s17178_s9 + $0x178] sm:$0xf0] }
 0x8ec   : > { %v5816_v30 = vmul.f32 %v5768_v50, %v11235_v49  ;;  %v6054_v8 = vadd.f32 %v6006_v20, %v5958_v34  ;;  %v10372_v57 = vpop.eup %10371  ;;  %v15591_v50 = vmul.f32 %v15579_v21, %v15368_v10  ;;  %vm6318_vm9 = vweird.f32 %v15484_v12  ;;  %7286 = vmatmul.bf16.vlgmr.msrb.gmra.mxu2 %v15291_v2 }
 0x8ed   : > { %v5959_v33 = vmul.f32 %v15574_v23, %v15574_v23  ;;  %v6323_v10 = vmul.f32 %v10372_v57, %v15542_v5  ;;  %v6317_v34 = vmul.f32 %v10370_v52, %v6316_v31  ;;  %v9750_v14 = vor.u32 %v10073_v51, %v9747_v44  ;;  %vm6320_vm10 = vmor %vm6318_vm9, %vm6319_vm7  ;;  %v5629_v51 = vpop.f32.mrf.mxu3  ;;  %v5453_v44 = vpop.f32.mrf.mxu1 }
 0x8ee   : > { %17557 = vst [vmem:[#allocation24_spill] sm:$0xff] %v15591_v50  ;;  %v6102_v48 = vmul.f32 %v6054_v8, %v11235_v49  ;;  %v15608_v55 = vsub.f32 %v17555_v53, %v5816_v30  ;;  %v15611_v16 = vsub.f32 %v5720_v39, %v5816_v30  ;;  %v9814_v8 = vor.u32 %v10089_v35, %v9811_v47 }
 0x8ef   : > { %v6055_v20 = vadd.f32 %v6007_v45, %v5959_v33  ;;  %v6324_v50 = vmul.f32 %v10372_v57, %v6323_v10  ;;  %v15618_v6 = vsel %vm6320_vm10, %v10370_v52, %v6317_v34  ;;  %7456 = vmatpush.bf16.msrb.mxu0 %v9750_v14  ;;  %v17558_v39 = vmax.f32 %v14857_v13, 0.0 }
 0x8f0   : > { %v15614_v40 = vadd.f32 1e-05, %v6102_v48  ;;  %v5960_v12 = vmul.f32 %v15608_v55, %v15608_v55  ;;  %v6008_v31 = vmul.f32 %v15611_v16, %v15611_v16  ;;  %v10374_v33 = vpop.eup %10373  ;;  %v15628_v10 = vmul.f32 %v15618_v6, %v15420_v58  ;;  %7545 = vmatpush.bf16.msrb.mxu1 %v9814_v8 }
 0x8f1   : > { %v6103_v32 = vmul.f32 %v6055_v20, %v11235_v49  ;;  %v5769_v30 = vadd.f32 %v5721_v27, %v17558_v39  ;;  %v6325_v52 = vmul.f32 0.5, %v6324_v50  ;;  %vm6329_vm11 = vweird.f32 %v10372_v57 }
 0x8f2   : > { %17559 = vst [vmem:[#allocation33_spill] sm:$0xff] %v15628_v10  ;;  %10375 = vrsqrt.f32 %v15614_v40  ;;  %v6333_v35 = vmul.f32 %v10374_v33, %v15563_v11  ;;  %v6056_v48 = vadd.f32 %v6008_v31, %v5960_v12  ;;  %v5722_v20 = vmax.f32 %v5629_v51, 0.0 }
 0x8f3   : > { %v15632_v47 = vadd.f32 1e-05, %v6103_v32  ;;  %v6326_v53 = vsub.f32 1.5, %v6325_v52  ;;  %v5817_v34 = vmul.f32 %v5769_v30, %v11235_v49  ;;  %v5723_v14 = vmax.f32 %v5453_v44, 0.0  ;;  %v15652_v52 = vpop.f32.mrf.mxu2 }
 0x8f4   : > { %vm6328_vm12 = vweird.f32 %v15542_v5  ;;  %v6334_v39 = vmul.f32 %v10374_v33, %v6333_v35  ;;  %v6104_v58 = vmul.f32 %v6056_v48, %v11235_v49  ;;  %v17560_v8 = vmax.f32 %v14857_v13, 0.0 }
 0x8f5   : > { %10377 = vrsqrt.f32 %v15632_v47  ;;  %v6327_v50 = vmul.f32 %v10372_v57, %v6326_v53  ;;  %v15642_v32 = vsub.f32 %v5721_v27, %v5817_v34  ;;  %v17561_v12 = vmax.f32 %v14874_v36, 0.0  ;;  %vm6330_vm13 = vmor %vm6328_vm12, %vm6329_vm11 }
 0x8f6   : > { %v15640_v45 = vsub.f32 %v17560_v8, %v5817_v34  ;;  %v6335_v30 = vmul.f32 0.5, %v6334_v39  ;;  %vm6338_vm14 = vweird.f32 %v15563_v11  ;;  %v15648_v5 = vadd.f32 1e-05, %v6104_v58 }
 0x8f7   : > { %v5770_v31 = vadd.f32 %v5722_v20, %v17561_v12  ;;  %v17562_v51 = vmax.f32 %v14859_v25, 0.0  ;;  %v15654_v35 = vsel %vm6330_vm13, %v10372_v57, %v6327_v50  ;;  %v6009_v48 = vmul.f32 %v15642_v32, %v15642_v32 }
 0x8f8   : > { %v10376_v13 = vpop.eup %10375  ;;  %v5961_v27 = vmul.f32 %v15640_v45, %v15640_v45  ;;  %v15663_v34 = vmul.f32 %v15654_v35, %v15482_v63  ;;  %v6336_v39 = vsub.f32 1.5, %v6335_v30  ;;  %vm6339_vm15 = vweird.f32 %v10374_v33 }
 0x8f9   : > { %v5771_v44 = vadd.f32 %v5723_v14, %v17562_v51  ;;  %v5818_v53 = vmul.f32 %v5770_v31, %v11235_v49  ;;  %v6343_v58 = vmul.f32 %v10376_v13, %v15614_v40  ;;  %10379 = vrsqrt.f32 %v15648_v5  ;;  %vm6340_vm0 = vmor %vm6338_vm14, %vm6339_vm15 }
 0x8fa   : > { %17563 = vst [vmem:[#allocation42_spill] sm:$0xff] %v15663_v34  ;;  %v6057_v57 = vadd.f32 %v6009_v48, %v5961_v27  ;;  %v17564_v50 = vmov %v17561_v12  ;;  %v5724_v12 = vmax.f32 %v15652_v52, 0.0  ;;  %v6337_v2 = vmul.f32 %v10374_v33, %v6336_v39 }
 0x8fb   : > { %v15669_v8 = vsub.f32 %v17564_v50, %v5818_v53  ;;  %v10378_v51 = vpop.eup %10377  ;;  %v6344_v31 = vmul.f32 %v10376_v13, %v6343_v58  ;;  %v15672_v10 = vsub.f32 %v5722_v20, %v5818_v53  ;;  %v5819_v63 = vmul.f32 %v5771_v44, %v11235_v49 }
 0x8fc   : > { %vm6349_vm1 = vweird.f32 %v10376_v13  ;;  %v6353_v30 = vmul.f32 %v10378_v51, %v15632_v47  ;;  %v6105_v27 = vmul.f32 %v6057_v57, %v11235_v49  ;;  %v15681_v48 = vsel %vm6340_vm0, %v10374_v33, %v6337_v2 }
 0x8fd   : > { %v5962_v36 = vmul.f32 %v15669_v8, %v15669_v8  ;;  %v6345_v52 = vmul.f32 0.5, %v6344_v31  ;;  %v6010_v20 = vmul.f32 %v15672_v10, %v15672_v10  ;;  %v17565_v53 = vmax.f32 %v14859_v25, 0.0  ;;  %v5631_v25 = vpop.f32.mrf.mxu3 }
 0x8fe   : > { %v15691_v11 = vmul.f32 %v15681_v48, %v15501_v56  ;;  %v6354_v39 = vmul.f32 %v10378_v51, %v6353_v30  ;;  %v15693_v58 = vadd.f32 1e-05, %v6105_v27  ;;  %v15695_v57 = vsub.f32 %v5723_v14, %v5819_v63 }
 0x8ff   : > { %v15687_v44 = vsub.f32 %v17565_v53, %v5819_v63  ;;  %v6346_v50 = vsub.f32 1.5, %v6345_v52  ;;  %v6058_v2 = vadd.f32 %v6010_v20, %v5962_v36  ;;  %v17567_v31 = vmax.f32 %v14876_v22, 0.0  ;;  %v10380_v53 = vpop.eup %10379 }
 0x900   : > { %17566 = vst [vmem:[#allocation19_spill] sm:$0xff] %v15691_v11  ;;  %vm6348_vm2 = vweird.f32 %v15614_v40  ;;  %v6355_v43 = vmul.f32 0.5, %v6354_v39  ;;  %10381 = vrsqrt.f32 %v15693_v58  ;;  %v6011_v56 = vmul.f32 %v15695_v57, %v15695_v57 }
 0x901   : > { %v5963_v33 = vmul.f32 %v15687_v44, %v15687_v44  ;;  %v5772_v34 = vadd.f32 %v5724_v12, %v17567_v31  ;;  %v6347_v14 = vmul.f32 %v10376_v13, %v6346_v50  ;;  %vm6359_vm3 = vweird.f32 %v10378_v51  ;;  %vm6350_vm4 = vmor %vm6348_vm2, %vm6349_vm1 }
 0x902   : > { %v6363_v63 = vmul.f32 %v10380_v53, %v15648_v5  ;;  %v6106_v30 = vmul.f32 %v6058_v2, %v11235_v49  ;;  %v6356_v27 = vsub.f32 1.5, %v6355_v43  ;;  %v5725_v20 = vmax.f32 %v5631_v25, 0.0 }
 0x903   : > { %v6059_v36 = vadd.f32 %v6011_v56, %v5963_v33  ;;  %v5820_v52 = vmul.f32 %v5772_v34, %v11235_v49  ;;  %v15709_v40 = vsel %vm6350_vm4, %v10376_v13, %v6347_v14  ;;  %vm6358_vm5 = vweird.f32 %v15632_v47 }
 0x904   : > { %v6364_v39 = vmul.f32 %v10380_v53, %v6363_v63  ;;  %v15712_v31 = vadd.f32 1e-05, %v6106_v30  ;;  %v15716_v50 = vmul.f32 %v15709_v40, %v15556_v61  ;;  %v6357_v11 = vmul.f32 %v10378_v51, %v6356_v27  ;;  %vm6360_vm6 = vmor %vm6358_vm5, %vm6359_vm3  ;;  %v5456_v30 = vpop.f32.mrf.mxu1 }
 0x905   : > { %v6107_v2 = vmul.f32 %v6059_v36, %v11235_v49  ;;  %v17569_v43 = vmax.f32 %v14876_v22, 0.0  ;;  %vm6368_vm7 = vweird.f32 %v15648_v5  ;;  %v15726_v47 = vsub.f32 %v5724_v12, %v5820_v52  ;;  %v17570_v22 = vld [vmem:[#allocation37_spill] sm:$0xff] }
 0x906   : > { %17568 = vst [vmem:[#allocation2_spill] sm:$0xff] %v15716_v50  ;;  %v6365_v13 = vmul.f32 0.5, %v6364_v39  ;;  %10383 = vrsqrt.f32 %v15712_v31  ;;  %v10382_v34 = vpop.eup %10381  ;;  %v15728_v25 = vsel %vm6360_vm6, %v10378_v51, %v6357_v11  ;;  %v17571_v14 = vmax.f32 %v17570_v22, 0.0  ;;  %v15769_v22 = vpop.f32.mrf.mxu2 }
 0x907   : > { %v15721_v33 = vsub.f32 %v17569_v43, %v5820_v52  ;;  %v15730_v61 = vadd.f32 1e-05, %v6107_v2  ;;  %v15738_v27 = vmul.f32 %v15728_v25, %v15576_v42  ;;  %vm6369_vm8 = vweird.f32 %v10380_v53 }
 0x908   : > { %v5773_v63 = vadd.f32 %v5725_v20, %v17571_v14  ;;  %v6366_v36 = vsub.f32 1.5, %v6365_v13  ;;  %v6373_v12 = vmul.f32 %v10382_v34, %v15693_v58  ;;  %v6012_v51 = vmul.f32 %v15726_v47, %v15726_v47  ;;  %vm6370_vm9 = vmor %vm6368_vm7, %vm6369_vm8 }
 0x909   : > { %v5964_v56 = vmul.f32 %v15721_v33, %v15721_v33  ;;  %17572 = vst [vmem:[#allocation8_spill] sm:$0xff] %v15738_v27  ;;  %10385 = vrsqrt.f32 %v15730_v61  ;;  %v6668_v52 = vmul.f32 %v15348_v7, %v15129_v28  ;;  %v6671_v42 = vmul.f32 %v15463_v4, %v15253_v18 }
 0x90a   : > { %v5821_v11 = vmul.f32 %v5773_v63, %v11235_v49  ;;  %v6367_v39 = vmul.f32 %v10380_v53, %v6366_v36  ;;  %v6374_v2 = vmul.f32 %v10382_v34, %v6373_v12  ;;  %v5726_v43 = vmax.f32 %v5456_v30, 0.0  ;;  %v17573_v12 = vld [vmem:[#allocation3_spill] sm:$0xff] }
 0x90b   : > { %vm6378_vm10 = vweird.f32 %v15693_v58  ;;  %v6060_v13 = vadd.f32 %v6012_v51, %v5964_v56  ;;  %v6761_v36 = vpack.c.bf16 %v6671_v42, %v6668_v52  ;;  %v17574_v18 = vmax.f32 %v17573_v12, 0.0 }
 0x90c   : > { %v15754_v27 = vsub.f32 %v17571_v14, %v5821_v11  ;;  %v15756_v63 = vsub.f32 %v5725_v20, %v5821_v11  ;;  %v10384_v50 = vpop.eup %10383  ;;  %v15758_v28 = vsel %vm6370_vm9, %v10380_v53, %v6367_v39  ;;  %v6375_v7 = vmul.f32 0.5, %v6374_v2  ;;  %v15771_v53 = vpop.f32.mrf.mxu3 }
 0x90d   : > { %v5774_v4 = vadd.f32 %v5726_v43, %v17574_v18  ;;  %v15764_v5 = vmul.f32 %v15758_v28, %v15611_v16  ;;  %vm6379_vm11 = vweird.f32 %v10382_v34  ;;  %v6383_v56 = vmul.f32 %v10384_v50, %v15712_v31  ;;  %7113 = vmatmul.bf16.gmra.mxu0 %v6761_v36  ;;  %7380 = vmatmul.bf16.gmra.mxu3 %v6761_v36 }
 0x90e   : > { %vm6388_vm12 = vweird.f32 %v15712_v31  ;;  %v6108_v20 = vmul.f32 %v6060_v13, %v11235_v49  ;;  %v6376_v30 = vsub.f32 1.5, %v6375_v7  ;;  %v5965_v51 = vmul.f32 %v15754_v27, %v15754_v27  ;;  %vm6380_vm15 = vmor %vm6378_vm10, %vm6379_vm11 }
 0x90f   : > { %17575 = vst [vmem:[#allocation9_spill] sm:$0xff] %v15764_v5  ;;  %v6013_v11 = vmul.f32 %v15756_v63, %v15756_v63  ;;  %v5822_v16 = vmul.f32 %v5774_v4, %v11235_v49  ;;  %v10386_v52 = vpop.eup %10385  ;;  %v6384_v39 = vmul.f32 %v10384_v50, %v6383_v56  ;;  %v6669_v42 = vmul.f32 %v15399_v38, %v15199_v19 }
 0x910   : > { %v15778_v2 = vadd.f32 1e-05, %v6108_v20  ;;  %v6672_v13 = vmul.f32 %v15504_v15, %v15299_v26  ;;  %v6377_v14 = vmul.f32 %v10382_v34, %v6376_v30  ;;  %vm6389_vm13 = vweird.f32 %v10384_v50  ;;  %v5458_v30 = vpop.f32.mrf.mxu1 }
 0x911   : > { %v6393_v7 = vmul.f32 %v10386_v52, %v15730_v61  ;;  %vm6398_vm14 = vweird.f32 %v15730_v61  ;;  %v6061_v18 = vadd.f32 %v6013_v11, %v5965_v51  ;;  %v6385_v36 = vmul.f32 0.5, %v6384_v39  ;;  %vm6390_vm0 = vmor %vm6388_vm12, %vm6389_vm13 }
 0x912   : > { %10387 = vrsqrt.f32 %v15778_v2  ;;  %v17576_v4 = vmax.f32 %v17573_v12, 0.0  ;;  %v6670_v26 = vmul.f32 %v15437_v9, %v15239_v0  ;;  %v15796_v38 = vsel %vm6380_vm15, %v10382_v34, %v6377_v14 }
 0x913   : > { %v6394_v15 = vmul.f32 %v10386_v52, %v6393_v7  ;;  %v6109_v56 = vmul.f32 %v6061_v18, %v11235_v49  ;;  %v15799_v20 = vsub.f32 %v5726_v43, %v5822_v16  ;;  %v15803_v58 = vmul.f32 %v15796_v38, %v15642_v32 }
 0x914   : > { %v15792_v19 = vsub.f32 %v17576_v4, %v5822_v16  ;;  %v6386_v51 = vsub.f32 1.5, %v6385_v36  ;;  %v15807_v11 = vpack.c.bf16 %v6672_v13, %v6669_v42  ;;  %v6673_v34 = vmul.f32 %v15524_v60, %v15305_v29  ;;  %v17580_v60 = vld [vmem:[#allocation39_spill] sm:$0xff]  ;;  %v17582_v4 = vld [vmem:[#allocation14_spill] sm:$0xff]  ;;  %v15832_v31 = vpop.f32.mrf.mxu3 }
 0x915   : > { %17577 = vst [vmem:[#allocation44_spill] sm:$0xff] %v15803_v58  ;;  %v6395_v39 = vmul.f32 0.5, %v6394_v15  ;;  %v15809_v0 = vadd.f32 1e-05, %v6109_v56  ;;  %v6014_v9 = vmul.f32 %v15799_v20, %v15799_v20  ;;  %v5727_v32 = vmax.f32 %v15769_v22, 0.0  ;;  %v15830_v56 = vpop.f32.mrf.mxu2 }
 0x916   : > { %v5966_v12 = vmul.f32 %v15792_v19, %v15792_v19  ;;  %17578 = vst [vmem:[#allocation27_spill] sm:$0xff] %v15807_v11  ;;  %v6387_v43 = vmul.f32 %v10384_v50, %v6386_v51  ;;  %7202 = vmatmul.bf16.gmra.mxu1 %v15807_v11  ;;  %v5728_v16 = vmax.f32 %v15771_v53, 0.0  ;;  %v5729_v14 = vmax.f32 %v5458_v30, 0.0 }
 0x917   : > { %v6396_v42 = vsub.f32 1.5, %v6395_v39  ;;  %vm6399_vm1 = vweird.f32 %v10386_v52  ;;  %10389 = vrsqrt.f32 %v15809_v0  ;;  %v15824_v29 = vpack.c.bf16 %v6673_v34, %v6670_v26 }
 0x918   : > { %v6062_v13 = vadd.f32 %v6014_v9, %v5966_v12  ;;  %v10388_v7 = vpop.eup %10387  ;;  %v15822_v18 = vsel %vm6390_vm0, %v10384_v50, %v6387_v43  ;;  %v17581_v36 = vmax.f32 %v17580_v60, 0.0  ;;  %v17583_v53 = vmax.f32 %v17582_v4, 0.0  ;;  %vm6400_vm3 = vmor %vm6398_vm14, %vm6399_vm1  ;;  %v17585_v9 = vld [vmem:[#allocation46_spill] sm:$0xff] }
 0x919   : > { %17579 = vst [vmem:[#allocation43_spill] sm:$0xff] %v15824_v29  ;;  %v15836_v30 = vmul.f32 %v15822_v18, %v15672_v10  ;;  %v6397_v51 = vmul.f32 %v10386_v52, %v6396_v42  ;;  %v6403_v50 = vmul.f32 %v10388_v7, %v15778_v2  ;;  %vm6408_vm2 = vweird.f32 %v15778_v2  ;;  %7291 = vmatmul.bf16.gmra.mxu2 %v15824_v29 }
 0x91a   : > { %v5775_v22 = vadd.f32 %v5727_v32, %v17581_v36  ;;  %v5776_v15 = vadd.f32 %v5728_v16, %v17583_v53  ;;  %v6110_v26 = vmul.f32 %v6062_v13, %v11235_v49  ;;  %v17586_v34 = vmax.f32 %v17585_v9, 0.0 }
 0x91b   : > { %17584 = vst [vmem:[#allocation45_spill] sm:$0xff] %v15836_v30  ;;  %v15848_v43 = vsel %vm6400_vm3, %v10386_v52, %v6397_v51  ;;  %v6404_v42 = vmul.f32 %v10388_v7, %v6403_v50  ;;  %v5730_v36 = vmax.f32 %v15830_v56, 0.0  ;;  %v17589_v51 = vmov %v17583_v53 }
 0x91c   : > { %v5823_v12 = vmul.f32 %v5775_v22, %v11235_v49  ;;  %v5824_v39 = vmul.f32 %v5776_v15, %v11235_v49  ;;  %v5777_v10 = vadd.f32 %v5729_v14, %v17586_v34  ;;  %v15854_v61 = vmul.f32 %v15848_v43, %v15695_v57 }
 0x91d   : > { %v15856_v13 = vadd.f32 1e-05, %v6110_v26  ;;  %v17588_v22 = vmax.f32 %v17580_v60, 0.0  ;;  %v10390_v34 = vpop.eup %10389  ;;  %v6405_v52 = vmul.f32 0.5, %v6404_v42  ;;  %vm6409_vm4 = vweird.f32 %v10388_v7 }
 0x91e   : > { %17587 = vst [vmem:[#allocation30_spill] sm:$0xff] %v15854_v61  ;;  %v15862_v15 = vsub.f32 %v5727_v32, %v5823_v12  ;;  %v15866_v50 = vsub.f32 %v17589_v51, %v5824_v39  ;;  %v15868_v56 = vsub.f32 %v5728_v16, %v5824_v39  ;;  %v5825_v53 = vmul.f32 %v5777_v10, %v11235_v49  ;;  %vm6410_vm6 = vmor %vm6408_vm2, %vm6409_vm4 }
 0x91f   : > { %v15860_v29 = vsub.f32 %v17588_v22, %v5823_v12  ;;  %v6413_v57 = vmul.f32 %v10390_v34, %v15809_v0  ;;  %vm6418_vm5 = vweird.f32 %v15809_v0  ;;  %10391 = vrsqrt.f32 %v15856_v13 }
 0x920   : > { %v6406_v60 = vsub.f32 1.5, %v6405_v52  ;;  %v6015_v4 = vmul.f32 %v15862_v15, %v15862_v15  ;;  %v5968_v16 = vmul.f32 %v15866_v50, %v15866_v50  ;;  %v6016_v12 = vmul.f32 %v15868_v56, %v15868_v56 }
 0x921   : > { %v5967_v32 = vmul.f32 %v15860_v29, %v15860_v29  ;;  %v6414_v26 = vmul.f32 %v10390_v34, %v6413_v57  ;;  %v17590_v39 = vmax.f32 %v17585_v9, 0.0  ;;  %v15886_v42 = vsub.f32 %v5729_v14, %v5825_v53 }
 0x922   : > { %v6407_v22 = vmul.f32 %v10388_v7, %v6406_v60  ;;  %v17591_v51 = vmax.f32 %v14891_v62, 0.0  ;;  %v17592_v30 = vmax.f32 %v14897_v37, 0.0  ;;  %v17593_v58 = vmax.f32 %v15832_v31, 0.0 }
 0x923   : > { %v15884_v10 = vsub.f32 %v17590_v39, %v5825_v53  ;;  %v6063_v52 = vadd.f32 %v6015_v4, %v5967_v32  ;;  %v6415_v57 = vmul.f32 0.5, %v6414_v26  ;;  %v6064_v9 = vadd.f32 %v6016_v12, %v5968_v16 }
 0x924   : > { %v5778_v11 = vadd.f32 %v5730_v36, %v17591_v51  ;;  %v5779_v61 = vadd.f32 %v17593_v58, %v17592_v30  ;;  %v6017_v53 = vmul.f32 %v15886_v42, %v15886_v42  ;;  %v15901_v60 = vsel %vm6410_vm6, %v10388_v7, %v6407_v22 }
 0x925   : > { %v5969_v14 = vmul.f32 %v15884_v10, %v15884_v10  ;;  %vm6419_vm7 = vweird.f32 %v10390_v34  ;;  %v6111_v32 = vmul.f32 %v6063_v52, %v11235_v49  ;;  %v10392_v58 = vpop.eup %10391  ;;  %v15907_v2 = vmul.f32 %v15901_v60, %v15726_v47 }
 0x926   : > { %v5826_v4 = vmul.f32 %v5778_v11, %v11235_v49  ;;  %v6416_v30 = vsub.f32 1.5, %v6415_v57  ;;  %v6112_v16 = vmul.f32 %v6064_v9, %v11235_v49  ;;  %v6423_v12 = vmul.f32 %v10392_v58, %v15856_v13  ;;  %v17596_v57 = vld [vmem:[#allocation47_spill] sm:$0xff]  ;;  %vm6420_vm8 = vmor %vm6418_vm5, %vm6419_vm7 }
 0x927   : > { %17594 = vst [vmem:[#allocation17_spill] sm:$0xff] %v15907_v2  ;;  %v6065_v26 = vadd.f32 %v6017_v53, %v5969_v14  ;;  %v15911_v39 = vadd.f32 1e-05, %v6111_v32  ;;  %v17595_v7 = vmov %v17591_v51  ;;  %v5827_v52 = vmul.f32 %v5779_v61, %v11235_v49  ;;  %v17597_v61 = vld [vmem:[#allocation11_spill] sm:$0xff]  ;;  %v10087_v53 = vld [vmem:[%s17178_s9 + $0x164] sm:$0xf] }
 0x928   : > { %v15915_v22 = vsub.f32 %v17595_v7, %v5826_v4  ;;  %v6417_v11 = vmul.f32 %v10390_v34, %v6416_v30  ;;  %v15918_v51 = vadd.f32 1e-05, %v6112_v16  ;;  %v15921_v2 = vsub.f32 %v5730_v36, %v5826_v4 }
 0x929   : > { %v6113_v47 = vmul.f32 %v6065_v26, %v11235_v49  ;;  %v6424_v14 = vmul.f32 %v10392_v58, %v6423_v12  ;;  %10393 = vrsqrt.f32 %v15911_v39  ;;  %v17599_v16 = vmax.f32 %v14897_v37, 0.0  ;;  %v5461_v12 = vpop.f32.mrf.mxu1 }
 0x92a   : > { %v5970_v62 = vmul.f32 %v15915_v22, %v15915_v22  ;;  %v15931_v32 = vsel %vm6420_vm8, %v10390_v34, %v6417_v11  ;;  %10395 = vrsqrt.f32 %v15918_v51  ;;  %v6018_v30 = vmul.f32 %v15921_v2, %v15921_v2 }
 0x92b   : > { %v15934_v36 = vadd.f32 1e-05, %v6113_v47  ;;  %v15938_v4 = vmul.f32 %v15931_v32, %v15756_v63  ;;  %v6425_v0 = vmul.f32 0.5, %v6424_v14  ;;  %v15944_v26 = vsub.f32 %v17599_v16, %v5827_v52  ;;  %v17601_v16 = vld [vmem:[#allocation22_spill] sm:$0xff] }
 0x92c   : > { %vm6429_vm9 = vweird.f32 %v10392_v58  ;;  %v17600_v34 = vmax.f32 %v15832_v31, 0.0  ;;  %v6674_v63 = vmul.f32 %v15579_v21, %v15364_v54  ;;  %v6066_v47 = vadd.f32 %v6018_v30, %v5970_v62 }
 0x92d   : > { %17598 = vst [vmem:[#allocation37_spill] sm:$0xff] %v15938_v4  ;;  %10397 = vrsqrt.f32 %v15934_v36  ;;  %v6426_v11 = vsub.f32 1.5, %v6425_v0  ;;  %v5971_v14 = vmul.f32 %v15944_v26, %v15944_v26  ;;  %v6677_v37 = vmul.f32 %v15681_v48, %v15495_v3 }
 0x92e   : > { %v15949_v7 = vsub.f32 %v17600_v34, %v5827_v52  ;;  %vm6428_vm10 = vweird.f32 %v15856_v13  ;;  %v5732_v52 = vmax.f32 %v5461_v12, 0.0  ;;  %v6114_v54 = vmul.f32 %v6066_v47, %v11235_v49 }
 0x92f   : > { %v15961_v34 = vpop.eup %10393  ;;  %v6427_v9 = vmul.f32 %v10392_v58, %v6426_v11  ;;  %v6764_v21 = vpack.c.bf16 %v6677_v37, %v6674_v63  ;;  %v6675_v62 = vmul.f32 %v15618_v6, %v15415_v59  ;;  %vm6430_vm11 = vmor %vm6428_vm10, %vm6429_vm9  ;;  %vm6438_vm12 = vweird.f32 %v15911_v39 }
 0x930   : > { %v6019_v31 = vmul.f32 %v15949_v7, %v15949_v7  ;;  %v15966_v0 = vpop.eup %10395  ;;  %v6433_v3 = vmul.f32 %v15961_v34, %v15911_v39  ;;  %v17602_v13 = vmax.f32 %v14893_v17, 0.0  ;;  %v6678_v12 = vmul.f32 %v15709_v40, %v15554_v41 }
 0x931   : > { %v15976_v63 = vsel %vm6430_vm11, %v10392_v58, %v6427_v9  ;;  %v6443_v6 = vmul.f32 %v15966_v0, %v15918_v51  ;;  %vm6448_vm13 = vweird.f32 %v15918_v51  ;;  %v15981_v59 = vadd.f32 1e-05, %v6114_v54  ;;  %7118 = vmatmul.bf16.gmra.mxu0 %v6764_v21  ;;  %7385 = vmatmul.bf16.gmra.mxu3 %v6764_v21  ;;  %v10071_v9 = vld [vmem:[%s17178_s9 + $0xe4] sm:$0xf] }
 0x932   : > { %v6067_v48 = vadd.f32 %v6019_v31, %v5971_v14  ;;  %v5780_v30 = vadd.f32 %v5732_v52, %v17602_v13  ;;  %v6676_v11 = vmul.f32 %v15654_v35, %v15480_v46  ;;  %v15989_v14 = vmul.f32 %v15976_v63, %v15799_v20  ;;  %v9739_v46 = vld [vmem:[%s17178_s9 + $0xe8] sm:$0xf0] }
 0x933   : > { %v15985_v47 = vpop.eup %10397  ;;  %v6434_v41 = vmul.f32 %v15961_v34, %v6433_v3  ;;  %vm6439_vm14 = vweird.f32 %v15961_v34  ;;  %v6444_v35 = vmul.f32 %v15966_v0, %v6443_v6  ;;  %vm6458_vm15 = vweird.f32 %v15934_v36  ;;  %v5550_v3 = vpop.f32.mrf.mxu2 }
 0x934   : > { %17603 = vst [vmem:[#allocation3_spill] sm:$0xff] %v15989_v14  ;;  %v6115_v40 = vmul.f32 %v6067_v48, %v11235_v49  ;;  %v5828_v58 = vmul.f32 %v5780_v30, %v11235_v49  ;;  %v6453_v20 = vmul.f32 %v15985_v47, %v15934_v36  ;;  %10399 = vrsqrt.f32 %v15981_v59  ;;  %vm6440_vm2 = vmor %vm6438_vm12, %vm6439_vm14 }
 0x935   : > { %v6435_v37 = vmul.f32 0.5, %v6434_v41  ;;  %vm6449_vm0 = vweird.f32 %v15966_v0  ;;  %v17604_v54 = vmov %v17602_v13  ;;  %v6445_v48 = vmul.f32 0.5, %v6444_v35  ;;  %v9803_v41 = vld [vmem:[%s17178_s9 + $0x168] sm:$0xf0]  ;;  %v5639_v35 = vpop.f32.mrf.mxu3 }
 0x936   : > { %v16007_v31 = vadd.f32 1e-05, %v6115_v40  ;;  %v16011_v21 = vsub.f32 %v17604_v54, %v5828_v58  ;;  %v6454_v13 = vmul.f32 %v15985_v47, %v6453_v20  ;;  %v16014_v30 = vsub.f32 %v5732_v52, %v5828_v58  ;;  %vm6450_vm3 = vmor %vm6448_vm13, %vm6449_vm0 }
 0x937   : > { %v9742_v6 = vor.u32 %v10071_v9, %v9739_v46  ;;  %v6436_v40 = vsub.f32 1.5, %v6435_v37  ;;  %vm6459_vm1 = vweird.f32 %v15985_v47  ;;  %v6446_v52 = vsub.f32 1.5, %v6445_v48 }
 0x938   : > { %10401 = vrsqrt.f32 %v16007_v31  ;;  %v5972_v17 = vmul.f32 %v16011_v21, %v16011_v21  ;;  %v6455_v58 = vmul.f32 0.5, %v6454_v13  ;;  %v6020_v9 = vmul.f32 %v16014_v30, %v16014_v30  ;;  %vm6460_vm5 = vmor %vm6458_vm15, %vm6459_vm1 }
 0x939   : > { %7457 = vmatpush.bf16.msrb.mxu0 %v9742_v6  ;;  %v16028_v46 = vpack.c.bf16 %v6678_v12, %v6675_v62  ;;  %v6437_v20 = vmul.f32 %v15961_v34, %v6436_v40  ;;  %v6679_v37 = vmul.f32 %v15728_v25, %v15574_v23  ;;  %v9806_v54 = vor.u32 %v10087_v53, %v9803_v41  ;;  %v17610_v41 = vld [vmem:[#allocation7_spill] sm:$0xff] }
 0x93a   : > { %v5733_v14 = vmax.f32 %v5550_v3, 0.0  ;;  %v10400_v4 = vpop.eup %10399  ;;  %v6447_v48 = vmul.f32 %v15966_v0, %v6446_v52  ;;  %v6456_v13 = vsub.f32 1.5, %v6455_v58  ;;  %v6068_v5 = vadd.f32 %v6020_v9, %v5972_v17 }
 0x93b   : > { %17605 = vst [vmem:[#allocation39_spill] sm:$0xff] %v16028_v46  ;;  %7207 = vmatmul.bf16.gmra.mxu1 %v16028_v46  ;;  %v5734_v62 = vmax.f32 %v5639_v35, 0.0  ;;  %v16040_v12 = vsel %vm6440_vm2, %v15961_v34, %v6437_v20  ;;  %v6463_v23 = vmul.f32 %v10400_v4, %v15981_v59  ;;  %vm6468_vm4 = vweird.f32 %v15981_v59 }
 0x93c   : > { %v16048_v25 = vpack.c.bf16 %v6679_v37, %v6676_v11  ;;  %7546 = vmatpush.bf16.msrb.mxu1 %v9806_v54  ;;  %v16052_v39 = vmul.f32 %v16040_v12, %v15862_v15  ;;  %v16055_v53 = vsel %vm6450_vm3, %v15966_v0, %v6447_v48  ;;  %v6457_v34 = vmul.f32 %v15985_v47, %v6456_v13  ;;  %v5552_v37 = vpop.f32.mrf.mxu2 }
 0x93d   : > { %v6116_v3 = vmul.f32 %v6068_v5, %v11235_v49  ;;  %v16061_v6 = vmul.f32 %v16055_v53, %v15868_v56  ;;  %v6464_v11 = vmul.f32 %v10400_v4, %v6463_v23  ;;  %v17609_v15 = vmax.f32 %v14899_v1, 0.0  ;;  %v5463_v5 = vpop.f32.mrf.mxu1 }
 0x93e   : > { %17606 = vst [vmem:[#allocation14_spill] sm:$0xff] %v16048_v25  ;;  %v10402_v51 = vpop.eup %10401  ;;  %7296 = vmatmul.bf16.gmra.mxu2 %v16048_v25  ;;  %v17611_v40 = vmax.f32 %v17610_v41, 0.0  ;;  %v16073_v35 = vsel %vm6460_vm5, %v15985_v47, %v6457_v34  ;;  %vm6469_vm6 = vweird.f32 %v10400_v4  ;;  %v5735_v47 = vmax.f32 %v5463_v5, 0.0  ;;  %v5641_v25 = vpop.f32.mrf.mxu3 }
 0x93f   : > { %17607 = vst [vmem:[#allocation46_spill] sm:$0xff] %v16052_v39  ;;  %v5781_v0 = vadd.f32 %v5733_v14, %v17609_v15  ;;  %v6473_v56 = vmul.f32 %v10402_v51, %v16007_v31  ;;  %v16076_v52 = vadd.f32 1e-05, %v6116_v3  ;;  %v16080_v36 = vmul.f32 %v16073_v35, %v15886_v42  ;;  %vm6470_vm8 = vmor %vm6468_vm4, %vm6469_vm6 }
 0x940   : > { %17608 = vst [vmem:[#allocation47_spill] sm:$0xff] %v16061_v6  ;;  %v5782_v17 = vadd.f32 %v5734_v62, %v17611_v40  ;;  %v6465_v58 = vmul.f32 0.5, %v6464_v11  ;;  %vm6479_vm7 = vweird.f32 %v10402_v51  ;;  %v17612_v13 = vmov %v17609_v15 }
 0x941   : > { %v5829_v9 = vmul.f32 %v5781_v0, %v11235_v49  ;;  %v6474_v54 = vmul.f32 %v10402_v51, %v6473_v56  ;;  %10403 = vrsqrt.f32 %v16076_v52  ;;  %v17613_v42 = vmov %v17611_v40  ;;  %v17614_v0 = vld [vmem:[#allocation4_spill] sm:$0xff] }
 0x942   : > { %v5830_v20 = vmul.f32 %v5782_v17, %v11235_v49  ;;  %v6466_v48 = vsub.f32 1.5, %v6465_v58  ;;  %v17615_v40 = vmax.f32 %v17614_v0, 0.0  ;;  %v5736_v56 = vmax.f32 %v5552_v37, 0.0 }
 0x943   : > { %v16087_v23 = vsub.f32 %v17612_v13, %v5829_v9  ;;  %v16089_v34 = vsub.f32 %v5733_v14, %v5829_v9  ;;  %v6475_v11 = vmul.f32 0.5, %v6474_v54  ;;  %vm6478_vm9 = vweird.f32 %v16007_v31 }
 0x944   : > { %v16093_v3 = vsub.f32 %v17613_v42, %v5830_v20  ;;  %v16095_v15 = vsub.f32 %v5734_v62, %v5830_v20  ;;  %v5783_v17 = vadd.f32 %v5735_v47, %v17615_v40  ;;  %v6467_v5 = vmul.f32 %v10400_v4, %v6466_v48  ;;  %v17616_v20 = vld [vmem:[#allocation35_spill] sm:$0xff]  ;;  %vm6480_vm10 = vmor %vm6478_vm9, %vm6479_vm7 }
 0x945   : > { %v5973_v1 = vmul.f32 %v16087_v23, %v16087_v23  ;;  %v6021_v14 = vmul.f32 %v16089_v34, %v16089_v34  ;;  %v6476_v62 = vsub.f32 1.5, %v6475_v11  ;;  %v17617_v37 = vmax.f32 %v17616_v20, 0.0 }
 0x946   : > { %v5974_v41 = vmul.f32 %v16093_v3, %v16093_v3  ;;  %v6022_v58 = vmul.f32 %v16095_v15, %v16095_v15  ;;  %v5831_v9 = vmul.f32 %v5783_v17, %v11235_v49  ;;  %v16113_v48 = vsel %vm6470_vm8, %v10400_v4, %v6467_v5 }
 0x947   : > { %v5784_v54 = vadd.f32 %v5736_v56, %v17617_v37  ;;  %v6069_v13 = vadd.f32 %v6021_v14, %v5973_v1  ;;  %v5737_v42 = vmax.f32 %v5641_v25, 0.0  ;;  %v10404_v40 = vpop.eup %10403  ;;  %v16118_v59 = vmul.f32 %v16113_v48, %v15921_v2 }
 0x948   : > { %v6477_v11 = vmul.f32 %v10402_v51, %v6476_v62  ;;  %v6070_v46 = vadd.f32 %v6022_v58, %v5974_v41  ;;  %v17618_v6 = vmax.f32 %v17614_v0, 0.0  ;;  %v6483_v4 = vmul.f32 %v10404_v40, %v16076_v52  ;;  %v17621_v58 = vld [vmem:[#allocation13_spill] sm:$0xff] }
 0x949   : > { %vm6488_vm11 = vweird.f32 %v16076_v52  ;;  %v6117_v31 = vmul.f32 %v6069_v13, %v11235_v49  ;;  %v16128_v25 = vsub.f32 %v5735_v47, %v5831_v9  ;;  %v6680_v13 = vmul.f32 %v15758_v28, %v15608_v55 }
 0x94a   : > { %v16122_v39 = vsub.f32 %v17618_v6, %v5831_v9  ;;  %v16130_v17 = vsel %vm6480_vm10, %v10402_v51, %v6477_v11  ;;  %v6118_v2 = vmul.f32 %v6070_v46, %v11235_v49  ;;  %v5832_v6 = vmul.f32 %v5784_v54, %v11235_v49  ;;  %v5466_v11 = vpop.f32.mrf.mxu1 }
 0x94b   : > { %v16138_v0 = vmul.f32 %v16130_v17, %v15949_v7  ;;  %v6484_v1 = vmul.f32 %v10404_v40, %v6483_v4  ;;  %v16140_v14 = vadd.f32 1e-05, %v6117_v31  ;;  %v6023_v47 = vmul.f32 %v16128_v25, %v16128_v25 }
 0x94c   : > { %v5975_v5 = vmul.f32 %v16122_v39, %v16122_v39  ;;  %v16144_v41 = vadd.f32 1e-05, %v6118_v2  ;;  %v17620_v51 = vmov %v17617_v37  ;;  %v16150_v62 = vsub.f32 %v5736_v56, %v5832_v6 }
 0x94d   : > { %17619 = vst [vmem:[#allocation11_spill] sm:$0xff] %v16138_v0  ;;  %v16148_v46 = vsub.f32 %v17620_v51, %v5832_v6  ;;  %v17622_v9 = vmax.f32 %v17621_v58, 0.0  ;;  %v6485_v54 = vmul.f32 0.5, %v6484_v1  ;;  %10405 = vrsqrt.f32 %v16140_v14 }
 0x94e   : > { %v6071_v7 = vadd.f32 %v6023_v47, %v5975_v5  ;;  %vm6489_vm12 = vweird.f32 %v10404_v40  ;;  %10407 = vrsqrt.f32 %v16144_v41  ;;  %v6024_v56 = vmul.f32 %v16150_v62, %v16150_v62 }
 0x94f   : > { %v5785_v37 = vadd.f32 %v5737_v42, %v17622_v9  ;;  %v5976_v20 = vmul.f32 %v16148_v46, %v16148_v46  ;;  %v6486_v4 = vsub.f32 1.5, %v6485_v54  ;;  %v6683_v5 = vmul.f32 %v15848_v43, %v15687_v44  ;;  %vm6490_vm13 = vmor %vm6488_vm11, %vm6489_vm12 }
 0x950   : > { %v6119_v31 = vmul.f32 %v6071_v7, %v11235_v49  ;;  %v5738_v55 = vmax.f32 %v5466_v11, 0.0  ;;  %v6681_v28 = vmul.f32 %v15796_v38, %v15640_v45  ;;  %v6684_v1 = vmul.f32 %v15901_v60, %v15721_v33  ;;  %v17623_v45 = vld [vmem:[#allocation32_spill] sm:$0xff]  ;;  %v17626_v11 = vld [vmem:[#allocation18_spill] sm:$0xff] }
 0x951   : > { %v5833_v2 = vmul.f32 %v5785_v37, %v11235_v49  ;;  %v6072_v6 = vadd.f32 %v6024_v56, %v5976_v20  ;;  %v6487_v47 = vmul.f32 %v10404_v40, %v6486_v4  ;;  %v6767_v43 = vpack.c.bf16 %v6683_v5, %v6680_v13  ;;  %v16206_v5 = vpop.f32.mrf.mxu3 }
 0x952   : > { %v16170_v51 = vadd.f32 1e-05, %v6119_v31  ;;  %v17624_v38 = vmax.f32 %v17623_v45, 0.0  ;;  %v16184_v33 = vpack.c.bf16 %v6684_v1, %v6681_v28  ;;  %vm6498_vm14 = vweird.f32 %v16140_v14 }
 0x953   : > { %v16174_v54 = vsub.f32 %v17622_v9, %v5833_v2  ;;  %v16176_v7 = vsub.f32 %v5737_v42, %v5833_v2  ;;  %v6120_v44 = vmul.f32 %v6072_v6, %v11235_v49  ;;  %v10406_v60 = vpop.eup %10405  ;;  %v16187_v58 = vsel %vm6490_vm13, %v10404_v40, %v6487_v47  ;;  %7123 = vmatmul.bf16.gmra.mxu0 %v6767_v43 }
 0x954   : > { %v5786_v37 = vadd.f32 %v5738_v55, %v17624_v38  ;;  %17625 = vst [vmem:[#allocation22_spill] sm:$0xff] %v16184_v33  ;;  %10409 = vrsqrt.f32 %v16170_v51  ;;  %v10408_v52 = vpop.eup %10407  ;;  %v16194_v56 = vmul.f32 %v16187_v58, %v16014_v30  ;;  %v6493_v13 = vmul.f32 %v10406_v60, %v16140_v14  ;;  %7390 = vmatmul.bf16.gmra.mxu3 %v6767_v43  ;;  %v5555_v30 = vpop.f32.mrf.mxu2 }
 0x955   : > { %v5977_v42 = vmul.f32 %v16174_v54, %v16174_v54  ;;  %v16198_v4 = vadd.f32 1e-05, %v6120_v44  ;;  %v6503_v40 = vmul.f32 %v10408_v52, %v16144_v41  ;;  %vm6508_vm15 = vweird.f32 %v16144_v41  ;;  %7212 = vmatmul.bf16.gmra.mxu1 %v16184_v33 }
 0x956   : > { %17627 = vst [vmem:[#allocation7_spill] sm:$0xff] %v16194_v56  ;;  %v6025_v31 = vmul.f32 %v16176_v7, %v16176_v7  ;;  %v5834_v2 = vmul.f32 %v5786_v37, %v11235_v49  ;;  %v6494_v6 = vmul.f32 %v10406_v60, %v6493_v13  ;;  %vm6499_vm0 = vweird.f32 %v10406_v60 }
 0x957   : > { %10411 = vrsqrt.f32 %v16198_v4  ;;  %v6682_v28 = vmul.f32 %v15822_v18, %v15669_v8  ;;  %v6504_v1 = vmul.f32 %v10408_v52, %v6503_v40  ;;  %v17628_v9 = vmov %v17624_v38  ;;  %vm6500_vm3 = vmor %vm6498_vm14, %vm6499_vm0 }
 0x958   : > { %v6073_v47 = vadd.f32 %v6025_v31, %v5977_v42  ;;  %v16213_v44 = vsub.f32 %v17628_v9, %v5834_v2  ;;  %v16215_v43 = vsub.f32 %v5738_v55, %v5834_v2  ;;  %v6495_v38 = vmul.f32 0.5, %v6494_v6  ;;  %v17630_v31 = vld [vmem:[#allocation6_spill] sm:$0xff] }
 0x959   : > { %v6685_v37 = vmul.f32 %v15931_v32, %v15754_v27  ;;  %v5739_v20 = vmax.f32 %v5555_v30, 0.0  ;;  %v5740_v13 = vmax.f32 %v16206_v5, 0.0  ;;  %v6505_v56 = vmul.f32 0.5, %v6504_v1  ;;  %v16232_v5 = vpop.f32.mrf.mxu1 }
 0x95a   : > { %v10410_v33 = vpop.eup %10409  ;;  %v6121_v0 = vmul.f32 %v6073_v47, %v11235_v49  ;;  %v5978_v8 = vmul.f32 %v16213_v44, %v16213_v44  ;;  %v6026_v18 = vmul.f32 %v16215_v43, %v16215_v43  ;;  %v6496_v45 = vsub.f32 1.5, %v6495_v38 }
 0x95b   : > { %vm6509_vm1 = vweird.f32 %v10408_v52  ;;  %v6513_v55 = vmul.f32 %v10410_v33, %v16170_v51  ;;  %v16226_v42 = vpack.c.bf16 %v6685_v37, %v6682_v28  ;;  %v6506_v27 = vsub.f32 1.5, %v6505_v56 }
 0x95c   : > { %v16228_v32 = vadd.f32 1e-05, %v6121_v0  ;;  %v6074_v40 = vadd.f32 %v6026_v18, %v5978_v8  ;;  %v17631_v2 = vmax.f32 %v17630_v31, 0.0  ;;  %v6497_v1 = vmul.f32 %v10406_v60, %v6496_v45  ;;  %vm6510_vm5 = vmor %vm6508_vm15, %vm6509_vm1 }
 0x95d   : > { %17629 = vst [vmem:[#allocation4_spill] sm:$0xff] %v16226_v42  ;;  %v10412_v6 = vpop.eup %10411  ;;  %v6514_v47 = vmul.f32 %v10410_v33, %v6513_v55  ;;  %vm6518_vm2 = vweird.f32 %v16170_v51  ;;  %7301 = vmatmul.bf16.gmra.mxu2 %v16226_v42  ;;  %v17632_v9 = vmax.f32 %v14931_v24, 0.0  ;;  %v6507_v0 = vmul.f32 %v10408_v52, %v6506_v27  ;;  %v5557_v24 = vpop.f32.mrf.mxu2 }
 0x95e   : > { %v5787_v30 = vadd.f32 %v5739_v20, %v17631_v2  ;;  %vm6519_vm4 = vweird.f32 %v10410_v33  ;;  %v6523_v56 = vmul.f32 %v10412_v6, %v16198_v4  ;;  %10413 = vrsqrt.f32 %v16228_v32 }
 0x95f   : > { %v5788_v28 = vadd.f32 %v5740_v13, %v17632_v9  ;;  %v16243_v38 = vsel %vm6500_vm3, %v10406_v60, %v6497_v1  ;;  %v6515_v37 = vmul.f32 0.5, %v6514_v47  ;;  %v6122_v8 = vmul.f32 %v6074_v40, %v11235_v49  ;;  %vm6520_vm7 = vmor %vm6518_vm2, %vm6519_vm4 }
 0x960   : > { %v5741_v18 = vmax.f32 %v16232_v5, 0.0  ;;  %v16252_v14 = vmul.f32 %v16243_v38, %v16089_v34  ;;  %v16254_v45 = vsel %vm6510_vm5, %v10408_v52, %v6507_v0  ;;  %v6524_v55 = vmul.f32 %v10412_v6, %v6523_v56 }
 0x961   : > { %v5835_v27 = vmul.f32 %v5787_v30, %v11235_v49  ;;  %v16259_v60 = vmul.f32 %v16254_v45, %v16095_v15  ;;  %v6516_v41 = vsub.f32 1.5, %v6515_v37  ;;  %v16261_v2 = vadd.f32 1e-05, %v6122_v8 }
 0x962   : > { %17633 = vst [vmem:[#allocation35_spill] sm:$0xff] %v16252_v14  ;;  %v5836_v40 = vmul.f32 %v5788_v28, %v11235_v49  ;;  %v6525_v1 = vmul.f32 0.5, %v6524_v55  ;;  %vm6529_vm6 = vweird.f32 %v10412_v6  ;;  %v17635_v5 = vmax.f32 %v17630_v31, 0.0 }
 0x963   : > { %17634 = vst [vmem:[#allocation13_spill] sm:$0xff] %v16259_v60  ;;  %v16268_v52 = vsub.f32 %v5739_v20, %v5835_v27  ;;  %v6517_v47 = vmul.f32 %v10410_v33, %v6516_v41  ;;  %10415 = vrsqrt.f32 %v16261_v2  ;;  %v17636_v30 = vmov %v17632_v9  ;;  %v17637_v9 = vld [vmem:[#allocation15_spill] sm:$0xff]  ;;  %v5646_v41 = vpop.f32.mrf.mxu3 }
 0x964   : > { %v16266_v34 = vsub.f32 %v17635_v5, %v5835_v27  ;;  %v16273_v15 = vsub.f32 %v17636_v30, %v5836_v40  ;;  %v17638_v0 = vmax.f32 %v17637_v9, 0.0  ;;  %v10414_v37 = vpop.eup %10413  ;;  %v6526_v31 = vsub.f32 1.5, %v6525_v1 }
 0x965   : > { %v6027_v28 = vmul.f32 %v16268_v52, %v16268_v52  ;;  %v16284_v8 = vsub.f32 %v5740_v13, %v5836_v40  ;;  %v16286_v55 = vsel %vm6520_vm7, %v10410_v33, %v6517_v47  ;;  %vm6528_vm8 = vweird.f32 %v16198_v4 }
 0x966   : > { %v5789_v56 = vadd.f32 %v5741_v18, %v17638_v0  ;;  %v5979_v20 = vmul.f32 %v16266_v34, %v16266_v34  ;;  %v6533_v27 = vmul.f32 %v10414_v37, %v16228_v32  ;;  %v5980_v51 = vmul.f32 %v16273_v15, %v16273_v15  ;;  %vm6530_vm9 = vmor %vm6528_vm8, %vm6529_vm6 }
 0x967   : > { %v16294_v1 = vmul.f32 %v16286_v55, %v16128_v25  ;;  %v6527_v5 = vmul.f32 %v10412_v6, %v6526_v31  ;;  %v6028_v13 = vmul.f32 %v16284_v8, %v16284_v8  ;;  %vm6538_vm10 = vweird.f32 %v16228_v32 }
 0x968   : > { %v6075_v30 = vadd.f32 %v6027_v28, %v5979_v20  ;;  %v6534_v33 = vmul.f32 %v10414_v37, %v6533_v27  ;;  %v5837_v4 = vmul.f32 %v5789_v56, %v11235_v49  ;;  %v5742_v40 = vmax.f32 %v5557_v24, 0.0 }
 0x969   : > { %v16301_v47 = vsel %vm6530_vm9, %v10412_v6, %v6527_v5  ;;  %v6076_v42 = vadd.f32 %v6028_v13, %v5980_v51  ;;  %v5743_v25 = vmax.f32 %v5646_v41, 0.0  ;;  %v10416_v60 = vpop.eup %10415  ;;  %v17640_v28 = vmax.f32 %v17637_v9, 0.0  ;;  %v17641_v5 = vld [vmem:[#allocation12_spill] sm:$0xff] }
 0x96a   : > { %v6123_v0 = vmul.f32 %v6075_v30, %v11235_v49  ;;  %v16306_v31 = vmul.f32 %v16301_v47, %v16150_v62  ;;  %v6535_v20 = vmul.f32 0.5, %v6534_v33  ;;  %v16312_v14 = vsub.f32 %v5741_v18, %v5837_v4 }
 0x96b   : > { %v16310_v27 = vsub.f32 %v17640_v28, %v5837_v4  ;;  %vm6539_vm11 = vweird.f32 %v10414_v37  ;;  %v6543_v6 = vmul.f32 %v10416_v60, %v16261_v2  ;;  %v6124_v24 = vmul.f32 %v6076_v42, %v11235_v49 }
 0x96c   : > { %17639 = vst [vmem:[#allocation32_spill] sm:$0xff] %v16306_v31  ;;  %v16315_v56 = vadd.f32 1e-05, %v6123_v0  ;;  %v6536_v51 = vsub.f32 1.5, %v6535_v20  ;;  %v6029_v62 = vmul.f32 %v16312_v14, %v16312_v14  ;;  %v17642_v9 = vmax.f32 %v17641_v5, 0.0  ;;  %vm6540_vm12 = vmor %vm6538_vm10, %vm6539_vm11 }
 0x96d   : > { %v5981_v41 = vmul.f32 %v16310_v27, %v16310_v27  ;;  %v6544_v13 = vmul.f32 %v10416_v60, %v6543_v6  ;;  %v16325_v18 = vadd.f32 1e-05, %v6124_v24  ;;  %v6686_v33 = vmul.f32 %v15976_v63, %v15792_v19 }
 0x96e   : > { %v5790_v30 = vadd.f32 %v5742_v40, %v17642_v9  ;;  %10417 = vrsqrt.f32 %v16315_v56  ;;  %v6537_v4 = vmul.f32 %v10414_v37, %v6536_v51  ;;  %v17643_v20 = vmax.f32 %v17596_v57, 0.0 }
 0x96f   : > { %v6077_v42 = vadd.f32 %v6029_v62, %v5981_v41  ;;  %v6545_v9 = vmul.f32 0.5, %v6544_v13  ;;  %vm6549_vm13 = vweird.f32 %v10416_v60  ;;  %10419 = vrsqrt.f32 %v16325_v18  ;;  %v16347_v62 = vpop.f32.mrf.mxu1 }
 0x970   : > { %v5838_v0 = vmul.f32 %v5790_v30, %v11235_v49  ;;  %v5791_v28 = vadd.f32 %v5743_v25, %v17643_v20  ;;  %v6689_v6 = vmul.f32 %v16073_v35, %v15884_v10  ;;  %v16338_v24 = vsel %vm6540_vm12, %v10414_v37, %v6537_v4 }
 0x971   : > { %v6125_v19 = vmul.f32 %v6077_v42, %v11235_v49  ;;  %v17644_v63 = vmax.f32 %v17641_v5, 0.0  ;;  %v16351_v32 = vmul.f32 %v16338_v24, %v16176_v7  ;;  %v6546_v30 = vsub.f32 1.5, %v6545_v9 }
 0x972   : > { %v16345_v41 = vsub.f32 %v5742_v40, %v5838_v0  ;;  %v5839_v13 = vmul.f32 %v5791_v28, %v11235_v49  ;;  %v6770_v10 = vpack.c.bf16 %v6689_v6, %v6686_v33  ;;  %vm6548_vm14 = vweird.f32 %v16261_v2  ;;  %v16370_v33 = vpop.f32.mrf.mxu2 }
 0x973   : > { %v16343_v51 = vsub.f32 %v17644_v63, %v5838_v0  ;;  %17645 = vst [vmem:[#allocation18_spill] sm:$0xff] %v16351_v32  ;;  %v16355_v35 = vadd.f32 1e-05, %v6125_v19  ;;  %v6547_v4 = vmul.f32 %v10416_v60, %v6546_v30  ;;  %v17646_v7 = vmov %v17643_v20  ;;  %v17647_v20 = vld [vmem:[#allocation25_spill] sm:$0xff]  ;;  %vm6550_vm15 = vmor %vm6548_vm14, %vm6549_vm13 }
 0x974   : > { %v6030_v40 = vmul.f32 %v16345_v41, %v16345_v41  ;;  %v16361_v5 = vpop.eup %10417  ;;  %v16365_v42 = vsub.f32 %v17646_v7, %v5839_v13  ;;  %v16367_v0 = vsub.f32 %v5743_v25, %v5839_v13  ;;  %7128 = vmatmul.bf16.gmra.mxu0 %v6770_v10  ;;  %7395 = vmatmul.bf16.gmra.mxu3 %v6770_v10  ;;  %v5744_v2 = vmax.f32 %v16347_v62, 0.0 }
 0x975   : > { %v5982_v37 = vmul.f32 %v16343_v51, %v16343_v51  ;;  %v6553_v9 = vmul.f32 %v16361_v5, %v16315_v56  ;;  %vm6558_vm0 = vweird.f32 %v16315_v56  ;;  %10421 = vrsqrt.f32 %v16355_v35  ;;  %v10420_v57 = vpop.eup %10419 }
 0x976   : > { %v16378_v25 = vsel %vm6550_vm15, %v10416_v60, %v6547_v4  ;;  %v5983_v19 = vmul.f32 %v16365_v42, %v16365_v42  ;;  %v6031_v63 = vmul.f32 %v16367_v0, %v16367_v0  ;;  %v6563_v13 = vmul.f32 %v10420_v57, %v16325_v18 }
 0x977   : > { %v6078_v6 = vadd.f32 %v6030_v40, %v5982_v37  ;;  %v16386_v62 = vmul.f32 %v16378_v25, %v16215_v43  ;;  %v6554_v30 = vmul.f32 %v16361_v5, %v6553_v9  ;;  %vm6568_vm1 = vweird.f32 %v16325_v18  ;;  %v17649_v40 = vld [vmem:[#allocation23_spill] sm:$0xff] }
 0x978   : > { %vm6559_vm2 = vweird.f32 %v16361_v5  ;;  %v6079_v37 = vadd.f32 %v6031_v63, %v5983_v19  ;;  %v17650_v4 = vmax.f32 %v17649_v40, 0.0  ;;  %v6564_v32 = vmul.f32 %v10420_v57, %v6563_v13  ;;  %v9731_v19 = vld [vmem:[%s17178_s9 + $0xd8] sm:$0xf0]  ;;  %v10085_v13 = vld [vmem:[%s17178_s9 + $0x154] sm:$0xf] }
 0x979   : > { %17648 = vst [vmem:[#allocation6_spill] sm:$0xff] %v16386_v62  ;;  %v6126_v10 = vmul.f32 %v6078_v6, %v11235_v49  ;;  %v6555_v28 = vmul.f32 0.5, %v6554_v30  ;;  %v6687_v43 = vmul.f32 %v16040_v12, %v15860_v29  ;;  %v6690_v9 = vmul.f32 %v16113_v48, %v15915_v22  ;;  %v10069_v6 = vld [vmem:[%s17178_s9 + $0xd4] sm:$0xf]  ;;  %vm6560_vm5 = vmor %vm6558_vm0, %vm6559_vm2 }
 0x97a   : > { %v5792_v7 = vadd.f32 %v5744_v2, %v17650_v4  ;;  %v6127_v60 = vmul.f32 %v6079_v37, %v11235_v49  ;;  %v6691_v29 = vmul.f32 %v16130_v17, %v15944_v26  ;;  %v6565_v22 = vmul.f32 0.5, %v6564_v32 }
 0x97b   : > { %v16400_v62 = vadd.f32 1e-05, %v6126_v10  ;;  %v10422_v12 = vpop.eup %10421  ;;  %v6556_v63 = vsub.f32 1.5, %v6555_v28  ;;  %v9734_v48 = vor.u32 %v10069_v6, %v9731_v19  ;;  %v16412_v30 = vpack.c.bf16 %v6690_v9, %v6687_v43  ;;  %v9795_v10 = vld [vmem:[%s17178_s9 + $0x158] sm:$0xf0]  ;;  %v5649_v43 = vpop.f32.mrf.mxu3 }
 0x97c   : > { %v5840_v31 = vmul.f32 %v5792_v7, %v11235_v49  ;;  %vm6569_vm3 = vweird.f32 %v10420_v57  ;;  %v6573_v37 = vmul.f32 %v10422_v12, %v16355_v35  ;;  %vm6578_vm4 = vweird.f32 %v16355_v35  ;;  %v16441_v6 = vpop.f32.mrf.mxu1 }
 0x97d   : > { %17651 = vst [vmem:[#allocation15_spill] sm:$0xff] %v16412_v30  ;;  %10423 = vrsqrt.f32 %v16400_v62  ;;  %v6688_v26 = vmul.f32 %v16055_v53, %v15866_v50  ;;  %v6557_v17 = vmul.f32 %v16361_v5, %v6556_v63  ;;  %v6566_v32 = vsub.f32 1.5, %v6565_v22  ;;  %7458 = vmatpush.bf16.msrb.mxu0 %v9734_v48  ;;  %7217 = vmatmul.bf16.gmra.mxu1 %v16412_v30  ;;  %v5562_v63 = vpop.f32.mrf.mxu2  ;;  %vm6570_vm7 = vmor %vm6568_vm1, %vm6569_vm3 }
 0x97e   : > { %v16426_v28 = vadd.f32 1e-05, %v6127_v60  ;;  %v16430_v7 = vsub.f32 %v17650_v4, %v5840_v31  ;;  %v6574_v9 = vmul.f32 %v10422_v12, %v6573_v37  ;;  %v16437_v50 = vsub.f32 %v5744_v2, %v5840_v31 }
 0x97f   : > { %v16439_v53 = vpack.c.bf16 %v6691_v29, %v6688_v26  ;;  %v9798_v60 = vor.u32 %v10085_v13, %v9795_v10  ;;  %v16444_v40 = vsel %vm6560_vm5, %v16361_v5, %v6557_v17  ;;  %v6567_v19 = vmul.f32 %v10420_v57, %v6566_v32 }
 0x980   : > { %vm6579_vm6 = vweird.f32 %v10422_v12  ;;  %10425 = vrsqrt.f32 %v16426_v28  ;;  %v16449_v56 = vmul.f32 %v16444_v40, %v16268_v52  ;;  %v6575_v31 = vmul.f32 0.5, %v6574_v9 }
 0x981   : > { %17652 = vst [vmem:[#allocation12_spill] sm:$0xff] %v16439_v53  ;;  %v5984_v2 = vmul.f32 %v16430_v7, %v16430_v7  ;;  %v6032_v5 = vmul.f32 %v16437_v50, %v16437_v50  ;;  %7306 = vmatmul.bf16.gmra.mxu2 %v16439_v53  ;;  %7547 = vmatpush.bf16.msrb.mxu1 %v9798_v60  ;;  %v17654_v22 = vmax.f32 %v17597_v61, 0.0  ;;  %v17655_v52 = vmax.f32 %v16370_v33, 0.0  ;;  %vm6580_vm10 = vmor %vm6578_vm4, %vm6579_vm6 }
 0x982   : > { %17653 = vst [vmem:[#allocation25_spill] sm:$0xff] %v16449_v56  ;;  %v16459_v29 = vsel %vm6570_vm7, %v10420_v57, %v6567_v19  ;;  %v5746_v13 = vmax.f32 %v5649_v43, 0.0  ;;  %v5747_v18 = vmax.f32 %v16441_v6, 0.0  ;;  %v6576_v26 = vsub.f32 1.5, %v6575_v31 }
 0x983   : > { %v5793_v48 = vadd.f32 %v17655_v52, %v17654_v22  ;;  %v10424_v10 = vpop.eup %10423  ;;  %v16468_v37 = vmul.f32 %v16459_v29, %v16284_v8  ;;  %v6080_v17 = vadd.f32 %v6032_v5, %v5984_v2  ;;  %v5748_v32 = vmax.f32 %v5562_v63, 0.0 }
 0x984   : > { %v6583_v4 = vmul.f32 %v10424_v10, %v16400_v62  ;;  %vm6588_vm8 = vweird.f32 %v16400_v62  ;;  %v17657_v9 = vmax.f32 %v17626_v11, 0.0  ;;  %v6577_v43 = vmul.f32 %v10422_v12, %v6576_v26 }
 0x985   : > { %17656 = vst [vmem:[#allocation23_spill] sm:$0xff] %v16468_v37  ;;  %v5841_v57 = vmul.f32 %v5793_v48, %v11235_v49  ;;  %vm6589_vm9 = vweird.f32 %v10424_v10  ;;  %v6128_v6 = vmul.f32 %v6080_v17, %v11235_v49  ;;  %v17658_v19 = vmax.f32 %v17601_v16, 0.0 }
 0x986   : > { %v5794_v60 = vadd.f32 %v5746_v13, %v17657_v9  ;;  %v10426_v22 = vpop.eup %10425  ;;  %v6584_v63 = vmul.f32 %v10424_v10, %v6583_v4  ;;  %v17659_v31 = vmax.f32 %v17597_v61, 0.0  ;;  %v17660_v5 = vmov %v17655_v52  ;;  %vm6590_vm13 = vmor %vm6588_vm8, %vm6589_vm9 }
 0x987   : > { %v5795_v8 = vadd.f32 %v5747_v18, %v17658_v19  ;;  %v16487_v52 = vsub.f32 %v17660_v5, %v5841_v57  ;;  %v16490_v26 = vsel %vm6580_vm10, %v10422_v12, %v6577_v43  ;;  %v6593_v17 = vmul.f32 %v10426_v22, %v16426_v28 }
 0x988   : > { %v16483_v2 = vsub.f32 %v17659_v31, %v5841_v57  ;;  %v5842_v48 = vmul.f32 %v5794_v60, %v11235_v49  ;;  %vm6598_vm11 = vweird.f32 %v16426_v28  ;;  %v16494_v9 = vadd.f32 1e-05, %v6128_v6  ;;  %v5651_v60 = vpop.f32.mrf.mxu3 }
 0x989   : > { %v17661_v35 = vmax.f32 %v17647_v20, 0.0  ;;  %v16500_v61 = vmul.f32 %v16490_v26, %v16312_v14  ;;  %v6585_v33 = vmul.f32 0.5, %v6584_v63  ;;  %v6033_v12 = vmul.f32 %v16487_v52, %v16487_v52 }
 0x98a   : > { %v5985_v57 = vmul.f32 %v16483_v2, %v16483_v2  ;;  %v6594_v43 = vmul.f32 %v10426_v22, %v6593_v17  ;;  %vm6599_vm12 = vweird.f32 %v10426_v22  ;;  %10427 = vrsqrt.f32 %v16494_v9 }
 0x98b   : > { %v5796_v4 = vadd.f32 %v5748_v32, %v17661_v35  ;;  %v17662_v6 = vmax.f32 %v17626_v11, 0.0  ;;  %v6586_v31 = vsub.f32 1.5, %v6585_v33  ;;  %v16511_v14 = vsub.f32 %v5746_v13, %v5842_v48  ;;  %vm6600_vm14 = vmor %vm6598_vm11, %vm6599_vm12 }
 0x98c   : > { %v6081_v5 = vadd.f32 %v6033_v12, %v5985_v57  ;;  %v5843_v63 = vmul.f32 %v5795_v8, %v11235_v49  ;;  %v6595_v35 = vmul.f32 0.5, %v6594_v43  ;;  %v5749_v17 = vmax.f32 %v5651_v60, 0.0 }
 0x98d   : > { %v16509_v19 = vsub.f32 %v17662_v6, %v5842_v48  ;;  %v5844_v30 = vmul.f32 %v5796_v4, %v11235_v49  ;;  %v6587_v37 = vmul.f32 %v10424_v10, %v6586_v31  ;;  %v6034_v11 = vmul.f32 %v16511_v14, %v16511_v14 }
 0x98e   : > { %v6129_v56 = vmul.f32 %v6081_v5, %v11235_v49  ;;  %v17663_v33 = vmax.f32 %v17601_v16, 0.0  ;;  %v6596_v13 = vsub.f32 1.5, %v6595_v35  ;;  %v16527_v8 = vsub.f32 %v5747_v18, %v5843_v63 }
 0x98f   : > { %v5986_v53 = vmul.f32 %v16509_v19, %v16509_v19  ;;  %v17664_v48 = vmax.f32 %v17647_v20, 0.0  ;;  %v16533_v12 = vsub.f32 %v5748_v32, %v5844_v30  ;;  %v16535_v60 = vsel %vm6590_vm13, %v10424_v10, %v6587_v37  ;;  %v17665_v10 = vld [vmem:[#allocation48_spill] sm:$0xff] }
 0x990   : > { %v16522_v57 = vsub.f32 %v17663_v33, %v5843_v63  ;;  %v16537_v43 = vadd.f32 1e-05, %v6129_v56  ;;  %v10428_v31 = vpop.eup %10427  ;;  %v16543_v62 = vmul.f32 %v16535_v60, %v16345_v41  ;;  %v6597_v18 = vmul.f32 %v10426_v22, %v6596_v13 }
 0x991   : > { %v16531_v4 = vsub.f32 %v17664_v48, %v5844_v30  ;;  %v6082_v16 = vadd.f32 %v6034_v11, %v5986_v53  ;;  %v6035_v20 = vmul.f32 %v16527_v8, %v16527_v8  ;;  %v5701_v37 = vmax.f32 %v17665_v10, 0.0 }
 0x992   : > { %v5987_v6 = vmul.f32 %v16522_v57, %v16522_v57  ;;  %v6603_v53 = vmul.f32 %v10428_v31, %v16494_v9  ;;  %10429 = vrsqrt.f32 %v16537_v43  ;;  %v16555_v56 = vsel %vm6600_vm14, %v10426_v22, %v6597_v18 }
 0x993   : > { %v5988_v30 = vmul.f32 %v16531_v4, %v16531_v4  ;;  %v6130_v41 = vmul.f32 %v6082_v16, %v11235_v49  ;;  %v6036_v5 = vmul.f32 %v16533_v12, %v16533_v12  ;;  %v16562_v63 = vmul.f32 %v16555_v56, %v16367_v0 }
 0x994   : > { %v6083_v32 = vadd.f32 %v6035_v20, %v5987_v6  ;;  %v6604_v35 = vmul.f32 %v10428_v31, %v6603_v53  ;;  %v5797_v11 = vadd.f32 %v5749_v17, %v5701_v37  ;;  %v6695_v22 = vmul.f32 %v16286_v55, %v16122_v39 }
 0x995   : > { %v16564_v28 = vadd.f32 1e-05, %v6130_v41  ;;  %v6084_v13 = vadd.f32 %v6036_v5, %v5988_v30  ;;  %vm6609_vm15 = vweird.f32 %v10428_v31  ;;  %v6692_v6 = vmul.f32 %v16187_v58, %v16011_v21 }
 0x996   : > { %v6131_v33 = vmul.f32 %v6083_v32, %v11235_v49  ;;  %v6605_v48 = vmul.f32 0.5, %v6604_v35  ;;  %v5845_v16 = vmul.f32 %v5797_v11, %v11235_v49  ;;  %v6696_v20 = vmul.f32 %v16301_v47, %v16148_v46  ;;  %v10067_v35 = vld [vmem:[%s17178_s9 + $0xc4] sm:$0xf]  ;;  %v9723_v11 = vld [vmem:[%s17178_s9 + $0xc8] sm:$0xf0] }
 0x997   : > { %10431 = vrsqrt.f32 %v16564_v28  ;;  %v6132_v18 = vmul.f32 %v6084_v13, %v11235_v49  ;;  %v6773_v55 = vpack.c.bf16 %v6695_v22, %v6692_v6  ;;  %vm6608_vm0 = vweird.f32 %v16494_v9 }
 0x998   : > { %v16573_v0 = vadd.f32 1e-05, %v6131_v33  ;;  %v10430_v30 = vpop.eup %10429  ;;  %v6606_v10 = vsub.f32 1.5, %v6605_v48  ;;  %v16578_v53 = vsub.f32 %v5701_v37, %v5845_v16  ;;  %v16580_v39 = vsub.f32 %v5749_v17, %v5845_v16  ;;  %vm6610_vm1 = vmor %vm6608_vm0, %vm6609_vm15 }
 0x999   : > { %v6613_v21 = vmul.f32 %v10430_v30, %v16537_v43  ;;  %v6693_v58 = vmul.f32 %v16243_v38, %v16087_v23  ;;  %v16587_v32 = vadd.f32 1e-05, %v6132_v18  ;;  %7133 = vmatmul.bf16.gmra.mxu0 %v6773_v55  ;;  %7400 = vmatmul.bf16.gmra.mxu3 %v6773_v55  ;;  %v6694_v37 = vmul.f32 %v16254_v45, %v16093_v3  ;;  %v10083_v55 = vld [vmem:[%s17178_s9 + $0x144] sm:$0xf] }
 0x99a   : > { %10433 = vrsqrt.f32 %v16573_v0  ;;  %v6607_v41 = vmul.f32 %v10428_v31, %v6606_v10  ;;  %v5989_v46 = vmul.f32 %v16578_v53, %v16578_v53  ;;  %v6037_v47 = vmul.f32 %v16580_v39, %v16580_v39 }
 0x99b   : > { %v6614_v9 = vmul.f32 %v10430_v30, %v6613_v21  ;;  %v16594_v17 = vpack.c.bf16 %v6696_v20, %v6693_v58  ;;  %v6697_v23 = vmul.f32 %v16338_v24, %v16174_v54  ;;  %10435 = vrsqrt.f32 %v16587_v32  ;;  %v9787_v21 = vld [vmem:[%s17178_s9 + $0x148] sm:$0xf0]  ;;  %v7109_v58 = vpop.f32.mrf.mxu0 }
 0x99c   : > { %v16600_v38 = vsel %vm6610_vm1, %v10428_v31, %v6607_v41  ;;  %v6085_v5 = vadd.f32 %v6037_v47, %v5989_v46  ;;  %vm6618_vm2 = vweird.f32 %v16537_v43  ;;  %vm6619_vm3 = vweird.f32 %v10430_v30 }
 0x99d   : > { %v10432_v33 = vpop.eup %10431  ;;  %v16611_v3 = vmul.f32 %v16600_v38, %v16437_v50  ;;  %v6615_v45 = vmul.f32 0.5, %v6614_v9  ;;  %7222 = vmatmul.bf16.gmra.mxu1 %v16594_v17  ;;  %v16614_v54 = vpack.c.bf16 %v6697_v23, %v6694_v37  ;;  %vm6628_vm4 = vweird.f32 %v16564_v28  ;;  %vm6620_vm6 = vmor %vm6618_vm2, %vm6619_vm3 }
 0x99e   : > { %v6623_v24 = vmul.f32 %v10432_v33, %v16564_v28  ;;  %v6133_v31 = vmul.f32 %v6085_v5, %v11235_v49  ;;  %v9726_v50 = vor.u32 %v10067_v35, %v9723_v11  ;;  %vm6638_vm5 = vweird.f32 %v16573_v0  ;;  %v6854_v5 = vld [vmem:[%s17179_s10] sm:$0x3]  ;;  %v17667_v11 = vld [vmem:[#allocation28_spill] sm:$0xff] }
 0x99f   : > { %v6616_v22 = vsub.f32 1.5, %v6615_v45  ;;  %7311 = vmatmul.bf16.gmra.mxu2 %v16614_v54  ;;  %v6698_v20 = vmul.f32 %v16378_v25, %v16213_v44  ;;  %v6701_v49 = vmul.f32 %v16490_v26, %v16310_v27  ;;  %v6702_v10 = vmul.f32 %v16535_v60, %v16343_v51  ;;  %v17674_v28 = vld [vmem:[#allocation36_spill] sm:$0xff] }
 0x9a0   : > { %v10434_v13 = vpop.eup %10433  ;;  %v6624_v48 = vmul.f32 %v10432_v33, %v6623_v24  ;;  %v16623_v6 = vadd.f32 1e-05, %v6133_v31  ;;  %7459 = vmatpush.bf16.msrb.mxu0 %v9726_v50  ;;  %vm6629_vm7 = vweird.f32 %v10432_v33  ;;  %v6699_v26 = vmul.f32 %v16444_v40, %v16266_v34  ;;  %v17671_v50 = vld [vmem:[#allocation31_spill] sm:$0xff] }
 0x9a1   : > { %v6633_v16 = vmul.f32 %v10434_v13, %v16573_v0  ;;  %v6617_v18 = vmul.f32 %v10430_v30, %v6616_v22  ;;  %v10436_v41 = vpop.eup %10435  ;;  %vm6639_vm8 = vweird.f32 %v10434_v13  ;;  %v9790_v47 = vor.u32 %v10083_v55, %v9787_v21  ;;  %vm6630_vm9 = vmor %vm6628_vm4, %vm6629_vm7  ;;  %v17670_v22 = vld [vmem:[#allocation21_spill] sm:$0xff]  ;;  %v17676_v0 = vld [vmem:[#allocation10_spill] sm:$0xff] }
 0x9a2   : > { %v6625_v44 = vmul.f32 0.5, %v6624_v48  ;;  %10437 = vrsqrt.f32 %v16623_v6  ;;  %v6643_v25 = vmul.f32 %v10436_v41, %v16587_v32  ;;  %v6776_v37 = vpack.c.bf16 %v6701_v49, %v6698_v20  ;;  %v17675_v55 = vld [vmem:[#allocation29_spill] sm:$0xff]  ;;  %vm6640_vm10 = vmor %vm6638_vm5, %vm6639_vm8 }
 0x9a3   : > { %v6634_v27 = vmul.f32 %v10434_v13, %v6633_v16  ;;  %v16641_v51 = vsel %vm6620_vm6, %v10430_v30, %v6617_v18  ;;  %v16650_v23 = vpack.c.bf16 %v6702_v10, %v6699_v26  ;;  %v6700_v30 = vmul.f32 %v16459_v29, %v16273_v15  ;;  %7548 = vmatpush.bf16.msrb.mxu1 %v9790_v47  ;;  %v17668_v15 = vld [vmem:[#allocation26_spill] sm:$0xff]  ;;  %v17672_v16 = vld [vmem:[#allocation5_spill] sm:$0xff] }
 0x9a4   : > { %v16648_v60 = vmul.f32 %v16641_v51, %v16487_v52  ;;  %v6626_v46 = vsub.f32 1.5, %v6625_v44  ;;  %v6644_v9 = vmul.f32 %v10436_v41, %v6643_v25  ;;  %v6703_v40 = vmul.f32 %v16555_v56, %v16365_v42  ;;  %v17666_v52 = vld [vmem:[#allocation16_spill] sm:$0xff]  ;;  %v17669_v29 = vld [vmem:[#allocation34_spill] sm:$0xff] }
 0x9a5   : > { %v6635_v43 = vmul.f32 0.5, %v6634_v27  ;;  %v16661_v45 = vpack.c.bf16 %v17667_v11, %v17666_v52  ;;  %v16668_v31 = vpack.c.bf16 %v17669_v29, %v17668_v15  ;;  %v16672_v48 = vpack.c.bf16 %v17671_v50, %v17670_v22  ;;  %v17673_v42 = vld [vmem:[#allocation20_spill] sm:$0xff]  ;;  %v17679_v15 = vld [vmem:[#allocation19_spill] sm:$0xff] }
 0x9a6   : > { %v6627_v35 = vmul.f32 %v10432_v33, %v6626_v46  ;;  %v6645_v24 = vmul.f32 0.5, %v6644_v9  ;;  %v16676_v56 = vpack.c.bf16 %v17673_v42, %v17672_v16  ;;  %v16678_v10 = vperm.slane %v6854_v5, 0  ;;  %v10065_v46 = vld [vmem:[%s17178_s9 + $0xb4] sm:$0xf]  ;;  %v17682_v16 = vld [vmem:[#allocation42_spill] sm:$0xff] }
 0x9a7   : > { %v6636_v34 = vsub.f32 1.5, %v6635_v43  ;;  %v16682_v21 = vpack.c.bf16 %v17675_v55, %v17674_v28  ;;  %vm6649_vm11 = vweird.f32 %v10436_v41  ;;  %vm6648_vm12 = vweird.f32 %v16587_v32  ;;  %v17677_v43 = vld [vmem:[#allocation40_spill] sm:$0xff]  ;;  %v7287_v28 = vpop.f32.mrf.mxu2 }
 0x9a8   : > { %v10438_v18 = vpop.eup %10437  ;;  %v6631_v20 = vsel %vm6630_vm9, %v10432_v33, %v6627_v35  ;;  %v6646_v27 = vsub.f32 1.5, %v6645_v24  ;;  %v7198_v33 = vpop.f32.mrf.mxu1  ;;  %v16700_v47 = vpack.c.bf16 %v17677_v43, %v17676_v0  ;;  %v16705_v5 = vpack.c.bf16 %v6703_v40, %v6700_v30  ;;  %vm6650_vm13 = vmor %vm6648_vm12, %vm6649_vm11  ;;  %v17678_v24 = vld [vmem:[#allocation24_spill] sm:$0xff]  ;;  %v17680_v30 = vld [vmem:[#allocation33_spill] sm:$0xff] }
 0x9a9   : > { %v6637_v49 = vmul.f32 %v10434_v13, %v6636_v34  ;;  %v16685_v44 = vmul.f32 %v6631_v20, %v16511_v14  ;;  %v6653_v25 = vmul.f32 %v10438_v18, %v16623_v6  ;;  %7138 = vmatmul.bf16.gmra.mxu0 %v6776_v37  ;;  %7405 = vmatmul.bf16.gmra.mxu3 %v6776_v37  ;;  %v9715_v14 = vld [vmem:[%s17178_s9 + $0xb8] sm:$0xf0]  ;;  %v7111_v37 = vpop.f32.mrf.mxu0  ;;  %v17681_v40 = vld [vmem:[#allocation2_spill] sm:$0xff]  ;;  %vm6659_vm14 = vweird.f32 %v10438_v18 }
 0x9aa   : > { %v7110_v35 = vadd.f32 %v7109_v58, %v16678_v10  ;;  %v9718_v34 = vor.u32 %v10065_v46, %v9715_v14  ;;  %v16712_v29 = vpack.c.bf16 %v17679_v15, %v17678_v24  ;;  %v16719_v50 = vpack.c.bf16 %v17681_v40, %v17680_v30  ;;  %v17683_v58 = vld [vmem:[#allocation8_spill] sm:$0xff] }
 0x9ab   : > { %v6641_v26 = vsel %vm6640_vm10, %v10434_v13, %v6637_v49  ;;  %v6647_v13 = vmul.f32 %v10436_v41, %v6646_v27  ;;  %v6654_v32 = vmul.f32 %v10438_v18, %v6653_v25  ;;  %v16723_v42 = vpack.c.bf16 %v17683_v58, %v17682_v16  ;;  %v10081_v49 = vld [vmem:[%s17178_s9 + $0x134] sm:$0xf] }
 0x9ac   : > { %v16703_v9 = vmul.f32 %v6641_v26, %v16527_v8  ;;  %v7199_v22 = vadd.f32 %v7198_v33, %v7110_v35  ;;  %7460 = vmatpush.bf16.msrb.mxu0 %v9718_v34  ;;  %vm6658_vm15 = vweird.f32 %v16623_v6  ;;  %v6707_v33 = vmul.f32 %v6641_v26, %v16522_v57  ;;  %v17685_v6 = vld [vmem:[#allocation30_spill] sm:$0xff]  ;;  %v17686_v16 = vld [vmem:[#allocation44_spill] sm:$0xff] }
 0x9ad   : > { %v6651_v52 = vsel %vm6650_vm13, %v10436_v41, %v6647_v13  ;;  %v6655_v11 = vmul.f32 0.5, %v6654_v32  ;;  %7227 = vmatmul.bf16.gmra.mxu1 %v16650_v23  ;;  %vm6660_vm0 = vmor %vm6658_vm15, %vm6659_vm14  ;;  %v6704_v13 = vmul.f32 %v16600_v38, %v16430_v7  ;;  %v6705_v57 = vmul.f32 %v16641_v51, %v16483_v2  ;;  %v17687_v2 = vld [vmem:[#allocation17_spill] sm:$0xff] }
 0x9ae   : > { %v16715_v8 = vmul.f32 %v6651_v52, %v16533_v12  ;;  %v9779_v12 = vld [vmem:[%s17178_s9 + $0x138] sm:$0xf0]  ;;  %v7288_v27 = vadd.f32 %v7287_v28, %v7199_v22  ;;  %v6708_v32 = vmul.f32 %v6651_v52, %v16531_v4  ;;  %v6706_v7 = vmul.f32 %v6631_v20, %v16509_v19 }
 0x9af   : > { %v6656_v41 = vsub.f32 1.5, %v6655_v11  ;;  %7316 = vmatmul.bf16.gmra.mxu2 %v16705_v5  ;;  %v9782_v55 = vor.u32 %v10081_v49, %v9779_v12  ;;  %v6779_v34 = vpack.c.bf16 %v6707_v33, %v6704_v13  ;;  %v17684_v11 = vld [vmem:[#allocation9_spill] sm:$0xff]  ;;  %v7289_v4 = vpop.f32.mrf.mxu2  ;;  %v16755_v51 = vpack.c.bf16 %v17687_v2, %v17686_v16 }
 0x9b0   : > { %v9815_v46 = vmul.f32 -1.442695, %v7288_v27  ;;  %v7200_v14 = vpop.f32.mrf.mxu1  ;;  %v16742_v24 = vpack.c.bf16 %v17685_v6, %v17684_v11  ;;  %v16748_v26 = vpack.c.bf16 %v6708_v32, %v6705_v57 }
 0x9b1   : > { %v6657_v25 = vmul.f32 %v10438_v18, %v6656_v41  ;;  %7549 = vmatpush.bf16.msrb.mxu1 %v9782_v55  ;;  %v7114_v35 = vpop.f32.mrf.mxu0 }
 0x9b2   : > { %10439 = vpow2.f32 %v9815_v46  ;;  %v7115_v20 = vadd.f32 %v7114_v35, %v16678_v10 }
 0x9b3   : > { %v6661_v0 = vsel %vm6660_vm0, %v10438_v18, %v6657_v25 }
 0x9b4   : > { %v16735_v43 = vmul.f32 %v6661_v0, %v16580_v39  ;;  %v6709_v18 = vmul.f32 %v6661_v0, %v16578_v53  ;;  %v7112_v39 = vadd.f32 %v7111_v37, %v16678_v10  ;;  %v17688_v53 = vld [vmem:[#allocation45_spill] sm:$0xff]  ;;  %v17690_v0 = vld [vmem:[#allocation3_spill] sm:$0xff] }
 0x9b5   : > { %v17689_v37 = vld [vmem:[#allocation37_spill] sm:$0xff]  ;;  %v16766_v13 = vpack.c.bf16 %v16080_v36, %v17690_v0 }
 0x9b6   : > { %v7201_v38 = vadd.f32 %v7200_v14, %v7112_v39  ;;  %v16751_v22 = vpack.c.bf16 %v6709_v18, %v6706_v7  ;;  %v16759_v58 = vpack.c.bf16 %v17689_v37, %v17688_v53  ;;  %v10063_v7 = vld [vmem:[%s17178_s9 + $0xa4] sm:$0xf] }
 0x9b7   : > { %v7292_v12 = vpop.f32.mrf.mxu2  ;;  %v17691_v53 = vld [vmem:[#allocation46_spill] sm:$0xff] }
 0x9b8   : > { %v10440_v15 = vpop.eup %10439  ;;  %v7203_v52 = vpop.f32.mrf.mxu1  ;;  %v7290_v40 = vadd.f32 %v7289_v4, %v7201_v38  ;;  %v9707_v38 = vld [vmem:[%s17178_s9 + $0xa8] sm:$0xf0]  ;;  %v16789_v37 = vpack.c.bf16 %v16118_v59, %v17691_v53 }
 0x9b9   : > { %7143 = vmatmul.bf16.gmra.mxu0 %v6779_v34  ;;  %7410 = vmatmul.bf16.gmra.mxu3 %v6779_v34  ;;  %v7826_v30 = vadd.f32 1.0, %v10440_v15  ;;  %v7116_v41 = vpop.f32.mrf.mxu0  ;;  %v7204_v49 = vadd.f32 %v7203_v52, %v7115_v20  ;;  %v17693_v20 = vld [vmem:[#allocation11_spill] sm:$0xff] }
 0x9ba   : > { %v9817_v19 = vmul.f32 -1.442695, %v7290_v40  ;;  %v7117_v35 = vadd.f32 %v7116_v41, %v16678_v10  ;;  %v9771_v59 = vld [vmem:[%s17178_s9 + $0x128] sm:$0xf0] }
 0x9bb   : > { %10441 = vrcp.f32 %v7826_v30  ;;  %v7293_v27 = vadd.f32 %v7292_v12, %v7204_v49  ;;  %v7901_v32 = vand.u32 2147483648, %v7826_v30  ;;  %v7899_v6 = vand.u32 2147483647, %v7826_v30 }
 0x9bc   : > { %10443 = vpow2.f32 %v9817_v19  ;;  %vm7895_vm2 = vweird.f32 %v7826_v30  ;;  %v17692_v19 = vld [vmem:[#allocation47_spill] sm:$0xff] }
 0x9bd   : > { %7232 = vmatmul.bf16.gmra.mxu1 %v16748_v26  ;;  %v9819_v33 = vmul.f32 -1.442695, %v7293_v27  ;;  %v7902_v15 = vor.u32 1.1754944e-38, %v7901_v32  ;;  %vm7900_vm4 = vcmp.eq.f32.partialorder %v7899_v6, 8.507059e+37  ;;  %v16793_v41 = vpack.c.bf16 %v17693_v20, %v17692_v19 }
 0x9bf   : > { %7321 = vmatmul.bf16.gmra.mxu2 %v16751_v22  ;;  %10445 = vpow2.f32 %v9819_v33  ;;  %v7294_v39 = vpop.f32.mrf.mxu2 }
 0x9c0   : > { %v7205_v28 = vpop.f32.mrf.mxu1 }
 0x9c1   : > { %v10442_v55 = vpop.eup %10441  ;;  %v7206_v57 = vadd.f32 %v7205_v28, %v7117_v35  ;;  %v7119_v18 = vpop.f32.mrf.mxu0 }
 0x9c2   : > { %v7891_v25 = vmul.f32 %v10442_v55, %v7826_v30  ;;  %v10444_v46 = vpop.eup %10443  ;;  %vm7896_vm1 = vweird.f32 %v10442_v55  ;;  %v9710_v30 = vor.u32 %v10063_v7, %v9707_v38  ;;  %v7120_v28 = vadd.f32 %v7119_v18, %v16678_v10 }
 0x9c3   : > { %v16768_v34 = vadd.f32 1.0, %v10444_v46  ;;  %vm7897_vm3 = vmor %vm7895_vm2, %vm7896_vm1 }
 0x9c4   : > { %v7892_v14 = vsub.f32 1.0, %v7891_v25  ;;  %7461 = vmatpush.bf16.msrb.mxu0 %v9710_v30 }
 0x9c5   : > { %10447 = vrcp.f32 %v16768_v34  ;;  %v10446_v40 = vpop.eup %10445  ;;  %v7931_v0 = vand.u32 2147483648, %v16768_v34  ;;  %v7929_v6 = vand.u32 2147483647, %v16768_v34  ;;  %vm7925_vm6 = vweird.f32 %v16768_v34 }
 0x9c6   : > { %v7893_v11 = vmul.f32 %v10442_v55, %v7892_v14  ;;  %v16796_v49 = vadd.f32 1.0, %v10446_v40 }
 0x9c7   : > { %v7297_v14 = vpop.f32.mrf.mxu2  ;;  %vm7930_vm8 = vcmp.eq.f32.partialorder %v7929_v6, 8.507059e+37 }
 0x9c8   : > { %v7894_v36 = vadd.f32 %v10442_v55, %v7893_v11  ;;  %v7208_v4 = vpop.f32.mrf.mxu1  ;;  %v7959_v20 = vand.u32 2147483647, %v16796_v49  ;;  %vm7955_vm10 = vweird.f32 %v16796_v49 }
 0x9c9   : > { %7148 = vmatmul.bf16.gmra.mxu0 %v16661_v45  ;;  %7415 = vmatmul.bf16.gmra.mxu3 %v16661_v45  ;;  %v7295_v45 = vadd.f32 %v7294_v39, %v7206_v57  ;;  %v7209_v25 = vadd.f32 %v7208_v4, %v7120_v28  ;;  %v7121_v32 = vpop.f32.mrf.mxu0  ;;  %v7932_v4 = vor.u32 1.1754944e-38, %v7931_v0 }
 0x9ca   : > { %v7898_v52 = vsel %vm7897_vm3, %v10442_v55, %v7894_v36  ;;  %v10079_v55 = vld [vmem:[%s17178_s9 + $0x124] sm:$0xf]  ;;  %v7122_v30 = vadd.f32 %v7121_v32, %v16678_v10  ;;  %vm7960_vm12 = vcmp.eq.f32.partialorder %v7959_v20, 8.507059e+37 }
 0x9cb   : > { %v7903_v16 = vsel %vm7900_vm4, %v7902_v15, %v7898_v52  ;;  %v9821_v2 = vmul.f32 -1.442695, %v7295_v45  ;;  %v10448_v12 = vpop.eup %10447  ;;  %v9774_v33 = vor.u32 %v10079_v55, %v9771_v59  ;;  %v7298_v35 = vadd.f32 %v7297_v14, %v7209_v25  ;;  %v17694_v15 = vld [vmem:[#allocation7_spill] sm:$0xff]  ;;  %v17698_v25 = vld [vmem:[#allocation18_spill] sm:$0xff] }
 0x9cc   : > { %8850 = vst [vmem:[%s16784_s12] sm:$0xff] %v7903_v16  ;;  %v7921_v27 = vmul.f32 %v10448_v12, %v16768_v34  ;;  %vm7926_vm5 = vweird.f32 %v10448_v12  ;;  %v16813_v45 = vpack.c.bf16 %v16294_v1, %v17694_v15  ;;  %v7961_v1 = vand.u32 2147483648, %v16796_v49  ;;  %v17695_v55 = vld [vmem:[#allocation35_spill] sm:$0xff] }
 0x9cd   : > { %7237 = vmatmul.bf16.gmra.mxu1 %v16668_v31  ;;  %10449 = vpow2.f32 %v9821_v2  ;;  %v9823_v18 = vmul.f32 -1.442695, %v7298_v35  ;;  %vm7927_vm7 = vmor %vm7925_vm6, %vm7926_vm5 }
 0x9ce   : > { %10451 = vrcp.f32 %v16796_v49  ;;  %v7922_v46 = vsub.f32 1.0, %v7921_v27  ;;  %7550 = vmatpush.bf16.msrb.mxu1 %v9774_v33  ;;  %v17697_v27 = vld [vmem:[#allocation13_spill] sm:$0xff]  ;;  %v7962_v35 = vor.u32 1.1754944e-38, %v7961_v1 }
 0x9cf   : > { %7326 = vmatmul.bf16.gmra.mxu2 %v16672_v48  ;;  %10453 = vpow2.f32 %v9823_v18  ;;  %v7299_v34 = vpop.f32.mrf.mxu2  ;;  %v16828_v33 = vpack.c.bf16 %v17698_v25, %v17697_v27 }
 0x9d0   : > { %v7923_v11 = vmul.f32 %v10448_v12, %v7922_v46  ;;  %v7210_v36 = vpop.f32.mrf.mxu1 }
 0x9d1   : > { %v7211_v53 = vadd.f32 %v7210_v36, %v7122_v30  ;;  %v7124_v14 = vpop.f32.mrf.mxu0 }
 0x9d2   : > { %v7924_v7 = vadd.f32 %v10448_v12, %v7923_v11 }
 0x9d3   : > { %v10450_v57 = vpop.eup %10449  ;;  %v7300_v28 = vadd.f32 %v7299_v34, %v7211_v53 }
 0x9d4   : > { %v10452_v39 = vpop.eup %10451  ;;  %v7832_v38 = vadd.f32 1.0, %v10450_v57  ;;  %v7928_v40 = vsel %vm7927_vm7, %v10448_v12, %v7924_v7  ;;  %v17696_v12 = vld [vmem:[#allocation32_spill] sm:$0xff] }
 0x9d5   : > { %v7951_v52 = vmul.f32 %v10452_v39, %v16796_v49  ;;  %v7933_v16 = vsel %vm7930_vm8, %v7932_v4, %v7928_v40  ;;  %vm7956_vm9 = vweird.f32 %v10452_v39  ;;  %v16824_v59 = vpack.c.bf16 %v17696_v12, %v17695_v55  ;;  %v10454_v46 = vpop.eup %10453 }
 0x9d6   : > { %10455 = vrcp.f32 %v7832_v38  ;;  %8852 = vst [vmem:[%s16784_s12 + $0x10] sm:$0xff] %v7933_v16  ;;  %v9825_v0 = vmul.f32 -1.442695, %v7300_v28  ;;  %vm7957_vm11 = vmor %vm7955_vm10, %vm7956_vm9  ;;  %v7834_v11 = vadd.f32 1.0, %v10454_v46  ;;  %v7991_v15 = vand.u32 2147483648, %v7832_v38 }
 0x9d7   : > { %v7952_v2 = vsub.f32 1.0, %v7951_v52  ;;  %v7125_v49 = vadd.f32 %v7124_v14, %v16678_v10  ;;  %v7989_v52 = vand.u32 2147483647, %v7832_v38  ;;  %vm7985_vm14 = vweird.f32 %v7832_v38 }
 0x9d8   : > { %10457 = vpow2.f32 %v9825_v0  ;;  %v7213_v18 = vpop.f32.mrf.mxu1  ;;  %v7992_v53 = vor.u32 1.1754944e-38, %v7991_v15  ;;  %v8019_v0 = vand.u32 2147483647, %v7834_v11  ;;  %vm8015_vm2 = vweird.f32 %v7834_v11 }
 0x9d9   : > { %7153 = vmatmul.bf16.gmra.mxu0 %v16676_v56  ;;  %7420 = vmatmul.bf16.gmra.mxu3 %v16676_v56  ;;  %v7953_v19 = vmul.f32 %v10452_v39, %v7952_v2  ;;  %10459 = vrcp.f32 %v7834_v11  ;;  %v7214_v30 = vadd.f32 %v7213_v18, %v7125_v49  ;;  %vm7990_vm0 = vcmp.eq.f32.partialorder %v7989_v52, 8.507059e+37  ;;  %v7126_v12 = vpop.f32.mrf.mxu0 }
 0x9da   : > { %v7127_v14 = vadd.f32 %v7126_v12, %v16678_v10  ;;  %vm8020_vm4 = vcmp.eq.f32.partialorder %v8019_v0, 8.507059e+37 }
 0x9db   : > { %v7954_v56 = vadd.f32 %v10452_v39, %v7953_v19  ;;  %v17699_v19 = vld [vmem:[#allocation6_spill] sm:$0xff] }
 0x9dc   : > { %v10456_v32 = vpop.eup %10455  ;;  %v16839_v20 = vpack.c.bf16 %v16500_v61, %v17699_v19 }
 0x9dd   : > { %7242 = vmatmul.bf16.gmra.mxu1 %v16682_v21  ;;  %v7958_v6 = vsel %vm7957_vm11, %v10452_v39, %v7954_v56  ;;  %v7981_v57 = vmul.f32 %v10456_v32, %v7832_v38  ;;  %vm7986_vm13 = vweird.f32 %v10456_v32  ;;  %v8021_v56 = vand.u32 2147483648, %v7834_v11 }
 0x9de   : > { %v7963_v36 = vsel %vm7960_vm12, %v7962_v35, %v7958_v6  ;;  %v10458_v40 = vpop.eup %10457  ;;  %vm7987_vm15 = vmor %vm7985_vm14, %vm7986_vm13  ;;  %v10061_v35 = vld [vmem:[%s17178_s9 + $0x94] sm:$0xf]  ;;  %v9699_v6 = vld [vmem:[%s17178_s9 + $0x98] sm:$0xf0] }
 0x9df   : > { %7331 = vmatmul.bf16.gmra.mxu2 %v16700_v47  ;;  %8854 = vst [vmem:[%s16784_s12 + $0x20] sm:$0xff] %v7963_v36  ;;  %v7982_v7 = vsub.f32 1.0, %v7981_v57  ;;  %v10460_v2 = vpop.eup %10459  ;;  %v16835_v1 = vadd.f32 1.0, %v10458_v40  ;;  %v17700_v57 = vld [vmem:[#allocation25_spill] sm:$0xff]  ;;  %v9702_v49 = vor.u32 %v10061_v35, %v9699_v6  ;;  %v8022_v52 = vor.u32 1.1754944e-38, %v8021_v56 }
 0x9e0   : > { %v7302_v39 = vpop.f32.mrf.mxu2  ;;  %v8011_v55 = vmul.f32 %v10460_v2, %v7834_v11  ;;  %v7215_v46 = vpop.f32.mrf.mxu1  ;;  %vm8016_vm1 = vweird.f32 %v10460_v2  ;;  %v16854_v18 = vpack.c.bf16 %v16543_v62, %v17700_v57  ;;  %v9763_v11 = vld [vmem:[%s17178_s9 + $0x118] sm:$0xf0] }
 0x9e1   : > { %v7983_v4 = vmul.f32 %v10456_v32, %v7982_v7  ;;  %v7303_v34 = vadd.f32 %v7302_v39, %v7214_v30  ;;  %10461 = vrcp.f32 %v16835_v1  ;;  %vm8017_vm3 = vmor %vm8015_vm2, %vm8016_vm1  ;;  %7462 = vmatpush.bf16.msrb.mxu0 %v9702_v49  ;;  %vm8045_vm6 = vweird.f32 %v16835_v1 }
 0x9e2   : > { %v8012_v38 = vsub.f32 1.0, %v8011_v55  ;;  %v16871_v55 = vpop.f32.mrf.mxu3 }
 0x9e3   : > { %v7984_v16 = vadd.f32 %v10456_v32, %v7983_v4  ;;  %v9827_v25 = vmul.f32 -1.442695, %v7303_v34 }
 0x9e4   : > { %v8013_v61 = vmul.f32 %v10460_v2, %v8012_v38 }
 0x9e5   : > { %v7988_v28 = vsel %vm7987_vm15, %v10456_v32, %v7984_v16  ;;  %10463 = vpow2.f32 %v9827_v25  ;;  %v7216_v32 = vadd.f32 %v7215_v46, %v7127_v14  ;;  %v16877_v46 = vpack.c.bf16 %v16703_v9, %v16611_v3 }
 0x9e6   : > { %v7993_v27 = vsel %vm7990_vm0, %v7992_v53, %v7988_v28  ;;  %v8014_v7 = vadd.f32 %v10460_v2, %v8013_v61  ;;  %v16891_v9 = vpack.c.bf16 %v16735_v43, %v16685_v44 }
 0x9e7   : > { %8856 = vst [vmem:[%s16784_s12 + $0x30] sm:$0xff] %v7993_v27  ;;  %v10462_v4 = vpop.eup %10461  ;;  %v8049_v27 = vand.u32 2147483647, %v16835_v1 }
 0x9e8   : > { %v7304_v15 = vpop.f32.mrf.mxu2  ;;  %v8018_v40 = vsel %vm8017_vm3, %v10460_v2, %v8014_v7  ;;  %v8041_v62 = vmul.f32 %v10462_v4, %v16835_v1  ;;  %v8051_v2 = vand.u32 2147483648, %v16835_v1  ;;  %vm8046_vm5 = vweird.f32 %v10462_v4 }
 0x9e9   : > { %7158 = vmatmul.bf16.gmra.mxu0 %v16712_v29  ;;  %7425 = vmatmul.bf16.gmra.mxu3 %v16712_v29  ;;  %v17701_v29 = vld [vmem:[#allocation23_spill] sm:$0xff]  ;;  %v7305_v30 = vadd.f32 %v7304_v15, %v7216_v32  ;;  %v8023_v16 = vsel %vm8020_vm4, %v8022_v52, %v8018_v40  ;;  %vm8047_vm7 = vmor %vm8045_vm6, %vm8046_vm5  ;;  %vm8050_vm8 = vcmp.eq.f32.partialorder %v8049_v27, 8.507059e+37  ;;  %v16884_v1 = vpack.c.bf16 %v16715_v8, %v16648_v60 }
 0x9ea   : > { %v16858_v36 = vpack.c.bf16 %v16562_v63, %v17701_v29  ;;  %v10077_v63 = vld [vmem:[%s17178_s9 + $0x114] sm:$0xf]  ;;  %8858 = vst [vmem:[%s16784_s12 + $0x40] sm:$0xff] %v8023_v16  ;;  %v8042_v19 = vsub.f32 1.0, %v8041_v62  ;;  %v8052_v25 = vor.u32 1.1754944e-38, %v8051_v2  ;;  %v16886_v6 = vpop.f32.mrf.mxu3 }
 0x9eb   : > { %v9829_v39 = vmul.f32 -1.442695, %v7305_v30  ;;  %v9766_v53 = vor.u32 %v10077_v63, %v9763_v11  ;;  %v10464_v34 = vpop.eup %10463 }
 0x9ec   : > { %v7838_v28 = vadd.f32 1.0, %v10464_v34  ;;  %v8043_v12 = vmul.f32 %v10462_v4, %v8042_v19 }
 0x9ed   : > { %7247 = vmatmul.bf16.gmra.mxu1 %v16719_v50  ;;  %10465 = vpow2.f32 %v9829_v39 }
 0x9ee   : > { %7551 = vmatpush.bf16.msrb.mxu1 %v9766_v53  ;;  %10467 = vrcp.f32 %v7838_v28  ;;  %v8044_v38 = vadd.f32 %v10462_v4, %v8043_v12  ;;  %v8081_v57 = vand.u32 2147483648, %v7838_v28  ;;  %v8079_v7 = vand.u32 2147483647, %v7838_v28 }
 0x9ef   : > { %7336 = vmatmul.bf16.gmra.mxu2 %v16723_v42  ;;  %vm8075_vm10 = vweird.f32 %v7838_v28 }
 0x9f0   : > { %v8048_v56 = vsel %vm8047_vm7, %v10462_v4, %v8044_v38  ;;  %v8082_v49 = vor.u32 1.1754944e-38, %v8081_v57  ;;  %vm8080_vm12 = vcmp.eq.f32.partialorder %v8079_v7, 8.507059e+37 }
 0x9f1   : > { %v8053_v61 = vsel %vm8050_vm8, %v8052_v25, %v8048_v56  ;;  %v7129_v29 = vpop.f32.mrf.mxu0 }
 0x9f2   : > { %8860 = vst [vmem:[%s16784_s12 + $0x50] sm:$0xff] %v8053_v61  ;;  %v7130_v44 = vadd.f32 %v7129_v29, %v16678_v10  ;;  %v16896_v39 = vpop.f32.mrf.mxu3 }
 0x9f3   : > { %v10466_v14 = vpop.eup %10465 }
 0x9f4   : > { %v7840_v0 = vadd.f32 1.0, %v10466_v14  ;;  %v10468_v32 = vpop.eup %10467 }
 0x9f5   : > { %v8071_v35 = vmul.f32 %v10468_v32, %v7838_v28  ;;  %vm8076_vm9 = vweird.f32 %v10468_v32 }
 0x9f6   : > { %10469 = vrcp.f32 %v7840_v0  ;;  %vm8077_vm11 = vmor %vm8075_vm10, %vm8076_vm9  ;;  %v8111_v40 = vand.u32 2147483648, %v7840_v0  ;;  %v8109_v11 = vand.u32 2147483647, %v7840_v0  ;;  %vm8105_vm14 = vweird.f32 %v7840_v0 }
 0x9f7   : > { %v8072_v3 = vsub.f32 1.0, %v8071_v35 }
 0x9f8   : > { %v8112_v2 = vor.u32 1.1754944e-38, %v8111_v40  ;;  %vm8110_vm0 = vcmp.eq.f32.partialorder %v8109_v11, 8.507059e+37 }
 0x9f9   : > { %7163 = vmatmul.bf16.gmra.mxu0 %v16742_v24  ;;  %7430 = vmatmul.bf16.gmra.mxu3 %v16742_v24  ;;  %v8073_v24 = vmul.f32 %v10468_v32, %v8072_v3  ;;  %v7131_v19 = vpop.f32.mrf.mxu0 }
 0x9fa   : > { %v7218_v15 = vpop.f32.mrf.mxu1  ;;  %v7132_v25 = vadd.f32 %v7131_v19, %v16678_v10 }
 0x9fb   : > { %v8074_v8 = vadd.f32 %v10468_v32, %v8073_v24  ;;  %v7219_v62 = vadd.f32 %v7218_v15, %v7130_v44 }
 0x9fc   : > { %v10470_v60 = vpop.eup %10469 }
 0x9fd   : > { %7252 = vmatmul.bf16.gmra.mxu1 %v16755_v51  ;;  %v8101_v4 = vmul.f32 %v10470_v60, %v7840_v0  ;;  %v8078_v52 = vsel %vm8077_vm11, %v10468_v32, %v8074_v8  ;;  %vm8106_vm13 = vweird.f32 %v10470_v60  ;;  %v16904_v32 = vpop.f32.mrf.mxu3 }
 0x9fe   : > { %v8083_v43 = vsel %vm8080_vm12, %v8082_v49, %v8078_v52  ;;  %vm8107_vm15 = vmor %vm8105_vm14, %vm8106_vm13 }
 0x9ff   : > { %7341 = vmatmul.bf16.gmra.mxu2 %v16759_v58  ;;  %v8102_v30 = vsub.f32 1.0, %v8101_v4  ;;  %8862 = vst [vmem:[%s16784_s12 + $0x60] sm:$0xff] %v8083_v43 }
 0xa01   : > { %v8103_v63 = vmul.f32 %v10470_v60, %v8102_v30 }
 0xa02   : > { %v7220_v27 = vpop.f32.mrf.mxu1 }
 0xa03   : > { %v8104_v34 = vadd.f32 %v10470_v60, %v8103_v63  ;;  %v7221_v56 = vadd.f32 %v7220_v27, %v7132_v25 }
 0xa04   : > { %v7307_v16 = vpop.f32.mrf.mxu2 }
 0xa05   : > { %v7308_v53 = vadd.f32 %v7307_v16, %v7219_v62  ;;  %v8108_v12 = vsel %vm8107_vm15, %v10470_v60, %v8104_v34  ;;  %v16908_v15 = vpop.f32.mrf.mxu3 }
 0xa06   : > { %v8113_v38 = vsel %vm8110_vm0, %v8112_v2, %v8108_v12 }
 0xa07   : > { %v9831_v28 = vmul.f32 -1.442695, %v7308_v53  ;;  %8864 = vst [vmem:[%s16784_s12 + $0x70] sm:$0xff] %v8113_v38 }
 0xa09   : > { %7168 = vmatmul.bf16.gmra.mxu0 %v16766_v13  ;;  %7435 = vmatmul.bf16.gmra.mxu3 %v16766_v13  ;;  %10471 = vpow2.f32 %v9831_v28 }
 0xa0c   : > { %v7309_v14 = vpop.f32.mrf.mxu2 }
 0xa0d   : > { %7257 = vmatmul.bf16.gmra.mxu1 %v16789_v37  ;;  %v7310_v61 = vadd.f32 %v7309_v14, %v7221_v56  ;;  %v16913_v2 = vpop.f32.mrf.mxu3 }
 0xa0f   : > { %7346 = vmatmul.bf16.gmra.mxu2 %v16793_v41  ;;  %v10472_v0 = vpop.eup %10471  ;;  %v9833_v35 = vmul.f32 -1.442695, %v7310_v61 }
 0xa10   : > { %v7842_v13 = vadd.f32 1.0, %v10472_v0 }
 0xa11   : > { %10473 = vpow2.f32 %v9833_v35  ;;  %v10059_v35 = vld [vmem:[%s17178_s9 + $0x84] sm:$0xf] }
 0xa12   : > { %10475 = vrcp.f32 %v7842_v13  ;;  %v8141_v49 = vand.u32 2147483648, %v7842_v13  ;;  %v8139_v52 = vand.u32 2147483647, %v7842_v13  ;;  %vm8135_vm2 = vweird.f32 %v7842_v13 }
 0xa14   : > { %v8142_v62 = vor.u32 1.1754944e-38, %v8141_v49  ;;  %vm8140_vm4 = vcmp.eq.f32.partialorder %v8139_v52, 8.507059e+37 }
 0xa16   : > { %v7134_v3 = vpop.f32.mrf.mxu0 }
 0xa17   : > { %v10474_v57 = vpop.eup %10473  ;;  %v7135_v44 = vadd.f32 %v7134_v3, %v16678_v10  ;;  %v10075_v3 = vld [vmem:[%s17178_s9 + $0x104] sm:$0xf] }
 0xa18   : > { %v10476_v29 = vpop.eup %10475  ;;  %v7844_v24 = vadd.f32 1.0, %v10474_v57 }
 0xa19   : > { %7173 = vmatmul.bf16.gmra.mxu0 %v16813_v45  ;;  %7440 = vmatmul.bf16.gmra.mxu3 %v16813_v45  ;;  %v8131_v60 = vmul.f32 %v10476_v29, %v7842_v13  ;;  %vm8136_vm1 = vweird.f32 %v10476_v29  ;;  %v9691_v13 = vld [vmem:[%s17178_s9 + $0x88] sm:$0xf0] }
 0xa1a   : > { %v7223_v7 = vpop.f32.mrf.mxu1  ;;  %10477 = vrcp.f32 %v7844_v24  ;;  %vm8137_vm3 = vmor %vm8135_vm2, %vm8136_vm1  ;;  %v8169_v27 = vand.u32 2147483647, %v7844_v24  ;;  %v8171_v38 = vand.u32 2147483648, %v7844_v24  ;;  %vm8165_vm6 = vweird.f32 %v7844_v24 }
 0xa1b   : > { %v8132_v8 = vsub.f32 1.0, %v8131_v60  ;;  %v7224_v30 = vadd.f32 %v7223_v7, %v7135_v44  ;;  %v9694_v7 = vor.u32 %v10059_v35, %v9691_v13  ;;  %v9755_v60 = vld [vmem:[%s17178_s9 + $0x108] sm:$0xf0] }
 0xa1c   : > { %v8172_v57 = vor.u32 1.1754944e-38, %v8171_v38  ;;  %vm8170_vm8 = vcmp.eq.f32.partialorder %v8169_v27, 8.507059e+37 }
 0xa1d   : > { %7262 = vmatmul.bf16.gmra.mxu1 %v16824_v59  ;;  %v8133_v4 = vmul.f32 %v10476_v29, %v8132_v8  ;;  %7463 = vmatpush.bf16.msrb.mxu0 %v9694_v7 }
 0xa1e   : > { %v7136_v43 = vpop.f32.mrf.mxu0 }
 0xa1f   : > { %7351 = vmatmul.bf16.gmra.mxu2 %v16828_v33  ;;  %v8134_v45 = vadd.f32 %v10476_v29, %v8133_v4  ;;  %v7137_v56 = vadd.f32 %v7136_v43, %v16678_v10  ;;  %v9758_v4 = vor.u32 %v10075_v3, %v9755_v60 }
 0xa20   : > { %v10478_v40 = vpop.eup %10477 }
 0xa21   : > { %v8138_v16 = vsel %vm8137_vm3, %v10476_v29, %v8134_v45  ;;  %v8161_v53 = vmul.f32 %v10478_v40, %v7844_v24  ;;  %vm8166_vm5 = vweird.f32 %v10478_v40  ;;  %7552 = vmatpush.bf16.msrb.mxu1 %v9758_v4 }
 0xa22   : > { %v7312_v63 = vpop.f32.mrf.mxu2  ;;  %v7225_v11 = vpop.f32.mrf.mxu1  ;;  %v8143_v19 = vsel %vm8140_vm4, %v8142_v62, %v8138_v16  ;;  %vm8167_vm7 = vmor %vm8165_vm6, %vm8166_vm5 }
 0xa23   : > { %v7313_v34 = vadd.f32 %v7312_v63, %v7224_v30  ;;  %8866 = vst [vmem:[%s16784_s12 + $0x80] sm:$0xff] %v8143_v19  ;;  %v8162_v28 = vsub.f32 1.0, %v8161_v53  ;;  %v7226_v0 = vadd.f32 %v7225_v11, %v7137_v56 }
 0xa25   : > { %v9835_v12 = vmul.f32 -1.442695, %v7313_v34  ;;  %v8163_v25 = vmul.f32 %v10478_v40, %v8162_v28 }
 0xa26   : > { %v7139_v14 = vpop.f32.mrf.mxu0 }
 0xa27   : > { %10479 = vpow2.f32 %v9835_v12  ;;  %v8164_v61 = vadd.f32 %v10478_v40, %v8163_v25  ;;  %v7140_v30 = vadd.f32 %v7139_v14, %v16678_v10 }
 0xa29   : > { %7178 = vmatmul.bf16.gmra.mxu0 %v16839_v20  ;;  %7445 = vmatmul.bf16.gmra.mxu3 %v16839_v20  ;;  %v8168_v8 = vsel %vm8167_vm7, %v10478_v40, %v8164_v61  ;;  %v16933_v20 = vpop.f32.mrf.mxu3 }
 0xa2a   : > { %v7314_v29 = vpop.f32.mrf.mxu2  ;;  %v7228_v24 = vpop.f32.mrf.mxu1  ;;  %v8173_v52 = vsel %vm8170_vm8, %v8172_v57, %v8168_v8 }
 0xa2b   : > { %v7315_v49 = vadd.f32 %v7314_v29, %v7226_v0  ;;  %8868 = vst [vmem:[%s16784_s12 + $0x90] sm:$0xff] %v8173_v52  ;;  %v7229_v40 = vadd.f32 %v7228_v24, %v7140_v30 }
 0xa2d   : > { %v10480_v44 = vpop.eup %10479  ;;  %v9837_v43 = vmul.f32 -1.442695, %v7315_v49  ;;  %7267 = vmatmul.bf16.gmra.mxu1 %v16854_v18 }
 0xa2e   : > { %v7846_v45 = vadd.f32 1.0, %v10480_v44  ;;  %v7141_v62 = vpop.f32.mrf.mxu0 }
 0xa2f   : > { %10481 = vpow2.f32 %v9837_v43  ;;  %7356 = vmatmul.bf16.gmra.mxu2 %v16858_v36  ;;  %v7142_v27 = vadd.f32 %v7141_v62, %v16678_v10 }
 0xa30   : > { %10483 = vrcp.f32 %v7846_v45  ;;  %v8199_v61 = vand.u32 2147483647, %v7846_v45  ;;  %v8201_v0 = vand.u32 2147483648, %v7846_v45  ;;  %vm8195_vm10 = vweird.f32 %v7846_v45 }
 0xa31   : > { %v16938_v25 = vpop.f32.mrf.mxu3 }
 0xa32   : > { %v7317_v63 = vpop.f32.mrf.mxu2  ;;  %v7230_v11 = vpop.f32.mrf.mxu1  ;;  %vm8200_vm12 = vcmp.eq.f32.partialorder %v8199_v61, 8.507059e+37  ;;  %v8202_v8 = vor.u32 1.1754944e-38, %v8201_v0 }
 0xa33   : > { %v7318_v16 = vadd.f32 %v7317_v63, %v7229_v40  ;;  %v7231_v14 = vadd.f32 %v7230_v11, %v7142_v27 }
 0xa35   : > { %v10482_v53 = vpop.eup %10481  ;;  %v9839_v34 = vmul.f32 -1.442695, %v7318_v16 }
 0xa36   : > { %v10484_v19 = vpop.eup %10483  ;;  %v7848_v28 = vadd.f32 1.0, %v10482_v53  ;;  %v7144_v38 = vpop.f32.mrf.mxu0 }
 0xa37   : > { %v8191_v12 = vmul.f32 %v10484_v19, %v7846_v45  ;;  %10485 = vpow2.f32 %v9839_v34  ;;  %vm8196_vm9 = vweird.f32 %v10484_v19 }
 0xa38   : > { %10487 = vrcp.f32 %v7848_v28  ;;  %vm8197_vm11 = vmor %vm8195_vm10, %vm8196_vm9  ;;  %v8229_v62 = vand.u32 2147483647, %v7848_v28  ;;  %v8231_v40 = vand.u32 2147483648, %v7848_v28  ;;  %vm8225_vm14 = vweird.f32 %v7848_v28 }
 0xa39   : > { %v8192_v56 = vsub.f32 1.0, %v8191_v12  ;;  %7183 = vmatmul.bf16.gmra.mxu0 %v16877_v46  ;;  %7450 = vmatmul.bf16.gmra.mxu3 %v16877_v46  ;;  %v7145_v46 = vadd.f32 %v7144_v38, %v16678_v10 }
 0xa3a   : > { %v7319_v35 = vpop.f32.mrf.mxu2  ;;  %v7233_v13 = vpop.f32.mrf.mxu1  ;;  %vm8230_vm0 = vcmp.eq.f32.partialorder %v8229_v62, 8.507059e+37  ;;  %v8232_v38 = vor.u32 1.1754944e-38, %v8231_v40 }
 0xa3b   : > { %v8193_v3 = vmul.f32 %v10484_v19, %v8192_v56  ;;  %v7320_v57 = vadd.f32 %v7319_v35, %v7231_v14  ;;  %v7234_v30 = vadd.f32 %v7233_v13, %v7145_v46 }
 0xa3d   : > { %v10486_v29 = vpop.eup %10485  ;;  %v8194_v24 = vadd.f32 %v10484_v19, %v8193_v3  ;;  %v9841_v7 = vmul.f32 -1.442695, %v7320_v57  ;;  %7272 = vmatmul.bf16.gmra.mxu1 %v16884_v1 }
 0xa3e   : > { %v10488_v60 = vpop.eup %10487  ;;  %v7850_v49 = vadd.f32 1.0, %v10486_v29  ;;  %v7146_v44 = vpop.f32.mrf.mxu0 }
 0xa3f   : > { %v8198_v4 = vsel %vm8197_vm11, %v10484_v19, %v8194_v24  ;;  %v8221_v52 = vmul.f32 %v10488_v60, %v7848_v28  ;;  %10489 = vpow2.f32 %v9841_v7  ;;  %7361 = vmatmul.bf16.gmra.mxu2 %v16891_v9  ;;  %vm8226_vm13 = vweird.f32 %v10488_v60  ;;  %v17702_v28 = vld [vmem:[#allocation41_spill] sm:$0xff] }
 0xa40   : > { %v8203_v43 = vsel %vm8200_vm12, %v8202_v8, %v8198_v4  ;;  %10491 = vrcp.f32 %v7850_v49  ;;  %vm8227_vm15 = vmor %vm8225_vm14, %vm8226_vm13  ;;  %v7147_v0 = vadd.f32 %v7146_v44, %v16678_v10  ;;  %v8259_v29 = vand.u32 2147483647, %v7850_v49 }
 0xa41   : > { %8870 = vst [vmem:[%s16784_s12 + $0xa0] sm:$0xff] %v8203_v43  ;;  %v8222_v45 = vsub.f32 1.0, %v8221_v52  ;;  %v8261_v24 = vand.u32 2147483648, %v7850_v49  ;;  %vm8255_vm2 = vweird.f32 %v7850_v49  ;;  %v17703_v43 = vld [vmem:[#allocation38_spill] sm:$0xff] }
 0xa42   : > { %v7322_v63 = vpop.f32.mrf.mxu2  ;;  %v7235_v11 = vpop.f32.mrf.mxu1  ;;  %vm8260_vm4 = vcmp.eq.f32.partialorder %v8259_v29, 8.507059e+37 }
 0xa43   : > { %v8223_v16 = vmul.f32 %v10488_v60, %v8222_v45  ;;  %v7323_v53 = vadd.f32 %v7322_v63, %v7234_v30  ;;  %v7236_v57 = vadd.f32 %v7235_v11, %v7147_v0  ;;  %v8262_v30 = vor.u32 1.1754944e-38, %v8261_v24 }
 0xa45   : > { %v10490_v34 = vpop.eup %10489  ;;  %v8224_v19 = vadd.f32 %v10488_v60, %v8223_v16  ;;  %v9843_v12 = vmul.f32 -1.442695, %v7323_v53 }
 0xa46   : > { %v10492_v27 = vpop.eup %10491  ;;  %v7852_v56 = vadd.f32 1.0, %v10490_v34  ;;  %v7149_v35 = vpop.f32.mrf.mxu0 }
 0xa47   : > { %v8228_v14 = vsel %vm8227_vm15, %v10488_v60, %v8224_v19  ;;  %v8251_v61 = vmul.f32 %v10492_v27, %v7850_v49  ;;  %10493 = vpow2.f32 %v9843_v12  ;;  %vm8256_vm1 = vweird.f32 %v10492_v27 }
 0xa48   : > { %v8233_v13 = vsel %vm8230_vm0, %v8232_v38, %v8228_v14  ;;  %10495 = vrcp.f32 %v7852_v56  ;;  %vm8257_vm3 = vmor %vm8255_vm2, %vm8256_vm1  ;;  %v7150_v11 = vadd.f32 %v7149_v35, %v16678_v10  ;;  %v8289_v49 = vand.u32 2147483647, %v7852_v56 }
 0xa49   : > { %8872 = vst [vmem:[%s16784_s12 + $0xb0] sm:$0xff] %v8233_v13  ;;  %v8252_v3 = vsub.f32 1.0, %v8251_v61  ;;  %7464 = vmatmul.bf16.vlgmr.msrb.gmra.mxu0 %v17702_v28  ;;  %v8291_v12 = vand.u32 2147483648, %v7852_v56  ;;  %vm8285_vm6 = vweird.f32 %v7852_v56 }
 0xa4a   : > { %v7324_v7 = vpop.f32.mrf.mxu2  ;;  %v7238_v8 = vpop.f32.mrf.mxu1  ;;  %vm8290_vm8 = vcmp.eq.f32.partialorder %v8289_v49, 8.507059e+37 }
 0xa4b   : > { %v8253_v4 = vmul.f32 %v10492_v27, %v8252_v3  ;;  %v7325_v52 = vadd.f32 %v7324_v7, %v7236_v57  ;;  %v7239_v19 = vadd.f32 %v7238_v8, %v7150_v11  ;;  %v8292_v57 = vor.u32 1.1754944e-38, %v8291_v12 }
 0xa4d   : > { %v10494_v60 = vpop.eup %10493  ;;  %v8254_v46 = vadd.f32 %v10492_v27, %v8253_v4  ;;  %v9845_v44 = vmul.f32 -1.442695, %v7325_v52  ;;  %7553 = vmatmul.bf16.vlgmr.msrb.gmra.mxu1 %v17703_v43 }
 0xa4e   : > { %v10496_v45 = vpop.eup %10495  ;;  %v7854_v62 = vadd.f32 1.0, %v10494_v60  ;;  %v7151_v16 = vpop.f32.mrf.mxu0 }
 0xa4f   : > { %v8258_v40 = vsel %vm8257_vm3, %v10492_v27, %v8254_v46  ;;  %v8281_v63 = vmul.f32 %v10496_v45, %v7852_v56  ;;  %10497 = vpow2.f32 %v9845_v44  ;;  %vm8286_vm5 = vweird.f32 %v10496_v45  ;;  %v17704_v56 = vld [vmem:[#allocation27_spill] sm:$0xff] }
 0xa50   : > { %v8263_v53 = vsel %vm8260_vm4, %v8262_v30, %v8258_v40  ;;  %10499 = vrcp.f32 %v7854_v62  ;;  %vm8287_vm7 = vmor %vm8285_vm6, %vm8286_vm5  ;;  %v7152_v7 = vadd.f32 %v7151_v16, %v16678_v10  ;;  %v8319_v46 = vand.u32 2147483647, %v7854_v62 }
 0xa51   : > { %8874 = vst [vmem:[%s16784_s12 + $0xc0] sm:$0xff] %v8263_v53  ;;  %v8282_v34 = vsub.f32 1.0, %v8281_v63  ;;  %v8321_v44 = vand.u32 2147483648, %v7854_v62  ;;  %vm8315_vm10 = vweird.f32 %v7854_v62  ;;  %v17705_v53 = vld [vmem:[#allocation43_spill] sm:$0xff] }
 0xa52   : > { %v7327_v38 = vpop.f32.mrf.mxu2  ;;  %v7240_v14 = vpop.f32.mrf.mxu1  ;;  %vm8320_vm12 = vcmp.eq.f32.partialorder %v8319_v46, 8.507059e+37 }
 0xa53   : > { %v8283_v61 = vmul.f32 %v10496_v45, %v8282_v34  ;;  %v7328_v0 = vadd.f32 %v7327_v38, %v7239_v19  ;;  %v7241_v60 = vadd.f32 %v7240_v14, %v7152_v7  ;;  %v8322_v19 = vor.u32 1.1754944e-38, %v8321_v44 }
 0xa55   : > { %v10498_v13 = vpop.eup %10497  ;;  %v8284_v27 = vadd.f32 %v10496_v45, %v8283_v61  ;;  %v9847_v3 = vmul.f32 -1.442695, %v7328_v0 }
 0xa56   : > { %v10500_v35 = vpop.eup %10499  ;;  %v7856_v29 = vadd.f32 1.0, %v10498_v13  ;;  %v7154_v8 = vpop.f32.mrf.mxu0 }
 0xa57   : > { %v8288_v24 = vsel %vm8287_vm7, %v10496_v45, %v8284_v27  ;;  %v8311_v28 = vmul.f32 %v10500_v35, %v7854_v62  ;;  %10501 = vpow2.f32 %v9847_v3  ;;  %vm8316_vm9 = vweird.f32 %v10500_v35 }
 0xa58   : > { %v8293_v4 = vsel %vm8290_vm8, %v8292_v57, %v8288_v24  ;;  %10503 = vrcp.f32 %v7856_v29  ;;  %vm8317_vm11 = vmor %vm8315_vm10, %vm8316_vm9  ;;  %v7155_v14 = vadd.f32 %v7154_v8, %v16678_v10  ;;  %v8349_v62 = vand.u32 2147483647, %v7856_v29 }
 0xa59   : > { %8876 = vst [vmem:[%s16784_s12 + $0xd0] sm:$0xff] %v8293_v4  ;;  %v8312_v52 = vsub.f32 1.0, %v8311_v28  ;;  %7469 = vmatmul.bf16.gmra.mxu0 %v17704_v56  ;;  %v8351_v3 = vand.u32 2147483648, %v7856_v29  ;;  %vm8345_vm14 = vweird.f32 %v7856_v29 }
 0xa5a   : > { %v7329_v43 = vpop.f32.mrf.mxu2  ;;  %v7243_v30 = vpop.f32.mrf.mxu1  ;;  %vm8350_vm0 = vcmp.eq.f32.partialorder %v8349_v62, 8.507059e+37 }
 0xa5b   : > { %v8313_v40 = vmul.f32 %v10500_v35, %v8312_v52  ;;  %v7330_v63 = vadd.f32 %v7329_v43, %v7241_v60  ;;  %v7244_v27 = vadd.f32 %v7243_v30, %v7155_v14  ;;  %v8352_v60 = vor.u32 1.1754944e-38, %v8351_v3 }
 0xa5d   : > { %v10502_v45 = vpop.eup %10501  ;;  %v8314_v11 = vadd.f32 %v10500_v35, %v8313_v40  ;;  %v9849_v16 = vmul.f32 -1.442695, %v7330_v63  ;;  %7558 = vmatmul.bf16.gmra.mxu1 %v17705_v53 }
 0xa5e   : > { %v10504_v34 = vpop.eup %10503  ;;  %v7858_v49 = vadd.f32 1.0, %v10502_v45  ;;  %v7156_v61 = vpop.f32.mrf.mxu0 }
 0xa5f   : > { %v8318_v12 = vsel %vm8317_vm11, %v10500_v35, %v8314_v11  ;;  %v8341_v38 = vmul.f32 %v10504_v34, %v7856_v29  ;;  %10505 = vpow2.f32 %v9849_v16  ;;  %vm8346_vm13 = vweird.f32 %v10504_v34  ;;  %v17706_v29 = vld [vmem:[#allocation39_spill] sm:$0xff] }
 0xa60   : > { %v8323_v0 = vsel %vm8320_vm12, %v8322_v19, %v8318_v12  ;;  %10507 = vrcp.f32 %v7858_v49  ;;  %vm8347_vm15 = vmor %vm8345_vm14, %vm8346_vm13  ;;  %v7157_v43 = vadd.f32 %v7156_v61, %v16678_v10  ;;  %v8379_v11 = vand.u32 2147483647, %v7858_v49 }
 0xa61   : > { %8878 = vst [vmem:[%s16784_s12 + $0xe0] sm:$0xff] %v8323_v0  ;;  %v8342_v13 = vsub.f32 1.0, %v8341_v38  ;;  %v8381_v16 = vand.u32 2147483648, %v7858_v49  ;;  %vm8375_vm2 = vweird.f32 %v7858_v49  ;;  %v17707_v0 = vld [vmem:[#allocation14_spill] sm:$0xff] }
 0xa62   : > { %v7332_v57 = vpop.f32.mrf.mxu2  ;;  %v7245_v24 = vpop.f32.mrf.mxu1  ;;  %vm8380_vm4 = vcmp.eq.f32.partialorder %v8379_v11, 8.507059e+37 }
 0xa63   : > { %v8343_v28 = vmul.f32 %v10504_v34, %v8342_v13  ;;  %v7333_v7 = vadd.f32 %v7332_v57, %v7244_v27  ;;  %v7246_v45 = vadd.f32 %v7245_v24, %v7157_v43  ;;  %v8382_v27 = vor.u32 1.1754944e-38, %v8381_v16 }
 0xa65   : > { %v10506_v4 = vpop.eup %10505  ;;  %v8344_v35 = vadd.f32 %v10504_v34, %v8343_v28  ;;  %v9851_v52 = vmul.f32 -1.442695, %v7333_v7 }
 0xa66   : > { %v10508_v8 = vpop.eup %10507  ;;  %v7860_v46 = vadd.f32 1.0, %v10506_v4  ;;  %v7159_v30 = vpop.f32.mrf.mxu0 }
 0xa67   : > { %v8348_v44 = vsel %vm8347_vm15, %v10504_v34, %v8344_v35  ;;  %v8371_v56 = vmul.f32 %v10508_v8, %v7858_v49  ;;  %10509 = vpow2.f32 %v9851_v52  ;;  %vm8376_vm1 = vweird.f32 %v10508_v8 }
 0xa68   : > { %v8353_v40 = vsel %vm8350_vm0, %v8352_v60, %v8348_v44  ;;  %10511 = vrcp.f32 %v7860_v46  ;;  %vm8377_vm3 = vmor %vm8375_vm2, %vm8376_vm1  ;;  %v7160_v24 = vadd.f32 %v7159_v30, %v16678_v10  ;;  %v8409_v49 = vand.u32 2147483647, %v7860_v46 }
 0xa69   : > { %8880 = vst [vmem:[%s16784_s12 + $0xf0] sm:$0xff] %v8353_v40  ;;  %v8372_v63 = vsub.f32 1.0, %v8371_v56  ;;  %7474 = vmatmul.bf16.gmra.mxu0 %v17706_v29  ;;  %v8411_v52 = vand.u32 2147483648, %v7860_v46  ;;  %vm8405_vm6 = vweird.f32 %v7860_v46 }
 0xa6a   : > { %v7334_v53 = vpop.f32.mrf.mxu2  ;;  %v7248_v19 = vpop.f32.mrf.mxu1  ;;  %vm8410_vm8 = vcmp.eq.f32.partialorder %v8409_v49, 8.507059e+37 }
 0xa6b   : > { %v8373_v12 = vmul.f32 %v10508_v8, %v8372_v63  ;;  %v7335_v38 = vadd.f32 %v7334_v53, %v7246_v45  ;;  %v7249_v35 = vadd.f32 %v7248_v19, %v7160_v24  ;;  %v8412_v45 = vor.u32 1.1754944e-38, %v8411_v52 }
 0xa6d   : > { %v10510_v34 = vpop.eup %10509  ;;  %v8374_v14 = vadd.f32 %v10508_v8, %v8373_v12  ;;  %v9853_v61 = vmul.f32 -1.442695, %v7335_v38  ;;  %7563 = vmatmul.bf16.gmra.mxu1 %v17707_v0 }
 0xa6e   : > { %v10512_v13 = vpop.eup %10511  ;;  %v7862_v62 = vadd.f32 1.0, %v10510_v34  ;;  %v7161_v28 = vpop.f32.mrf.mxu0 }
 0xa6f   : > { %v8378_v3 = vsel %vm8377_vm3, %v10508_v8, %v8374_v14  ;;  %v8401_v57 = vmul.f32 %v10512_v13, %v7860_v46  ;;  %10513 = vpow2.f32 %v9853_v61  ;;  %vm8406_vm5 = vweird.f32 %v10512_v13  ;;  %v17708_v46 = vld [vmem:[#allocation22_spill] sm:$0xff] }
 0xa70   : > { %v8383_v7 = vsel %vm8380_vm4, %v8382_v27, %v8378_v3  ;;  %10515 = vrcp.f32 %v7862_v62  ;;  %vm8407_vm7 = vmor %vm8405_vm6, %vm8406_vm5  ;;  %v7162_v53 = vadd.f32 %v7161_v28, %v16678_v10  ;;  %v8439_v14 = vand.u32 2147483647, %v7862_v62 }
 0xa71   : > { %8882 = vst [vmem:[%s16784_s12 + $0x100] sm:$0xff] %v8383_v7  ;;  %v8402_v4 = vsub.f32 1.0, %v8401_v57  ;;  %v8441_v61 = vand.u32 2147483648, %v7862_v62  ;;  %vm8435_vm10 = vweird.f32 %v7862_v62  ;;  %v17709_v7 = vld [vmem:[#allocation4_spill] sm:$0xff] }
 0xa72   : > { %v7337_v60 = vpop.f32.mrf.mxu2  ;;  %v7250_v44 = vpop.f32.mrf.mxu1  ;;  %vm8440_vm12 = vcmp.eq.f32.partialorder %v8439_v14, 8.507059e+37 }
 0xa73   : > { %v8403_v56 = vmul.f32 %v10512_v13, %v8402_v4  ;;  %v7338_v43 = vadd.f32 %v7337_v60, %v7249_v35  ;;  %v7251_v34 = vadd.f32 %v7250_v44, %v7162_v53  ;;  %v8442_v35 = vor.u32 1.1754944e-38, %v8441_v61 }
 0xa75   : > { %v10514_v40 = vpop.eup %10513  ;;  %v8404_v8 = vadd.f32 %v10512_v13, %v8403_v56  ;;  %v9855_v63 = vmul.f32 -1.442695, %v7338_v43 }
 0xa76   : > { %v10516_v30 = vpop.eup %10515  ;;  %v7864_v11 = vadd.f32 1.0, %v10514_v40  ;;  %v7164_v19 = vpop.f32.mrf.mxu0 }
 0xa77   : > { %v8408_v16 = vsel %vm8407_vm7, %v10512_v13, %v8404_v8  ;;  %v8431_v29 = vmul.f32 %v10516_v30, %v7862_v62  ;;  %10517 = vpow2.f32 %v9855_v63  ;;  %vm8436_vm9 = vweird.f32 %v10516_v30 }
 0xa78   : > { %v8413_v12 = vsel %vm8410_vm8, %v8412_v45, %v8408_v16  ;;  %10519 = vrcp.f32 %v7864_v11  ;;  %vm8437_vm11 = vmor %vm8435_vm10, %vm8436_vm9  ;;  %v7165_v44 = vadd.f32 %v7164_v19, %v16678_v10  ;;  %v8469_v62 = vand.u32 2147483647, %v7864_v11 }
 0xa79   : > { %8884 = vst [vmem:[%s16784_s12 + $0x110] sm:$0xff] %v8413_v12  ;;  %v8432_v38 = vsub.f32 1.0, %v8431_v29  ;;  %7479 = vmatmul.bf16.gmra.mxu0 %v17708_v46  ;;  %v8471_v63 = vand.u32 2147483648, %v7864_v11  ;;  %vm8465_vm14 = vweird.f32 %v7864_v11 }
 0xa7a   : > { %v7339_v0 = vpop.f32.mrf.mxu2  ;;  %v7253_v27 = vpop.f32.mrf.mxu1  ;;  %vm8470_vm0 = vcmp.eq.f32.partialorder %v8469_v62, 8.507059e+37 }
 0xa7b   : > { %v8433_v3 = vmul.f32 %v10516_v30, %v8432_v38  ;;  %v7340_v57 = vadd.f32 %v7339_v0, %v7251_v34  ;;  %v7254_v8 = vadd.f32 %v7253_v27, %v7165_v44  ;;  %v8472_v34 = vor.u32 1.1754944e-38, %v8471_v63 }
 0xa7d   : > { %v10518_v13 = vpop.eup %10517  ;;  %v8434_v24 = vadd.f32 %v10516_v30, %v8433_v3  ;;  %v9857_v28 = vmul.f32 -1.442695, %v7340_v57  ;;  %7568 = vmatmul.bf16.gmra.mxu1 %v17709_v7 }
 0xa7e   : > { %v10520_v4 = vpop.eup %10519  ;;  %v7866_v49 = vadd.f32 1.0, %v10518_v13  ;;  %v7166_v56 = vpop.f32.mrf.mxu0 }
 0xa7f   : > { %v8438_v52 = vsel %vm8437_vm11, %v10516_v30, %v8434_v24  ;;  %v8461_v60 = vmul.f32 %v10520_v4, %v7864_v11  ;;  %10521 = vpow2.f32 %v9857_v28  ;;  %vm8466_vm13 = vweird.f32 %v10520_v4  ;;  %v17710_v11 = vld [vmem:[#allocation15_spill] sm:$0xff] }
 0xa80   : > { %v8443_v43 = vsel %vm8440_vm12, %v8442_v35, %v8438_v52  ;;  %10523 = vrcp.f32 %v7866_v49  ;;  %vm8467_vm15 = vmor %vm8465_vm14, %vm8466_vm13  ;;  %v7167_v0 = vadd.f32 %v7166_v56, %v16678_v10  ;;  %v8499_v24 = vand.u32 2147483647, %v7866_v49 }
 0xa81   : > { %8886 = vst [vmem:[%s16784_s12 + $0x120] sm:$0xff] %v8443_v43  ;;  %v8462_v40 = vsub.f32 1.0, %v8461_v60  ;;  %v8501_v28 = vand.u32 2147483648, %v7866_v49  ;;  %vm8495_vm2 = vweird.f32 %v7866_v49  ;;  %v17711_v43 = vld [vmem:[#allocation12_spill] sm:$0xff] }
 0xa82   : > { %v7342_v45 = vpop.f32.mrf.mxu2  ;;  %v7255_v16 = vpop.f32.mrf.mxu1  ;;  %vm8500_vm4 = vcmp.eq.f32.partialorder %v8499_v24, 8.507059e+37 }
 0xa83   : > { %v8463_v29 = vmul.f32 %v10520_v4, %v8462_v40  ;;  %v7343_v53 = vadd.f32 %v7342_v45, %v7254_v8  ;;  %v7256_v13 = vadd.f32 %v7255_v16, %v7167_v0  ;;  %v8502_v8 = vor.u32 1.1754944e-38, %v8501_v28 }
 0xa85   : > { %v10522_v12 = vpop.eup %10521  ;;  %v8464_v30 = vadd.f32 %v10520_v4, %v8463_v29  ;;  %v9859_v38 = vmul.f32 -1.442695, %v7343_v53 }
 0xa86   : > { %v10524_v19 = vpop.eup %10523  ;;  %v7868_v14 = vadd.f32 1.0, %v10522_v12  ;;  %v7169_v27 = vpop.f32.mrf.mxu0 }
 0xa87   : > { %v8468_v61 = vsel %vm8467_vm15, %v10520_v4, %v8464_v30  ;;  %v8491_v46 = vmul.f32 %v10524_v19, %v7866_v49  ;;  %10525 = vpow2.f32 %v9859_v38  ;;  %vm8496_vm1 = vweird.f32 %v10524_v19 }
 0xa88   : > { %v8473_v3 = vsel %vm8470_vm0, %v8472_v34, %v8468_v61  ;;  %10527 = vrcp.f32 %v7868_v14  ;;  %vm8497_vm3 = vmor %vm8495_vm2, %vm8496_vm1  ;;  %v7170_v16 = vadd.f32 %v7169_v27, %v16678_v10  ;;  %v8529_v49 = vand.u32 2147483647, %v7868_v14 }
 0xa89   : > { %8888 = vst [vmem:[%s16784_s12 + $0x130] sm:$0xff] %v8473_v3  ;;  %v8492_v57 = vsub.f32 1.0, %v8491_v46  ;;  %7484 = vmatmul.bf16.gmra.mxu0 %v17710_v11  ;;  %v8531_v38 = vand.u32 2147483648, %v7868_v14  ;;  %vm8525_vm6 = vweird.f32 %v7868_v14 }
 0xa8a   : > { %v7344_v7 = vpop.f32.mrf.mxu2  ;;  %v7258_v35 = vpop.f32.mrf.mxu1  ;;  %vm8530_vm8 = vcmp.eq.f32.partialorder %v8529_v49, 8.507059e+37 }
 0xa8b   : > { %v8493_v52 = vmul.f32 %v10524_v19, %v8492_v57  ;;  %v7345_v60 = vadd.f32 %v7344_v7, %v7256_v13  ;;  %v7259_v30 = vadd.f32 %v7258_v35, %v7170_v16  ;;  %v8532_v13 = vor.u32 1.1754944e-38, %v8531_v38 }
 0xa8d   : > { %v10526_v4 = vpop.eup %10525  ;;  %v8494_v44 = vadd.f32 %v10524_v19, %v8493_v52  ;;  %v9861_v56 = vmul.f32 -1.442695, %v7345_v60  ;;  %7573 = vmatmul.bf16.gmra.mxu1 %v17711_v43 }
 0xa8e   : > { %v10528_v40 = vpop.eup %10527  ;;  %v7870_v62 = vadd.f32 1.0, %v10526_v4  ;;  %v7171_v29 = vpop.f32.mrf.mxu0 }
 0xa8f   : > { %v8498_v63 = vsel %vm8497_vm3, %v10524_v19, %v8494_v44  ;;  %v8521_v45 = vmul.f32 %v10528_v40, %v7868_v14  ;;  %10529 = vpow2.f32 %v9861_v56  ;;  %vm8526_vm5 = vweird.f32 %v10528_v40 }
 0xa90   : > { %v8503_v53 = vsel %vm8500_vm4, %v8502_v8, %v8498_v63  ;;  %10531 = vrcp.f32 %v7870_v62  ;;  %vm8527_vm7 = vmor %vm8525_vm6, %vm8526_vm5  ;;  %v7172_v7 = vadd.f32 %v7171_v29, %v16678_v10  ;;  %v8559_v44 = vand.u32 2147483647, %v7870_v62 }
 0xa91   : > { %8890 = vst [vmem:[%s16784_s12 + $0x140] sm:$0xff] %v8503_v53  ;;  %v8522_v12 = vsub.f32 1.0, %v8521_v45  ;;  %v8561_v56 = vand.u32 2147483648, %v7870_v62  ;;  %vm8555_vm10 = vweird.f32 %v7870_v62 }
 0xa92   : > { %v7347_v34 = vpop.f32.mrf.mxu2  ;;  %v7260_v61 = vpop.f32.mrf.mxu1  ;;  %vm8560_vm12 = vcmp.eq.f32.partialorder %v8559_v44, 8.507059e+37 }
 0xa93   : > { %v8523_v46 = vmul.f32 %v10528_v40, %v8522_v12  ;;  %v7348_v0 = vadd.f32 %v7347_v34, %v7259_v30  ;;  %v7261_v4 = vadd.f32 %v7260_v61, %v7172_v7  ;;  %v8562_v53 = vor.u32 1.1754944e-38, %v8561_v56 }
 0xa95   : > { %v10530_v3 = vpop.eup %10529  ;;  %v8524_v19 = vadd.f32 %v10528_v40, %v8523_v46  ;;  %v9863_v57 = vmul.f32 -1.442695, %v7348_v0 }
 0xa96   : > { %v10532_v27 = vpop.eup %10531  ;;  %v7872_v24 = vadd.f32 1.0, %v10530_v3  ;;  %v7174_v35 = vpop.f32.mrf.mxu0 }
 0xa97   : > { %v8528_v28 = vsel %vm8527_vm7, %v10528_v40, %v8524_v19  ;;  %v8551_v11 = vmul.f32 %v10532_v27, %v7870_v62  ;;  %10533 = vpow2.f32 %v9863_v57  ;;  %vm8556_vm9 = vweird.f32 %v10532_v27 }
 0xa98   : > { %v8533_v52 = vsel %vm8530_vm8, %v8532_v13, %v8528_v28  ;;  %10535 = vrcp.f32 %v7872_v24  ;;  %vm8557_vm11 = vmor %vm8555_vm10, %vm8556_vm9  ;;  %v8589_v62 = vand.u32 2147483647, %v7872_v24  ;;  %v8591_v0 = vand.u32 2147483648, %v7872_v24 }
 0xa99   : > { %8892 = vst [vmem:[%s16784_s12 + $0x150] sm:$0xff] %v8533_v52  ;;  %v8552_v60 = vsub.f32 1.0, %v8551_v11  ;;  %7489 = vmatmul.bf16.gmra.mxu0 %v16594_v17  ;;  %v7175_v17 = vadd.f32 %v7174_v35, %v16678_v10  ;;  %vm8585_vm14 = vweird.f32 %v7872_v24 }
 0xa9a   : > { %v7349_v14 = vpop.f32.mrf.mxu2  ;;  %v7263_v43 = vpop.f32.mrf.mxu1  ;;  %vm8590_vm0 = vcmp.eq.f32.partialorder %v8589_v62, 8.507059e+37  ;;  %v8592_v7 = vor.u32 1.1754944e-38, %v8591_v0 }
 0xa9b   : > { %v8553_v8 = vmul.f32 %v10532_v27, %v8552_v60  ;;  %v7350_v63 = vadd.f32 %v7349_v14, %v7261_v4  ;;  %v7264_v46 = vadd.f32 %v7263_v43, %v7175_v17 }
 0xa9d   : > { %v10534_v40 = vpop.eup %10533  ;;  %v8554_v45 = vadd.f32 %v10532_v27, %v8553_v8  ;;  %v9865_v16 = vmul.f32 -1.442695, %v7350_v63  ;;  %7578 = vmatmul.bf16.gmra.mxu1 %v16614_v54 }
 0xa9e   : > { %v10536_v29 = vpop.eup %10535  ;;  %v7874_v12 = vadd.f32 1.0, %v10534_v40  ;;  %v7176_v38 = vpop.f32.mrf.mxu0 }
 0xa9f   : > { %v8558_v30 = vsel %vm8557_vm11, %v10532_v27, %v8554_v45  ;;  %v8581_v49 = vmul.f32 %v10536_v29, %v7872_v24  ;;  %10537 = vpow2.f32 %v9865_v16  ;;  %vm8586_vm13 = vweird.f32 %v10536_v29 }
 0xaa0   : > { %v8563_v34 = vsel %vm8560_vm12, %v8562_v53, %v8558_v30  ;;  %10539 = vrcp.f32 %v7874_v12  ;;  %vm8587_vm15 = vmor %vm8585_vm14, %vm8586_vm13  ;;  %v7177_v4 = vadd.f32 %v7176_v38, %v16678_v10  ;;  %v8619_v8 = vand.u32 2147483647, %v7874_v12 }
 0xaa1   : > { %8894 = vst [vmem:[%s16784_s12 + $0x160] sm:$0xff] %v8563_v34  ;;  %v8582_v61 = vsub.f32 1.0, %v8581_v49  ;;  %v8621_v63 = vand.u32 2147483648, %v7874_v12  ;;  %vm8615_vm2 = vweird.f32 %v7874_v12 }
 0xaa2   : > { %v7352_v3 = vpop.f32.mrf.mxu2  ;;  %v7265_v54 = vpop.f32.mrf.mxu1  ;;  %vm8620_vm4 = vcmp.eq.f32.partialorder %v8619_v8, 8.507059e+37 }
 0xaa3   : > { %v8583_v19 = vmul.f32 %v10536_v29, %v8582_v61  ;;  %v7353_v57 = vadd.f32 %v7352_v3, %v7264_v46  ;;  %v7266_v43 = vadd.f32 %v7265_v54, %v7177_v4  ;;  %v8622_v17 = vor.u32 1.1754944e-38, %v8621_v63 }
 0xaa5   : > { %v10538_v13 = vpop.eup %10537  ;;  %v8584_v27 = vadd.f32 %v10536_v29, %v8583_v19  ;;  %v9867_v28 = vmul.f32 -1.442695, %v7353_v57 }
 0xaa6   : > { %v10540_v11 = vpop.eup %10539  ;;  %v7876_v35 = vadd.f32 1.0, %v10538_v13  ;;  %v7179_v44 = vpop.f32.mrf.mxu0 }
 0xaa7   : > { %v8588_v52 = vsel %vm8587_vm15, %v10536_v29, %v8584_v27  ;;  %v8611_v60 = vmul.f32 %v10540_v11, %v7874_v12  ;;  %10541 = vpow2.f32 %v9867_v28  ;;  %vm8616_vm1 = vweird.f32 %v10540_v11 }
 0xaa8   : > { %v8593_v56 = vsel %vm8590_vm0, %v8592_v7, %v8588_v52  ;;  %10543 = vrcp.f32 %v7876_v35  ;;  %vm8617_vm3 = vmor %vm8615_vm2, %vm8616_vm1  ;;  %v8649_v12 = vand.u32 2147483647, %v7876_v35  ;;  %v8651_v54 = vand.u32 2147483648, %v7876_v35 }
 0xaa9   : > { %8896 = vst [vmem:[%s16784_s12 + $0x170] sm:$0xff] %v8593_v56  ;;  %v8612_v14 = vsub.f32 1.0, %v8611_v60  ;;  %7494 = vmatmul.bf16.gmra.mxu0 %v16650_v23  ;;  %v7180_v23 = vadd.f32 %v7179_v44, %v16678_v10  ;;  %vm8645_vm6 = vweird.f32 %v7876_v35 }
 0xaaa   : > { %v7354_v24 = vpop.f32.mrf.mxu2  ;;  %v7268_v40 = vpop.f32.mrf.mxu1  ;;  %vm8650_vm8 = vcmp.eq.f32.partialorder %v8649_v12, 8.507059e+37  ;;  %v8652_v52 = vor.u32 1.1754944e-38, %v8651_v54 }
 0xaab   : > { %v8613_v45 = vmul.f32 %v10540_v11, %v8612_v14  ;;  %v7355_v16 = vadd.f32 %v7354_v24, %v7266_v43  ;;  %v7269_v3 = vadd.f32 %v7268_v40, %v7180_v23 }
 0xaad   : > { %v10542_v29 = vpop.eup %10541  ;;  %v8614_v53 = vadd.f32 %v10540_v11, %v8613_v45  ;;  %v9869_v30 = vmul.f32 -1.442695, %v7355_v16  ;;  %7583 = vmatmul.bf16.gmra.mxu1 %v16705_v5 }
 0xaae   : > { %v10544_v49 = vpop.eup %10543  ;;  %v7878_v38 = vadd.f32 1.0, %v10542_v29  ;;  %v7181_v46 = vpop.f32.mrf.mxu0 }
 0xaaf   : > { %v8618_v34 = vsel %vm8617_vm3, %v10540_v11, %v8614_v53  ;;  %v8641_v61 = vmul.f32 %v10544_v49, %v7876_v35  ;;  %10545 = vpow2.f32 %v9869_v30  ;;  %vm8646_vm5 = vweird.f32 %v10544_v49 }
 0xab0   : > { %v8623_v62 = vsel %vm8620_vm4, %v8622_v17, %v8618_v34  ;;  %10547 = vrcp.f32 %v7878_v38  ;;  %vm8647_vm7 = vmor %vm8645_vm6, %vm8646_vm5  ;;  %v7182_v56 = vadd.f32 %v7181_v46, %v16678_v10  ;;  %v8679_v24 = vand.u32 2147483647, %v7878_v38 }
 0xab1   : > { %8898 = vst [vmem:[%s16784_s12 + $0x180] sm:$0xff] %v8623_v62  ;;  %v8642_v0 = vsub.f32 1.0, %v8641_v61  ;;  %v8681_v40 = vand.u32 2147483648, %v7878_v38  ;;  %vm8675_vm10 = vweird.f32 %v7878_v38 }
 0xab2   : > { %v7357_v19 = vpop.f32.mrf.mxu2  ;;  %v7270_v5 = vpop.f32.mrf.mxu1  ;;  %vm8680_vm12 = vcmp.eq.f32.partialorder %v8679_v24, 8.507059e+37 }
 0xab3   : > { %v8643_v57 = vmul.f32 %v10544_v49, %v8642_v0  ;;  %v7358_v13 = vadd.f32 %v7357_v19, %v7269_v3  ;;  %v7271_v63 = vadd.f32 %v7270_v5, %v7182_v56  ;;  %v8682_v34 = vor.u32 1.1754944e-38, %v8681_v40 }
 0xab5   : > { %v10546_v27 = vpop.eup %10545  ;;  %v8644_v28 = vadd.f32 %v10544_v49, %v8643_v57  ;;  %v9871_v11 = vmul.f32 -1.442695, %v7358_v13 }
 0xab6   : > { %v10548_v7 = vpop.eup %10547  ;;  %v7880_v60 = vadd.f32 1.0, %v10546_v27  ;;  %v7184_v14 = vpop.f32.mrf.mxu0 }
 0xab7   : > { %v8648_v4 = vsel %vm8647_vm7, %v10544_v49, %v8644_v28  ;;  %v8671_v44 = vmul.f32 %v10548_v7, %v7878_v38  ;;  %10549 = vpow2.f32 %v9871_v11  ;;  %vm8676_vm9 = vweird.f32 %v10548_v7 }
 0xab8   : > { %v8653_v43 = vsel %vm8650_vm8, %v8652_v52, %v8648_v4  ;;  %10551 = vrcp.f32 %v7880_v60  ;;  %vm8677_vm11 = vmor %vm8675_vm10, %vm8676_vm9  ;;  %v7185_v46 = vadd.f32 %v7184_v14, %v16678_v10  ;;  %v8709_v54 = vand.u32 2147483647, %v7880_v60 }
 0xab9   : > { %8900 = vst [vmem:[%s16784_s12 + $0x190] sm:$0xff] %v8653_v43  ;;  %v8672_v8 = vsub.f32 1.0, %v8671_v44  ;;  %7499 = vmatmul.bf16.gmra.mxu0 %v16748_v26  ;;  %v8711_v19 = vand.u32 2147483648, %v7880_v60  ;;  %vm8705_vm14 = vweird.f32 %v7880_v60 }
 0xaba   : > { %v7359_v35 = vpop.f32.mrf.mxu2  ;;  %v7273_v45 = vpop.f32.mrf.mxu1  ;;  %vm8710_vm0 = vcmp.eq.f32.partialorder %v8709_v54, 8.507059e+37 }
 0xabb   : > { %v8673_v16 = vmul.f32 %v10548_v7, %v8672_v8  ;;  %v7360_v29 = vadd.f32 %v7359_v35, %v7271_v63  ;;  %v7274_v3 = vadd.f32 %v7273_v45, %v7185_v46  ;;  %v8712_v44 = vor.u32 1.1754944e-38, %v8711_v19 }
 0xabd   : > { %v10550_v53 = vpop.eup %10549  ;;  %v8674_v30 = vadd.f32 %v10548_v7, %v8673_v16  ;;  %v9873_v49 = vmul.f32 -1.442695, %v7360_v29  ;;  %7588 = vmatmul.bf16.gmra.mxu1 %v16751_v22  ;;  %v10695_v22 = vld [vmem:[%s17179_s10] sm:$0x3] }
 0xabe   : > { %v10552_v17 = vpop.eup %10551  ;;  %v16992_v61 = vadd.f32 1.0, %v10550_v53  ;;  %v7186_v62 = vpop.f32.mrf.mxu0  ;;  %v17000_v12 = vperm.slane %v10695_v22, 1 }
 0xabf   : > { %v8678_v23 = vsel %vm8677_vm11, %v10548_v7, %v8674_v30  ;;  %v8701_v26 = vmul.f32 %v10552_v17, %v7880_v60  ;;  %10553 = vpow2.f32 %v9873_v49  ;;  %vm8706_vm13 = vweird.f32 %v10552_v17 }
 0xac0   : > { %v8683_v0 = vsel %vm8680_vm12, %v8682_v34, %v8678_v23  ;;  %10555 = vrcp.f32 %v16992_v61  ;;  %v7377_v4 = vadd.f32 %v16871_v55, %v17000_v12  ;;  %vm8707_vm15 = vmor %vm8705_vm14, %vm8706_vm13  ;;  %v7187_v8 = vadd.f32 %v7186_v62, %v16678_v10 }
 0xac1   : > { %8902 = vst [vmem:[%s16784_s12 + $0x1a0] sm:$0xff] %v8683_v0  ;;  %v8702_v38 = vsub.f32 1.0, %v8701_v26  ;;  %v8739_v45 = vand.u32 2147483647, %v16992_v61  ;;  %v8741_v55 = vand.u32 2147483648, %v16992_v61  ;;  %vm8735_vm2 = vweird.f32 %v16992_v61 }
 0xac2   : > { %v7362_v5 = vpop.f32.mrf.mxu2  ;;  %v7275_v57 = vpop.f32.mrf.mxu1  ;;  %v7379_v46 = vadd.f32 %v16886_v6, %v17000_v12 }
 0xac3   : > { %v8703_v13 = vmul.f32 %v10552_v17, %v8702_v38  ;;  %v7363_v27 = vadd.f32 %v7362_v5, %v7274_v3  ;;  %v7276_v40 = vadd.f32 %v7275_v57, %v7187_v8  ;;  %vm8740_vm4 = vcmp.eq.f32.partialorder %v8739_v45, 8.507059e+37 }
 0xac5   : > { %v10554_v28 = vpop.eup %10553  ;;  %v8704_v11 = vadd.f32 %v10552_v17, %v8703_v13  ;;  %v9875_v7 = vmul.f32 -1.442695, %v7363_v27  ;;  %v17015_v27 = vpop.f32.mrf.mxu3 }
 0xac6   : > { %v10556_v52 = vpop.eup %10555  ;;  %v7884_v56 = vadd.f32 1.0, %v10554_v28  ;;  %v7465_v63 = vpop.f32.mrf.mxu0 }
 0xac7   : > { %v8708_v14 = vsel %vm8707_vm15, %v10552_v17, %v8704_v11  ;;  %v8731_v43 = vmul.f32 %v10556_v52, %v16992_v61  ;;  %10557 = vpow2.f32 %v9875_v7  ;;  %v7466_v35 = vadd.f32 %v7465_v63, %v7377_v4 }
 0xac8   : > { %v8713_v24 = vsel %vm8710_vm0, %v8712_v44, %v8708_v14  ;;  %10559 = vrcp.f32 %v7884_v56  ;;  %vm8736_vm1 = vweird.f32 %v10556_v52  ;;  %v8771_v19 = vand.u32 2147483648, %v7884_v56 }
 0xac9   : > { %8904 = vst [vmem:[%s16784_s12 + $0x1b0] sm:$0xff] %v8713_v24  ;;  %v8732_v60 = vsub.f32 1.0, %v8731_v43  ;;  %7504 = vmatmul.bf16.gmra.mxu0 %v16668_v31  ;;  %vm8737_vm3 = vmor %vm8735_vm2, %vm8736_vm1  ;;  %v8742_v31 = vor.u32 1.1754944e-38, %v8741_v55  ;;  %v8769_v57 = vand.u32 2147483647, %v7884_v56  ;;  %vm8765_vm6 = vweird.f32 %v7884_v56 }
 0xaca   : > { %v7364_v16 = vpop.f32.mrf.mxu2  ;;  %v7554_v29 = vpop.f32.mrf.mxu1  ;;  %v7382_v63 = vadd.f32 %v16896_v39, %v17000_v12 }
 0xacb   : > { %v8733_v53 = vmul.f32 %v10556_v52, %v8732_v60  ;;  %v7365_v30 = vadd.f32 %v7364_v16, %v7276_v40  ;;  %v7555_v10 = vadd.f32 %v7554_v29, %v7466_v35  ;;  %vm8770_vm8 = vcmp.eq.f32.partialorder %v8769_v57, 8.507059e+37 }
 0xacd   : > { %v10558_v49 = vpop.eup %10557  ;;  %v8734_v17 = vadd.f32 %v10556_v52, %v8733_v53  ;;  %v9877_v34 = vmul.f32 -1.442695, %v7365_v30  ;;  %v9816_v23 = vmul.f32 -1.442695, %v7555_v10  ;;  %7593 = vmatmul.bf16.gmra.mxu1 %v16672_v48 }
 0xace   : > { %v10560_v26 = vpop.eup %10559  ;;  %v7886_v62 = vadd.f32 1.0, %v10558_v49  ;;  %v7467_v3 = vpop.f32.mrf.mxu0 }
 0xacf   : > { %v8738_v0 = vsel %vm8737_vm3, %v10556_v52, %v8734_v17  ;;  %v8761_v38 = vmul.f32 %v10560_v26, %v7884_v56  ;;  %10561 = vpow2.f32 %v9877_v34  ;;  %v7468_v54 = vadd.f32 %v7467_v3, %v7379_v46  ;;  %v17032_v34 = vpop.f32.mrf.mxu3 }
 0xad0   : > { %v8743_v22 = vsel %vm8740_vm4, %v8742_v31, %v8738_v0  ;;  %10563 = vrcp.f32 %v7886_v62  ;;  %vm8766_vm5 = vweird.f32 %v10560_v26  ;;  %v8772_v52 = vor.u32 1.1754944e-38, %v8771_v19 }
 0xad1   : > { %8906 = vst [vmem:[%s16784_s12 + $0x1c0] sm:$0xff] %v8743_v22  ;;  %v8762_v61 = vsub.f32 1.0, %v8761_v38  ;;  %10565 = vpow2.f32 %v9816_v23  ;;  %vm8767_vm7 = vmor %vm8765_vm6, %vm8766_vm5  ;;  %v8801_v40 = vand.u32 2147483648, %v7886_v62  ;;  %v8799_v16 = vand.u32 2147483647, %v7886_v62 }
 0xad2   : > { %v7556_v48 = vpop.f32.mrf.mxu1  ;;  %vm8795_vm10 = vweird.f32 %v7886_v62 }
 0xad3   : > { %v8763_v5 = vmul.f32 %v10560_v26, %v8762_v61  ;;  %v7557_v6 = vadd.f32 %v7556_v48, %v7468_v54  ;;  %v8802_v10 = vor.u32 1.1754944e-38, %v8801_v40  ;;  %vm8800_vm12 = vcmp.eq.f32.partialorder %v8799_v16, 8.507059e+37 }
 0xad5   : > { %v10562_v13 = vpop.eup %10561  ;;  %v8764_v28 = vadd.f32 %v10560_v26, %v8763_v5  ;;  %v9818_v11 = vmul.f32 -1.442695, %v7557_v6 }
 0xad6   : > { %v10564_v7 = vpop.eup %10563  ;;  %v17017_v4 = vadd.f32 1.0, %v10562_v13  ;;  %v7470_v8 = vpop.f32.mrf.mxu0 }
 0xad7   : > { %v10566_v44 = vpop.eup %10565  ;;  %v8768_v14 = vsel %vm8767_vm7, %v10560_v26, %v8764_v28  ;;  %v8791_v43 = vmul.f32 %v10564_v7, %v7886_v62  ;;  %10567 = vpow2.f32 %v9818_v11  ;;  %v7471_v35 = vadd.f32 %v7470_v8, %v7382_v63 }
 0xad8   : > { %v8773_v24 = vsel %vm8770_vm8, %v8772_v52, %v8768_v14  ;;  %10569 = vrcp.f32 %v17017_v4  ;;  %v17023_v60 = vadd.f32 1.0, %v10566_v44  ;;  %vm8796_vm9 = vweird.f32 %v10564_v7 }
 0xad9   : > { %8908 = vst [vmem:[%s16784_s12 + $0x1d0] sm:$0xff] %v8773_v24  ;;  %v8792_v56 = vsub.f32 1.0, %v8791_v43  ;;  %7509 = vmatmul.bf16.gmra.mxu0 %v16682_v21  ;;  %vm8797_vm11 = vmor %vm8795_vm10, %vm8796_vm9  ;;  %v7384_v21 = vadd.f32 %v16904_v32, %v17000_v12  ;;  %v8831_v38 = vand.u32 2147483648, %v17017_v4  ;;  %v8829_v61 = vand.u32 2147483647, %v17017_v4  ;;  %v17047_v24 = vpop.f32.mrf.mxu3 }
 0xada   : > { %v7559_v45 = vpop.f32.mrf.mxu1  ;;  %10571 = vrcp.f32 %v17023_v60  ;;  %vm8825_vm14 = vweird.f32 %v17017_v4  ;;  %v7914_v5 = vand.u32 2147483647, %v17023_v60  ;;  %v7916_v57 = vand.u32 2147483648, %v17023_v60 }
 0xadb   : > { %v8793_v55 = vmul.f32 %v10564_v7, %v8792_v56  ;;  %v7560_v29 = vadd.f32 %v7559_v45, %v7471_v35  ;;  %v7387_v28 = vadd.f32 %v16908_v15, %v17000_v12  ;;  %v8832_v11 = vor.u32 1.1754944e-38, %v8831_v38 }
 0xadc   : > { %vm8830_vm1 = vcmp.eq.f32.partialorder %v8829_v61, 8.507059e+37  ;;  %vm7910_vm2 = vweird.f32 %v17023_v60  ;;  %vm7915_vm4 = vcmp.eq.f32.partialorder %v7914_v5, 8.507059e+37  ;;  %v7917_v15 = vor.u32 1.1754944e-38, %v7916_v57 }
 0xadd   : > { %v10568_v53 = vpop.eup %10567  ;;  %v8794_v39 = vadd.f32 %v10564_v7, %v8793_v55  ;;  %7598 = vmatmul.bf16.gmra.mxu1 %v16700_v47  ;;  %v9820_v17 = vmul.f32 -1.442695, %v7560_v29 }
 0xade   : > { %v10570_v30 = vpop.eup %10569  ;;  %v17028_v49 = vadd.f32 1.0, %v10568_v53  ;;  %v7472_v46 = vpop.f32.mrf.mxu0 }
 0xadf   : > { %v8798_v23 = vsel %vm8797_vm11, %v10564_v7, %v8794_v39  ;;  %v8821_v26 = vmul.f32 %v10570_v30, %v17017_v4  ;;  %v7473_v0 = vadd.f32 %v7472_v46, %v7384_v21  ;;  %vm8826_vm13 = vweird.f32 %v10570_v30 }
 0xae0   : > { %v8803_v31 = vsel %vm8800_vm12, %v8802_v10, %v8798_v23  ;;  %10573 = vrcp.f32 %v17028_v49  ;;  %v10572_v47 = vpop.eup %10571  ;;  %vm8827_vm15 = vmor %vm8825_vm14, %vm8826_vm13  ;;  %v7944_v45 = vand.u32 2147483647, %v17028_v49  ;;  %v7946_v55 = vand.u32 2147483648, %v17028_v49 }
 0xae1   : > { %8910 = vst [vmem:[%s16784_s12 + $0x1e0] sm:$0xff] %v8803_v31  ;;  %v8822_v62 = vsub.f32 1.0, %v8821_v26  ;;  %10575 = vpow2.f32 %v9820_v17  ;;  %v7906_v3 = vmul.f32 %v10572_v47, %v17023_v60  ;;  %vm7911_vm0 = vweird.f32 %v10572_v47 }
 0xae2   : > { %v7561_v32 = vpop.f32.mrf.mxu1  ;;  %vm7912_vm3 = vmor %vm7910_vm2, %vm7911_vm0  ;;  %vm7940_vm6 = vweird.f32 %v17028_v49  ;;  %v7947_v17 = vor.u32 1.1754944e-38, %v7946_v55  ;;  %vm7945_vm8 = vcmp.eq.f32.partialorder %v7944_v45, 8.507059e+37 }
 0xae3   : > { %v8823_v22 = vmul.f32 %v10570_v30, %v8822_v62  ;;  %v7562_v54 = vadd.f32 %v7561_v32, %v7473_v0  ;;  %v7907_v19 = vsub.f32 1.0, %v7906_v3  ;;  %v17059_v0 = vpop.f32.mrf.mxu3 }
 0xae5   : > { %v8824_v48 = vadd.f32 %v10570_v30, %v8823_v22  ;;  %v9822_v6 = vmul.f32 -1.442695, %v7562_v54  ;;  %v7908_v7 = vmul.f32 %v10572_v47, %v7907_v19  ;;  %v7392_v19 = vadd.f32 %v16933_v20, %v17000_v12 }
 0xae6   : > { %v10574_v13 = vpop.eup %10573  ;;  %v7475_v14 = vpop.f32.mrf.mxu0 }
 0xae7   : > { %v10576_v52 = vpop.eup %10575  ;;  %v8828_v44 = vsel %vm8827_vm15, %v10570_v30, %v8824_v48  ;;  %v7936_v4 = vmul.f32 %v10574_v13, %v17028_v49  ;;  %10577 = vpow2.f32 %v9822_v6  ;;  %v7909_v8 = vadd.f32 %v10572_v47, %v7908_v7 }
 0xae8   : > { %v8833_v43 = vsel %vm8830_vm1, %v8832_v11, %v8828_v44  ;;  %v7831_v63 = vadd.f32 1.0, %v10576_v52  ;;  %v7476_v40 = vadd.f32 %v7475_v14, %v7387_v28  ;;  %vm7941_vm5 = vweird.f32 %v10574_v13 }
 0xae9   : > { %8912 = vst [vmem:[%s16784_s12 + $0x1f0] sm:$0xff] %v8833_v43  ;;  %v7937_v56 = vsub.f32 1.0, %v7936_v4  ;;  %v7913_v35 = vsel %vm7912_vm3, %v10572_v47, %v7909_v8  ;;  %7514 = vmatmul.bf16.gmra.mxu0 %v16719_v50  ;;  %vm7942_vm7 = vmor %vm7940_vm6, %vm7941_vm5  ;;  %v7389_v50 = vadd.f32 %v16913_v2, %v17000_v12 }
 0xaea   : > { %10579 = vrcp.f32 %v7831_v63  ;;  %v7564_v16 = vpop.f32.mrf.mxu1  ;;  %v7918_v60 = vsel %vm7915_vm4, %v7917_v15, %v7913_v35  ;;  %v7976_v3 = vand.u32 2147483648, %v7831_v63  ;;  %v7974_v2 = vand.u32 2147483647, %v7831_v63 }
 0xaeb   : > { %v7938_v29 = vmul.f32 %v10574_v13, %v7937_v56  ;;  %v7565_v53 = vadd.f32 %v7564_v16, %v7476_v40  ;;  %8851 = vst [vmem:[%s16784_s12 + $0x8] sm:$0xff] %v7918_v60  ;;  %vm7970_vm10 = vweird.f32 %v7831_v63  ;;  %v7394_v35 = vadd.f32 %v16938_v25, %v17000_v12 }
 0xaec   : > { %vm7975_vm12 = vcmp.eq.f32.partialorder %v7974_v2, 8.507059e+37 }
 0xaed   : > { %v10578_v39 = vpop.eup %10577  ;;  %v7939_v30 = vadd.f32 %v10574_v13, %v7938_v29  ;;  %v9824_v10 = vmul.f32 -1.442695, %v7565_v53  ;;  %7603 = vmatmul.bf16.gmra.mxu1 %v16723_v42 }
 0xaee   : > { %v7833_v21 = vadd.f32 1.0, %v10578_v39  ;;  %v7477_v26 = vpop.f32.mrf.mxu0 }
 0xaef   : > { %v7943_v23 = vsel %vm7942_vm7, %v10574_v13, %v7939_v30  ;;  %10581 = vpow2.f32 %v9824_v10  ;;  %v7478_v62 = vadd.f32 %v7477_v26, %v7389_v50  ;;  %v7977_v13 = vor.u32 1.1754944e-38, %v7976_v3 }
 0xaf0   : > { %v10580_v46 = vpop.eup %10579  ;;  %v7948_v31 = vsel %vm7945_vm8, %v7947_v17, %v7943_v23  ;;  %10583 = vrcp.f32 %v7833_v21  ;;  %v8006_v44 = vand.u32 2147483648, %v7833_v21  ;;  %v8004_v14 = vand.u32 2147483647, %v7833_v21 }
 0xaf1   : > { %8853 = vst [vmem:[%s16784_s12 + $0x18] sm:$0xff] %v7948_v31  ;;  %v7966_v47 = vmul.f32 %v10580_v46, %v7831_v63  ;;  %vm7971_vm9 = vweird.f32 %v10580_v46  ;;  %v17065_v63 = vpop.f32.mrf.mxu3  ;;  %vm8000_vm14 = vweird.f32 %v7833_v21 }
 0xaf2   : > { %v7566_v49 = vpop.f32.mrf.mxu1  ;;  %vm7972_vm11 = vmor %vm7970_vm10, %vm7971_vm9  ;;  %vm8005_vm0 = vcmp.eq.f32.partialorder %v8004_v14, 8.507059e+37 }
 0xaf3   : > { %v7967_v42 = vsub.f32 1.0, %v7966_v47  ;;  %v7567_v38 = vadd.f32 %v7566_v49, %v7478_v62 }
 0xaf5   : > { %v10582_v32 = vpop.eup %10581  ;;  %v7968_v22 = vmul.f32 %v10580_v46, %v7967_v42  ;;  %v9826_v61 = vmul.f32 -1.442695, %v7567_v38 }
 0xaf6   : > { %v10584_v54 = vpop.eup %10583  ;;  %v7835_v48 = vadd.f32 1.0, %v10582_v32  ;;  %v7480_v6 = vpop.f32.mrf.mxu0 }
 0xaf7   : > { %v7969_v5 = vadd.f32 %v10580_v46, %v7968_v22  ;;  %v7996_v57 = vmul.f32 %v10584_v54, %v7833_v21  ;;  %10585 = vpow2.f32 %v9826_v61  ;;  %v7481_v7 = vadd.f32 %v7480_v6, %v7392_v19 }
 0xaf8   : > { %10587 = vrcp.f32 %v7835_v48  ;;  %vm8001_vm13 = vweird.f32 %v10584_v54  ;;  %v8036_v30 = vand.u32 2147483648, %v7835_v48  ;;  %v8034_v17 = vand.u32 2147483647, %v7835_v48 }
 0xaf9   : > { %v7973_v28 = vsel %vm7972_vm11, %v10580_v46, %v7969_v5  ;;  %v7997_v11 = vsub.f32 1.0, %v7996_v57  ;;  %7519 = vmatmul.bf16.gmra.mxu0 %v16755_v51  ;;  %vm8002_vm15 = vmor %vm8000_vm14, %vm8001_vm13  ;;  %v8007_v51 = vor.u32 1.1754944e-38, %v8006_v44  ;;  %vm8030_vm2 = vweird.f32 %v7835_v48  ;;  %v17073_v62 = vpop.f32.mrf.mxu3 }
 0xafa   : > { %v7978_v52 = vsel %vm7975_vm12, %v7977_v13, %v7973_v28  ;;  %v7569_v4 = vpop.f32.mrf.mxu1  ;;  %v7397_v46 = vadd.f32 %v17015_v27, %v17000_v12  ;;  %v8037_v31 = vor.u32 1.1754944e-38, %v8036_v30  ;;  %vm8035_vm4 = vcmp.eq.f32.partialorder %v8034_v17, 8.507059e+37 }
 0xafb   : > { %8855 = vst [vmem:[%s16784_s12 + $0x28] sm:$0xff] %v7978_v52  ;;  %v7998_v20 = vmul.f32 %v10584_v54, %v7997_v11  ;;  %v7570_v43 = vadd.f32 %v7569_v4, %v7481_v7  ;;  %v7399_v13 = vadd.f32 %v17032_v34, %v17000_v12 }
 0xafd   : > { %v10586_v8 = vpop.eup %10585  ;;  %v7999_v15 = vadd.f32 %v10584_v54, %v7998_v20  ;;  %v9828_v56 = vmul.f32 -1.442695, %v7570_v43  ;;  %7608 = vmatmul.bf16.gmra.mxu1 %v16759_v58 }
 0xafe   : > { %v10588_v40 = vpop.eup %10587  ;;  %v7837_v45 = vadd.f32 1.0, %v10586_v8  ;;  %v7482_v60 = vpop.f32.mrf.mxu0 }
 0xaff   : > { %v8003_v55 = vsel %vm8002_vm15, %v10584_v54, %v7999_v15  ;;  %v8026_v16 = vmul.f32 %v10588_v40, %v7835_v48  ;;  %10589 = vpow2.f32 %v9828_v56  ;;  %v7483_v39 = vadd.f32 %v7482_v60, %v7394_v35 }
 0xb00   : > { %v8008_v29 = vsel %vm8005_vm0, %v8007_v51, %v8003_v55  ;;  %10591 = vrcp.f32 %v7837_v45  ;;  %vm8031_vm1 = vweird.f32 %v10588_v40  ;;  %v8066_v2 = vand.u32 2147483648, %v7837_v45 }
 0xb01   : > { %8857 = vst [vmem:[%s16784_s12 + $0x38] sm:$0xff] %v8008_v29  ;;  %v8027_v53 = vsub.f32 1.0, %v8026_v16  ;;  %vm8032_vm3 = vmor %vm8030_vm2, %vm8031_vm1  ;;  %v8064_v54 = vand.u32 2147483647, %v7837_v45  ;;  %vm8060_vm6 = vweird.f32 %v7837_v45  ;;  %v17080_v4 = vpop.f32.mrf.mxu3 }
 0xb02   : > { %v7571_v10 = vpop.f32.mrf.mxu1  ;;  %v8067_v28 = vor.u32 1.1754944e-38, %v8066_v2 }
 0xb03   : > { %v8028_v58 = vmul.f32 %v10588_v40, %v8027_v53  ;;  %v7572_v21 = vadd.f32 %v7571_v10, %v7483_v39  ;;  %vm8065_vm8 = vcmp.eq.f32.partialorder %v8064_v54, 8.507059e+37 }
 0xb05   : > { %v10590_v25 = vpop.eup %10589  ;;  %v8029_v50 = vadd.f32 %v10588_v40, %v8028_v58  ;;  %v9830_v23 = vmul.f32 -1.442695, %v7572_v21 }
 0xb06   : > { %v10592_v26 = vpop.eup %10591  ;;  %v7839_v47 = vadd.f32 1.0, %v10590_v25  ;;  %v7485_v38 = vpop.f32.mrf.mxu0 }
 0xb07   : > { %v8033_v49 = vsel %vm8032_vm3, %v10588_v40, %v8029_v50  ;;  %v8056_v42 = vmul.f32 %v10592_v26, %v7837_v45  ;;  %10593 = vpow2.f32 %v9830_v23  ;;  %v7486_v22 = vadd.f32 %v7485_v38, %v7397_v46 }
 0xb08   : > { %v8038_v3 = vsel %vm8035_vm4, %v8037_v31, %v8033_v49  ;;  %10595 = vrcp.f32 %v7839_v47  ;;  %vm8061_vm5 = vweird.f32 %v10592_v26  ;;  %v8094_v34 = vand.u32 2147483647, %v7839_v47 }
 0xb09   : > { %8859 = vst [vmem:[%s16784_s12 + $0x48] sm:$0xff] %v8038_v3  ;;  %v8057_v32 = vsub.f32 1.0, %v8056_v42  ;;  %7524 = vmatmul.bf16.gmra.mxu0 %v16789_v37  ;;  %vm8062_vm7 = vmor %vm8060_vm6, %vm8061_vm5  ;;  %vm8090_vm10 = vweird.f32 %v7839_v47  ;;  %v7402_v45 = vadd.f32 %v17047_v24, %v17000_v12  ;;  %v17087_v21 = vpop.f32.mrf.mxu3 }
 0xb0a   : > { %v7574_v61 = vpop.f32.mrf.mxu1  ;;  %vm8095_vm12 = vcmp.eq.f32.partialorder %v8094_v34, 8.507059e+37 }
 0xb0b   : > { %v8058_v27 = vmul.f32 %v10592_v26, %v8057_v32  ;;  %v7575_v19 = vadd.f32 %v7574_v61, %v7486_v22 }
 0xb0d   : > { %v10594_v48 = vpop.eup %10593  ;;  %v8059_v5 = vadd.f32 %v10592_v26, %v8058_v27  ;;  %v9832_v57 = vmul.f32 -1.442695, %v7575_v19  ;;  %7613 = vmatmul.bf16.gmra.mxu1 %v16793_v41  ;;  %v8096_v41 = vand.u32 2147483648, %v7839_v47 }
 0xb0e   : > { %v10596_v6 = vpop.eup %10595  ;;  %v7841_v11 = vadd.f32 1.0, %v10594_v48  ;;  %v7487_v52 = vpop.f32.mrf.mxu0 }
 0xb0f   : > { %v8063_v37 = vsel %vm8062_vm7, %v10592_v26, %v8059_v5  ;;  %v8086_v7 = vmul.f32 %v10596_v6, %v7839_v47  ;;  %10597 = vpow2.f32 %v9832_v57  ;;  %v7488_v14 = vadd.f32 %v7487_v52, %v7399_v13 }
 0xb10   : > { %v8068_v44 = vsel %vm8065_vm8, %v8067_v28, %v8063_v37  ;;  %10599 = vrcp.f32 %v7841_v11  ;;  %vm8091_vm9 = vweird.f32 %v10596_v6  ;;  %v8097_v55 = vor.u32 1.1754944e-38, %v8096_v41 }
 0xb11   : > { %8861 = vst [vmem:[%s16784_s12 + $0x58] sm:$0xff] %v8068_v44  ;;  %v8087_v20 = vsub.f32 1.0, %v8086_v7  ;;  %vm8092_vm11 = vmor %vm8090_vm10, %vm8091_vm9  ;;  %v8126_v58 = vand.u32 2147483648, %v7841_v11  ;;  %v8124_v25 = vand.u32 2147483647, %v7841_v11  ;;  %vm8120_vm14 = vweird.f32 %v7841_v11  ;;  %v17093_v48 = vpop.f32.mrf.mxu3 }
 0xb12   : > { %v7576_v43 = vpop.f32.mrf.mxu1  ;;  %v7404_v47 = vadd.f32 %v17059_v0, %v17000_v12  ;;  %v7407_v13 = vadd.f32 %v17065_v63, %v17000_v12 }
 0xb13   : > { %v8088_v8 = vmul.f32 %v10596_v6, %v8087_v20  ;;  %v7577_v15 = vadd.f32 %v7576_v43, %v7488_v14  ;;  %vm8125_vm0 = vcmp.eq.f32.partialorder %v8124_v25, 8.507059e+37 }
 0xb15   : > { %v10598_v56 = vpop.eup %10597  ;;  %v8089_v40 = vadd.f32 %v10596_v6, %v8088_v8  ;;  %v9834_v35 = vmul.f32 -1.442695, %v7577_v15 }
 0xb16   : > { %v10600_v51 = vpop.eup %10599  ;;  %v7843_v16 = vadd.f32 1.0, %v10598_v56  ;;  %v7490_v53 = vpop.f32.mrf.mxu0 }
 0xb17   : > { %v8093_v60 = vsel %vm8092_vm11, %v10596_v6, %v8089_v40  ;;  %v8116_v29 = vmul.f32 %v10600_v51, %v7841_v11  ;;  %10601 = vpow2.f32 %v9834_v35  ;;  %v7491_v10 = vadd.f32 %v7490_v53, %v7402_v45 }
 0xb18   : > { %v8098_v39 = vsel %vm8095_vm12, %v8097_v55, %v8093_v60  ;;  %10603 = vrcp.f32 %v7843_v16  ;;  %vm8121_vm13 = vweird.f32 %v10600_v51  ;;  %v8156_v61 = vand.u32 2147483648, %v7843_v16 }
 0xb19   : > { %8863 = vst [vmem:[%s16784_s12 + $0x68] sm:$0xff] %v8098_v39  ;;  %v8117_v30 = vsub.f32 1.0, %v8116_v29  ;;  %7529 = vmatmul.bf16.gmra.mxu0 %v16824_v59  ;;  %vm8122_vm15 = vmor %vm8120_vm14, %vm8121_vm13  ;;  %v8127_v59 = vor.u32 1.1754944e-38, %v8126_v58  ;;  %v8154_v54 = vand.u32 2147483647, %v7843_v16  ;;  %vm8150_vm2 = vweird.f32 %v7843_v16 }
 0xb1a   : > { %v7579_v17 = vpop.f32.mrf.mxu1  ;;  %v8157_v28 = vor.u32 1.1754944e-38, %v8156_v61 }
 0xb1b   : > { %v8118_v24 = vmul.f32 %v10600_v51, %v8117_v30  ;;  %v7580_v50 = vadd.f32 %v7579_v17, %v7491_v10  ;;  %vm8155_vm4 = vcmp.eq.f32.partialorder %v8154_v54, 8.507059e+37 }
 0xb1d   : > { %v10602_v23 = vpop.eup %10601  ;;  %v8119_v26 = vadd.f32 %v10600_v51, %v8118_v24  ;;  %v9836_v46 = vmul.f32 -1.442695, %v7580_v50  ;;  %7618 = vmatmul.bf16.gmra.mxu1 %v16828_v33 }
 0xb1e   : > { %v10604_v31 = vpop.eup %10603  ;;  %v7845_v49 = vadd.f32 1.0, %v10602_v23  ;;  %v7492_v3 = vpop.f32.mrf.mxu0 }
 0xb1f   : > { %v8123_v42 = vsel %vm8122_vm15, %v10600_v51, %v8119_v26  ;;  %v8146_v38 = vmul.f32 %v10604_v31, %v7843_v16  ;;  %10605 = vpow2.f32 %v9836_v46  ;;  %v7493_v2 = vadd.f32 %v7492_v3, %v7404_v47 }
 0xb20   : > { %v8128_v32 = vsel %vm8125_vm0, %v8127_v59, %v8123_v42  ;;  %10607 = vrcp.f32 %v7845_v49  ;;  %vm8151_vm1 = vweird.f32 %v10604_v31  ;;  %v8186_v41 = vand.u32 2147483648, %v7845_v49 }
 0xb21   : > { %8865 = vst [vmem:[%s16784_s12 + $0x78] sm:$0xff] %v8128_v32  ;;  %v8147_v22 = vsub.f32 1.0, %v8146_v38  ;;  %vm8152_vm3 = vmor %vm8150_vm2, %vm8151_vm1  ;;  %v8184_v63 = vand.u32 2147483647, %v7845_v49  ;;  %vm8180_vm6 = vweird.f32 %v7845_v49  ;;  %v7409_v51 = vadd.f32 %v17073_v62, %v17000_v12 }
 0xb22   : > { %v7581_v27 = vpop.f32.mrf.mxu1  ;;  %v8187_v45 = vor.u32 1.1754944e-38, %v8186_v41  ;;  %v7412_v26 = vadd.f32 %v17080_v4, %v17000_v12 }
 0xb23   : > { %v8148_v33 = vmul.f32 %v10604_v31, %v8147_v22  ;;  %v7582_v19 = vadd.f32 %v7581_v27, %v7493_v2  ;;  %vm8185_vm8 = vcmp.eq.f32.partialorder %v8184_v63, 8.507059e+37 }
 0xb25   : > { %v10606_v0 = vpop.eup %10605  ;;  %v8149_v5 = vadd.f32 %v10604_v31, %v8148_v33  ;;  %v9838_v57 = vmul.f32 -1.442695, %v7582_v19 }
 0xb26   : > { %v10608_v6 = vpop.eup %10607  ;;  %v7847_v11 = vadd.f32 1.0, %v10606_v0  ;;  %v7495_v52 = vpop.f32.mrf.mxu0 }
 0xb27   : > { %v8153_v37 = vsel %vm8152_vm3, %v10604_v31, %v8149_v5  ;;  %v8176_v7 = vmul.f32 %v10608_v6, %v7845_v49  ;;  %10609 = vpow2.f32 %v9838_v57  ;;  %v7496_v14 = vadd.f32 %v7495_v52, %v7407_v13 }
 0xb28   : > { %v8158_v44 = vsel %vm8155_vm4, %v8157_v28, %v8153_v37  ;;  %10611 = vrcp.f32 %v7847_v11  ;;  %vm8181_vm5 = vweird.f32 %v10608_v6  ;;  %v8214_v62 = vand.u32 2147483647, %v7847_v11 }
 0xb29   : > { %8867 = vst [vmem:[%s16784_s12 + $0x88] sm:$0xff] %v8158_v44  ;;  %v8177_v20 = vsub.f32 1.0, %v8176_v7  ;;  %7534 = vmatmul.bf16.gmra.mxu0 %v16854_v18  ;;  %vm8182_vm7 = vmor %vm8180_vm6, %vm8181_vm5  ;;  %v17102_v18 = vpop.f32.mrf.mxu3  ;;  %vm8210_vm10 = vweird.f32 %v7847_v11  ;;  %v7414_v5 = vadd.f32 %v17087_v21, %v17000_v12 }
 0xb2a   : > { %v7584_v43 = vpop.f32.mrf.mxu1  ;;  %vm8215_vm12 = vcmp.eq.f32.partialorder %v8214_v62, 8.507059e+37 }
 0xb2b   : > { %v8178_v8 = vmul.f32 %v10608_v6, %v8177_v20  ;;  %v7585_v34 = vadd.f32 %v7584_v43, %v7496_v14 }
 0xb2d   : > { %v10610_v15 = vpop.eup %10609  ;;  %v8179_v56 = vadd.f32 %v10608_v6, %v8178_v8  ;;  %v9840_v40 = vmul.f32 -1.442695, %v7585_v34  ;;  %7623 = vmatmul.bf16.gmra.mxu1 %v16858_v36  ;;  %v8216_v36 = vand.u32 2147483648, %v7847_v11  ;;  %v7417_v34 = vadd.f32 %v17093_v48, %v17000_v12 }
 0xb2e   : > { %v10612_v35 = vpop.eup %10611  ;;  %v7849_v55 = vadd.f32 1.0, %v10610_v15  ;;  %v7497_v29 = vpop.f32.mrf.mxu0 }
 0xb2f   : > { %v8183_v16 = vsel %vm8182_vm7, %v10608_v6, %v8179_v56  ;;  %v8206_v60 = vmul.f32 %v10612_v35, %v7847_v11  ;;  %10613 = vpow2.f32 %v9840_v40  ;;  %v7498_v30 = vadd.f32 %v7497_v29, %v7409_v51 }
 0xb30   : > { %v8188_v53 = vsel %vm8185_vm8, %v8187_v45, %v8183_v16  ;;  %10615 = vrcp.f32 %v7849_v55  ;;  %vm8211_vm9 = vweird.f32 %v10612_v35  ;;  %v8217_v46 = vor.u32 1.1754944e-38, %v8216_v36 }
 0xb31   : > { %8869 = vst [vmem:[%s16784_s12 + $0x98] sm:$0xff] %v8188_v53  ;;  %v8207_v39 = vsub.f32 1.0, %v8206_v60  ;;  %vm8212_vm11 = vmor %vm8210_vm10, %vm8211_vm9  ;;  %v17107_v38 = vpop.f32.mrf.mxu3  ;;  %v8246_v22 = vand.u32 2147483648, %v7849_v55  ;;  %v8244_v61 = vand.u32 2147483647, %v7849_v55  ;;  %vm8240_vm14 = vweird.f32 %v7849_v55 }
 0xb32   : > { %v7586_v10 = vpop.f32.mrf.mxu1 }
 0xb33   : > { %v8208_v58 = vmul.f32 %v10612_v35, %v8207_v39  ;;  %v7587_v17 = vadd.f32 %v7586_v10, %v7498_v30  ;;  %v8247_v57 = vor.u32 1.1754944e-38, %v8246_v22  ;;  %vm8245_vm0 = vcmp.eq.f32.partialorder %v8244_v61, 8.507059e+37 }
 0xb34   : > { %v7422_v61 = vadd.f32 %v17107_v38, %v17000_v12 }
 0xb35   : > { %v10614_v24 = vpop.eup %10613  ;;  %v8209_v25 = vadd.f32 %v10612_v35, %v8208_v58  ;;  %v9842_v50 = vmul.f32 -1.442695, %v7587_v17  ;;  %v7419_v17 = vadd.f32 %v17102_v18, %v17000_v12 }
 0xb36   : > { %v10616_v23 = vpop.eup %10615  ;;  %v7851_v31 = vadd.f32 1.0, %v10614_v24  ;;  %v7500_v49 = vpop.f32.mrf.mxu0 }
 0xb37   : > { %v8213_v47 = vsel %vm8212_vm11, %v10612_v35, %v8209_v25  ;;  %v8236_v59 = vmul.f32 %v10616_v23, %v7849_v55  ;;  %10617 = vpow2.f32 %v9842_v50  ;;  %v7501_v32 = vadd.f32 %v7500_v49, %v7412_v26 }
 0xb38   : > { %v8218_v42 = vsel %vm8215_vm12, %v8217_v46, %v8213_v47  ;;  %10619 = vrcp.f32 %v7851_v31  ;;  %vm8241_vm13 = vweird.f32 %v10616_v23  ;;  %v8276_v52 = vand.u32 2147483648, %v7851_v31 }
 0xb39   : > { %8871 = vst [vmem:[%s16784_s12 + $0xa8] sm:$0xff] %v8218_v42  ;;  %v8237_v3 = vsub.f32 1.0, %v8236_v59  ;;  %7539 = vmatmul.bf16.gmra.mxu0 %v16884_v1  ;;  %vm8242_vm15 = vmor %vm8240_vm14, %vm8241_vm13  ;;  %v8274_v21 = vand.u32 2147483647, %v7851_v31  ;;  %vm8270_vm2 = vweird.f32 %v7851_v31 }
 0xb3a   : > { %v7589_v2 = vpop.f32.mrf.mxu1  ;;  %v8277_v15 = vor.u32 1.1754944e-38, %v8276_v52 }
 0xb3b   : > { %v8238_v4 = vmul.f32 %v10616_v23, %v8237_v3  ;;  %v7590_v27 = vadd.f32 %v7589_v2, %v7501_v32  ;;  %vm8275_vm4 = vcmp.eq.f32.partialorder %v8274_v21, 8.507059e+37 }
 0xb3d   : > { %v10618_v33 = vpop.eup %10617  ;;  %v8239_v54 = vadd.f32 %v10616_v23, %v8238_v4  ;;  %v9844_v19 = vmul.f32 -1.442695, %v7590_v27  ;;  %7628 = vmatmul.bf16.gmra.mxu1 %v16891_v9  ;;  %v17115_v9 = vpop.f32.mrf.mxu3 }
 0xb3e   : > { %v10620_v0 = vpop.eup %10619  ;;  %v7853_v6 = vadd.f32 1.0, %v10618_v33  ;;  %v7502_v28 = vpop.f32.mrf.mxu0  ;;  %v7424_v21 = vadd.f32 %v17115_v9, %v17000_v12 }
 0xb3f   : > { %v8243_v1 = vsel %vm8242_vm15, %v10616_v23, %v8239_v54  ;;  %v8266_v13 = vmul.f32 %v10620_v0, %v7851_v31  ;;  %10621 = vpow2.f32 %v9844_v19  ;;  %v7503_v7 = vadd.f32 %v7502_v28, %v7414_v5 }
 0xb40   : > { %v8248_v11 = vsel %vm8245_vm0, %v8247_v57, %v8243_v1  ;;  %10623 = vrcp.f32 %v7853_v6  ;;  %vm8271_vm1 = vweird.f32 %v10620_v0  ;;  %v8306_v60 = vand.u32 2147483648, %v7853_v6 }
 0xb41   : > { %8873 = vst [vmem:[%s16784_s12 + $0xb8] sm:$0xff] %v8248_v11  ;;  %v8267_v37 = vsub.f32 1.0, %v8266_v13  ;;  %vm8272_vm3 = vmor %vm8270_vm2, %vm8271_vm1  ;;  %v8304_v39 = vand.u32 2147483647, %v7853_v6  ;;  %vm8300_vm6 = vweird.f32 %v7853_v6 }
 0xb42   : > { %v7591_v44 = vpop.f32.mrf.mxu1  ;;  %v8307_v24 = vor.u32 1.1754944e-38, %v8306_v60 }
 0xb43   : > { %v8268_v20 = vmul.f32 %v10620_v0, %v8267_v37  ;;  %v7592_v14 = vadd.f32 %v7591_v44, %v7503_v7  ;;  %vm8305_vm8 = vcmp.eq.f32.partialorder %v8304_v39, 8.507059e+37 }
 0xb45   : > { %v10622_v41 = vpop.eup %10621  ;;  %v8269_v43 = vadd.f32 %v10620_v0, %v8268_v20  ;;  %v9846_v8 = vmul.f32 -1.442695, %v7592_v14  ;;  %v17120_v36 = vpop.f32.mrf.mxu3 }
 0xb46   : > { %v10624_v63 = vpop.eup %10623  ;;  %v7855_v56 = vadd.f32 1.0, %v10622_v41  ;;  %v7505_v51 = vpop.f32.mrf.mxu0  ;;  %v7427_v39 = vadd.f32 %v17120_v36, %v17000_v12 }
 0xb47   : > { %v8273_v40 = vsel %vm8272_vm3, %v10620_v0, %v8269_v43  ;;  %v8296_v35 = vmul.f32 %v10624_v63, %v7853_v6  ;;  %10625 = vpow2.f32 %v9846_v8  ;;  %v7506_v16 = vadd.f32 %v7505_v51, %v7417_v34 }
 0xb48   : > { %v8278_v45 = vsel %vm8275_vm4, %v8277_v15, %v8273_v40  ;;  %10627 = vrcp.f32 %v7855_v56  ;;  %vm8301_vm5 = vweird.f32 %v10624_v63  ;;  %v8336_v59 = vand.u32 2147483648, %v7855_v56 }
 0xb49   : > { %8875 = vst [vmem:[%s16784_s12 + $0xc8] sm:$0xff] %v8278_v45  ;;  %v8297_v55 = vsub.f32 1.0, %v8296_v35  ;;  %vm8302_vm7 = vmor %vm8300_vm6, %vm8301_vm5  ;;  %v8334_v3 = vand.u32 2147483647, %v7855_v56  ;;  %vm8330_vm10 = vweird.f32 %v7855_v56 }
 0xb4a   : > { %v7594_v29 = vpop.f32.mrf.mxu1  ;;  %v8337_v27 = vor.u32 1.1754944e-38, %v8336_v59 }
 0xb4b   : > { %v8298_v53 = vmul.f32 %v10624_v63, %v8297_v55  ;;  %v7595_v30 = vadd.f32 %v7594_v29, %v7506_v16  ;;  %vm8335_vm12 = vcmp.eq.f32.partialorder %v8334_v3, 8.507059e+37 }
 0xb4d   : > { %v10626_v48 = vpop.eup %10625  ;;  %v8299_v10 = vadd.f32 %v10624_v63, %v8298_v53  ;;  %v9848_v58 = vmul.f32 -1.442695, %v7595_v30  ;;  %v17127_v54 = vpop.f32.mrf.mxu3 }
 0xb4e   : > { %v10628_v62 = vpop.eup %10627  ;;  %v7857_v25 = vadd.f32 1.0, %v10626_v48  ;;  %v7507_v26 = vpop.f32.mrf.mxu0  ;;  %v7429_v3 = vadd.f32 %v17127_v54, %v17000_v12 }
 0xb4f   : > { %v8303_v50 = vsel %vm8302_vm7, %v10624_v63, %v8299_v10  ;;  %v8326_v23 = vmul.f32 %v10628_v62, %v7855_v56  ;;  %10629 = vpow2.f32 %v9848_v58  ;;  %v7508_v47 = vadd.f32 %v7507_v26, %v7419_v17 }
 0xb50   : > { %v8308_v46 = vsel %vm8305_vm8, %v8307_v24, %v8303_v50  ;;  %10631 = vrcp.f32 %v7857_v25  ;;  %vm8331_vm9 = vweird.f32 %v10628_v62  ;;  %v8366_v13 = vand.u32 2147483648, %v7857_v25 }
 0xb51   : > { %8877 = vst [vmem:[%s16784_s12 + $0xd8] sm:$0xff] %v8308_v46  ;;  %v8327_v31 = vsub.f32 1.0, %v8326_v23  ;;  %vm8332_vm11 = vmor %vm8330_vm10, %vm8331_vm9  ;;  %v8364_v38 = vand.u32 2147483647, %v7857_v25  ;;  %vm8360_vm14 = vweird.f32 %v7857_v25 }
 0xb52   : > { %v7596_v49 = vpop.f32.mrf.mxu1  ;;  %v8367_v14 = vor.u32 1.1754944e-38, %v8366_v13 }
 0xb53   : > { %v8328_v42 = vmul.f32 %v10628_v62, %v8327_v31  ;;  %v7597_v32 = vadd.f32 %v7596_v49, %v7508_v47  ;;  %vm8365_vm0 = vcmp.eq.f32.partialorder %v8364_v38, 8.507059e+37 }
 0xb55   : > { %v10630_v18 = vpop.eup %10629  ;;  %v8329_v22 = vadd.f32 %v10628_v62, %v8328_v42  ;;  %v9850_v2 = vmul.f32 -1.442695, %v7597_v32  ;;  %v17132_v15 = vpop.f32.mrf.mxu3 }
 0xb56   : > { %v10632_v4 = vpop.eup %10631  ;;  %v7859_v33 = vadd.f32 1.0, %v10630_v18  ;;  %v7510_v5 = vpop.f32.mrf.mxu0  ;;  %v7432_v38 = vadd.f32 %v17132_v15, %v17000_v12 }
 0xb57   : > { %v8333_v19 = vsel %vm8332_vm11, %v10628_v62, %v8329_v22  ;;  %v8356_v0 = vmul.f32 %v10632_v4, %v7857_v25  ;;  %10633 = vpow2.f32 %v9850_v2  ;;  %v7511_v1 = vadd.f32 %v7510_v5, %v7422_v61 }
 0xb58   : > { %v8338_v57 = vsel %vm8335_vm12, %v8337_v27, %v8333_v19  ;;  %10635 = vrcp.f32 %v7859_v33  ;;  %vm8361_vm13 = vweird.f32 %v10632_v4  ;;  %v8396_v35 = vand.u32 2147483648, %v7859_v33 }
 0xb59   : > { %8879 = vst [vmem:[%s16784_s12 + $0xe8] sm:$0xff] %v8338_v57  ;;  %v8357_v6 = vsub.f32 1.0, %v8356_v0  ;;  %vm8362_vm15 = vmor %vm8360_vm14, %vm8361_vm13  ;;  %v8394_v9 = vand.u32 2147483647, %v7859_v33  ;;  %vm8390_vm2 = vweird.f32 %v7859_v33 }
 0xb5a   : > { %v7599_v28 = vpop.f32.mrf.mxu1  ;;  %v8397_v30 = vor.u32 1.1754944e-38, %v8396_v35 }
 0xb5b   : > { %v8358_v11 = vmul.f32 %v10632_v4, %v8357_v6  ;;  %v7600_v37 = vadd.f32 %v7599_v28, %v7511_v1  ;;  %vm8395_vm4 = vcmp.eq.f32.partialorder %v8394_v9, 8.507059e+37 }
 0xb5d   : > { %v10634_v7 = vpop.eup %10633  ;;  %v8359_v52 = vadd.f32 %v10632_v4, %v8358_v11  ;;  %v9852_v44 = vmul.f32 -1.442695, %v7600_v37  ;;  %v7433_v26 = vpop.f32.mrf.mxu3 }
 0xb5e   : > { %v10636_v20 = vpop.eup %10635  ;;  %v7861_v41 = vadd.f32 1.0, %v10634_v7  ;;  %v7512_v63 = vpop.f32.mrf.mxu0 }
 0xb5f   : > { %v8363_v43 = vsel %vm8362_vm15, %v10632_v4, %v8359_v52  ;;  %v8386_v8 = vmul.f32 %v10636_v20, %v7859_v33  ;;  %10637 = vpow2.f32 %v9852_v44  ;;  %v7513_v40 = vadd.f32 %v7512_v63, %v7424_v21 }
 0xb60   : > { %v8368_v34 = vsel %vm8365_vm0, %v8367_v14, %v8363_v43  ;;  %10639 = vrcp.f32 %v7861_v41  ;;  %vm8391_vm1 = vweird.f32 %v10636_v20  ;;  %v8426_v50 = vand.u32 2147483648, %v7861_v41 }
 0xb61   : > { %8881 = vst [vmem:[%s16784_s12 + $0xf8] sm:$0xff] %v8368_v34  ;;  %v8387_v56 = vsub.f32 1.0, %v8386_v8  ;;  %vm8392_vm3 = vmor %vm8390_vm2, %vm8391_vm1  ;;  %v8424_v31 = vand.u32 2147483647, %v7861_v41  ;;  %vm8420_vm6 = vweird.f32 %v7861_v41 }
 0xb62   : > { %v7601_v51 = vpop.f32.mrf.mxu1  ;;  %v8427_v32 = vor.u32 1.1754944e-38, %v8426_v50 }
 0xb63   : > { %v8388_v45 = vmul.f32 %v10636_v20, %v8387_v56  ;;  %v7602_v55 = vadd.f32 %v7601_v51, %v7513_v40  ;;  %vm8425_vm8 = vcmp.eq.f32.partialorder %v8424_v31, 8.507059e+37 }
 0xb65   : > { %v10638_v16 = vpop.eup %10637  ;;  %v8389_v60 = vadd.f32 %v10636_v20, %v8388_v45  ;;  %v9854_v29 = vmul.f32 -1.442695, %v7602_v55  ;;  %v7436_v1 = vpop.f32.mrf.mxu3  ;;  %v7434_v45 = vadd.f32 %v7433_v26, %v17000_v12 }
 0xb66   : > { %v10640_v53 = vpop.eup %10639  ;;  %v7863_v48 = vadd.f32 1.0, %v10638_v16  ;;  %v7515_v62 = vpop.f32.mrf.mxu0 }
 0xb67   : > { %v8393_v10 = vsel %vm8392_vm3, %v10636_v20, %v8389_v60  ;;  %v8416_v58 = vmul.f32 %v10640_v53, %v7861_v41  ;;  %10641 = vpow2.f32 %v9854_v29  ;;  %v7516_v25 = vadd.f32 %v7515_v62, %v7427_v39 }
 0xb68   : > { %v8398_v17 = vsel %vm8395_vm4, %v8397_v30, %v8393_v10  ;;  %10643 = vrcp.f32 %v7863_v48  ;;  %vm8421_vm5 = vweird.f32 %v10640_v53  ;;  %v8456_v19 = vand.u32 2147483648, %v7863_v48 }
 0xb69   : > { %8883 = vst [vmem:[%s16784_s12 + $0x108] sm:$0xff] %v8398_v17  ;;  %v8417_v24 = vsub.f32 1.0, %v8416_v58  ;;  %vm8422_vm7 = vmor %vm8420_vm6, %vm8421_vm5  ;;  %v8454_v57 = vand.u32 2147483647, %v7863_v48  ;;  %vm8450_vm10 = vweird.f32 %v7863_v48 }
 0xb6a   : > { %v7604_v23 = vpop.f32.mrf.mxu1  ;;  %v8457_v37 = vor.u32 1.1754944e-38, %v8456_v19 }
 0xb6b   : > { %v8418_v46 = vmul.f32 %v10640_v53, %v8417_v24  ;;  %v7605_v36 = vadd.f32 %v7604_v23, %v7516_v25  ;;  %vm8455_vm12 = vcmp.eq.f32.partialorder %v8454_v57, 8.507059e+37 }
 0xb6d   : > { %v10642_v47 = vpop.eup %10641  ;;  %v8419_v59 = vadd.f32 %v10640_v53, %v8418_v46  ;;  %v9856_v49 = vmul.f32 -1.442695, %v7605_v36  ;;  %v7438_v16 = vpop.f32.mrf.mxu3  ;;  %v7437_v46 = vadd.f32 %v7436_v1, %v17000_v12 }
 0xb6e   : > { %v10644_v42 = vpop.eup %10643  ;;  %v7865_v18 = vadd.f32 1.0, %v10642_v47  ;;  %v7517_v4 = vpop.f32.mrf.mxu0  ;;  %v7439_v57 = vadd.f32 %v7438_v16, %v17000_v12 }
 0xb6f   : > { %v8423_v22 = vsel %vm8422_vm7, %v10640_v53, %v8419_v59  ;;  %v8446_v2 = vmul.f32 %v10644_v42, %v7863_v48  ;;  %10645 = vpow2.f32 %v9856_v49  ;;  %v7518_v33 = vadd.f32 %v7517_v4, %v7429_v3 }
 0xb70   : > { %v8428_v61 = vsel %vm8425_vm8, %v8427_v32, %v8423_v22  ;;  %10647 = vrcp.f32 %v7865_v18  ;;  %vm8451_vm9 = vweird.f32 %v10644_v42  ;;  %v8486_v43 = vand.u32 2147483648, %v7865_v18 }
 0xb71   : > { %8885 = vst [vmem:[%s16784_s12 + $0x118] sm:$0xff] %v8428_v61  ;;  %v8447_v27 = vsub.f32 1.0, %v8446_v2  ;;  %vm8452_vm11 = vmor %vm8450_vm10, %vm8451_vm9  ;;  %v8484_v34 = vand.u32 2147483647, %v7865_v18  ;;  %vm8480_vm14 = vweird.f32 %v7865_v18 }
 0xb72   : > { %v7606_v0 = vpop.f32.mrf.mxu1  ;;  %v8487_v9 = vor.u32 1.1754944e-38, %v8486_v43 }
 0xb73   : > { %v8448_v5 = vmul.f32 %v10644_v42, %v8447_v27  ;;  %v7607_v6 = vadd.f32 %v7606_v0, %v7518_v33  ;;  %vm8485_vm0 = vcmp.eq.f32.partialorder %v8484_v34, 8.507059e+37 }
 0xb75   : > { %v10646_v54 = vpop.eup %10645  ;;  %v8449_v13 = vadd.f32 %v10644_v42, %v8448_v5  ;;  %v9858_v28 = vmul.f32 -1.442695, %v7607_v6  ;;  %v7441_v3 = vpop.f32.mrf.mxu3 }
 0xb76   : > { %v10648_v11 = vpop.eup %10647  ;;  %v7867_v7 = vadd.f32 1.0, %v10646_v54  ;;  %v7520_v20 = vpop.f32.mrf.mxu0  ;;  %v7442_v34 = vadd.f32 %v7441_v3, %v17000_v12 }
 0xb77   : > { %v8453_v52 = vsel %vm8452_vm11, %v10644_v42, %v8449_v13  ;;  %v8476_v44 = vmul.f32 %v10648_v11, %v7865_v18  ;;  %10649 = vpow2.f32 %v9858_v28  ;;  %v7521_v41 = vadd.f32 %v7520_v20, %v7432_v38 }
 0xb78   : > { %v8458_v21 = vsel %vm8455_vm12, %v8457_v37, %v8453_v52  ;;  %10651 = vrcp.f32 %v7867_v7  ;;  %vm8481_vm13 = vweird.f32 %v10648_v11  ;;  %v8516_v10 = vand.u32 2147483648, %v7867_v7 }
 0xb79   : > { %8887 = vst [vmem:[%s16784_s12 + $0x128] sm:$0xff] %v8458_v21  ;;  %v8477_v14 = vsub.f32 1.0, %v8476_v44  ;;  %vm8482_vm15 = vmor %vm8480_vm14, %vm8481_vm13  ;;  %v8514_v17 = vand.u32 2147483647, %v7867_v7  ;;  %vm8510_vm2 = vweird.f32 %v7867_v7 }
 0xb7a   : > { %v7609_v8 = vpop.f32.mrf.mxu1  ;;  %v8517_v31 = vor.u32 1.1754944e-38, %v8516_v10 }
 0xb7b   : > { %v8478_v63 = vmul.f32 %v10648_v11, %v8477_v14  ;;  %v7610_v56 = vadd.f32 %v7609_v8, %v7521_v41  ;;  %vm8515_vm4 = vcmp.eq.f32.partialorder %v8514_v17, 8.507059e+37 }
 0xb7d   : > { %v10650_v15 = vpop.eup %10649  ;;  %v8479_v40 = vadd.f32 %v10648_v11, %v8478_v63  ;;  %v9860_v35 = vmul.f32 -1.442695, %v7610_v56  ;;  %v7443_v44 = vpop.f32.mrf.mxu3 }
 0xb7e   : > { %v10652_v51 = vpop.eup %10651  ;;  %v7869_v55 = vadd.f32 1.0, %v10650_v15  ;;  %v7522_v53 = vpop.f32.mrf.mxu0  ;;  %v7444_v17 = vadd.f32 %v7443_v44, %v17000_v12 }
 0xb7f   : > { %v8483_v60 = vsel %vm8482_vm15, %v10648_v11, %v8479_v40  ;;  %v8506_v29 = vmul.f32 %v10652_v51, %v7867_v7  ;;  %10653 = vpow2.f32 %v9860_v35  ;;  %v7523_v48 = vadd.f32 %v7522_v53, %v7434_v45 }
 0xb80   : > { %v8488_v39 = vsel %vm8485_vm0, %v8487_v9, %v8483_v60  ;;  %10655 = vrcp.f32 %v7869_v55  ;;  %vm8511_vm1 = vweird.f32 %v10652_v51  ;;  %v8546_v22 = vand.u32 2147483648, %v7869_v55 }
 0xb81   : > { %8889 = vst [vmem:[%s16784_s12 + $0x138] sm:$0xff] %v8488_v39  ;;  %v8507_v30 = vsub.f32 1.0, %v8506_v29  ;;  %vm8512_vm3 = vmor %vm8510_vm2, %vm8511_vm1  ;;  %v8544_v61 = vand.u32 2147483647, %v7869_v55  ;;  %vm8540_vm6 = vweird.f32 %v7869_v55 }
 0xb82   : > { %v7611_v58 = vpop.f32.mrf.mxu1  ;;  %v8547_v6 = vor.u32 1.1754944e-38, %v8546_v22 }
 0xb83   : > { %v8508_v62 = vmul.f32 %v10652_v51, %v8507_v30  ;;  %v7612_v24 = vadd.f32 %v7611_v58, %v7523_v48  ;;  %vm8545_vm8 = vcmp.eq.f32.partialorder %v8544_v61, 8.507059e+37 }
 0xb85   : > { %v10654_v25 = vpop.eup %10653  ;;  %v8509_v50 = vadd.f32 %v10652_v51, %v8508_v62  ;;  %v9862_v23 = vmul.f32 -1.442695, %v7612_v24  ;;  %v7446_v48 = vpop.f32.mrf.mxu3 }
 0xb86   : > { %v10656_v26 = vpop.eup %10655  ;;  %v7871_v36 = vadd.f32 1.0, %v10654_v25  ;;  %v7525_v49 = vpop.f32.mrf.mxu0 }
 0xb87   : > { %v8513_v47 = vsel %vm8512_vm3, %v10652_v51, %v8509_v50  ;;  %v8536_v59 = vmul.f32 %v10656_v26, %v7869_v55  ;;  %10657 = vpow2.f32 %v9862_v23  ;;  %v7526_v18 = vadd.f32 %v7525_v49, %v7437_v46 }
 0xb88   : > { %v8518_v42 = vsel %vm8515_vm4, %v8517_v31, %v8513_v47  ;;  %10659 = vrcp.f32 %v7871_v36  ;;  %vm8541_vm5 = vweird.f32 %v10656_v26  ;;  %v8576_v7 = vand.u32 2147483648, %v7871_v36 }
 0xb89   : > { %8891 = vst [vmem:[%s16784_s12 + $0x148] sm:$0xff] %v8518_v42  ;;  %v8537_v32 = vsub.f32 1.0, %v8536_v59  ;;  %vm8542_vm7 = vmor %vm8540_vm6, %vm8541_vm5  ;;  %v8574_v21 = vand.u32 2147483647, %v7871_v36  ;;  %vm8570_vm10 = vweird.f32 %v7871_v36 }
 0xb8a   : > { %v7614_v2 = vpop.f32.mrf.mxu1  ;;  %v8577_v56 = vor.u32 1.1754944e-38, %v8576_v7 }
 0xb8b   : > { %v8538_v4 = vmul.f32 %v10656_v26, %v8537_v32  ;;  %v7615_v27 = vadd.f32 %v7614_v2, %v7526_v18  ;;  %vm8575_vm12 = vcmp.eq.f32.partialorder %v8574_v21, 8.507059e+37 }
 0xb8d   : > { %v10658_v33 = vpop.eup %10657  ;;  %v8539_v19 = vadd.f32 %v10656_v26, %v8538_v4  ;;  %v9864_v0 = vmul.f32 -1.442695, %v7615_v27  ;;  %v7447_v4 = vadd.f32 %v7446_v48, %v17000_v12 }
 0xb8e   : > { %v10660_v5 = vpop.eup %10659  ;;  %v7873_v54 = vadd.f32 1.0, %v10658_v33  ;;  %v7527_v28 = vpop.f32.mrf.mxu0 }
 0xb8f   : > { %v8543_v1 = vsel %vm8542_vm7, %v10656_v26, %v8539_v19  ;;  %v8566_v13 = vmul.f32 %v10660_v5, %v7871_v36  ;;  %10661 = vpow2.f32 %v9864_v0  ;;  %v7528_v37 = vadd.f32 %v7527_v28, %v7439_v57  ;;  %v7448_v33 = vpop.f32.mrf.mxu3 }
 0xb90   : > { %v8548_v11 = vsel %vm8545_vm8, %v8547_v6, %v8543_v1  ;;  %10663 = vrcp.f32 %v7873_v54  ;;  %vm8571_vm9 = vweird.f32 %v10660_v5  ;;  %v8606_v16 = vand.u32 2147483648, %v7873_v54 }
 0xb91   : > { %8893 = vst [vmem:[%s16784_s12 + $0x158] sm:$0xff] %v8548_v11  ;;  %v8567_v38 = vsub.f32 1.0, %v8566_v13  ;;  %vm8572_vm11 = vmor %vm8570_vm10, %vm8571_vm9  ;;  %v8604_v53 = vand.u32 2147483647, %v7873_v54  ;;  %vm8600_vm14 = vweird.f32 %v7873_v54 }
 0xb92   : > { %v7616_v52 = vpop.f32.mrf.mxu1  ;;  %v8607_v24 = vor.u32 1.1754944e-38, %v8606_v16 }
 0xb93   : > { %v8568_v20 = vmul.f32 %v10660_v5, %v8567_v38  ;;  %v7617_v14 = vadd.f32 %v7616_v52, %v7528_v37  ;;  %vm8605_vm0 = vcmp.eq.f32.partialorder %v8604_v53, 8.507059e+37 }
 0xb95   : > { %v10662_v41 = vpop.eup %10661  ;;  %v8569_v43 = vadd.f32 %v10660_v5, %v8568_v20  ;;  %v9866_v8 = vmul.f32 -1.442695, %v7617_v14  ;;  %v7449_v20 = vadd.f32 %v7448_v33, %v17000_v12 }
 0xb96   : > { %v10664_v63 = vpop.eup %10663  ;;  %v7875_v15 = vadd.f32 1.0, %v10662_v41  ;;  %v7530_v51 = vpop.f32.mrf.mxu0 }
 0xb97   : > { %v8573_v40 = vsel %vm8572_vm11, %v10660_v5, %v8569_v43  ;;  %v8596_v35 = vmul.f32 %v10664_v63, %v7873_v54  ;;  %10665 = vpow2.f32 %v9866_v8  ;;  %v7531_v55 = vadd.f32 %v7530_v51, %v7442_v34  ;;  %v7451_v34 = vpop.f32.mrf.mxu3 }
 0xb98   : > { %v8578_v45 = vsel %vm8575_vm12, %v8577_v56, %v8573_v40  ;;  %10667 = vrcp.f32 %v7875_v15  ;;  %vm8601_vm13 = vweird.f32 %v10664_v63  ;;  %v8636_v47 = vand.u32 2147483648, %v7875_v15 }
 0xb99   : > { %8895 = vst [vmem:[%s16784_s12 + $0x168] sm:$0xff] %v8578_v45  ;;  %v8597_v9 = vsub.f32 1.0, %v8596_v35  ;;  %vm8602_vm15 = vmor %vm8600_vm14, %vm8601_vm13  ;;  %v8634_v42 = vand.u32 2147483647, %v7875_v15  ;;  %vm8630_vm2 = vweird.f32 %v7875_v15  ;;  %v7452_v53 = vadd.f32 %v7451_v34, %v17000_v12 }
 0xb9a   : > { %v7619_v60 = vpop.f32.mrf.mxu1  ;;  %v8637_v61 = vor.u32 1.1754944e-38, %v8636_v47 }
 0xb9b   : > { %v8598_v29 = vmul.f32 %v10664_v63, %v8597_v9  ;;  %v7620_v39 = vadd.f32 %v7619_v60, %v7531_v55  ;;  %vm8635_vm4 = vcmp.eq.f32.partialorder %v8634_v42, 8.507059e+37 }
 0xb9d   : > { %v10666_v30 = vpop.eup %10665  ;;  %v8599_v10 = vadd.f32 %v10664_v63, %v8598_v29  ;;  %v9868_v58 = vmul.f32 -1.442695, %v7620_v39 }
 0xb9e   : > { %v10668_v62 = vpop.eup %10667  ;;  %v7877_v25 = vadd.f32 1.0, %v10666_v30  ;;  %v7532_v26 = vpop.f32.mrf.mxu0 }
 0xb9f   : > { %v8603_v50 = vsel %vm8602_vm15, %v10664_v63, %v8599_v10  ;;  %v8626_v23 = vmul.f32 %v10668_v62, %v7875_v15  ;;  %10669 = vpow2.f32 %v9868_v58  ;;  %v7533_v36 = vadd.f32 %v7532_v26, %v7444_v17 }
 0xba0   : > { %v8608_v46 = vsel %vm8605_vm0, %v8607_v24, %v8603_v50  ;;  %10671 = vrcp.f32 %v7877_v25  ;;  %vm8631_vm1 = vweird.f32 %v10668_v62  ;;  %v8666_v1 = vand.u32 2147483648, %v7877_v25 }
 0xba1   : > { %8897 = vst [vmem:[%s16784_s12 + $0x178] sm:$0xff] %v8608_v46  ;;  %v8627_v31 = vsub.f32 1.0, %v8626_v23  ;;  %vm8632_vm3 = vmor %vm8630_vm2, %vm8631_vm1  ;;  %v8664_v11 = vand.u32 2147483647, %v7877_v25  ;;  %vm8660_vm6 = vweird.f32 %v7877_v25  ;;  %v7453_v23 = vpop.f32.mrf.mxu3 }
 0xba2   : > { %v7621_v59 = vpop.f32.mrf.mxu1  ;;  %v8667_v21 = vor.u32 1.1754944e-38, %v8666_v1  ;;  %v7454_v42 = vadd.f32 %v7453_v23, %v17000_v12 }
 0xba3   : > { %v8628_v49 = vmul.f32 %v10668_v62, %v8627_v31  ;;  %v7622_v3 = vadd.f32 %v7621_v59, %v7533_v36  ;;  %vm8665_vm8 = vcmp.eq.f32.partialorder %v8664_v11, 8.507059e+37 }
 0xba5   : > { %v10670_v32 = vpop.eup %10669  ;;  %v8629_v18 = vadd.f32 %v10668_v62, %v8628_v49  ;;  %v9870_v22 = vmul.f32 -1.442695, %v7622_v3 }
 0xba6   : > { %v10672_v2 = vpop.eup %10671  ;;  %v7879_v27 = vadd.f32 1.0, %v10670_v32  ;;  %v7535_v5 = vpop.f32.mrf.mxu0 }
 0xba7   : > { %v8633_v19 = vsel %vm8632_vm3, %v10668_v62, %v8629_v18  ;;  %v8656_v0 = vmul.f32 %v10672_v2, %v7877_v25  ;;  %10673 = vpow2.f32 %v9870_v22  ;;  %v7536_v54 = vadd.f32 %v7535_v5, %v7447_v4 }
 0xba8   : > { %v8638_v57 = vsel %vm8635_vm4, %v8637_v61, %v8633_v19  ;;  %10675 = vrcp.f32 %v7879_v27  ;;  %vm8661_vm5 = vweird.f32 %v10672_v2  ;;  %v8696_v40 = vand.u32 2147483648, %v7879_v27 }
 0xba9   : > { %8899 = vst [vmem:[%s16784_s12 + $0x188] sm:$0xff] %v8638_v57  ;;  %v8657_v6 = vsub.f32 1.0, %v8656_v0  ;;  %vm8662_vm7 = vmor %vm8660_vm6, %vm8661_vm5  ;;  %v8694_v45 = vand.u32 2147483647, %v7879_v27  ;;  %vm8690_vm10 = vweird.f32 %v7879_v27 }
 0xbaa   : > { %v7624_v13 = vpop.f32.mrf.mxu1  ;;  %v8697_v39 = vor.u32 1.1754944e-38, %v8696_v40 }
 0xbab   : > { %v8658_v28 = vmul.f32 %v10672_v2, %v8657_v6  ;;  %v7625_v38 = vadd.f32 %v7624_v13, %v7536_v54  ;;  %vm8695_vm12 = vcmp.eq.f32.partialorder %v8694_v45, 8.507059e+37 }
 0xbad   : > { %v10674_v37 = vpop.eup %10673  ;;  %v8659_v7 = vadd.f32 %v10672_v2, %v8658_v28  ;;  %v9872_v52 = vmul.f32 -1.442695, %v7625_v38 }
 0xbae   : > { %v10676_v44 = vpop.eup %10675  ;;  %v7881_v14 = vadd.f32 1.0, %v10674_v37  ;;  %v7537_v8 = vpop.f32.mrf.mxu0 }
 0xbaf   : > { %v8663_v41 = vsel %vm8662_vm7, %v10672_v2, %v8659_v7  ;;  %v8686_v43 = vmul.f32 %v10676_v44, %v7879_v27  ;;  %10677 = vpow2.f32 %v9872_v52  ;;  %v7538_v15 = vadd.f32 %v7537_v8, %v7449_v20 }
 0xbb0   : > { %v8668_v63 = vsel %vm8665_vm8, %v8667_v21, %v8663_v41  ;;  %10679 = vrcp.f32 %v7881_v14  ;;  %vm8691_vm9 = vweird.f32 %v10676_v44  ;;  %v8726_v25 = vand.u32 2147483648, %v7881_v14 }
 0xbb1   : > { %8901 = vst [vmem:[%s16784_s12 + $0x198] sm:$0xff] %v8668_v63  ;;  %v8687_v56 = vsub.f32 1.0, %v8686_v43  ;;  %vm8692_vm11 = vmor %vm8690_vm10, %vm8691_vm9  ;;  %v8724_v46 = vand.u32 2147483647, %v7881_v14  ;;  %vm8720_vm14 = vweird.f32 %v7881_v14 }
 0xbb2   : > { %v7626_v35 = vpop.f32.mrf.mxu1  ;;  %v8727_v3 = vor.u32 1.1754944e-38, %v8726_v25 }
 0xbb3   : > { %v8688_v51 = vmul.f32 %v10676_v44, %v8687_v56  ;;  %v7627_v9 = vadd.f32 %v7626_v35, %v7538_v15  ;;  %vm8725_vm0 = vcmp.eq.f32.partialorder %v8724_v46, 8.507059e+37 }
 0xbb5   : > { %v10678_v55 = vpop.eup %10677  ;;  %v8689_v16 = vadd.f32 %v10676_v44, %v8688_v51  ;;  %v9874_v60 = vmul.f32 -1.442695, %v7627_v9 }
 0xbb6   : > { %v10680_v29 = vpop.eup %10679  ;;  %v7883_v30 = vadd.f32 1.0, %v10678_v55  ;;  %v7540_v58 = vpop.f32.mrf.mxu0 }
 0xbb7   : > { %v8693_v48 = vsel %vm8692_vm11, %v10676_v44, %v8689_v16  ;;  %v8716_v10 = vmul.f32 %v10680_v29, %v7881_v14  ;;  %10681 = vpow2.f32 %v9874_v60  ;;  %v7541_v24 = vadd.f32 %v7540_v58, %v7452_v53 }
 0xbb8   : > { %v8698_v62 = vsel %vm8695_vm12, %v8697_v39, %v8693_v48  ;;  %10683 = vrcp.f32 %v7883_v30  ;;  %vm8721_vm13 = vweird.f32 %v10680_v29  ;;  %v8756_v33 = vand.u32 2147483648, %v7883_v30 }
 0xbb9   : > { %8903 = vst [vmem:[%s16784_s12 + $0x1a8] sm:$0xff] %v8698_v62  ;;  %v8717_v17 = vsub.f32 1.0, %v8716_v10  ;;  %vm8722_vm15 = vmor %vm8720_vm14, %vm8721_vm13  ;;  %v8754_v5 = vand.u32 2147483647, %v7883_v30  ;;  %vm8750_vm2 = vweird.f32 %v7883_v30 }
 0xbba   : > { %v7629_v50 = vpop.f32.mrf.mxu1  ;;  %v8757_v13 = vor.u32 1.1754944e-38, %v8756_v33 }
 0xbbb   : > { %v8718_v26 = vmul.f32 %v10680_v29, %v8717_v17  ;;  %v7630_v31 = vadd.f32 %v7629_v50, %v7541_v24  ;;  %vm8755_vm4 = vcmp.eq.f32.partialorder %v8754_v5, 8.507059e+37 }
 0xbbd   : > { %v10682_v36 = vpop.eup %10681  ;;  %v8719_v47 = vadd.f32 %v10680_v29, %v8718_v26  ;;  %v9876_v59 = vmul.f32 -1.442695, %v7630_v31 }
 0xbbe   : > { %v10684_v49 = vpop.eup %10683  ;;  %v7885_v32 = vadd.f32 1.0, %v10682_v36  ;;  %v7542_v2 = vpop.f32.mrf.mxu0 }
 0xbbf   : > { %v8723_v18 = vsel %vm8722_vm15, %v10680_v29, %v8719_v47  ;;  %v8746_v22 = vmul.f32 %v10684_v49, %v7883_v30  ;;  %10685 = vpow2.f32 %v9876_v59  ;;  %v7543_v27 = vadd.f32 %v7542_v2, %v7454_v42 }
 0xbc0   : > { %v8728_v4 = vsel %vm8725_vm0, %v8727_v3, %v8723_v18  ;;  %10687 = vrcp.f32 %v7885_v32  ;;  %vm8751_vm1 = vweird.f32 %v10684_v49  ;;  %v8786_v52 = vand.u32 2147483648, %v7885_v32 }
 0xbc1   : > { %8905 = vst [vmem:[%s16784_s12 + $0x1b8] sm:$0xff] %v8728_v4  ;;  %v8747_v61 = vsub.f32 1.0, %v8746_v22  ;;  %vm8752_vm3 = vmor %vm8750_vm2, %vm8751_vm1  ;;  %v8784_v20 = vand.u32 2147483647, %v7885_v32  ;;  %vm8780_vm6 = vweird.f32 %v7885_v32 }
 0xbc2   : > { %v7631_v19 = vpop.f32.mrf.mxu1  ;;  %v8787_v43 = vor.u32 1.1754944e-38, %v8786_v52 }
 0xbc3   : > { %v8748_v0 = vmul.f32 %v10684_v49, %v8747_v61  ;;  %v7632_v12 = vadd.f32 %v7631_v19, %v7543_v27  ;;  %vm8785_vm8 = vcmp.eq.f32.partialorder %v8784_v20, 8.507059e+37 }
 0xbc5   : > { %v10686_v57 = vpop.eup %10685  ;;  %v8749_v6 = vadd.f32 %v10684_v49, %v8748_v0  ;;  %v9878_v54 = vmul.f32 -1.442695, %v7632_v12 }
 0xbc6   : > { %v10688_v1 = vpop.eup %10687  ;;  %v7887_v28 = vadd.f32 1.0, %v10686_v57 }
 0xbc7   : > { %v8753_v11 = vsel %vm8752_vm3, %v10684_v49, %v8749_v6  ;;  %v8776_v38 = vmul.f32 %v10688_v1, %v7885_v32  ;;  %10689 = vpow2.f32 %v9878_v54  ;;  %vm8781_vm5 = vweird.f32 %v10688_v1 }
 0xbc8   : > { %v8758_v37 = vsel %vm8755_vm4, %v8757_v13, %v8753_v11  ;;  %10691 = vrcp.f32 %v7887_v28  ;;  %vm8782_vm7 = vmor %vm8780_vm6, %vm8781_vm5  ;;  %v8816_v40 = vand.u32 2147483648, %v7887_v28  ;;  %v8814_v51 = vand.u32 2147483647, %v7887_v28 }
 0xbc9   : > { %8907 = vst [vmem:[%s16784_s12 + $0x1c8] sm:$0xff] %v8758_v37  ;;  %v8777_v7 = vsub.f32 1.0, %v8776_v38  ;;  %vm8810_vm10 = vweird.f32 %v7887_v28 }
 0xbca   : > { %v8817_v55 = vor.u32 1.1754944e-38, %v8816_v40  ;;  %vm8815_vm12 = vcmp.eq.f32.partialorder %v8814_v51, 8.507059e+37 }
 0xbcb   : > { %v8778_v44 = vmul.f32 %v10688_v1, %v8777_v7 }
 0xbcd   : > { %v10690_v21 = vpop.eup %10689  ;;  %v8779_v14 = vadd.f32 %v10688_v1, %v8778_v44 }
 0xbce   : > { %v10692_v41 = vpop.eup %10691  ;;  %v7889_v8 = vadd.f32 1.0, %v10690_v21 }
 0xbcf   : > { %v8783_v63 = vsel %vm8782_vm7, %v10688_v1, %v8779_v14  ;;  %v8806_v34 = vmul.f32 %v10692_v41, %v7887_v28  ;;  %vm8811_vm9 = vweird.f32 %v10692_v41 }
 0xbd0   : > { %v8788_v56 = vsel %vm8785_vm8, %v8787_v43, %v8783_v63  ;;  %10693 = vrcp.f32 %v7889_v8  ;;  %vm8812_vm11 = vmor %vm8810_vm10, %vm8811_vm9  ;;  %v8846_v39 = vand.u32 2147483648, %v7889_v8  ;;  %v8844_v48 = vand.u32 2147483647, %v7889_v8 }
 0xbd1   : > { %8909 = vst [vmem:[%s16784_s12 + $0x1d8] sm:$0xff] %v8788_v56  ;;  %v8807_v15 = vsub.f32 1.0, %v8806_v34  ;;  %vm8840_vm14 = vweird.f32 %v7889_v8 }
 0xbd2   : > { %v8847_v58 = vor.u32 1.1754944e-38, %v8846_v39  ;;  %vm8845_vm0 = vcmp.eq.f32.partialorder %v8844_v48, 8.507059e+37 }
 0xbd3   : > { %v8808_v35 = vmul.f32 %v10692_v41, %v8807_v15 }
 0xbd5   : > { %v8809_v45 = vadd.f32 %v10692_v41, %v8808_v35 }
 0xbd6   : > { %v10694_v9 = vpop.eup %10693 }
 0xbd7   : > { %v8813_v16 = vsel %vm8812_vm11, %v10692_v41, %v8809_v45  ;;  %v8836_v60 = vmul.f32 %v10694_v9, %v7889_v8  ;;  %vm8841_vm13 = vweird.f32 %v10694_v9 }
 0xbd8   : > { %v8818_v29 = vsel %vm8815_vm12, %v8817_v55, %v8813_v16  ;;  %vm8842_vm15 = vmor %vm8840_vm14, %vm8841_vm13 }
 0xbd9   : > { %8911 = vst [vmem:[%s16784_s12 + $0x1e8] sm:$0xff] %v8818_v29  ;;  %v8837_v53 = vsub.f32 1.0, %v8836_v60 }
 0xbdb   : > { %v8838_v30 = vmul.f32 %v10694_v9, %v8837_v53 }
 0xbdd   : > { %v8839_v10 = vadd.f32 %v10694_v9, %v8838_v30 }
 0xbdf   : > { %v8843_v62 = vsel %vm8842_vm15, %v10694_v9, %v8839_v10 }
 0xbe0   : > { %v8848_v17 = vsel %vm8845_vm0, %v8847_v58, %v8843_v62 }
 0xbe1   : > { %8913 = vst [vmem:[%s16784_s12 + $0x1f8] sm:$0xff] %v8848_v17 }
 0xbe2 PF: > { %s21_s17 = sadd.s32 1, %s10702_s17  }
 0xbe3   : > { %p18_p4 = scmp.ge.s32.totalorder %s21_s17, 4  }
 0xbe5   :  { %20 = sbr.rel (!%p18_p4) target bundleno = 1 (0x1), region = 94 }

</bundles_post_ra>
